<compile_context>
chip_gen: v7x
topology: tpu7x:2x2x1
jax: 0.10.0
libtpu: 0.0.40
codegen_flags: <defaults>
</compile_context>

<pallas_src>
import jax
import jax.numpy as jnp
from jax import lax
from jax.experimental import pallas as pl
from jax.experimental.pallas import tpu as pltpu


# ----------------------------------------------------------------------------------
# Pallas kernel
# ----------------------------------------------------------------------------------
def make_grnn_kernel(I, H, L, depth, n_enc, TB, hoist_weights):
    """I=input_size, H=hidden, L=nlayers, depth=prediction depth,
    n_enc=number of encoder linear layers, TB=timesteps per grid step."""
    X = 2 * I

    def kernel(*refs):
        idx = 0
        x_ref = refs[idx]
        idx += 1
        Bp = x_ref.shape[1]

        # Weight access policy: hoist into vregs once (small H) or read per use (big H).
        ld = (lambda r: r[...]) if hoist_weights else (lambda r: r)
        rd = (lambda w: w) if hoist_weights else (lambda r: r[...])

        # ---- GRU parameters: per layer [w_ih (in,3H), w_hh (H,3H), bias4 (4,H)] ----
        gru_params = []
        for _ in range(L):
            w_ih = ld(refs[idx])
            w_hh = ld(refs[idx + 1])
            bias = refs[idx + 2][...]                       # (4, H): r, z, in, hn
            b_r = jnp.broadcast_to(bias[0], (Bp, H))        # broadcasts hoisted once
            b_z = jnp.broadcast_to(bias[1], (Bp, H))
            b_in = jnp.broadcast_to(bias[2], (Bp, H))
            b_hn = jnp.broadcast_to(bias[3], (Bp, H))
            gru_params.append((w_ih, w_hh, b_r, b_z, b_in, b_hn))
            idx += 3

        # ---- readout MLP ----
        w1 = ld(refs[idx]); b1 = jnp.broadcast_to(refs[idx + 1][...], (Bp, H))
        w2 = ld(refs[idx + 2]); b2 = jnp.broadcast_to(refs[idx + 3][...], (Bp, H))
        w3 = ld(refs[idx + 4]); b3 = jnp.broadcast_to(refs[idx + 5][...], (Bp, X))
        idx += 6

        # ---- block-diagonal encoders (first layer split by input rows) ----
        we_x0 = ld(refs[idx])
        we_o0 = ld(refs[idx + 1])
        be0 = jnp.broadcast_to(refs[idx + 2][...], (Bp, refs[idx + 2].shape[-1]))
        idx += 3
        enc_rest = []
        for _ in range(n_enc - 1):
            We = ld(refs[idx])
            be = jnp.broadcast_to(refs[idx + 1][...], (Bp, refs[idx + 1].shape[-1]))
            enc_rest.append((We, be))
            idx += 2

        out_ref, hout_ref, h_scr, xo_scr = refs[idx:idx + 4]

        t_blk = pl.program_id(1)

        # ---- initialize carries at the start of every batch tile's time sweep ----
        @pl.when(t_blk == 0)
        def _init():
            h_scr[...] = jnp.zeros(h_scr.shape, jnp.float32)
            xo_scr[...] = jnp.concatenate(
                [jnp.zeros((Bp, I), jnp.float32), jnp.ones((Bp, I), jnp.float32)], axis=-1)

        # ---- building blocks ----
        def gru_cell(xin, hprev, p):
            w_ih, w_hh, b_r, b_z, b_in, b_hn = p
            gi = jnp.dot(xin, rd(w_ih), preferred_element_type=jnp.float32)    # (B, 3H)
            gh = jnp.dot(hprev, rd(w_hh), preferred_element_type=jnp.float32)  # (B, 3H)
            r = jax.nn.sigmoid(gi[:, :H] + gh[:, :H] + b_r)
            z = jax.nn.sigmoid(gi[:, H:2 * H] + gh[:, H:2 * H] + b_z)
            n = jnp.tanh(gi[:, 2 * H:] + b_in + r * (gh[:, 2 * H:] + b_hn))
            return (1.0 - z) * n + z * hprev

        def rnncell(xin, hs):
            # TODO(synk): nn.Dropout between GRU layers treated as identity (eval mode).
            out = []
            zz = xin
            for l in range(L):
                hl = gru_cell(zz, hs[l], gru_params[l])
                out.append(hl)
                zz = hl
            return tuple(out)

        def readout(hl):
            a = jnp.maximum(jnp.dot(hl, rd(w1), preferred_element_type=jnp.float32) + b1, 0.0)
            a = jnp.maximum(jnp.dot(a, rd(w2), preferred_element_type=jnp.float32) + b2, 0.0)
            return jnp.dot(a, rd(w3), preferred_element_type=jnp.float32) + b3

        def encode(xt, xo):
            # Block-diagonal dense encoders; input rows split so no lane concat needed.
            eh = (jnp.dot(xt[:, :I], rd(we_x0), preferred_element_type=jnp.float32)
                  + jnp.dot(xo, rd(we_o0), preferred_element_type=jnp.float32) + be0)
            if n_enc > 1:
                eh = jnp.maximum(eh, 0.0)
            for k, (We, be) in enumerate(enc_rest):
                eh = jnp.dot(eh, rd(We), preferred_element_type=jnp.float32) + be
                if k < n_enc - 2:
                    eh = jnp.maximum(eh, 0.0)
            # eh: (B, I) encoded means; observed stds pass through unchanged.
            return jnp.concatenate([eh, xt[:, I:]], axis=-1)                    # (B, 2I)

        # ---- inner (unrolled) time loop over TB steps of this block ----
        def step(t, carry):
            hs, xo = carry
            xt = x_ref[t]                                                       # (B, 2I)
            xe = encode(xt, xo)
            hs = rnncell(xe, hs)
            xo_new = readout(hs[-1])
            xos = [xo_new]
            hh, xoo = hs, xo_new
            for _ in range(depth - 1):                                          # depth rollout
                hh = rnncell(xoo, hh)
                xoo = readout(hh[-1])
                xos.append(xoo)
            # one lane-dense store per timestep: [encoded | pred_0 .. pred_{depth-1}]
            out_ref[t] = jnp.concatenate([xe] + xos, axis=-1)                   # (B, (depth+1)*2I)
            return hs, xo_new

        h0 = tuple(h_scr[l] for l in range(L))
        unroll = True if TB <= 32 else 8
        hs, xo = lax.fori_loop(0, TB, step, (h0, xo_scr[...]), unroll=unroll)

        # carry state to the next time block
        for l in range(L):
            h_scr[l] = hs[l]
        xo_scr[...] = xo

        # final hidden state (resident output block; last write wins)
        for l in range(L):
            hout_ref[l] = hs[l]

    return kernel


# ----------------------------------------------------------------------------------
# Wrapper
# ----------------------------------------------------------------------------------
def p_grnn_forward(x, params, *, input_size, hidden_size, nlayers, depth,
                   encoder_sizes, time_block=None, batch_block=None):
    T, B, Xdim = x.shape
    I, H, L = input_size, hidden_size, nlayers
    X = 2 * I
    assert Xdim == X and depth >= 1
    n_enc = len(encoder_sizes) + 1

    # Time blocking: default one block over the whole sequence (per-grid-step overhead
    # is large relative to a short block's compute).
    TB = T if time_block is None else time_block
    assert T % TB == 0, "time_block must divide the sequence length"
    n_t = T // TB

    # Batch tiling: optional "parallel" axis (v7x second TensorCore). Tiles are
    # sublane multiples (>= 8); padded rows are sliced off afterwards.
    if batch_block is None:
        Bblk = max(8, ((B + 7) // 8) * 8)
    else:
        Bblk = max(8, ((batch_block + 7) // 8) * 8)
    Bp = ((max(B, 1) + Bblk - 1) // Bblk) * Bblk
    n_b = Bp // Bblk
    if Bp != B:
        x = jnp.concatenate([x, jnp.zeros((T, Bp - B, X), x.dtype)], axis=1)

    # ---- parameter preparation (once, in XLA, outside the kernel) ----
    flat = []
    for l in range(L):
        wih_t, whh_t, bih, bhh = params['gru'][l]           # (in,3H), (H,3H), (1,3H), (1,3H)
        bias4 = jnp.concatenate(
            [bih[:, :H] + bhh[:, :H],                       # b_r (combined)
             bih[:, H:2 * H] + bhh[:, H:2 * H],             # b_z (combined)
             bih[:, 2 * H:],                                # b_in (separate: r-gated term)
             bhh[:, 2 * H:]], axis=0)                       # b_hn
        flat += [wih_t, whh_t, bias4]
    flat += list(params['readout'])

    # Componentwise encoders -> block-diagonal dense matmuls.  First layer split by rows
    # (x rows vs [mu|sigma] rows) so the kernel avoids a per-timestep input concat.
    for k, (W, b) in enumerate(params['enc']):              # W (I, si, so), b (I, so)
        si, so = W.shape[1], W.shape[2]
        if k == 0:
            big = jnp.zeros((3 * I, I * so), jnp.float32)
            for i in range(I):
                for j in range(3):                          # x_i, mu_i, sigma_i rows
                    big = big.at[j * I + i, i * so:(i + 1) * so].set(W[i, j])
            flat += [big[:I], big[I:], b.reshape(1, I * so)]
        else:
            big = jnp.zeros((I * si, I * so), jnp.float32)
            for i in range(I):
                big = big.at[i * si:(i + 1) * si, i * so:(i + 1) * so].set(W[i])
            flat += [big, b.reshape(1, I * so)]

    # Hoist weights into vregs only if they comfortably fit the register file.
    weight_bytes = 0
    for l in range(L):
        in_l = X if l == 0 else H
        weight_bytes += 4 * (in_l * 3 * H + H * 3 * H)
    weight_bytes += 4 * (2 * H * H + H * X)
    sizes = [3] + list(encoder_sizes) + [1]
    weight_bytes += 4 * sum(I * sizes[k] * I * sizes[k + 1] for k in range(len(sizes) - 1))
    hoist_weights = weight_bytes <= (128 * 1024)

    def full_spec(a):
        nd = a.ndim
        return pl.BlockSpec(a.shape, lambda bi, ti, _nd=nd: (0,) * _nd)

    kernel = make_grnn_kernel(I, H, L, depth, n_enc, TB, hoist_weights)

    OUTW = (depth + 1) * X                                  # [encoded | preds] lane-dense row
    out_shape = (
        jax.ShapeDtypeStruct((T, Bp, OUTW), jnp.float32),   # merged encoded+preds
        jax.ShapeDtypeStruct((L, Bp, H), jnp.float32),      # final hidden
    )
    in_specs = [pl.BlockSpec((TB, Bblk, X), lambda bi, ti: (ti, bi, 0))]
    in_specs += [full_spec(a) for a in flat]
    out_specs = (
        pl.BlockSpec((TB, Bblk, OUTW), lambda bi, ti: (ti, bi, 0)),
        pl.BlockSpec((L, Bblk, H), lambda bi, ti: (0, bi, 0)),
    )

    # VMEM budget: only raise the scoped limit when the footprint warrants it
    # (v5e default is 16 MiB; v7x physical VMEM is 64 MiB).
    param_bytes = sum(int(a.size) * 4 for a in flat)
    block_bytes = 4 * (TB * Bblk * X + TB * Bblk * OUTW + L * Bblk * H)
    scratch_bytes = 4 * (L * Bblk * H + Bblk * X)
    est = 2 * block_bytes + 2 * param_bytes + scratch_bytes + (1 << 20)
    vmem_limit = None if est <= (12 << 20) else int(min(est + (4 << 20), 100 << 20))

    merged, h = pl.pallas_call(
        kernel,
        out_shape=out_shape,
        grid=(n_b, n_t),
        in_specs=in_specs,
        out_specs=out_specs,
        scratch_shapes=[pltpu.VMEM((L, Bblk, H), jnp.float32),   # h carry across time blocks
                        pltpu.VMEM((Bblk, X), jnp.float32)],     # xo carry across time blocks
        compiler_params=pltpu.CompilerParams(
            dimension_semantics=("parallel", "arbitrary"),
            vmem_limit_bytes=vmem_limit),
    )(x, *flat)

    merged = merged[:, :B]
    encoded = merged[..., :X]
    preds = merged[..., X:].reshape(T, B, depth, X)
    h = h[:, :B]
    return preds, h, encoded


# ----------------------------------------------------------------------------------
# Deterministic parameter construction (synthetic, not a checkpoint load)
# ----------------------------------------------------------------------------------
def init_params(key, I, H, L, encoder_sizes):
    keys = iter(jax.random.split(key, 64))

    def lin(k, fan_in, shape):
        bound = float(fan_in) ** -0.5
        return jax.random.uniform(k, shape, jnp.float32, -bound, bound)

    gru = []
    for l in range(L):
        in_l = 2 * I if l == 0 else H
        wih_t = lin(next(keys), H, (in_l, 3 * H))   # stored transposed (in, 3H), gates r|z|n
        whh_t = lin(next(keys), H, (H, 3 * H))
        bih = lin(next(keys), H, (1, 3 * H))
        bhh = lin(next(keys), H, (1, 3 * H))
        gru.append((wih_t, whh_t, bih, bhh))

    w1 = lin(next(keys), H, (H, H)); b1 = lin(next(keys), H, (1, H))
    w2 = lin(next(keys), H, (H, H)); b2 = lin(next(keys), H, (1, H))
    w3 = lin(next(keys), H, (H, 2 * I)); b3 = lin(next(keys), H, (1, 2 * I))

    enc = []
    sizes = [3] + list(encoder_sizes) + [1]
    for k in range(len(sizes) - 1):
        si, so = sizes[k], sizes[k + 1]
        W = lin(next(keys), si, (I, si, so))        # stacked over features, transposed
        b = lin(next(keys), si, (I, so))
        enc.append((W, b))

    return {'gru': gru, 'readout': (w1, b1, w2, b2, w3, b3), 'enc': enc}


# ----------------------------------------------------------------------------------
# Pure-JAX reference (per-feature encoders, combined GRU weights) for correctness check
# ----------------------------------------------------------------------------------
def reference_forward(x, params, *, I, H, L, depth):
    T, B, _ = x.shape
    gru = params['gru']
    w1, b1, w2, b2, w3, b3 = params['readout']
    enc = params['enc']

    def gru_cell(xin, h, p):
        wih_t, whh_t, bih, bhh = p
        gi = xin @ wih_t + bih
        gh = h @ whh_t + bhh
        r = jax.nn.sigmoid(gi[:, :H] + gh[:, :H])
        z = jax.nn.sigmoid(gi[:, H:2 * H] + gh[:, H:2 * H])
        n = jnp.tanh(gi[:, 2 * H:] + r * gh[:, 2 * H:])
        return (1.0 - z) * n + z * h

    def rnncell(xin, hs):
        out = []
        zz = xin
        for l in range(L):
            hl = gru_cell(zz, hs[l], gru[l])
            out.append(hl)
            zz = hl
        return out

    def readout(hl):
        a = jax.nn.relu(hl @ w1 + b1)
        a = jax.nn.relu(a @ w2 + b2)
        return a @ w3 + b3

    def encode(xt, xo):
        cols = []
        for i in range(I):
            eh = jnp.stack([xt[:, i], xo[:, i], xo[:, I + i]], axis=1)  # (B, 3)
            for k, (W, b) in enumerate(enc):
                eh = eh @ W[i] + b[i]
                if k < len(enc) - 1:
                    eh = jax.nn.relu(eh)
            cols.append(eh)
        return jnp.concatenate(cols + [xt[:, I:]], axis=-1)

    xo = jnp.concatenate([jnp.zeros((B, I)), jnp.ones((B, I))], axis=-1)
    hs = [jnp.zeros((B, H)) for _ in range(L)]
    preds, encs = [], []
    for t in range(T):
        xt = x[t]
        xe = encode(xt, xo)
        encs.append(xe)
        hs = rnncell(xe, hs)
        xo_new = readout(hs[-1])
        xos = [xo_new]
        hh, xoo = hs, xo_new
        for _ in range(depth - 1):
            hh = rnncell(xoo, hh)
            xoo = readout(hh[-1])
            xos.append(xoo)
        preds.append(jnp.stack(xos, axis=1))
        xo = xo_new
    return jnp.stack(preds, 0), jnp.stack(hs, 0), jnp.stack(encs, 0)


# ----------------------------------------------------------------------------------
if __name__ == "__main__":
    I, H, L = 4, 32, 2            # input_size, hidden_size, nlayers
    encoder_sizes = [8, 8]
    depth = 3
    T, B = 8, 4                   # sequence length, batch

    key = jax.random.PRNGKey(0)
    kx, kp = jax.random.split(key)
    x = jax.random.normal(kx, (T, B, 2 * I), jnp.float32)
    params = init_params(kp, I, H, L, encoder_sizes)

    rp, rh, re = reference_forward(x, params, I=I, H=H, L=L, depth=depth)

    # Default: time_block = T (single grid step over time, fully unrolled inner loop).
    preds, h, encoded = p_grnn_forward(
        x, params, input_size=I, hidden_size=H, nlayers=L,
        depth=depth, encoder_sizes=encoder_sizes)
    jax.block_until_ready((preds, h, encoded))
    assert preds.shape == (T, B, depth, 2 * I)
    assert h.shape == (L, B, H)
    assert encoded.shape == (T, B, 2 * I)
    assert jnp.allclose(preds, rp, atol=2e-3, rtol=2e-3), "preds mismatch"
    assert jnp.allclose(h, rh, atol=2e-3, rtol=2e-3), "hidden mismatch"
    assert jnp.allclose(encoded, re, atol=2e-3, rtol=2e-3), "encoded mismatch"

    # Also exercise the multi-time-block state-carry path (time_block=4 -> grid time=2).
    preds2, h2, enc2 = p_grnn_forward(
        x, params, input_size=I, hidden_size=H, nlayers=L,
        depth=depth, encoder_sizes=encoder_sizes, time_block=4)
    jax.block_until_ready((preds2, h2, enc2))
    assert jnp.allclose(preds2, rp, atol=2e-3, rtol=2e-3), "preds mismatch (blocked)"
    assert jnp.allclose(h2, rh, atol=2e-3, rtol=2e-3), "hidden mismatch (blocked)"
    assert jnp.allclose(enc2, re, atol=2e-3, rtol=2e-3), "encoded mismatch (blocked)"

    print("KERNEL_OK")
</pallas_src>

<mosaic_0001>
module attributes {stable_mosaic.version = 11 : i64} {
  func.func @kernel(%arg0: i32, %arg1: i32, %arg2: memref<8x8x8xf32, #tpu.memory_space<vmem>>, %arg3: memref<8x96xf32, #tpu.memory_space<vmem>>, %arg4: memref<32x96xf32, #tpu.memory_space<vmem>>, %arg5: memref<4x32xf32, #tpu.memory_space<vmem>>, %arg6: memref<32x96xf32, #tpu.memory_space<vmem>>, %arg7: memref<32x96xf32, #tpu.memory_space<vmem>>, %arg8: memref<4x32xf32, #tpu.memory_space<vmem>>, %arg9: memref<32x32xf32, #tpu.memory_space<vmem>>, %arg10: memref<1x32xf32, #tpu.memory_space<vmem>>, %arg11: memref<32x32xf32, #tpu.memory_space<vmem>>, %arg12: memref<1x32xf32, #tpu.memory_space<vmem>>, %arg13: memref<32x8xf32, #tpu.memory_space<vmem>>, %arg14: memref<1x8xf32, #tpu.memory_space<vmem>>, %arg15: memref<4x32xf32, #tpu.memory_space<vmem>>, %arg16: memref<8x32xf32, #tpu.memory_space<vmem>>, %arg17: memref<1x32xf32, #tpu.memory_space<vmem>>, %arg18: memref<32x32xf32, #tpu.memory_space<vmem>>, %arg19: memref<1x32xf32, #tpu.memory_space<vmem>>, %arg20: memref<32x4xf32, #tpu.memory_space<vmem>>, %arg21: memref<1x4xf32, #tpu.memory_space<vmem>>, %arg22: memref<8x8x32xf32, #tpu.memory_space<vmem>>, %arg23: memref<2x8x32xf32, #tpu.memory_space<vmem>>, %arg24: memref<2x8x32xf32, #tpu.memory_space<vmem>>, %arg25: memref<8x8xf32, #tpu.memory_space<vmem>>) attributes {dimension_semantics = [#tpu.dimension_semantics<parallel>, #tpu.dimension_semantics<arbitrary>], iteration_bounds = array<i64: 1, 1>, scalar_prefetch = 0 : i64, scratch_operands = 2 : i64, tpu.core_type = #tpu.core_type<tc>, window_params = [{transform_indices = @transform_0, window_bounds = array<i64: 8, 8, 8>}, {pipeline_mode = #tpu.pipeline_mode<synchronous>, transform_indices = @transform_1, window_bounds = array<i64: 8, 96>}, {pipeline_mode = #tpu.pipeline_mode<synchronous>, transform_indices = @transform_2, window_bounds = array<i64: 32, 96>}, {pipeline_mode = #tpu.pipeline_mode<synchronous>, transform_indices = @transform_3, window_bounds = array<i64: 4, 32>}, {pipeline_mode = #tpu.pipeline_mode<synchronous>, transform_indices = @transform_4, window_bounds = array<i64: 32, 96>}, {pipeline_mode = #tpu.pipeline_mode<synchronous>, transform_indices = @transform_5, window_bounds = array<i64: 32, 96>}, {pipeline_mode = #tpu.pipeline_mode<synchronous>, transform_indices = @transform_6, window_bounds = array<i64: 4, 32>}, {pipeline_mode = #tpu.pipeline_mode<synchronous>, transform_indices = @transform_7, window_bounds = array<i64: 32, 32>}, {pipeline_mode = #tpu.pipeline_mode<synchronous>, transform_indices = @transform_8, window_bounds = array<i64: 1, 32>}, {pipeline_mode = #tpu.pipeline_mode<synchronous>, transform_indices = @transform_9, window_bounds = array<i64: 32, 32>}, {pipeline_mode = #tpu.pipeline_mode<synchronous>, transform_indices = @transform_10, window_bounds = array<i64: 1, 32>}, {pipeline_mode = #tpu.pipeline_mode<synchronous>, transform_indices = @transform_11, window_bounds = array<i64: 32, 8>}, {pipeline_mode = #tpu.pipeline_mode<synchronous>, transform_indices = @transform_12, window_bounds = array<i64: 1, 8>}, {pipeline_mode = #tpu.pipeline_mode<synchronous>, transform_indices = @transform_13, window_bounds = array<i64: 4, 32>}, {pipeline_mode = #tpu.pipeline_mode<synchronous>, transform_indices = @transform_14, window_bounds = array<i64: 8, 32>}, {pipeline_mode = #tpu.pipeline_mode<synchronous>, transform_indices = @transform_15, window_bounds = array<i64: 1, 32>}, {pipeline_mode = #tpu.pipeline_mode<synchronous>, transform_indices = @transform_16, window_bounds = array<i64: 32, 32>}, {pipeline_mode = #tpu.pipeline_mode<synchronous>, transform_indices = @transform_17, window_bounds = array<i64: 1, 32>}, {pipeline_mode = #tpu.pipeline_mode<synchronous>, transform_indices = @transform_18, window_bounds = array<i64: 32, 4>}, {pipeline_mode = #tpu.pipeline_mode<synchronous>, transform_indices = @transform_19, window_bounds = array<i64: 1, 4>}, {transform_indices = @transform_20, window_bounds = array<i64: 8, 8, 32>}, {transform_indices = @transform_21, window_bounds = array<i64: 2, 8, 32>}]} {
    %c0 = arith.constant 0 : index
    %c0_0 = arith.constant 0 : index
    %0 = vector.load %arg3[%c0, %c0_0] : memref<8x96xf32, #tpu.memory_space<vmem>>, vector<8x96xf32>
    %c0_1 = arith.constant 0 : index
    %c0_2 = arith.constant 0 : index
    %1 = vector.load %arg4[%c0_1, %c0_2] : memref<32x96xf32, #tpu.memory_space<vmem>>, vector<32x96xf32>
    %c0_3 = arith.constant 0 : index
    %c0_4 = arith.constant 0 : index
    %2 = vector.load %arg5[%c0_3, %c0_4] : memref<4x32xf32, #tpu.memory_space<vmem>>, vector<4x32xf32>
    %3 = vector.extract_strided_slice %2 {offsets = [0, 0], sizes = [1, 32], strides = [1, 1]} : vector<4x32xf32> to vector<1x32xf32>
    %4 = vector.shape_cast %3 : vector<1x32xf32> to vector<32xf32>
    %5 = vector.shape_cast %4 : vector<32xf32> to vector<1x32xf32>
    %6 = vector.broadcast %5 : vector<1x32xf32> to vector<8x32xf32>
    %7 = vector.extract_strided_slice %2 {offsets = [1, 0], sizes = [1, 32], strides = [1, 1]} : vector<4x32xf32> to vector<1x32xf32>
    %8 = vector.shape_cast %7 : vector<1x32xf32> to vector<32xf32>
    %9 = vector.shape_cast %8 : vector<32xf32> to vector<1x32xf32>
    %10 = vector.broadcast %9 : vector<1x32xf32> to vector<8x32xf32>
    %11 = vector.extract_strided_slice %2 {offsets = [2, 0], sizes = [1, 32], strides = [1, 1]} : vector<4x32xf32> to vector<1x32xf32>
    %12 = vector.shape_cast %11 : vector<1x32xf32> to vector<32xf32>
    %13 = vector.shape_cast %12 : vector<32xf32> to vector<1x32xf32>
    %14 = vector.broadcast %13 : vector<1x32xf32> to vector<8x32xf32>
    %15 = vector.extract_strided_slice %2 {offsets = [3, 0], sizes = [1, 32], strides = [1, 1]} : vector<4x32xf32> to vector<1x32xf32>
    %16 = vector.shape_cast %15 : vector<1x32xf32> to vector<32xf32>
    %17 = vector.shape_cast %16 : vector<32xf32> to vector<1x32xf32>
    %18 = vector.broadcast %17 : vector<1x32xf32> to vector<8x32xf32>
    %c0_5 = arith.constant 0 : index
    %c0_6 = arith.constant 0 : index
    %19 = vector.load %arg6[%c0_5, %c0_6] : memref<32x96xf32, #tpu.memory_space<vmem>>, vector<32x96xf32>
    %c0_7 = arith.constant 0 : index
    %c0_8 = arith.constant 0 : index
    %20 = vector.load %arg7[%c0_7, %c0_8] : memref<32x96xf32, #tpu.memory_space<vmem>>, vector<32x96xf32>
    %c0_9 = arith.constant 0 : index
    %c0_10 = arith.constant 0 : index
    %21 = vector.load %arg8[%c0_9, %c0_10] : memref<4x32xf32, #tpu.memory_space<vmem>>, vector<4x32xf32>
    %22 = vector.extract_strided_slice %21 {offsets = [0, 0], sizes = [1, 32], strides = [1, 1]} : vector<4x32xf32> to vector<1x32xf32>
    %23 = vector.shape_cast %22 : vector<1x32xf32> to vector<32xf32>
    %24 = vector.shape_cast %23 : vector<32xf32> to vector<1x32xf32>
    %25 = vector.broadcast %24 : vector<1x32xf32> to vector<8x32xf32>
    %26 = vector.extract_strided_slice %21 {offsets = [1, 0], sizes = [1, 32], strides = [1, 1]} : vector<4x32xf32> to vector<1x32xf32>
    %27 = vector.shape_cast %26 : vector<1x32xf32> to vector<32xf32>
    %28 = vector.shape_cast %27 : vector<32xf32> to vector<1x32xf32>
    %29 = vector.broadcast %28 : vector<1x32xf32> to vector<8x32xf32>
    %30 = vector.extract_strided_slice %21 {offsets = [2, 0], sizes = [1, 32], strides = [1, 1]} : vector<4x32xf32> to vector<1x32xf32>
    %31 = vector.shape_cast %30 : vector<1x32xf32> to vector<32xf32>
    %32 = vector.shape_cast %31 : vector<32xf32> to vector<1x32xf32>
    %33 = vector.broadcast %32 : vector<1x32xf32> to vector<8x32xf32>
    %34 = vector.extract_strided_slice %21 {offsets = [3, 0], sizes = [1, 32], strides = [1, 1]} : vector<4x32xf32> to vector<1x32xf32>
    %35 = vector.shape_cast %34 : vector<1x32xf32> to vector<32xf32>
    %36 = vector.shape_cast %35 : vector<32xf32> to vector<1x32xf32>
    %37 = vector.broadcast %36 : vector<1x32xf32> to vector<8x32xf32>
    %c0_11 = arith.constant 0 : index
    %c0_12 = arith.constant 0 : index
    %38 = vector.load %arg9[%c0_11, %c0_12] : memref<32x32xf32, #tpu.memory_space<vmem>>, vector<32x32xf32>
    %c0_13 = arith.constant 0 : index
    %c0_14 = arith.constant 0 : index
    %39 = vector.load %arg10[%c0_13, %c0_14] : memref<1x32xf32, #tpu.memory_space<vmem>>, vector<1x32xf32>
    %40 = vector.shape_cast %39 : vector<1x32xf32> to vector<1x32xf32>
    %41 = vector.broadcast %40 : vector<1x32xf32> to vector<8x32xf32>
    %c0_15 = arith.constant 0 : index
    %c0_16 = arith.constant 0 : index
    %42 = vector.load %arg11[%c0_15, %c0_16] : memref<32x32xf32, #tpu.memory_space<vmem>>, vector<32x32xf32>
    %c0_17 = arith.constant 0 : index
    %c0_18 = arith.constant 0 : index
    %43 = vector.load %arg12[%c0_17, %c0_18] : memref<1x32xf32, #tpu.memory_space<vmem>>, vector<1x32xf32>
    %44 = vector.shape_cast %43 : vector<1x32xf32> to vector<1x32xf32>
    %45 = vector.broadcast %44 : vector<1x32xf32> to vector<8x32xf32>
    %c0_19 = arith.constant 0 : index
    %c0_20 = arith.constant 0 : index
    %46 = vector.load %arg13[%c0_19, %c0_20] : memref<32x8xf32, #tpu.memory_space<vmem>>, vector<32x8xf32>
    %c0_21 = arith.constant 0 : index
    %c0_22 = arith.constant 0 : index
    %47 = vector.load %arg14[%c0_21, %c0_22] : memref<1x8xf32, #tpu.memory_space<vmem>>, vector<1x8xf32>
    %48 = vector.shape_cast %47 : vector<1x8xf32> to vector<1x8xf32>
    %49 = vector.broadcast %48 : vector<1x8xf32> to vector<8x8xf32>
    %c0_23 = arith.constant 0 : index
    %c0_24 = arith.constant 0 : index
    %50 = vector.load %arg15[%c0_23, %c0_24] : memref<4x32xf32, #tpu.memory_space<vmem>>, vector<4x32xf32>
    %c0_25 = arith.constant 0 : index
    %c0_26 = arith.constant 0 : index
    %51 = vector.load %arg16[%c0_25, %c0_26] : memref<8x32xf32, #tpu.memory_space<vmem>>, vector<8x32xf32>
    %c0_27 = arith.constant 0 : index
    %c0_28 = arith.constant 0 : index
    %52 = vector.load %arg17[%c0_27, %c0_28] : memref<1x32xf32, #tpu.memory_space<vmem>>, vector<1x32xf32>
    %53 = vector.shape_cast %52 : vector<1x32xf32> to vector<1x32xf32>
    %54 = vector.broadcast %53 : vector<1x32xf32> to vector<8x32xf32>
    %c0_29 = arith.constant 0 : index
    %c0_30 = arith.constant 0 : index
    %55 = vector.load %arg18[%c0_29, %c0_30] : memref<32x32xf32, #tpu.memory_space<vmem>>, vector<32x32xf32>
    %c0_31 = arith.constant 0 : index
    %c0_32 = arith.constant 0 : index
    %56 = vector.load %arg19[%c0_31, %c0_32] : memref<1x32xf32, #tpu.memory_space<vmem>>, vector<1x32xf32>
    %57 = vector.shape_cast %56 : vector<1x32xf32> to vector<1x32xf32>
    %58 = vector.broadcast %57 : vector<1x32xf32> to vector<8x32xf32>
    %c0_33 = arith.constant 0 : index
    %c0_34 = arith.constant 0 : index
    %59 = vector.load %arg20[%c0_33, %c0_34] : memref<32x4xf32, #tpu.memory_space<vmem>>, vector<32x4xf32>
    %c0_35 = arith.constant 0 : index
    %c0_36 = arith.constant 0 : index
    %60 = vector.load %arg21[%c0_35, %c0_36] : memref<1x4xf32, #tpu.memory_space<vmem>>, vector<1x4xf32>
    %61 = vector.shape_cast %60 : vector<1x4xf32> to vector<1x4xf32>
    %62 = vector.broadcast %61 : vector<1x4xf32> to vector<8x4xf32>
    %c0_i32 = arith.constant 0 : i32
    %63 = arith.cmpi eq, %arg1, %c0_i32 : i32
    %64 = arith.extui %63 : i1 to i32
    %c0_i32_37 = arith.constant 0 : i32
    %65 = arith.cmpi ne, %64, %c0_i32_37 : i32
    scf.if %65 {
      %cst_499 = arith.constant 0.000000e+00 : f32
      %2044 = vector.broadcast %cst_499 : f32 to vector<2x8x32xf32>
      %c0_500 = arith.constant 0 : index
      %c0_501 = arith.constant 0 : index
      %c0_502 = arith.constant 0 : index
      %2045 = vector.load %arg24[%c0_500, %c0_501, %c0_502] : memref<2x8x32xf32, #tpu.memory_space<vmem>>, vector<2x8x32xf32>
      tpu.vector_store %arg24[%c0_500, %c0_501, %c0_502], %2044 {strides = array<i32>} : memref<2x8x32xf32, #tpu.memory_space<vmem>>, vector<2x8x32xf32>,
      %cst_503 = arith.constant 0.000000e+00 : f32
      %2046 = vector.broadcast %cst_503 : f32 to vector<8x4xf32>
      %cst_504 = arith.constant 1.000000e+00 : f32
      %2047 = vector.broadcast %cst_504 : f32 to vector<8x4xf32>
      %2048 = tpu.concatenate %2046, %2047 in 1 : vector<8x4xf32>, vector<8x4xf32> -> vector<8x8xf32>
      %c0_505 = arith.constant 0 : index
      %c0_506 = arith.constant 0 : index
      %2049 = vector.load %arg25[%c0_505, %c0_506] : memref<8x8xf32, #tpu.memory_space<vmem>>, vector<8x8xf32>
      tpu.vector_store %arg25[%c0_505, %c0_506], %2048 {strides = array<i32>} : memref<8x8xf32, #tpu.memory_space<vmem>>, vector<8x8xf32>,
    } else {
    }
    %c0_38 = arith.constant 0 : index
    %c0_39 = arith.constant 0 : index
    %c0_40 = arith.constant 0 : index
    %66 = vector.load %arg24[%c0_38, %c0_39, %c0_40] : memref<2x8x32xf32, #tpu.memory_space<vmem>>, vector<1x8x32xf32>
    %67 = vector.shape_cast %66 : vector<1x8x32xf32> to vector<8x32xf32>
    %c1 = arith.constant 1 : index
    %c0_41 = arith.constant 0 : index
    %c0_42 = arith.constant 0 : index
    %68 = vector.load %arg24[%c1, %c0_41, %c0_42] : memref<2x8x32xf32, #tpu.memory_space<vmem>>, vector<1x8x32xf32>
    %69 = vector.shape_cast %68 : vector<1x8x32xf32> to vector<8x32xf32>
    %c0_43 = arith.constant 0 : index
    %c0_44 = arith.constant 0 : index
    %70 = vector.load %arg25[%c0_43, %c0_44] : memref<8x8xf32, #tpu.memory_space<vmem>>, vector<8x8xf32>
    %c0_i32_45 = arith.constant 0 : i32
    %71 = arith.index_cast %c0_i32_45 : i32 to index
    %c0_46 = arith.constant 0 : index
    %c0_47 = arith.constant 0 : index
    %72 = vector.load %arg2[%71, %c0_46, %c0_47] : memref<8x8x8xf32, #tpu.memory_space<vmem>>, vector<1x8x8xf32>
    %73 = vector.shape_cast %72 : vector<1x8x8xf32> to vector<8x8xf32>
    %74 = vector.extract_strided_slice %73 {offsets = [0, 0], sizes = [8, 4], strides = [1, 1]} : vector<8x8xf32> to vector<8x4xf32>
    %cst = arith.constant dense<0.000000e+00> : vector<8x32xf32>
    %75 = tpu.matmul %74, %50, %cst {dimension_numbers = #tpu.dot_dimension_numbers<[1], [0], [0], [1], [0, 0, 1, 1], [], []>} : vector<8x4xf32>, vector<4x32xf32>, vector<8x32xf32> -> vector<8x32xf32>
    %cst_48 = arith.constant dense<0.000000e+00> : vector<8x32xf32>
    %76 = tpu.matmul %70, %51, %cst_48 {dimension_numbers = #tpu.dot_dimension_numbers<[1], [0], [0], [1], [0, 0, 1, 1], [], []>} : vector<8x8xf32>, vector<8x32xf32>, vector<8x32xf32> -> vector<8x32xf32>
    %77 = arith.addf %75, %76 : vector<8x32xf32>
    %78 = arith.addf %77, %54 : vector<8x32xf32>
    %cst_49 = arith.constant 0.000000e+00 : f32
    %79 = vector.broadcast %cst_49 : f32 to vector<8x32xf32>
    %80 = arith.maximumf %78, %79 : vector<8x32xf32>
    %cst_50 = arith.constant dense<0.000000e+00> : vector<8x32xf32>
    %81 = tpu.matmul %80, %55, %cst_50 {dimension_numbers = #tpu.dot_dimension_numbers<[1], [0], [0], [1], [0, 0, 1, 1], [], []>} : vector<8x32xf32>, vector<32x32xf32>, vector<8x32xf32> -> vector<8x32xf32>
    %82 = arith.addf %81, %58 : vector<8x32xf32>
    %cst_51 = arith.constant 0.000000e+00 : f32
    %83 = vector.broadcast %cst_51 : f32 to vector<8x32xf32>
    %84 = arith.maximumf %82, %83 : vector<8x32xf32>
    %cst_52 = arith.constant dense<0.000000e+00> : vector<8x4xf32>
    %85 = tpu.matmul %84, %59, %cst_52 {dimension_numbers = #tpu.dot_dimension_numbers<[1], [0], [0], [1], [0, 0, 1, 1], [], []>} : vector<8x32xf32>, vector<32x4xf32>, vector<8x4xf32> -> vector<8x4xf32>
    %86 = arith.addf %85, %62 : vector<8x4xf32>
    %87 = vector.extract_strided_slice %73 {offsets = [0, 4], sizes = [8, 4], strides = [1, 1]} : vector<8x8xf32> to vector<8x4xf32>
    %88 = tpu.concatenate %86, %87 in 1 : vector<8x4xf32>, vector<8x4xf32> -> vector<8x8xf32>
    %cst_53 = arith.constant dense<0.000000e+00> : vector<8x96xf32>
    %89 = tpu.matmul %88, %0, %cst_53 {dimension_numbers = #tpu.dot_dimension_numbers<[1], [0], [0], [1], [0, 0, 1, 1], [], []>} : vector<8x8xf32>, vector<8x96xf32>, vector<8x96xf32> -> vector<8x96xf32>
    %cst_54 = arith.constant dense<0.000000e+00> : vector<8x96xf32>
    %90 = tpu.matmul %67, %1, %cst_54 {dimension_numbers = #tpu.dot_dimension_numbers<[1], [0], [0], [1], [0, 0, 1, 1], [], []>} : vector<8x32xf32>, vector<32x96xf32>, vector<8x96xf32> -> vector<8x96xf32>
    %91 = vector.extract_strided_slice %89 {offsets = [0, 0], sizes = [8, 32], strides = [1, 1]} : vector<8x96xf32> to vector<8x32xf32>
    %92 = vector.extract_strided_slice %90 {offsets = [0, 0], sizes = [8, 32], strides = [1, 1]} : vector<8x96xf32> to vector<8x32xf32>
    %93 = arith.addf %91, %92 : vector<8x32xf32>
    %94 = arith.addf %93, %6 : vector<8x32xf32>
    %95 = arith.negf %94 : vector<8x32xf32>
    %96 = math.exp %95 : vector<8x32xf32>
    %cst_55 = arith.constant 1.000000e+00 : f32
    %97 = vector.broadcast %cst_55 : f32 to vector<8x32xf32>
    %98 = arith.addf %97, %96 : vector<8x32xf32>
    %99 = arith.divf %97, %98 : vector<8x32xf32>
    %100 = vector.extract_strided_slice %89 {offsets = [0, 32], sizes = [8, 32], strides = [1, 1]} : vector<8x96xf32> to vector<8x32xf32>
    %101 = vector.extract_strided_slice %90 {offsets = [0, 32], sizes = [8, 32], strides = [1, 1]} : vector<8x96xf32> to vector<8x32xf32>
    %102 = arith.addf %100, %101 : vector<8x32xf32>
    %103 = arith.addf %102, %10 : vector<8x32xf32>
    %104 = arith.negf %103 : vector<8x32xf32>
    %105 = math.exp %104 : vector<8x32xf32>
    %cst_56 = arith.constant 1.000000e+00 : f32
    %106 = vector.broadcast %cst_56 : f32 to vector<8x32xf32>
    %107 = arith.addf %106, %105 : vector<8x32xf32>
    %108 = arith.divf %106, %107 : vector<8x32xf32>
    %109 = vector.extract_strided_slice %89 {offsets = [0, 64], sizes = [8, 32], strides = [1, 1]} : vector<8x96xf32> to vector<8x32xf32>
    %110 = arith.addf %109, %14 : vector<8x32xf32>
    %111 = vector.extract_strided_slice %90 {offsets = [0, 64], sizes = [8, 32], strides = [1, 1]} : vector<8x96xf32> to vector<8x32xf32>
    %112 = arith.addf %111, %18 : vector<8x32xf32>
    %113 = arith.mulf %99, %112 : vector<8x32xf32>
    %114 = arith.addf %110, %113 : vector<8x32xf32>
    %115 = math.tanh %114 : vector<8x32xf32>
    %cst_57 = arith.constant 1.000000e+00 : f32
    %116 = vector.broadcast %cst_57 : f32 to vector<8x32xf32>
    %117 = arith.subf %116, %108 : vector<8x32xf32>
    %118 = arith.mulf %117, %115 : vector<8x32xf32>
    %119 = arith.mulf %108, %67 : vector<8x32xf32>
    %120 = arith.addf %118, %119 : vector<8x32xf32>
    %cst_58 = arith.constant dense<0.000000e+00> : vector<8x96xf32>
    %121 = tpu.matmul %120, %19, %cst_58 {dimension_numbers = #tpu.dot_dimension_numbers<[1], [0], [0], [1], [0, 0, 1, 1], [], []>} : vector<8x32xf32>, vector<32x96xf32>, vector<8x96xf32> -> vector<8x96xf32>
    %cst_59 = arith.constant dense<0.000000e+00> : vector<8x96xf32>
    %122 = tpu.matmul %69, %20, %cst_59 {dimension_numbers = #tpu.dot_dimension_numbers<[1], [0], [0], [1], [0, 0, 1, 1], [], []>} : vector<8x32xf32>, vector<32x96xf32>, vector<8x96xf32> -> vector<8x96xf32>
    %123 = vector.extract_strided_slice %121 {offsets = [0, 0], sizes = [8, 32], strides = [1, 1]} : vector<8x96xf32> to vector<8x32xf32>
    %124 = vector.extract_strided_slice %122 {offsets = [0, 0], sizes = [8, 32], strides = [1, 1]} : vector<8x96xf32> to vector<8x32xf32>
    %125 = arith.addf %123, %124 : vector<8x32xf32>
    %126 = arith.addf %125, %25 : vector<8x32xf32>
    %127 = arith.negf %126 : vector<8x32xf32>
    %128 = math.exp %127 : vector<8x32xf32>
    %cst_60 = arith.constant 1.000000e+00 : f32
    %129 = vector.broadcast %cst_60 : f32 to vector<8x32xf32>
    %130 = arith.addf %129, %128 : vector<8x32xf32>
    %131 = arith.divf %129, %130 : vector<8x32xf32>
    %132 = vector.extract_strided_slice %121 {offsets = [0, 32], sizes = [8, 32], strides = [1, 1]} : vector<8x96xf32> to vector<8x32xf32>
    %133 = vector.extract_strided_slice %122 {offsets = [0, 32], sizes = [8, 32], strides = [1, 1]} : vector<8x96xf32> to vector<8x32xf32>
    %134 = arith.addf %132, %133 : vector<8x32xf32>
    %135 = arith.addf %134, %29 : vector<8x32xf32>
    %136 = arith.negf %135 : vector<8x32xf32>
    %137 = math.exp %136 : vector<8x32xf32>
    %cst_61 = arith.constant 1.000000e+00 : f32
    %138 = vector.broadcast %cst_61 : f32 to vector<8x32xf32>
    %139 = arith.addf %138, %137 : vector<8x32xf32>
    %140 = arith.divf %138, %139 : vector<8x32xf32>
    %141 = vector.extract_strided_slice %121 {offsets = [0, 64], sizes = [8, 32], strides = [1, 1]} : vector<8x96xf32> to vector<8x32xf32>
    %142 = arith.addf %141, %33 : vector<8x32xf32>
    %143 = vector.extract_strided_slice %122 {offsets = [0, 64], sizes = [8, 32], strides = [1, 1]} : vector<8x96xf32> to vector<8x32xf32>
    %144 = arith.addf %143, %37 : vector<8x32xf32>
    %145 = arith.mulf %131, %144 : vector<8x32xf32>
    %146 = arith.addf %142, %145 : vector<8x32xf32>
    %147 = math.tanh %146 : vector<8x32xf32>
    %cst_62 = arith.constant 1.000000e+00 : f32
    %148 = vector.broadcast %cst_62 : f32 to vector<8x32xf32>
    %149 = arith.subf %148, %140 : vector<8x32xf32>
    %150 = arith.mulf %149, %147 : vector<8x32xf32>
    %151 = arith.mulf %140, %69 : vector<8x32xf32>
    %152 = arith.addf %150, %151 : vector<8x32xf32>
    %cst_63 = arith.constant dense<0.000000e+00> : vector<8x32xf32>
    %153 = tpu.matmul %152, %38, %cst_63 {dimension_numbers = #tpu.dot_dimension_numbers<[1], [0], [0], [1], [0, 0, 1, 1], [], []>} : vector<8x32xf32>, vector<32x32xf32>, vector<8x32xf32> -> vector<8x32xf32>
    %154 = arith.addf %153, %41 : vector<8x32xf32>
    %cst_64 = arith.constant 0.000000e+00 : f32
    %155 = vector.broadcast %cst_64 : f32 to vector<8x32xf32>
    %156 = arith.maximumf %154, %155 : vector<8x32xf32>
    %cst_65 = arith.constant dense<0.000000e+00> : vector<8x32xf32>
    %157 = tpu.matmul %156, %42, %cst_65 {dimension_numbers = #tpu.dot_dimension_numbers<[1], [0], [0], [1], [0, 0, 1, 1], [], []>} : vector<8x32xf32>, vector<32x32xf32>, vector<8x32xf32> -> vector<8x32xf32>
    %158 = arith.addf %157, %45 : vector<8x32xf32>
    %cst_66 = arith.constant 0.000000e+00 : f32
    %159 = vector.broadcast %cst_66 : f32 to vector<8x32xf32>
    %160 = arith.maximumf %158, %159 : vector<8x32xf32>
    %cst_67 = arith.constant dense<0.000000e+00> : vector<8x8xf32>
    %161 = tpu.matmul %160, %46, %cst_67 {dimension_numbers = #tpu.dot_dimension_numbers<[1], [0], [0], [1], [0, 0, 1, 1], [], []>} : vector<8x32xf32>, vector<32x8xf32>, vector<8x8xf32> -> vector<8x8xf32>
    %162 = arith.addf %161, %49 : vector<8x8xf32>
    %cst_68 = arith.constant dense<0.000000e+00> : vector<8x96xf32>
    %163 = tpu.matmul %162, %0, %cst_68 {dimension_numbers = #tpu.dot_dimension_numbers<[1], [0], [0], [1], [0, 0, 1, 1], [], []>} : vector<8x8xf32>, vector<8x96xf32>, vector<8x96xf32> -> vector<8x96xf32>
    %cst_69 = arith.constant dense<0.000000e+00> : vector<8x96xf32>
    %164 = tpu.matmul %120, %1, %cst_69 {dimension_numbers = #tpu.dot_dimension_numbers<[1], [0], [0], [1], [0, 0, 1, 1], [], []>} : vector<8x32xf32>, vector<32x96xf32>, vector<8x96xf32> -> vector<8x96xf32>
    %165 = vector.extract_strided_slice %163 {offsets = [0, 0], sizes = [8, 32], strides = [1, 1]} : vector<8x96xf32> to vector<8x32xf32>
    %166 = vector.extract_strided_slice %164 {offsets = [0, 0], sizes = [8, 32], strides = [1, 1]} : vector<8x96xf32> to vector<8x32xf32>
    %167 = arith.addf %165, %166 : vector<8x32xf32>
    %168 = arith.addf %167, %6 : vector<8x32xf32>
    %169 = arith.negf %168 : vector<8x32xf32>
    %170 = math.exp %169 : vector<8x32xf32>
    %cst_70 = arith.constant 1.000000e+00 : f32
    %171 = vector.broadcast %cst_70 : f32 to vector<8x32xf32>
    %172 = arith.addf %171, %170 : vector<8x32xf32>
    %173 = arith.divf %171, %172 : vector<8x32xf32>
    %174 = vector.extract_strided_slice %163 {offsets = [0, 32], sizes = [8, 32], strides = [1, 1]} : vector<8x96xf32> to vector<8x32xf32>
    %175 = vector.extract_strided_slice %164 {offsets = [0, 32], sizes = [8, 32], strides = [1, 1]} : vector<8x96xf32> to vector<8x32xf32>
    %176 = arith.addf %174, %175 : vector<8x32xf32>
    %177 = arith.addf %176, %10 : vector<8x32xf32>
    %178 = arith.negf %177 : vector<8x32xf32>
    %179 = math.exp %178 : vector<8x32xf32>
    %cst_71 = arith.constant 1.000000e+00 : f32
    %180 = vector.broadcast %cst_71 : f32 to vector<8x32xf32>
    %181 = arith.addf %180, %179 : vector<8x32xf32>
    %182 = arith.divf %180, %181 : vector<8x32xf32>
    %183 = vector.extract_strided_slice %163 {offsets = [0, 64], sizes = [8, 32], strides = [1, 1]} : vector<8x96xf32> to vector<8x32xf32>
    %184 = arith.addf %183, %14 : vector<8x32xf32>
    %185 = vector.extract_strided_slice %164 {offsets = [0, 64], sizes = [8, 32], strides = [1, 1]} : vector<8x96xf32> to vector<8x32xf32>
    %186 = arith.addf %185, %18 : vector<8x32xf32>
    %187 = arith.mulf %173, %186 : vector<8x32xf32>
    %188 = arith.addf %184, %187 : vector<8x32xf32>
    %189 = math.tanh %188 : vector<8x32xf32>
    %cst_72 = arith.constant 1.000000e+00 : f32
    %190 = vector.broadcast %cst_72 : f32 to vector<8x32xf32>
    %191 = arith.subf %190, %182 : vector<8x32xf32>
    %192 = arith.mulf %191, %189 : vector<8x32xf32>
    %193 = arith.mulf %182, %120 : vector<8x32xf32>
    %194 = arith.addf %192, %193 : vector<8x32xf32>
    %cst_73 = arith.constant dense<0.000000e+00> : vector<8x96xf32>
    %195 = tpu.matmul %194, %19, %cst_73 {dimension_numbers = #tpu.dot_dimension_numbers<[1], [0], [0], [1], [0, 0, 1, 1], [], []>} : vector<8x32xf32>, vector<32x96xf32>, vector<8x96xf32> -> vector<8x96xf32>
    %cst_74 = arith.constant dense<0.000000e+00> : vector<8x96xf32>
    %196 = tpu.matmul %152, %20, %cst_74 {dimension_numbers = #tpu.dot_dimension_numbers<[1], [0], [0], [1], [0, 0, 1, 1], [], []>} : vector<8x32xf32>, vector<32x96xf32>, vector<8x96xf32> -> vector<8x96xf32>
    %197 = vector.extract_strided_slice %195 {offsets = [0, 0], sizes = [8, 32], strides = [1, 1]} : vector<8x96xf32> to vector<8x32xf32>
    %198 = vector.extract_strided_slice %196 {offsets = [0, 0], sizes = [8, 32], strides = [1, 1]} : vector<8x96xf32> to vector<8x32xf32>
    %199 = arith.addf %197, %198 : vector<8x32xf32>
    %200 = arith.addf %199, %25 : vector<8x32xf32>
    %201 = arith.negf %200 : vector<8x32xf32>
    %202 = math.exp %201 : vector<8x32xf32>
    %cst_75 = arith.constant 1.000000e+00 : f32
    %203 = vector.broadcast %cst_75 : f32 to vector<8x32xf32>
    %204 = arith.addf %203, %202 : vector<8x32xf32>
    %205 = arith.divf %203, %204 : vector<8x32xf32>
    %206 = vector.extract_strided_slice %195 {offsets = [0, 32], sizes = [8, 32], strides = [1, 1]} : vector<8x96xf32> to vector<8x32xf32>
    %207 = vector.extract_strided_slice %196 {offsets = [0, 32], sizes = [8, 32], strides = [1, 1]} : vector<8x96xf32> to vector<8x32xf32>
    %208 = arith.addf %206, %207 : vector<8x32xf32>
    %209 = arith.addf %208, %29 : vector<8x32xf32>
    %210 = arith.negf %209 : vector<8x32xf32>
    %211 = math.exp %210 : vector<8x32xf32>
    %cst_76 = arith.constant 1.000000e+00 : f32
    %212 = vector.broadcast %cst_76 : f32 to vector<8x32xf32>
    %213 = arith.addf %212, %211 : vector<8x32xf32>
    %214 = arith.divf %212, %213 : vector<8x32xf32>
    %215 = vector.extract_strided_slice %195 {offsets = [0, 64], sizes = [8, 32], strides = [1, 1]} : vector<8x96xf32> to vector<8x32xf32>
    %216 = arith.addf %215, %33 : vector<8x32xf32>
    %217 = vector.extract_strided_slice %196 {offsets = [0, 64], sizes = [8, 32], strides = [1, 1]} : vector<8x96xf32> to vector<8x32xf32>
    %218 = arith.addf %217, %37 : vector<8x32xf32>
    %219 = arith.mulf %205, %218 : vector<8x32xf32>
    %220 = arith.addf %216, %219 : vector<8x32xf32>
    %221 = math.tanh %220 : vector<8x32xf32>
    %cst_77 = arith.constant 1.000000e+00 : f32
    %222 = vector.broadcast %cst_77 : f32 to vector<8x32xf32>
    %223 = arith.subf %222, %214 : vector<8x32xf32>
    %224 = arith.mulf %223, %221 : vector<8x32xf32>
    %225 = arith.mulf %214, %152 : vector<8x32xf32>
    %226 = arith.addf %224, %225 : vector<8x32xf32>
    %cst_78 = arith.constant dense<0.000000e+00> : vector<8x32xf32>
    %227 = tpu.matmul %226, %38, %cst_78 {dimension_numbers = #tpu.dot_dimension_numbers<[1], [0], [0], [1], [0, 0, 1, 1], [], []>} : vector<8x32xf32>, vector<32x32xf32>, vector<8x32xf32> -> vector<8x32xf32>
    %228 = arith.addf %227, %41 : vector<8x32xf32>
    %cst_79 = arith.constant 0.000000e+00 : f32
    %229 = vector.broadcast %cst_79 : f32 to vector<8x32xf32>
    %230 = arith.maximumf %228, %229 : vector<8x32xf32>
    %cst_80 = arith.constant dense<0.000000e+00> : vector<8x32xf32>
    %231 = tpu.matmul %230, %42, %cst_80 {dimension_numbers = #tpu.dot_dimension_numbers<[1], [0], [0], [1], [0, 0, 1, 1], [], []>} : vector<8x32xf32>, vector<32x32xf32>, vector<8x32xf32> -> vector<8x32xf32>
    %232 = arith.addf %231, %45 : vector<8x32xf32>
    %cst_81 = arith.constant 0.000000e+00 : f32
    %233 = vector.broadcast %cst_81 : f32 to vector<8x32xf32>
    %234 = arith.maximumf %232, %233 : vector<8x32xf32>
    %cst_82 = arith.constant dense<0.000000e+00> : vector<8x8xf32>
    %235 = tpu.matmul %234, %46, %cst_82 {dimension_numbers = #tpu.dot_dimension_numbers<[1], [0], [0], [1], [0, 0, 1, 1], [], []>} : vector<8x32xf32>, vector<32x8xf32>, vector<8x8xf32> -> vector<8x8xf32>
    %236 = arith.addf %235, %49 : vector<8x8xf32>
    %cst_83 = arith.constant dense<0.000000e+00> : vector<8x96xf32>
    %237 = tpu.matmul %236, %0, %cst_83 {dimension_numbers = #tpu.dot_dimension_numbers<[1], [0], [0], [1], [0, 0, 1, 1], [], []>} : vector<8x8xf32>, vector<8x96xf32>, vector<8x96xf32> -> vector<8x96xf32>
    %cst_84 = arith.constant dense<0.000000e+00> : vector<8x96xf32>
    %238 = tpu.matmul %194, %1, %cst_84 {dimension_numbers = #tpu.dot_dimension_numbers<[1], [0], [0], [1], [0, 0, 1, 1], [], []>} : vector<8x32xf32>, vector<32x96xf32>, vector<8x96xf32> -> vector<8x96xf32>
    %239 = vector.extract_strided_slice %237 {offsets = [0, 0], sizes = [8, 32], strides = [1, 1]} : vector<8x96xf32> to vector<8x32xf32>
    %240 = vector.extract_strided_slice %238 {offsets = [0, 0], sizes = [8, 32], strides = [1, 1]} : vector<8x96xf32> to vector<8x32xf32>
    %241 = arith.addf %239, %240 : vector<8x32xf32>
    %242 = arith.addf %241, %6 : vector<8x32xf32>
    %243 = arith.negf %242 : vector<8x32xf32>
    %244 = math.exp %243 : vector<8x32xf32>
    %cst_85 = arith.constant 1.000000e+00 : f32
    %245 = vector.broadcast %cst_85 : f32 to vector<8x32xf32>
    %246 = arith.addf %245, %244 : vector<8x32xf32>
    %247 = arith.divf %245, %246 : vector<8x32xf32>
    %248 = vector.extract_strided_slice %237 {offsets = [0, 32], sizes = [8, 32], strides = [1, 1]} : vector<8x96xf32> to vector<8x32xf32>
    %249 = vector.extract_strided_slice %238 {offsets = [0, 32], sizes = [8, 32], strides = [1, 1]} : vector<8x96xf32> to vector<8x32xf32>
    %250 = arith.addf %248, %249 : vector<8x32xf32>
    %251 = arith.addf %250, %10 : vector<8x32xf32>
    %252 = arith.negf %251 : vector<8x32xf32>
    %253 = math.exp %252 : vector<8x32xf32>
    %cst_86 = arith.constant 1.000000e+00 : f32
    %254 = vector.broadcast %cst_86 : f32 to vector<8x32xf32>
    %255 = arith.addf %254, %253 : vector<8x32xf32>
    %256 = arith.divf %254, %255 : vector<8x32xf32>
    %257 = vector.extract_strided_slice %237 {offsets = [0, 64], sizes = [8, 32], strides = [1, 1]} : vector<8x96xf32> to vector<8x32xf32>
    %258 = arith.addf %257, %14 : vector<8x32xf32>
    %259 = vector.extract_strided_slice %238 {offsets = [0, 64], sizes = [8, 32], strides = [1, 1]} : vector<8x96xf32> to vector<8x32xf32>
    %260 = arith.addf %259, %18 : vector<8x32xf32>
    %261 = arith.mulf %247, %260 : vector<8x32xf32>
    %262 = arith.addf %258, %261 : vector<8x32xf32>
    %263 = math.tanh %262 : vector<8x32xf32>
    %cst_87 = arith.constant 1.000000e+00 : f32
    %264 = vector.broadcast %cst_87 : f32 to vector<8x32xf32>
    %265 = arith.subf %264, %256 : vector<8x32xf32>
    %266 = arith.mulf %265, %263 : vector<8x32xf32>
    %267 = arith.mulf %256, %194 : vector<8x32xf32>
    %268 = arith.addf %266, %267 : vector<8x32xf32>
    %cst_88 = arith.constant dense<0.000000e+00> : vector<8x96xf32>
    %269 = tpu.matmul %268, %19, %cst_88 {dimension_numbers = #tpu.dot_dimension_numbers<[1], [0], [0], [1], [0, 0, 1, 1], [], []>} : vector<8x32xf32>, vector<32x96xf32>, vector<8x96xf32> -> vector<8x96xf32>
    %cst_89 = arith.constant dense<0.000000e+00> : vector<8x96xf32>
    %270 = tpu.matmul %226, %20, %cst_89 {dimension_numbers = #tpu.dot_dimension_numbers<[1], [0], [0], [1], [0, 0, 1, 1], [], []>} : vector<8x32xf32>, vector<32x96xf32>, vector<8x96xf32> -> vector<8x96xf32>
    %271 = vector.extract_strided_slice %269 {offsets = [0, 0], sizes = [8, 32], strides = [1, 1]} : vector<8x96xf32> to vector<8x32xf32>
    %272 = vector.extract_strided_slice %270 {offsets = [0, 0], sizes = [8, 32], strides = [1, 1]} : vector<8x96xf32> to vector<8x32xf32>
    %273 = arith.addf %271, %272 : vector<8x32xf32>
    %274 = arith.addf %273, %25 : vector<8x32xf32>
    %275 = arith.negf %274 : vector<8x32xf32>
    %276 = math.exp %275 : vector<8x32xf32>
    %cst_90 = arith.constant 1.000000e+00 : f32
    %277 = vector.broadcast %cst_90 : f32 to vector<8x32xf32>
    %278 = arith.addf %277, %276 : vector<8x32xf32>
    %279 = arith.divf %277, %278 : vector<8x32xf32>
    %280 = vector.extract_strided_slice %269 {offsets = [0, 32], sizes = [8, 32], strides = [1, 1]} : vector<8x96xf32> to vector<8x32xf32>
    %281 = vector.extract_strided_slice %270 {offsets = [0, 32], sizes = [8, 32], strides = [1, 1]} : vector<8x96xf32> to vector<8x32xf32>
    %282 = arith.addf %280, %281 : vector<8x32xf32>
    %283 = arith.addf %282, %29 : vector<8x32xf32>
    %284 = arith.negf %283 : vector<8x32xf32>
    %285 = math.exp %284 : vector<8x32xf32>
    %cst_91 = arith.constant 1.000000e+00 : f32
    %286 = vector.broadcast %cst_91 : f32 to vector<8x32xf32>
    %287 = arith.addf %286, %285 : vector<8x32xf32>
    %288 = arith.divf %286, %287 : vector<8x32xf32>
    %289 = vector.extract_strided_slice %269 {offsets = [0, 64], sizes = [8, 32], strides = [1, 1]} : vector<8x96xf32> to vector<8x32xf32>
    %290 = arith.addf %289, %33 : vector<8x32xf32>
    %291 = vector.extract_strided_slice %270 {offsets = [0, 64], sizes = [8, 32], strides = [1, 1]} : vector<8x96xf32> to vector<8x32xf32>
    %292 = arith.addf %291, %37 : vector<8x32xf32>
    %293 = arith.mulf %279, %292 : vector<8x32xf32>
    %294 = arith.addf %290, %293 : vector<8x32xf32>
    %295 = math.tanh %294 : vector<8x32xf32>
    %cst_92 = arith.constant 1.000000e+00 : f32
    %296 = vector.broadcast %cst_92 : f32 to vector<8x32xf32>
    %297 = arith.subf %296, %288 : vector<8x32xf32>
    %298 = arith.mulf %297, %295 : vector<8x32xf32>
    %299 = arith.mulf %288, %226 : vector<8x32xf32>
    %300 = arith.addf %298, %299 : vector<8x32xf32>
    %cst_93 = arith.constant dense<0.000000e+00> : vector<8x32xf32>
    %301 = tpu.matmul %300, %38, %cst_93 {dimension_numbers = #tpu.dot_dimension_numbers<[1], [0], [0], [1], [0, 0, 1, 1], [], []>} : vector<8x32xf32>, vector<32x32xf32>, vector<8x32xf32> -> vector<8x32xf32>
    %302 = arith.addf %301, %41 : vector<8x32xf32>
    %cst_94 = arith.constant 0.000000e+00 : f32
    %303 = vector.broadcast %cst_94 : f32 to vector<8x32xf32>
    %304 = arith.maximumf %302, %303 : vector<8x32xf32>
    %cst_95 = arith.constant dense<0.000000e+00> : vector<8x32xf32>
    %305 = tpu.matmul %304, %42, %cst_95 {dimension_numbers = #tpu.dot_dimension_numbers<[1], [0], [0], [1], [0, 0, 1, 1], [], []>} : vector<8x32xf32>, vector<32x32xf32>, vector<8x32xf32> -> vector<8x32xf32>
    %306 = arith.addf %305, %45 : vector<8x32xf32>
    %cst_96 = arith.constant 0.000000e+00 : f32
    %307 = vector.broadcast %cst_96 : f32 to vector<8x32xf32>
    %308 = arith.maximumf %306, %307 : vector<8x32xf32>
    %cst_97 = arith.constant dense<0.000000e+00> : vector<8x8xf32>
    %309 = tpu.matmul %308, %46, %cst_97 {dimension_numbers = #tpu.dot_dimension_numbers<[1], [0], [0], [1], [0, 0, 1, 1], [], []>} : vector<8x32xf32>, vector<32x8xf32>, vector<8x8xf32> -> vector<8x8xf32>
    %310 = arith.addf %309, %49 : vector<8x8xf32>
    %311 = tpu.concatenate %88, %162, %236, %310 in 1 : vector<8x8xf32>, vector<8x8xf32>, vector<8x8xf32>, vector<8x8xf32> -> vector<8x32xf32>
    %312 = arith.index_cast %c0_i32_45 : i32 to index
    %c0_98 = arith.constant 0 : index
    %c0_99 = arith.constant 0 : index
    %313 = vector.load %arg22[%312, %c0_98, %c0_99] : memref<8x8x32xf32, #tpu.memory_space<vmem>>, vector<1x8x32xf32>
    %314 = vector.shape_cast %313 : vector<1x8x32xf32> to vector<8x32xf32>
    %315 = vector.shape_cast %311 : vector<8x32xf32> to vector<1x8x32xf32>
    tpu.vector_store %arg22[%312, %c0_98, %c0_99], %315 {strides = array<i32>} : memref<8x8x32xf32, #tpu.memory_space<vmem>>, vector<1x8x32xf32>,
    %c1_i32 = arith.constant 1 : i32
    %316 = arith.index_cast %c1_i32 : i32 to index
    %c0_100 = arith.constant 0 : index
    %c0_101 = arith.constant 0 : index
    %317 = vector.load %arg2[%316, %c0_100, %c0_101] : memref<8x8x8xf32, #tpu.memory_space<vmem>>, vector<1x8x8xf32>
    %318 = vector.shape_cast %317 : vector<1x8x8xf32> to vector<8x8xf32>
    %319 = vector.extract_strided_slice %318 {offsets = [0, 0], sizes = [8, 4], strides = [1, 1]} : vector<8x8xf32> to vector<8x4xf32>
    %cst_102 = arith.constant dense<0.000000e+00> : vector<8x32xf32>
    %320 = tpu.matmul %319, %50, %cst_102 {dimension_numbers = #tpu.dot_dimension_numbers<[1], [0], [0], [1], [0, 0, 1, 1], [], []>} : vector<8x4xf32>, vector<4x32xf32>, vector<8x32xf32> -> vector<8x32xf32>
    %cst_103 = arith.constant dense<0.000000e+00> : vector<8x32xf32>
    %321 = tpu.matmul %162, %51, %cst_103 {dimension_numbers = #tpu.dot_dimension_numbers<[1], [0], [0], [1], [0, 0, 1, 1], [], []>} : vector<8x8xf32>, vector<8x32xf32>, vector<8x32xf32> -> vector<8x32xf32>
    %322 = arith.addf %320, %321 : vector<8x32xf32>
    %323 = arith.addf %322, %54 : vector<8x32xf32>
    %cst_104 = arith.constant 0.000000e+00 : f32
    %324 = vector.broadcast %cst_104 : f32 to vector<8x32xf32>
    %325 = arith.maximumf %323, %324 : vector<8x32xf32>
    %cst_105 = arith.constant dense<0.000000e+00> : vector<8x32xf32>
    %326 = tpu.matmul %325, %55, %cst_105 {dimension_numbers = #tpu.dot_dimension_numbers<[1], [0], [0], [1], [0, 0, 1, 1], [], []>} : vector<8x32xf32>, vector<32x32xf32>, vector<8x32xf32> -> vector<8x32xf32>
    %327 = arith.addf %326, %58 : vector<8x32xf32>
    %cst_106 = arith.constant 0.000000e+00 : f32
    %328 = vector.broadcast %cst_106 : f32 to vector<8x32xf32>
    %329 = arith.maximumf %327, %328 : vector<8x32xf32>
    %cst_107 = arith.constant dense<0.000000e+00> : vector<8x4xf32>
    %330 = tpu.matmul %329, %59, %cst_107 {dimension_numbers = #tpu.dot_dimension_numbers<[1], [0], [0], [1], [0, 0, 1, 1], [], []>} : vector<8x32xf32>, vector<32x4xf32>, vector<8x4xf32> -> vector<8x4xf32>
    %331 = arith.addf %330, %62 : vector<8x4xf32>
    %332 = vector.extract_strided_slice %318 {offsets = [0, 4], sizes = [8, 4], strides = [1, 1]} : vector<8x8xf32> to vector<8x4xf32>
    %333 = tpu.concatenate %331, %332 in 1 : vector<8x4xf32>, vector<8x4xf32> -> vector<8x8xf32>
    %cst_108 = arith.constant dense<0.000000e+00> : vector<8x96xf32>
    %334 = tpu.matmul %333, %0, %cst_108 {dimension_numbers = #tpu.dot_dimension_numbers<[1], [0], [0], [1], [0, 0, 1, 1], [], []>} : vector<8x8xf32>, vector<8x96xf32>, vector<8x96xf32> -> vector<8x96xf32>
    %cst_109 = arith.constant dense<0.000000e+00> : vector<8x96xf32>
    %335 = tpu.matmul %120, %1, %cst_109 {dimension_numbers = #tpu.dot_dimension_numbers<[1], [0], [0], [1], [0, 0, 1, 1], [], []>} : vector<8x32xf32>, vector<32x96xf32>, vector<8x96xf32> -> vector<8x96xf32>
    %336 = vector.extract_strided_slice %334 {offsets = [0, 0], sizes = [8, 32], strides = [1, 1]} : vector<8x96xf32> to vector<8x32xf32>
    %337 = vector.extract_strided_slice %335 {offsets = [0, 0], sizes = [8, 32], strides = [1, 1]} : vector<8x96xf32> to vector<8x32xf32>
    %338 = arith.addf %336, %337 : vector<8x32xf32>
    %339 = arith.addf %338, %6 : vector<8x32xf32>
    %340 = arith.negf %339 : vector<8x32xf32>
    %341 = math.exp %340 : vector<8x32xf32>
    %cst_110 = arith.constant 1.000000e+00 : f32
    %342 = vector.broadcast %cst_110 : f32 to vector<8x32xf32>
    %343 = arith.addf %342, %341 : vector<8x32xf32>
    %344 = arith.divf %342, %343 : vector<8x32xf32>
    %345 = vector.extract_strided_slice %334 {offsets = [0, 32], sizes = [8, 32], strides = [1, 1]} : vector<8x96xf32> to vector<8x32xf32>
    %346 = vector.extract_strided_slice %335 {offsets = [0, 32], sizes = [8, 32], strides = [1, 1]} : vector<8x96xf32> to vector<8x32xf32>
    %347 = arith.addf %345, %346 : vector<8x32xf32>
    %348 = arith.addf %347, %10 : vector<8x32xf32>
    %349 = arith.negf %348 : vector<8x32xf32>
    %350 = math.exp %349 : vector<8x32xf32>
    %cst_111 = arith.constant 1.000000e+00 : f32
    %351 = vector.broadcast %cst_111 : f32 to vector<8x32xf32>
    %352 = arith.addf %351, %350 : vector<8x32xf32>
    %353 = arith.divf %351, %352 : vector<8x32xf32>
    %354 = vector.extract_strided_slice %334 {offsets = [0, 64], sizes = [8, 32], strides = [1, 1]} : vector<8x96xf32> to vector<8x32xf32>
    %355 = arith.addf %354, %14 : vector<8x32xf32>
    %356 = vector.extract_strided_slice %335 {offsets = [0, 64], sizes = [8, 32], strides = [1, 1]} : vector<8x96xf32> to vector<8x32xf32>
    %357 = arith.addf %356, %18 : vector<8x32xf32>
    %358 = arith.mulf %344, %357 : vector<8x32xf32>
    %359 = arith.addf %355, %358 : vector<8x32xf32>
    %360 = math.tanh %359 : vector<8x32xf32>
    %cst_112 = arith.constant 1.000000e+00 : f32
    %361 = vector.broadcast %cst_112 : f32 to vector<8x32xf32>
    %362 = arith.subf %361, %353 : vector<8x32xf32>
    %363 = arith.mulf %362, %360 : vector<8x32xf32>
    %364 = arith.mulf %353, %120 : vector<8x32xf32>
    %365 = arith.addf %363, %364 : vector<8x32xf32>
    %cst_113 = arith.constant dense<0.000000e+00> : vector<8x96xf32>
    %366 = tpu.matmul %365, %19, %cst_113 {dimension_numbers = #tpu.dot_dimension_numbers<[1], [0], [0], [1], [0, 0, 1, 1], [], []>} : vector<8x32xf32>, vector<32x96xf32>, vector<8x96xf32> -> vector<8x96xf32>
    %cst_114 = arith.constant dense<0.000000e+00> : vector<8x96xf32>
    %367 = tpu.matmul %152, %20, %cst_114 {dimension_numbers = #tpu.dot_dimension_numbers<[1], [0], [0], [1], [0, 0, 1, 1], [], []>} : vector<8x32xf32>, vector<32x96xf32>, vector<8x96xf32> -> vector<8x96xf32>
    %368 = vector.extract_strided_slice %366 {offsets = [0, 0], sizes = [8, 32], strides = [1, 1]} : vector<8x96xf32> to vector<8x32xf32>
    %369 = vector.extract_strided_slice %367 {offsets = [0, 0], sizes = [8, 32], strides = [1, 1]} : vector<8x96xf32> to vector<8x32xf32>
    %370 = arith.addf %368, %369 : vector<8x32xf32>
    %371 = arith.addf %370, %25 : vector<8x32xf32>
    %372 = arith.negf %371 : vector<8x32xf32>
    %373 = math.exp %372 : vector<8x32xf32>
    %cst_115 = arith.constant 1.000000e+00 : f32
    %374 = vector.broadcast %cst_115 : f32 to vector<8x32xf32>
    %375 = arith.addf %374, %373 : vector<8x32xf32>
    %376 = arith.divf %374, %375 : vector<8x32xf32>
    %377 = vector.extract_strided_slice %366 {offsets = [0, 32], sizes = [8, 32], strides = [1, 1]} : vector<8x96xf32> to vector<8x32xf32>
    %378 = vector.extract_strided_slice %367 {offsets = [0, 32], sizes = [8, 32], strides = [1, 1]} : vector<8x96xf32> to vector<8x32xf32>
    %379 = arith.addf %377, %378 : vector<8x32xf32>
    %380 = arith.addf %379, %29 : vector<8x32xf32>
    %381 = arith.negf %380 : vector<8x32xf32>
    %382 = math.exp %381 : vector<8x32xf32>
    %cst_116 = arith.constant 1.000000e+00 : f32
    %383 = vector.broadcast %cst_116 : f32 to vector<8x32xf32>
    %384 = arith.addf %383, %382 : vector<8x32xf32>
    %385 = arith.divf %383, %384 : vector<8x32xf32>
    %386 = vector.extract_strided_slice %366 {offsets = [0, 64], sizes = [8, 32], strides = [1, 1]} : vector<8x96xf32> to vector<8x32xf32>
    %387 = arith.addf %386, %33 : vector<8x32xf32>
    %388 = vector.extract_strided_slice %367 {offsets = [0, 64], sizes = [8, 32], strides = [1, 1]} : vector<8x96xf32> to vector<8x32xf32>
    %389 = arith.addf %388, %37 : vector<8x32xf32>
    %390 = arith.mulf %376, %389 : vector<8x32xf32>
    %391 = arith.addf %387, %390 : vector<8x32xf32>
    %392 = math.tanh %391 : vector<8x32xf32>
    %cst_117 = arith.constant 1.000000e+00 : f32
    %393 = vector.broadcast %cst_117 : f32 to vector<8x32xf32>
    %394 = arith.subf %393, %385 : vector<8x32xf32>
    %395 = arith.mulf %394, %392 : vector<8x32xf32>
    %396 = arith.mulf %385, %152 : vector<8x32xf32>
    %397 = arith.addf %395, %396 : vector<8x32xf32>
    %cst_118 = arith.constant dense<0.000000e+00> : vector<8x32xf32>
    %398 = tpu.matmul %397, %38, %cst_118 {dimension_numbers = #tpu.dot_dimension_numbers<[1], [0], [0], [1], [0, 0, 1, 1], [], []>} : vector<8x32xf32>, vector<32x32xf32>, vector<8x32xf32> -> vector<8x32xf32>
    %399 = arith.addf %398, %41 : vector<8x32xf32>
    %cst_119 = arith.constant 0.000000e+00 : f32
    %400 = vector.broadcast %cst_119 : f32 to vector<8x32xf32>
    %401 = arith.maximumf %399, %400 : vector<8x32xf32>
    %cst_120 = arith.constant dense<0.000000e+00> : vector<8x32xf32>
    %402 = tpu.matmul %401, %42, %cst_120 {dimension_numbers = #tpu.dot_dimension_numbers<[1], [0], [0], [1], [0, 0, 1, 1], [], []>} : vector<8x32xf32>, vector<32x32xf32>, vector<8x32xf32> -> vector<8x32xf32>
    %403 = arith.addf %402, %45 : vector<8x32xf32>
    %cst_121 = arith.constant 0.000000e+00 : f32
    %404 = vector.broadcast %cst_121 : f32 to vector<8x32xf32>
    %405 = arith.maximumf %403, %404 : vector<8x32xf32>
    %cst_122 = arith.constant dense<0.000000e+00> : vector<8x8xf32>
    %406 = tpu.matmul %405, %46, %cst_122 {dimension_numbers = #tpu.dot_dimension_numbers<[1], [0], [0], [1], [0, 0, 1, 1], [], []>} : vector<8x32xf32>, vector<32x8xf32>, vector<8x8xf32> -> vector<8x8xf32>
    %407 = arith.addf %406, %49 : vector<8x8xf32>
    %cst_123 = arith.constant dense<0.000000e+00> : vector<8x96xf32>
    %408 = tpu.matmul %407, %0, %cst_123 {dimension_numbers = #tpu.dot_dimension_numbers<[1], [0], [0], [1], [0, 0, 1, 1], [], []>} : vector<8x8xf32>, vector<8x96xf32>, vector<8x96xf32> -> vector<8x96xf32>
    %cst_124 = arith.constant dense<0.000000e+00> : vector<8x96xf32>
    %409 = tpu.matmul %365, %1, %cst_124 {dimension_numbers = #tpu.dot_dimension_numbers<[1], [0], [0], [1], [0, 0, 1, 1], [], []>} : vector<8x32xf32>, vector<32x96xf32>, vector<8x96xf32> -> vector<8x96xf32>
    %410 = vector.extract_strided_slice %408 {offsets = [0, 0], sizes = [8, 32], strides = [1, 1]} : vector<8x96xf32> to vector<8x32xf32>
    %411 = vector.extract_strided_slice %409 {offsets = [0, 0], sizes = [8, 32], strides = [1, 1]} : vector<8x96xf32> to vector<8x32xf32>
    %412 = arith.addf %410, %411 : vector<8x32xf32>
    %413 = arith.addf %412, %6 : vector<8x32xf32>
    %414 = arith.negf %413 : vector<8x32xf32>
    %415 = math.exp %414 : vector<8x32xf32>
    %cst_125 = arith.constant 1.000000e+00 : f32
    %416 = vector.broadcast %cst_125 : f32 to vector<8x32xf32>
    %417 = arith.addf %416, %415 : vector<8x32xf32>
    %418 = arith.divf %416, %417 : vector<8x32xf32>
    %419 = vector.extract_strided_slice %408 {offsets = [0, 32], sizes = [8, 32], strides = [1, 1]} : vector<8x96xf32> to vector<8x32xf32>
    %420 = vector.extract_strided_slice %409 {offsets = [0, 32], sizes = [8, 32], strides = [1, 1]} : vector<8x96xf32> to vector<8x32xf32>
    %421 = arith.addf %419, %420 : vector<8x32xf32>
    %422 = arith.addf %421, %10 : vector<8x32xf32>
    %423 = arith.negf %422 : vector<8x32xf32>
    %424 = math.exp %423 : vector<8x32xf32>
    %cst_126 = arith.constant 1.000000e+00 : f32
    %425 = vector.broadcast %cst_126 : f32 to vector<8x32xf32>
    %426 = arith.addf %425, %424 : vector<8x32xf32>
    %427 = arith.divf %425, %426 : vector<8x32xf32>
    %428 = vector.extract_strided_slice %408 {offsets = [0, 64], sizes = [8, 32], strides = [1, 1]} : vector<8x96xf32> to vector<8x32xf32>
    %429 = arith.addf %428, %14 : vector<8x32xf32>
    %430 = vector.extract_strided_slice %409 {offsets = [0, 64], sizes = [8, 32], strides = [1, 1]} : vector<8x96xf32> to vector<8x32xf32>
    %431 = arith.addf %430, %18 : vector<8x32xf32>
    %432 = arith.mulf %418, %431 : vector<8x32xf32>
    %433 = arith.addf %429, %432 : vector<8x32xf32>
    %434 = math.tanh %433 : vector<8x32xf32>
    %cst_127 = arith.constant 1.000000e+00 : f32
    %435 = vector.broadcast %cst_127 : f32 to vector<8x32xf32>
    %436 = arith.subf %435, %427 : vector<8x32xf32>
    %437 = arith.mulf %436, %434 : vector<8x32xf32>
    %438 = arith.mulf %427, %365 : vector<8x32xf32>
    %439 = arith.addf %437, %438 : vector<8x32xf32>
    %cst_128 = arith.constant dense<0.000000e+00> : vector<8x96xf32>
    %440 = tpu.matmul %439, %19, %cst_128 {dimension_numbers = #tpu.dot_dimension_numbers<[1], [0], [0], [1], [0, 0, 1, 1], [], []>} : vector<8x32xf32>, vector<32x96xf32>, vector<8x96xf32> -> vector<8x96xf32>
    %cst_129 = arith.constant dense<0.000000e+00> : vector<8x96xf32>
    %441 = tpu.matmul %397, %20, %cst_129 {dimension_numbers = #tpu.dot_dimension_numbers<[1], [0], [0], [1], [0, 0, 1, 1], [], []>} : vector<8x32xf32>, vector<32x96xf32>, vector<8x96xf32> -> vector<8x96xf32>
    %442 = vector.extract_strided_slice %440 {offsets = [0, 0], sizes = [8, 32], strides = [1, 1]} : vector<8x96xf32> to vector<8x32xf32>
    %443 = vector.extract_strided_slice %441 {offsets = [0, 0], sizes = [8, 32], strides = [1, 1]} : vector<8x96xf32> to vector<8x32xf32>
    %444 = arith.addf %442, %443 : vector<8x32xf32>
    %445 = arith.addf %444, %25 : vector<8x32xf32>
    %446 = arith.negf %445 : vector<8x32xf32>
    %447 = math.exp %446 : vector<8x32xf32>
    %cst_130 = arith.constant 1.000000e+00 : f32
    %448 = vector.broadcast %cst_130 : f32 to vector<8x32xf32>
    %449 = arith.addf %448, %447 : vector<8x32xf32>
    %450 = arith.divf %448, %449 : vector<8x32xf32>
    %451 = vector.extract_strided_slice %440 {offsets = [0, 32], sizes = [8, 32], strides = [1, 1]} : vector<8x96xf32> to vector<8x32xf32>
    %452 = vector.extract_strided_slice %441 {offsets = [0, 32], sizes = [8, 32], strides = [1, 1]} : vector<8x96xf32> to vector<8x32xf32>
    %453 = arith.addf %451, %452 : vector<8x32xf32>
    %454 = arith.addf %453, %29 : vector<8x32xf32>
    %455 = arith.negf %454 : vector<8x32xf32>
    %456 = math.exp %455 : vector<8x32xf32>
    %cst_131 = arith.constant 1.000000e+00 : f32
    %457 = vector.broadcast %cst_131 : f32 to vector<8x32xf32>
    %458 = arith.addf %457, %456 : vector<8x32xf32>
    %459 = arith.divf %457, %458 : vector<8x32xf32>
    %460 = vector.extract_strided_slice %440 {offsets = [0, 64], sizes = [8, 32], strides = [1, 1]} : vector<8x96xf32> to vector<8x32xf32>
    %461 = arith.addf %460, %33 : vector<8x32xf32>
    %462 = vector.extract_strided_slice %441 {offsets = [0, 64], sizes = [8, 32], strides = [1, 1]} : vector<8x96xf32> to vector<8x32xf32>
    %463 = arith.addf %462, %37 : vector<8x32xf32>
    %464 = arith.mulf %450, %463 : vector<8x32xf32>
    %465 = arith.addf %461, %464 : vector<8x32xf32>
    %466 = math.tanh %465 : vector<8x32xf32>
    %cst_132 = arith.constant 1.000000e+00 : f32
    %467 = vector.broadcast %cst_132 : f32 to vector<8x32xf32>
    %468 = arith.subf %467, %459 : vector<8x32xf32>
    %469 = arith.mulf %468, %466 : vector<8x32xf32>
    %470 = arith.mulf %459, %397 : vector<8x32xf32>
    %471 = arith.addf %469, %470 : vector<8x32xf32>
    %cst_133 = arith.constant dense<0.000000e+00> : vector<8x32xf32>
    %472 = tpu.matmul %471, %38, %cst_133 {dimension_numbers = #tpu.dot_dimension_numbers<[1], [0], [0], [1], [0, 0, 1, 1], [], []>} : vector<8x32xf32>, vector<32x32xf32>, vector<8x32xf32> -> vector<8x32xf32>
    %473 = arith.addf %472, %41 : vector<8x32xf32>
    %cst_134 = arith.constant 0.000000e+00 : f32
    %474 = vector.broadcast %cst_134 : f32 to vector<8x32xf32>
    %475 = arith.maximumf %473, %474 : vector<8x32xf32>
    %cst_135 = arith.constant dense<0.000000e+00> : vector<8x32xf32>
    %476 = tpu.matmul %475, %42, %cst_135 {dimension_numbers = #tpu.dot_dimension_numbers<[1], [0], [0], [1], [0, 0, 1, 1], [], []>} : vector<8x32xf32>, vector<32x32xf32>, vector<8x32xf32> -> vector<8x32xf32>
    %477 = arith.addf %476, %45 : vector<8x32xf32>
    %cst_136 = arith.constant 0.000000e+00 : f32
    %478 = vector.broadcast %cst_136 : f32 to vector<8x32xf32>
    %479 = arith.maximumf %477, %478 : vector<8x32xf32>
    %cst_137 = arith.constant dense<0.000000e+00> : vector<8x8xf32>
    %480 = tpu.matmul %479, %46, %cst_137 {dimension_numbers = #tpu.dot_dimension_numbers<[1], [0], [0], [1], [0, 0, 1, 1], [], []>} : vector<8x32xf32>, vector<32x8xf32>, vector<8x8xf32> -> vector<8x8xf32>
    %481 = arith.addf %480, %49 : vector<8x8xf32>
    %cst_138 = arith.constant dense<0.000000e+00> : vector<8x96xf32>
    %482 = tpu.matmul %481, %0, %cst_138 {dimension_numbers = #tpu.dot_dimension_numbers<[1], [0], [0], [1], [0, 0, 1, 1], [], []>} : vector<8x8xf32>, vector<8x96xf32>, vector<8x96xf32> -> vector<8x96xf32>
    %cst_139 = arith.constant dense<0.000000e+00> : vector<8x96xf32>
    %483 = tpu.matmul %439, %1, %cst_139 {dimension_numbers = #tpu.dot_dimension_numbers<[1], [0], [0], [1], [0, 0, 1, 1], [], []>} : vector<8x32xf32>, vector<32x96xf32>, vector<8x96xf32> -> vector<8x96xf32>
    %484 = vector.extract_strided_slice %482 {offsets = [0, 0], sizes = [8, 32], strides = [1, 1]} : vector<8x96xf32> to vector<8x32xf32>
    %485 = vector.extract_strided_slice %483 {offsets = [0, 0], sizes = [8, 32], strides = [1, 1]} : vector<8x96xf32> to vector<8x32xf32>
    %486 = arith.addf %484, %485 : vector<8x32xf32>
    %487 = arith.addf %486, %6 : vector<8x32xf32>
    %488 = arith.negf %487 : vector<8x32xf32>
    %489 = math.exp %488 : vector<8x32xf32>
    %cst_140 = arith.constant 1.000000e+00 : f32
    %490 = vector.broadcast %cst_140 : f32 to vector<8x32xf32>
    %491 = arith.addf %490, %489 : vector<8x32xf32>
    %492 = arith.divf %490, %491 : vector<8x32xf32>
    %493 = vector.extract_strided_slice %482 {offsets = [0, 32], sizes = [8, 32], strides = [1, 1]} : vector<8x96xf32> to vector<8x32xf32>
    %494 = vector.extract_strided_slice %483 {offsets = [0, 32], sizes = [8, 32], strides = [1, 1]} : vector<8x96xf32> to vector<8x32xf32>
    %495 = arith.addf %493, %494 : vector<8x32xf32>
    %496 = arith.addf %495, %10 : vector<8x32xf32>
    %497 = arith.negf %496 : vector<8x32xf32>
    %498 = math.exp %497 : vector<8x32xf32>
    %cst_141 = arith.constant 1.000000e+00 : f32
    %499 = vector.broadcast %cst_141 : f32 to vector<8x32xf32>
    %500 = arith.addf %499, %498 : vector<8x32xf32>
    %501 = arith.divf %499, %500 : vector<8x32xf32>
    %502 = vector.extract_strided_slice %482 {offsets = [0, 64], sizes = [8, 32], strides = [1, 1]} : vector<8x96xf32> to vector<8x32xf32>
    %503 = arith.addf %502, %14 : vector<8x32xf32>
    %504 = vector.extract_strided_slice %483 {offsets = [0, 64], sizes = [8, 32], strides = [1, 1]} : vector<8x96xf32> to vector<8x32xf32>
    %505 = arith.addf %504, %18 : vector<8x32xf32>
    %506 = arith.mulf %492, %505 : vector<8x32xf32>
    %507 = arith.addf %503, %506 : vector<8x32xf32>
    %508 = math.tanh %507 : vector<8x32xf32>
    %cst_142 = arith.constant 1.000000e+00 : f32
    %509 = vector.broadcast %cst_142 : f32 to vector<8x32xf32>
    %510 = arith.subf %509, %501 : vector<8x32xf32>
    %511 = arith.mulf %510, %508 : vector<8x32xf32>
    %512 = arith.mulf %501, %439 : vector<8x32xf32>
    %513 = arith.addf %511, %512 : vector<8x32xf32>
    %cst_143 = arith.constant dense<0.000000e+00> : vector<8x96xf32>
    %514 = tpu.matmul %513, %19, %cst_143 {dimension_numbers = #tpu.dot_dimension_numbers<[1], [0], [0], [1], [0, 0, 1, 1], [], []>} : vector<8x32xf32>, vector<32x96xf32>, vector<8x96xf32> -> vector<8x96xf32>
    %cst_144 = arith.constant dense<0.000000e+00> : vector<8x96xf32>
    %515 = tpu.matmul %471, %20, %cst_144 {dimension_numbers = #tpu.dot_dimension_numbers<[1], [0], [0], [1], [0, 0, 1, 1], [], []>} : vector<8x32xf32>, vector<32x96xf32>, vector<8x96xf32> -> vector<8x96xf32>
    %516 = vector.extract_strided_slice %514 {offsets = [0, 0], sizes = [8, 32], strides = [1, 1]} : vector<8x96xf32> to vector<8x32xf32>
    %517 = vector.extract_strided_slice %515 {offsets = [0, 0], sizes = [8, 32], strides = [1, 1]} : vector<8x96xf32> to vector<8x32xf32>
    %518 = arith.addf %516, %517 : vector<8x32xf32>
    %519 = arith.addf %518, %25 : vector<8x32xf32>
    %520 = arith.negf %519 : vector<8x32xf32>
    %521 = math.exp %520 : vector<8x32xf32>
    %cst_145 = arith.constant 1.000000e+00 : f32
    %522 = vector.broadcast %cst_145 : f32 to vector<8x32xf32>
    %523 = arith.addf %522, %521 : vector<8x32xf32>
    %524 = arith.divf %522, %523 : vector<8x32xf32>
    %525 = vector.extract_strided_slice %514 {offsets = [0, 32], sizes = [8, 32], strides = [1, 1]} : vector<8x96xf32> to vector<8x32xf32>
    %526 = vector.extract_strided_slice %515 {offsets = [0, 32], sizes = [8, 32], strides = [1, 1]} : vector<8x96xf32> to vector<8x32xf32>
    %527 = arith.addf %525, %526 : vector<8x32xf32>
    %528 = arith.addf %527, %29 : vector<8x32xf32>
    %529 = arith.negf %528 : vector<8x32xf32>
    %530 = math.exp %529 : vector<8x32xf32>
    %cst_146 = arith.constant 1.000000e+00 : f32
    %531 = vector.broadcast %cst_146 : f32 to vector<8x32xf32>
    %532 = arith.addf %531, %530 : vector<8x32xf32>
    %533 = arith.divf %531, %532 : vector<8x32xf32>
    %534 = vector.extract_strided_slice %514 {offsets = [0, 64], sizes = [8, 32], strides = [1, 1]} : vector<8x96xf32> to vector<8x32xf32>
    %535 = arith.addf %534, %33 : vector<8x32xf32>
    %536 = vector.extract_strided_slice %515 {offsets = [0, 64], sizes = [8, 32], strides = [1, 1]} : vector<8x96xf32> to vector<8x32xf32>
    %537 = arith.addf %536, %37 : vector<8x32xf32>
    %538 = arith.mulf %524, %537 : vector<8x32xf32>
    %539 = arith.addf %535, %538 : vector<8x32xf32>
    %540 = math.tanh %539 : vector<8x32xf32>
    %cst_147 = arith.constant 1.000000e+00 : f32
    %541 = vector.broadcast %cst_147 : f32 to vector<8x32xf32>
    %542 = arith.subf %541, %533 : vector<8x32xf32>
    %543 = arith.mulf %542, %540 : vector<8x32xf32>
    %544 = arith.mulf %533, %471 : vector<8x32xf32>
    %545 = arith.addf %543, %544 : vector<8x32xf32>
    %cst_148 = arith.constant dense<0.000000e+00> : vector<8x32xf32>
    %546 = tpu.matmul %545, %38, %cst_148 {dimension_numbers = #tpu.dot_dimension_numbers<[1], [0], [0], [1], [0, 0, 1, 1], [], []>} : vector<8x32xf32>, vector<32x32xf32>, vector<8x32xf32> -> vector<8x32xf32>
    %547 = arith.addf %546, %41 : vector<8x32xf32>
    %cst_149 = arith.constant 0.000000e+00 : f32
    %548 = vector.broadcast %cst_149 : f32 to vector<8x32xf32>
    %549 = arith.maximumf %547, %548 : vector<8x32xf32>
    %cst_150 = arith.constant dense<0.000000e+00> : vector<8x32xf32>
    %550 = tpu.matmul %549, %42, %cst_150 {dimension_numbers = #tpu.dot_dimension_numbers<[1], [0], [0], [1], [0, 0, 1, 1], [], []>} : vector<8x32xf32>, vector<32x32xf32>, vector<8x32xf32> -> vector<8x32xf32>
    %551 = arith.addf %550, %45 : vector<8x32xf32>
    %cst_151 = arith.constant 0.000000e+00 : f32
    %552 = vector.broadcast %cst_151 : f32 to vector<8x32xf32>
    %553 = arith.maximumf %551, %552 : vector<8x32xf32>
    %cst_152 = arith.constant dense<0.000000e+00> : vector<8x8xf32>
    %554 = tpu.matmul %553, %46, %cst_152 {dimension_numbers = #tpu.dot_dimension_numbers<[1], [0], [0], [1], [0, 0, 1, 1], [], []>} : vector<8x32xf32>, vector<32x8xf32>, vector<8x8xf32> -> vector<8x8xf32>
    %555 = arith.addf %554, %49 : vector<8x8xf32>
    %556 = tpu.concatenate %333, %407, %481, %555 in 1 : vector<8x8xf32>, vector<8x8xf32>, vector<8x8xf32>, vector<8x8xf32> -> vector<8x32xf32>
    %557 = arith.index_cast %c1_i32 : i32 to index
    %c0_153 = arith.constant 0 : index
    %c0_154 = arith.constant 0 : index
    %558 = vector.load %arg22[%557, %c0_153, %c0_154] : memref<8x8x32xf32, #tpu.memory_space<vmem>>, vector<1x8x32xf32>
    %559 = vector.shape_cast %558 : vector<1x8x32xf32> to vector<8x32xf32>
    %560 = vector.shape_cast %556 : vector<8x32xf32> to vector<1x8x32xf32>
    tpu.vector_store %arg22[%557, %c0_153, %c0_154], %560 {strides = array<i32>} : memref<8x8x32xf32, #tpu.memory_space<vmem>>, vector<1x8x32xf32>,
    %c2_i32 = arith.constant 2 : i32
    %561 = arith.index_cast %c2_i32 : i32 to index
    %c0_155 = arith.constant 0 : index
    %c0_156 = arith.constant 0 : index
    %562 = vector.load %arg2[%561, %c0_155, %c0_156] : memref<8x8x8xf32, #tpu.memory_space<vmem>>, vector<1x8x8xf32>
    %563 = vector.shape_cast %562 : vector<1x8x8xf32> to vector<8x8xf32>
    %564 = vector.extract_strided_slice %563 {offsets = [0, 0], sizes = [8, 4], strides = [1, 1]} : vector<8x8xf32> to vector<8x4xf32>
    %cst_157 = arith.constant dense<0.000000e+00> : vector<8x32xf32>
    %565 = tpu.matmul %564, %50, %cst_157 {dimension_numbers = #tpu.dot_dimension_numbers<[1], [0], [0], [1], [0, 0, 1, 1], [], []>} : vector<8x4xf32>, vector<4x32xf32>, vector<8x32xf32> -> vector<8x32xf32>
    %cst_158 = arith.constant dense<0.000000e+00> : vector<8x32xf32>
    %566 = tpu.matmul %407, %51, %cst_158 {dimension_numbers = #tpu.dot_dimension_numbers<[1], [0], [0], [1], [0, 0, 1, 1], [], []>} : vector<8x8xf32>, vector<8x32xf32>, vector<8x32xf32> -> vector<8x32xf32>
    %567 = arith.addf %565, %566 : vector<8x32xf32>
    %568 = arith.addf %567, %54 : vector<8x32xf32>
    %cst_159 = arith.constant 0.000000e+00 : f32
    %569 = vector.broadcast %cst_159 : f32 to vector<8x32xf32>
    %570 = arith.maximumf %568, %569 : vector<8x32xf32>
    %cst_160 = arith.constant dense<0.000000e+00> : vector<8x32xf32>
    %571 = tpu.matmul %570, %55, %cst_160 {dimension_numbers = #tpu.dot_dimension_numbers<[1], [0], [0], [1], [0, 0, 1, 1], [], []>} : vector<8x32xf32>, vector<32x32xf32>, vector<8x32xf32> -> vector<8x32xf32>
    %572 = arith.addf %571, %58 : vector<8x32xf32>
    %cst_161 = arith.constant 0.000000e+00 : f32
    %573 = vector.broadcast %cst_161 : f32 to vector<8x32xf32>
    %574 = arith.maximumf %572, %573 : vector<8x32xf32>
    %cst_162 = arith.constant dense<0.000000e+00> : vector<8x4xf32>
    %575 = tpu.matmul %574, %59, %cst_162 {dimension_numbers = #tpu.dot_dimension_numbers<[1], [0], [0], [1], [0, 0, 1, 1], [], []>} : vector<8x32xf32>, vector<32x4xf32>, vector<8x4xf32> -> vector<8x4xf32>
    %576 = arith.addf %575, %62 : vector<8x4xf32>
    %577 = vector.extract_strided_slice %563 {offsets = [0, 4], sizes = [8, 4], strides = [1, 1]} : vector<8x8xf32> to vector<8x4xf32>
    %578 = tpu.concatenate %576, %577 in 1 : vector<8x4xf32>, vector<8x4xf32> -> vector<8x8xf32>
    %cst_163 = arith.constant dense<0.000000e+00> : vector<8x96xf32>
    %579 = tpu.matmul %578, %0, %cst_163 {dimension_numbers = #tpu.dot_dimension_numbers<[1], [0], [0], [1], [0, 0, 1, 1], [], []>} : vector<8x8xf32>, vector<8x96xf32>, vector<8x96xf32> -> vector<8x96xf32>
    %cst_164 = arith.constant dense<0.000000e+00> : vector<8x96xf32>
    %580 = tpu.matmul %365, %1, %cst_164 {dimension_numbers = #tpu.dot_dimension_numbers<[1], [0], [0], [1], [0, 0, 1, 1], [], []>} : vector<8x32xf32>, vector<32x96xf32>, vector<8x96xf32> -> vector<8x96xf32>
    %581 = vector.extract_strided_slice %579 {offsets = [0, 0], sizes = [8, 32], strides = [1, 1]} : vector<8x96xf32> to vector<8x32xf32>
    %582 = vector.extract_strided_slice %580 {offsets = [0, 0], sizes = [8, 32], strides = [1, 1]} : vector<8x96xf32> to vector<8x32xf32>
    %583 = arith.addf %581, %582 : vector<8x32xf32>
    %584 = arith.addf %583, %6 : vector<8x32xf32>
    %585 = arith.negf %584 : vector<8x32xf32>
    %586 = math.exp %585 : vector<8x32xf32>
    %cst_165 = arith.constant 1.000000e+00 : f32
    %587 = vector.broadcast %cst_165 : f32 to vector<8x32xf32>
    %588 = arith.addf %587, %586 : vector<8x32xf32>
    %589 = arith.divf %587, %588 : vector<8x32xf32>
    %590 = vector.extract_strided_slice %579 {offsets = [0, 32], sizes = [8, 32], strides = [1, 1]} : vector<8x96xf32> to vector<8x32xf32>
    %591 = vector.extract_strided_slice %580 {offsets = [0, 32], sizes = [8, 32], strides = [1, 1]} : vector<8x96xf32> to vector<8x32xf32>
    %592 = arith.addf %590, %591 : vector<8x32xf32>
    %593 = arith.addf %592, %10 : vector<8x32xf32>
    %594 = arith.negf %593 : vector<8x32xf32>
    %595 = math.exp %594 : vector<8x32xf32>
    %cst_166 = arith.constant 1.000000e+00 : f32
    %596 = vector.broadcast %cst_166 : f32 to vector<8x32xf32>
    %597 = arith.addf %596, %595 : vector<8x32xf32>
    %598 = arith.divf %596, %597 : vector<8x32xf32>
    %599 = vector.extract_strided_slice %579 {offsets = [0, 64], sizes = [8, 32], strides = [1, 1]} : vector<8x96xf32> to vector<8x32xf32>
    %600 = arith.addf %599, %14 : vector<8x32xf32>
    %601 = vector.extract_strided_slice %580 {offsets = [0, 64], sizes = [8, 32], strides = [1, 1]} : vector<8x96xf32> to vector<8x32xf32>
    %602 = arith.addf %601, %18 : vector<8x32xf32>
    %603 = arith.mulf %589, %602 : vector<8x32xf32>
    %604 = arith.addf %600, %603 : vector<8x32xf32>
    %605 = math.tanh %604 : vector<8x32xf32>
    %cst_167 = arith.constant 1.000000e+00 : f32
    %606 = vector.broadcast %cst_167 : f32 to vector<8x32xf32>
    %607 = arith.subf %606, %598 : vector<8x32xf32>
    %608 = arith.mulf %607, %605 : vector<8x32xf32>
    %609 = arith.mulf %598, %365 : vector<8x32xf32>
    %610 = arith.addf %608, %609 : vector<8x32xf32>
    %cst_168 = arith.constant dense<0.000000e+00> : vector<8x96xf32>
    %611 = tpu.matmul %610, %19, %cst_168 {dimension_numbers = #tpu.dot_dimension_numbers<[1], [0], [0], [1], [0, 0, 1, 1], [], []>} : vector<8x32xf32>, vector<32x96xf32>, vector<8x96xf32> -> vector<8x96xf32>
    %cst_169 = arith.constant dense<0.000000e+00> : vector<8x96xf32>
    %612 = tpu.matmul %397, %20, %cst_169 {dimension_numbers = #tpu.dot_dimension_numbers<[1], [0], [0], [1], [0, 0, 1, 1], [], []>} : vector<8x32xf32>, vector<32x96xf32>, vector<8x96xf32> -> vector<8x96xf32>
    %613 = vector.extract_strided_slice %611 {offsets = [0, 0], sizes = [8, 32], strides = [1, 1]} : vector<8x96xf32> to vector<8x32xf32>
    %614 = vector.extract_strided_slice %612 {offsets = [0, 0], sizes = [8, 32], strides = [1, 1]} : vector<8x96xf32> to vector<8x32xf32>
    %615 = arith.addf %613, %614 : vector<8x32xf32>
    %616 = arith.addf %615, %25 : vector<8x32xf32>
    %617 = arith.negf %616 : vector<8x32xf32>
    %618 = math.exp %617 : vector<8x32xf32>
    %cst_170 = arith.constant 1.000000e+00 : f32
    %619 = vector.broadcast %cst_170 : f32 to vector<8x32xf32>
    %620 = arith.addf %619, %618 : vector<8x32xf32>
    %621 = arith.divf %619, %620 : vector<8x32xf32>
    %622 = vector.extract_strided_slice %611 {offsets = [0, 32], sizes = [8, 32], strides = [1, 1]} : vector<8x96xf32> to vector<8x32xf32>
    %623 = vector.extract_strided_slice %612 {offsets = [0, 32], sizes = [8, 32], strides = [1, 1]} : vector<8x96xf32> to vector<8x32xf32>
    %624 = arith.addf %622, %623 : vector<8x32xf32>
    %625 = arith.addf %624, %29 : vector<8x32xf32>
    %626 = arith.negf %625 : vector<8x32xf32>
    %627 = math.exp %626 : vector<8x32xf32>
    %cst_171 = arith.constant 1.000000e+00 : f32
    %628 = vector.broadcast %cst_171 : f32 to vector<8x32xf32>
    %629 = arith.addf %628, %627 : vector<8x32xf32>
    %630 = arith.divf %628, %629 : vector<8x32xf32>
    %631 = vector.extract_strided_slice %611 {offsets = [0, 64], sizes = [8, 32], strides = [1, 1]} : vector<8x96xf32> to vector<8x32xf32>
    %632 = arith.addf %631, %33 : vector<8x32xf32>
    %633 = vector.extract_strided_slice %612 {offsets = [0, 64], sizes = [8, 32], strides = [1, 1]} : vector<8x96xf32> to vector<8x32xf32>
    %634 = arith.addf %633, %37 : vector<8x32xf32>
    %635 = arith.mulf %621, %634 : vector<8x32xf32>
    %636 = arith.addf %632, %635 : vector<8x32xf32>
    %637 = math.tanh %636 : vector<8x32xf32>
    %cst_172 = arith.constant 1.000000e+00 : f32
    %638 = vector.broadcast %cst_172 : f32 to vector<8x32xf32>
    %639 = arith.subf %638, %630 : vector<8x32xf32>
    %640 = arith.mulf %639, %637 : vector<8x32xf32>
    %641 = arith.mulf %630, %397 : vector<8x32xf32>
    %642 = arith.addf %640, %641 : vector<8x32xf32>
    %cst_173 = arith.constant dense<0.000000e+00> : vector<8x32xf32>
    %643 = tpu.matmul %642, %38, %cst_173 {dimension_numbers = #tpu.dot_dimension_numbers<[1], [0], [0], [1], [0, 0, 1, 1], [], []>} : vector<8x32xf32>, vector<32x32xf32>, vector<8x32xf32> -> vector<8x32xf32>
    %644 = arith.addf %643, %41 : vector<8x32xf32>
    %cst_174 = arith.constant 0.000000e+00 : f32
    %645 = vector.broadcast %cst_174 : f32 to vector<8x32xf32>
    %646 = arith.maximumf %644, %645 : vector<8x32xf32>
    %cst_175 = arith.constant dense<0.000000e+00> : vector<8x32xf32>
    %647 = tpu.matmul %646, %42, %cst_175 {dimension_numbers = #tpu.dot_dimension_numbers<[1], [0], [0], [1], [0, 0, 1, 1], [], []>} : vector<8x32xf32>, vector<32x32xf32>, vector<8x32xf32> -> vector<8x32xf32>
    %648 = arith.addf %647, %45 : vector<8x32xf32>
    %cst_176 = arith.constant 0.000000e+00 : f32
    %649 = vector.broadcast %cst_176 : f32 to vector<8x32xf32>
    %650 = arith.maximumf %648, %649 : vector<8x32xf32>
    %cst_177 = arith.constant dense<0.000000e+00> : vector<8x8xf32>
    %651 = tpu.matmul %650, %46, %cst_177 {dimension_numbers = #tpu.dot_dimension_numbers<[1], [0], [0], [1], [0, 0, 1, 1], [], []>} : vector<8x32xf32>, vector<32x8xf32>, vector<8x8xf32> -> vector<8x8xf32>
    %652 = arith.addf %651, %49 : vector<8x8xf32>
    %cst_178 = arith.constant dense<0.000000e+00> : vector<8x96xf32>
    %653 = tpu.matmul %652, %0, %cst_178 {dimension_numbers = #tpu.dot_dimension_numbers<[1], [0], [0], [1], [0, 0, 1, 1], [], []>} : vector<8x8xf32>, vector<8x96xf32>, vector<8x96xf32> -> vector<8x96xf32>
    %cst_179 = arith.constant dense<0.000000e+00> : vector<8x96xf32>
    %654 = tpu.matmul %610, %1, %cst_179 {dimension_numbers = #tpu.dot_dimension_numbers<[1], [0], [0], [1], [0, 0, 1, 1], [], []>} : vector<8x32xf32>, vector<32x96xf32>, vector<8x96xf32> -> vector<8x96xf32>
    %655 = vector.extract_strided_slice %653 {offsets = [0, 0], sizes = [8, 32], strides = [1, 1]} : vector<8x96xf32> to vector<8x32xf32>
    %656 = vector.extract_strided_slice %654 {offsets = [0, 0], sizes = [8, 32], strides = [1, 1]} : vector<8x96xf32> to vector<8x32xf32>
    %657 = arith.addf %655, %656 : vector<8x32xf32>
    %658 = arith.addf %657, %6 : vector<8x32xf32>
    %659 = arith.negf %658 : vector<8x32xf32>
    %660 = math.exp %659 : vector<8x32xf32>
    %cst_180 = arith.constant 1.000000e+00 : f32
    %661 = vector.broadcast %cst_180 : f32 to vector<8x32xf32>
    %662 = arith.addf %661, %660 : vector<8x32xf32>
    %663 = arith.divf %661, %662 : vector<8x32xf32>
    %664 = vector.extract_strided_slice %653 {offsets = [0, 32], sizes = [8, 32], strides = [1, 1]} : vector<8x96xf32> to vector<8x32xf32>
    %665 = vector.extract_strided_slice %654 {offsets = [0, 32], sizes = [8, 32], strides = [1, 1]} : vector<8x96xf32> to vector<8x32xf32>
    %666 = arith.addf %664, %665 : vector<8x32xf32>
    %667 = arith.addf %666, %10 : vector<8x32xf32>
    %668 = arith.negf %667 : vector<8x32xf32>
    %669 = math.exp %668 : vector<8x32xf32>
    %cst_181 = arith.constant 1.000000e+00 : f32
    %670 = vector.broadcast %cst_181 : f32 to vector<8x32xf32>
    %671 = arith.addf %670, %669 : vector<8x32xf32>
    %672 = arith.divf %670, %671 : vector<8x32xf32>
    %673 = vector.extract_strided_slice %653 {offsets = [0, 64], sizes = [8, 32], strides = [1, 1]} : vector<8x96xf32> to vector<8x32xf32>
    %674 = arith.addf %673, %14 : vector<8x32xf32>
    %675 = vector.extract_strided_slice %654 {offsets = [0, 64], sizes = [8, 32], strides = [1, 1]} : vector<8x96xf32> to vector<8x32xf32>
    %676 = arith.addf %675, %18 : vector<8x32xf32>
    %677 = arith.mulf %663, %676 : vector<8x32xf32>
    %678 = arith.addf %674, %677 : vector<8x32xf32>
    %679 = math.tanh %678 : vector<8x32xf32>
    %cst_182 = arith.constant 1.000000e+00 : f32
    %680 = vector.broadcast %cst_182 : f32 to vector<8x32xf32>
    %681 = arith.subf %680, %672 : vector<8x32xf32>
    %682 = arith.mulf %681, %679 : vector<8x32xf32>
    %683 = arith.mulf %672, %610 : vector<8x32xf32>
    %684 = arith.addf %682, %683 : vector<8x32xf32>
    %cst_183 = arith.constant dense<0.000000e+00> : vector<8x96xf32>
    %685 = tpu.matmul %684, %19, %cst_183 {dimension_numbers = #tpu.dot_dimension_numbers<[1], [0], [0], [1], [0, 0, 1, 1], [], []>} : vector<8x32xf32>, vector<32x96xf32>, vector<8x96xf32> -> vector<8x96xf32>
    %cst_184 = arith.constant dense<0.000000e+00> : vector<8x96xf32>
    %686 = tpu.matmul %642, %20, %cst_184 {dimension_numbers = #tpu.dot_dimension_numbers<[1], [0], [0], [1], [0, 0, 1, 1], [], []>} : vector<8x32xf32>, vector<32x96xf32>, vector<8x96xf32> -> vector<8x96xf32>
    %687 = vector.extract_strided_slice %685 {offsets = [0, 0], sizes = [8, 32], strides = [1, 1]} : vector<8x96xf32> to vector<8x32xf32>
    %688 = vector.extract_strided_slice %686 {offsets = [0, 0], sizes = [8, 32], strides = [1, 1]} : vector<8x96xf32> to vector<8x32xf32>
    %689 = arith.addf %687, %688 : vector<8x32xf32>
    %690 = arith.addf %689, %25 : vector<8x32xf32>
    %691 = arith.negf %690 : vector<8x32xf32>
    %692 = math.exp %691 : vector<8x32xf32>
    %cst_185 = arith.constant 1.000000e+00 : f32
    %693 = vector.broadcast %cst_185 : f32 to vector<8x32xf32>
    %694 = arith.addf %693, %692 : vector<8x32xf32>
    %695 = arith.divf %693, %694 : vector<8x32xf32>
    %696 = vector.extract_strided_slice %685 {offsets = [0, 32], sizes = [8, 32], strides = [1, 1]} : vector<8x96xf32> to vector<8x32xf32>
    %697 = vector.extract_strided_slice %686 {offsets = [0, 32], sizes = [8, 32], strides = [1, 1]} : vector<8x96xf32> to vector<8x32xf32>
    %698 = arith.addf %696, %697 : vector<8x32xf32>
    %699 = arith.addf %698, %29 : vector<8x32xf32>
    %700 = arith.negf %699 : vector<8x32xf32>
    %701 = math.exp %700 : vector<8x32xf32>
    %cst_186 = arith.constant 1.000000e+00 : f32
    %702 = vector.broadcast %cst_186 : f32 to vector<8x32xf32>
    %703 = arith.addf %702, %701 : vector<8x32xf32>
    %704 = arith.divf %702, %703 : vector<8x32xf32>
    %705 = vector.extract_strided_slice %685 {offsets = [0, 64], sizes = [8, 32], strides = [1, 1]} : vector<8x96xf32> to vector<8x32xf32>
    %706 = arith.addf %705, %33 : vector<8x32xf32>
    %707 = vector.extract_strided_slice %686 {offsets = [0, 64], sizes = [8, 32], strides = [1, 1]} : vector<8x96xf32> to vector<8x32xf32>
    %708 = arith.addf %707, %37 : vector<8x32xf32>
    %709 = arith.mulf %695, %708 : vector<8x32xf32>
    %710 = arith.addf %706, %709 : vector<8x32xf32>
    %711 = math.tanh %710 : vector<8x32xf32>
    %cst_187 = arith.constant 1.000000e+00 : f32
    %712 = vector.broadcast %cst_187 : f32 to vector<8x32xf32>
    %713 = arith.subf %712, %704 : vector<8x32xf32>
    %714 = arith.mulf %713, %711 : vector<8x32xf32>
    %715 = arith.mulf %704, %642 : vector<8x32xf32>
    %716 = arith.addf %714, %715 : vector<8x32xf32>
    %cst_188 = arith.constant dense<0.000000e+00> : vector<8x32xf32>
    %717 = tpu.matmul %716, %38, %cst_188 {dimension_numbers = #tpu.dot_dimension_numbers<[1], [0], [0], [1], [0, 0, 1, 1], [], []>} : vector<8x32xf32>, vector<32x32xf32>, vector<8x32xf32> -> vector<8x32xf32>
    %718 = arith.addf %717, %41 : vector<8x32xf32>
    %cst_189 = arith.constant 0.000000e+00 : f32
    %719 = vector.broadcast %cst_189 : f32 to vector<8x32xf32>
    %720 = arith.maximumf %718, %719 : vector<8x32xf32>
    %cst_190 = arith.constant dense<0.000000e+00> : vector<8x32xf32>
    %721 = tpu.matmul %720, %42, %cst_190 {dimension_numbers = #tpu.dot_dimension_numbers<[1], [0], [0], [1], [0, 0, 1, 1], [], []>} : vector<8x32xf32>, vector<32x32xf32>, vector<8x32xf32> -> vector<8x32xf32>
    %722 = arith.addf %721, %45 : vector<8x32xf32>
    %cst_191 = arith.constant 0.000000e+00 : f32
    %723 = vector.broadcast %cst_191 : f32 to vector<8x32xf32>
    %724 = arith.maximumf %722, %723 : vector<8x32xf32>
    %cst_192 = arith.constant dense<0.000000e+00> : vector<8x8xf32>
    %725 = tpu.matmul %724, %46, %cst_192 {dimension_numbers = #tpu.dot_dimension_numbers<[1], [0], [0], [1], [0, 0, 1, 1], [], []>} : vector<8x32xf32>, vector<32x8xf32>, vector<8x8xf32> -> vector<8x8xf32>
    %726 = arith.addf %725, %49 : vector<8x8xf32>
    %cst_193 = arith.constant dense<0.000000e+00> : vector<8x96xf32>
    %727 = tpu.matmul %726, %0, %cst_193 {dimension_numbers = #tpu.dot_dimension_numbers<[1], [0], [0], [1], [0, 0, 1, 1], [], []>} : vector<8x8xf32>, vector<8x96xf32>, vector<8x96xf32> -> vector<8x96xf32>
    %cst_194 = arith.constant dense<0.000000e+00> : vector<8x96xf32>
    %728 = tpu.matmul %684, %1, %cst_194 {dimension_numbers = #tpu.dot_dimension_numbers<[1], [0], [0], [1], [0, 0, 1, 1], [], []>} : vector<8x32xf32>, vector<32x96xf32>, vector<8x96xf32> -> vector<8x96xf32>
    %729 = vector.extract_strided_slice %727 {offsets = [0, 0], sizes = [8, 32], strides = [1, 1]} : vector<8x96xf32> to vector<8x32xf32>
    %730 = vector.extract_strided_slice %728 {offsets = [0, 0], sizes = [8, 32], strides = [1, 1]} : vector<8x96xf32> to vector<8x32xf32>
    %731 = arith.addf %729, %730 : vector<8x32xf32>
    %732 = arith.addf %731, %6 : vector<8x32xf32>
    %733 = arith.negf %732 : vector<8x32xf32>
    %734 = math.exp %733 : vector<8x32xf32>
    %cst_195 = arith.constant 1.000000e+00 : f32
    %735 = vector.broadcast %cst_195 : f32 to vector<8x32xf32>
    %736 = arith.addf %735, %734 : vector<8x32xf32>
    %737 = arith.divf %735, %736 : vector<8x32xf32>
    %738 = vector.extract_strided_slice %727 {offsets = [0, 32], sizes = [8, 32], strides = [1, 1]} : vector<8x96xf32> to vector<8x32xf32>
    %739 = vector.extract_strided_slice %728 {offsets = [0, 32], sizes = [8, 32], strides = [1, 1]} : vector<8x96xf32> to vector<8x32xf32>
    %740 = arith.addf %738, %739 : vector<8x32xf32>
    %741 = arith.addf %740, %10 : vector<8x32xf32>
    %742 = arith.negf %741 : vector<8x32xf32>
    %743 = math.exp %742 : vector<8x32xf32>
    %cst_196 = arith.constant 1.000000e+00 : f32
    %744 = vector.broadcast %cst_196 : f32 to vector<8x32xf32>
    %745 = arith.addf %744, %743 : vector<8x32xf32>
    %746 = arith.divf %744, %745 : vector<8x32xf32>
    %747 = vector.extract_strided_slice %727 {offsets = [0, 64], sizes = [8, 32], strides = [1, 1]} : vector<8x96xf32> to vector<8x32xf32>
    %748 = arith.addf %747, %14 : vector<8x32xf32>
    %749 = vector.extract_strided_slice %728 {offsets = [0, 64], sizes = [8, 32], strides = [1, 1]} : vector<8x96xf32> to vector<8x32xf32>
    %750 = arith.addf %749, %18 : vector<8x32xf32>
    %751 = arith.mulf %737, %750 : vector<8x32xf32>
    %752 = arith.addf %748, %751 : vector<8x32xf32>
    %753 = math.tanh %752 : vector<8x32xf32>
    %cst_197 = arith.constant 1.000000e+00 : f32
    %754 = vector.broadcast %cst_197 : f32 to vector<8x32xf32>
    %755 = arith.subf %754, %746 : vector<8x32xf32>
    %756 = arith.mulf %755, %753 : vector<8x32xf32>
    %757 = arith.mulf %746, %684 : vector<8x32xf32>
    %758 = arith.addf %756, %757 : vector<8x32xf32>
    %cst_198 = arith.constant dense<0.000000e+00> : vector<8x96xf32>
    %759 = tpu.matmul %758, %19, %cst_198 {dimension_numbers = #tpu.dot_dimension_numbers<[1], [0], [0], [1], [0, 0, 1, 1], [], []>} : vector<8x32xf32>, vector<32x96xf32>, vector<8x96xf32> -> vector<8x96xf32>
    %cst_199 = arith.constant dense<0.000000e+00> : vector<8x96xf32>
    %760 = tpu.matmul %716, %20, %cst_199 {dimension_numbers = #tpu.dot_dimension_numbers<[1], [0], [0], [1], [0, 0, 1, 1], [], []>} : vector<8x32xf32>, vector<32x96xf32>, vector<8x96xf32> -> vector<8x96xf32>
    %761 = vector.extract_strided_slice %759 {offsets = [0, 0], sizes = [8, 32], strides = [1, 1]} : vector<8x96xf32> to vector<8x32xf32>
    %762 = vector.extract_strided_slice %760 {offsets = [0, 0], sizes = [8, 32], strides = [1, 1]} : vector<8x96xf32> to vector<8x32xf32>
    %763 = arith.addf %761, %762 : vector<8x32xf32>
    %764 = arith.addf %763, %25 : vector<8x32xf32>
    %765 = arith.negf %764 : vector<8x32xf32>
    %766 = math.exp %765 : vector<8x32xf32>
    %cst_200 = arith.constant 1.000000e+00 : f32
    %767 = vector.broadcast %cst_200 : f32 to vector<8x32xf32>
    %768 = arith.addf %767, %766 : vector<8x32xf32>
    %769 = arith.divf %767, %768 : vector<8x32xf32>
    %770 = vector.extract_strided_slice %759 {offsets = [0, 32], sizes = [8, 32], strides = [1, 1]} : vector<8x96xf32> to vector<8x32xf32>
    %771 = vector.extract_strided_slice %760 {offsets = [0, 32], sizes = [8, 32], strides = [1, 1]} : vector<8x96xf32> to vector<8x32xf32>
    %772 = arith.addf %770, %771 : vector<8x32xf32>
    %773 = arith.addf %772, %29 : vector<8x32xf32>
    %774 = arith.negf %773 : vector<8x32xf32>
    %775 = math.exp %774 : vector<8x32xf32>
    %cst_201 = arith.constant 1.000000e+00 : f32
    %776 = vector.broadcast %cst_201 : f32 to vector<8x32xf32>
    %777 = arith.addf %776, %775 : vector<8x32xf32>
    %778 = arith.divf %776, %777 : vector<8x32xf32>
    %779 = vector.extract_strided_slice %759 {offsets = [0, 64], sizes = [8, 32], strides = [1, 1]} : vector<8x96xf32> to vector<8x32xf32>
    %780 = arith.addf %779, %33 : vector<8x32xf32>
    %781 = vector.extract_strided_slice %760 {offsets = [0, 64], sizes = [8, 32], strides = [1, 1]} : vector<8x96xf32> to vector<8x32xf32>
    %782 = arith.addf %781, %37 : vector<8x32xf32>
    %783 = arith.mulf %769, %782 : vector<8x32xf32>
    %784 = arith.addf %780, %783 : vector<8x32xf32>
    %785 = math.tanh %784 : vector<8x32xf32>
    %cst_202 = arith.constant 1.000000e+00 : f32
    %786 = vector.broadcast %cst_202 : f32 to vector<8x32xf32>
    %787 = arith.subf %786, %778 : vector<8x32xf32>
    %788 = arith.mulf %787, %785 : vector<8x32xf32>
    %789 = arith.mulf %778, %716 : vector<8x32xf32>
    %790 = arith.addf %788, %789 : vector<8x32xf32>
    %cst_203 = arith.constant dense<0.000000e+00> : vector<8x32xf32>
    %791 = tpu.matmul %790, %38, %cst_203 {dimension_numbers = #tpu.dot_dimension_numbers<[1], [0], [0], [1], [0, 0, 1, 1], [], []>} : vector<8x32xf32>, vector<32x32xf32>, vector<8x32xf32> -> vector<8x32xf32>
    %792 = arith.addf %791, %41 : vector<8x32xf32>
    %cst_204 = arith.constant 0.000000e+00 : f32
    %793 = vector.broadcast %cst_204 : f32 to vector<8x32xf32>
    %794 = arith.maximumf %792, %793 : vector<8x32xf32>
    %cst_205 = arith.constant dense<0.000000e+00> : vector<8x32xf32>
    %795 = tpu.matmul %794, %42, %cst_205 {dimension_numbers = #tpu.dot_dimension_numbers<[1], [0], [0], [1], [0, 0, 1, 1], [], []>} : vector<8x32xf32>, vector<32x32xf32>, vector<8x32xf32> -> vector<8x32xf32>
    %796 = arith.addf %795, %45 : vector<8x32xf32>
    %cst_206 = arith.constant 0.000000e+00 : f32
    %797 = vector.broadcast %cst_206 : f32 to vector<8x32xf32>
    %798 = arith.maximumf %796, %797 : vector<8x32xf32>
    %cst_207 = arith.constant dense<0.000000e+00> : vector<8x8xf32>
    %799 = tpu.matmul %798, %46, %cst_207 {dimension_numbers = #tpu.dot_dimension_numbers<[1], [0], [0], [1], [0, 0, 1, 1], [], []>} : vector<8x32xf32>, vector<32x8xf32>, vector<8x8xf32> -> vector<8x8xf32>
    %800 = arith.addf %799, %49 : vector<8x8xf32>
    %801 = tpu.concatenate %578, %652, %726, %800 in 1 : vector<8x8xf32>, vector<8x8xf32>, vector<8x8xf32>, vector<8x8xf32> -> vector<8x32xf32>
    %802 = arith.index_cast %c2_i32 : i32 to index
    %c0_208 = arith.constant 0 : index
    %c0_209 = arith.constant 0 : index
    %803 = vector.load %arg22[%802, %c0_208, %c0_209] : memref<8x8x32xf32, #tpu.memory_space<vmem>>, vector<1x8x32xf32>
    %804 = vector.shape_cast %803 : vector<1x8x32xf32> to vector<8x32xf32>
    %805 = vector.shape_cast %801 : vector<8x32xf32> to vector<1x8x32xf32>
    tpu.vector_store %arg22[%802, %c0_208, %c0_209], %805 {strides = array<i32>} : memref<8x8x32xf32, #tpu.memory_space<vmem>>, vector<1x8x32xf32>,
    %c3_i32 = arith.constant 3 : i32
    %806 = arith.index_cast %c3_i32 : i32 to index
    %c0_210 = arith.constant 0 : index
    %c0_211 = arith.constant 0 : index
    %807 = vector.load %arg2[%806, %c0_210, %c0_211] : memref<8x8x8xf32, #tpu.memory_space<vmem>>, vector<1x8x8xf32>
    %808 = vector.shape_cast %807 : vector<1x8x8xf32> to vector<8x8xf32>
    %809 = vector.extract_strided_slice %808 {offsets = [0, 0], sizes = [8, 4], strides = [1, 1]} : vector<8x8xf32> to vector<8x4xf32>
    %cst_212 = arith.constant dense<0.000000e+00> : vector<8x32xf32>
    %810 = tpu.matmul %809, %50, %cst_212 {dimension_numbers = #tpu.dot_dimension_numbers<[1], [0], [0], [1], [0, 0, 1, 1], [], []>} : vector<8x4xf32>, vector<4x32xf32>, vector<8x32xf32> -> vector<8x32xf32>
    %cst_213 = arith.constant dense<0.000000e+00> : vector<8x32xf32>
    %811 = tpu.matmul %652, %51, %cst_213 {dimension_numbers = #tpu.dot_dimension_numbers<[1], [0], [0], [1], [0, 0, 1, 1], [], []>} : vector<8x8xf32>, vector<8x32xf32>, vector<8x32xf32> -> vector<8x32xf32>
    %812 = arith.addf %810, %811 : vector<8x32xf32>
    %813 = arith.addf %812, %54 : vector<8x32xf32>
    %cst_214 = arith.constant 0.000000e+00 : f32
    %814 = vector.broadcast %cst_214 : f32 to vector<8x32xf32>
    %815 = arith.maximumf %813, %814 : vector<8x32xf32>
    %cst_215 = arith.constant dense<0.000000e+00> : vector<8x32xf32>
    %816 = tpu.matmul %815, %55, %cst_215 {dimension_numbers = #tpu.dot_dimension_numbers<[1], [0], [0], [1], [0, 0, 1, 1], [], []>} : vector<8x32xf32>, vector<32x32xf32>, vector<8x32xf32> -> vector<8x32xf32>
    %817 = arith.addf %816, %58 : vector<8x32xf32>
    %cst_216 = arith.constant 0.000000e+00 : f32
    %818 = vector.broadcast %cst_216 : f32 to vector<8x32xf32>
    %819 = arith.maximumf %817, %818 : vector<8x32xf32>
    %cst_217 = arith.constant dense<0.000000e+00> : vector<8x4xf32>
    %820 = tpu.matmul %819, %59, %cst_217 {dimension_numbers = #tpu.dot_dimension_numbers<[1], [0], [0], [1], [0, 0, 1, 1], [], []>} : vector<8x32xf32>, vector<32x4xf32>, vector<8x4xf32> -> vector<8x4xf32>
    %821 = arith.addf %820, %62 : vector<8x4xf32>
    %822 = vector.extract_strided_slice %808 {offsets = [0, 4], sizes = [8, 4], strides = [1, 1]} : vector<8x8xf32> to vector<8x4xf32>
    %823 = tpu.concatenate %821, %822 in 1 : vector<8x4xf32>, vector<8x4xf32> -> vector<8x8xf32>
    %cst_218 = arith.constant dense<0.000000e+00> : vector<8x96xf32>
    %824 = tpu.matmul %823, %0, %cst_218 {dimension_numbers = #tpu.dot_dimension_numbers<[1], [0], [0], [1], [0, 0, 1, 1], [], []>} : vector<8x8xf32>, vector<8x96xf32>, vector<8x96xf32> -> vector<8x96xf32>
    %cst_219 = arith.constant dense<0.000000e+00> : vector<8x96xf32>
    %825 = tpu.matmul %610, %1, %cst_219 {dimension_numbers = #tpu.dot_dimension_numbers<[1], [0], [0], [1], [0, 0, 1, 1], [], []>} : vector<8x32xf32>, vector<32x96xf32>, vector<8x96xf32> -> vector<8x96xf32>
    %826 = vector.extract_strided_slice %824 {offsets = [0, 0], sizes = [8, 32], strides = [1, 1]} : vector<8x96xf32> to vector<8x32xf32>
    %827 = vector.extract_strided_slice %825 {offsets = [0, 0], sizes = [8, 32], strides = [1, 1]} : vector<8x96xf32> to vector<8x32xf32>
    %828 = arith.addf %826, %827 : vector<8x32xf32>
    %829 = arith.addf %828, %6 : vector<8x32xf32>
    %830 = arith.negf %829 : vector<8x32xf32>
    %831 = math.exp %830 : vector<8x32xf32>
    %cst_220 = arith.constant 1.000000e+00 : f32
    %832 = vector.broadcast %cst_220 : f32 to vector<8x32xf32>
    %833 = arith.addf %832, %831 : vector<8x32xf32>
    %834 = arith.divf %832, %833 : vector<8x32xf32>
    %835 = vector.extract_strided_slice %824 {offsets = [0, 32], sizes = [8, 32], strides = [1, 1]} : vector<8x96xf32> to vector<8x32xf32>
    %836 = vector.extract_strided_slice %825 {offsets = [0, 32], sizes = [8, 32], strides = [1, 1]} : vector<8x96xf32> to vector<8x32xf32>
    %837 = arith.addf %835, %836 : vector<8x32xf32>
    %838 = arith.addf %837, %10 : vector<8x32xf32>
    %839 = arith.negf %838 : vector<8x32xf32>
    %840 = math.exp %839 : vector<8x32xf32>
    %cst_221 = arith.constant 1.000000e+00 : f32
    %841 = vector.broadcast %cst_221 : f32 to vector<8x32xf32>
    %842 = arith.addf %841, %840 : vector<8x32xf32>
    %843 = arith.divf %841, %842 : vector<8x32xf32>
    %844 = vector.extract_strided_slice %824 {offsets = [0, 64], sizes = [8, 32], strides = [1, 1]} : vector<8x96xf32> to vector<8x32xf32>
    %845 = arith.addf %844, %14 : vector<8x32xf32>
    %846 = vector.extract_strided_slice %825 {offsets = [0, 64], sizes = [8, 32], strides = [1, 1]} : vector<8x96xf32> to vector<8x32xf32>
    %847 = arith.addf %846, %18 : vector<8x32xf32>
    %848 = arith.mulf %834, %847 : vector<8x32xf32>
    %849 = arith.addf %845, %848 : vector<8x32xf32>
    %850 = math.tanh %849 : vector<8x32xf32>
    %cst_222 = arith.constant 1.000000e+00 : f32
    %851 = vector.broadcast %cst_222 : f32 to vector<8x32xf32>
    %852 = arith.subf %851, %843 : vector<8x32xf32>
    %853 = arith.mulf %852, %850 : vector<8x32xf32>
    %854 = arith.mulf %843, %610 : vector<8x32xf32>
    %855 = arith.addf %853, %854 : vector<8x32xf32>
    %cst_223 = arith.constant dense<0.000000e+00> : vector<8x96xf32>
    %856 = tpu.matmul %855, %19, %cst_223 {dimension_numbers = #tpu.dot_dimension_numbers<[1], [0], [0], [1], [0, 0, 1, 1], [], []>} : vector<8x32xf32>, vector<32x96xf32>, vector<8x96xf32> -> vector<8x96xf32>
    %cst_224 = arith.constant dense<0.000000e+00> : vector<8x96xf32>
    %857 = tpu.matmul %642, %20, %cst_224 {dimension_numbers = #tpu.dot_dimension_numbers<[1], [0], [0], [1], [0, 0, 1, 1], [], []>} : vector<8x32xf32>, vector<32x96xf32>, vector<8x96xf32> -> vector<8x96xf32>
    %858 = vector.extract_strided_slice %856 {offsets = [0, 0], sizes = [8, 32], strides = [1, 1]} : vector<8x96xf32> to vector<8x32xf32>
    %859 = vector.extract_strided_slice %857 {offsets = [0, 0], sizes = [8, 32], strides = [1, 1]} : vector<8x96xf32> to vector<8x32xf32>
    %860 = arith.addf %858, %859 : vector<8x32xf32>
    %861 = arith.addf %860, %25 : vector<8x32xf32>
    %862 = arith.negf %861 : vector<8x32xf32>
    %863 = math.exp %862 : vector<8x32xf32>
    %cst_225 = arith.constant 1.000000e+00 : f32
    %864 = vector.broadcast %cst_225 : f32 to vector<8x32xf32>
    %865 = arith.addf %864, %863 : vector<8x32xf32>
    %866 = arith.divf %864, %865 : vector<8x32xf32>
    %867 = vector.extract_strided_slice %856 {offsets = [0, 32], sizes = [8, 32], strides = [1, 1]} : vector<8x96xf32> to vector<8x32xf32>
    %868 = vector.extract_strided_slice %857 {offsets = [0, 32], sizes = [8, 32], strides = [1, 1]} : vector<8x96xf32> to vector<8x32xf32>
    %869 = arith.addf %867, %868 : vector<8x32xf32>
    %870 = arith.addf %869, %29 : vector<8x32xf32>
    %871 = arith.negf %870 : vector<8x32xf32>
    %872 = math.exp %871 : vector<8x32xf32>
    %cst_226 = arith.constant 1.000000e+00 : f32
    %873 = vector.broadcast %cst_226 : f32 to vector<8x32xf32>
    %874 = arith.addf %873, %872 : vector<8x32xf32>
    %875 = arith.divf %873, %874 : vector<8x32xf32>
    %876 = vector.extract_strided_slice %856 {offsets = [0, 64], sizes = [8, 32], strides = [1, 1]} : vector<8x96xf32> to vector<8x32xf32>
    %877 = arith.addf %876, %33 : vector<8x32xf32>
    %878 = vector.extract_strided_slice %857 {offsets = [0, 64], sizes = [8, 32], strides = [1, 1]} : vector<8x96xf32> to vector<8x32xf32>
    %879 = arith.addf %878, %37 : vector<8x32xf32>
    %880 = arith.mulf %866, %879 : vector<8x32xf32>
    %881 = arith.addf %877, %880 : vector<8x32xf32>
    %882 = math.tanh %881 : vector<8x32xf32>
    %cst_227 = arith.constant 1.000000e+00 : f32
    %883 = vector.broadcast %cst_227 : f32 to vector<8x32xf32>
    %884 = arith.subf %883, %875 : vector<8x32xf32>
    %885 = arith.mulf %884, %882 : vector<8x32xf32>
    %886 = arith.mulf %875, %642 : vector<8x32xf32>
    %887 = arith.addf %885, %886 : vector<8x32xf32>
    %cst_228 = arith.constant dense<0.000000e+00> : vector<8x32xf32>
    %888 = tpu.matmul %887, %38, %cst_228 {dimension_numbers = #tpu.dot_dimension_numbers<[1], [0], [0], [1], [0, 0, 1, 1], [], []>} : vector<8x32xf32>, vector<32x32xf32>, vector<8x32xf32> -> vector<8x32xf32>
    %889 = arith.addf %888, %41 : vector<8x32xf32>
    %cst_229 = arith.constant 0.000000e+00 : f32
    %890 = vector.broadcast %cst_229 : f32 to vector<8x32xf32>
    %891 = arith.maximumf %889, %890 : vector<8x32xf32>
    %cst_230 = arith.constant dense<0.000000e+00> : vector<8x32xf32>
    %892 = tpu.matmul %891, %42, %cst_230 {dimension_numbers = #tpu.dot_dimension_numbers<[1], [0], [0], [1], [0, 0, 1, 1], [], []>} : vector<8x32xf32>, vector<32x32xf32>, vector<8x32xf32> -> vector<8x32xf32>
    %893 = arith.addf %892, %45 : vector<8x32xf32>
    %cst_231 = arith.constant 0.000000e+00 : f32
    %894 = vector.broadcast %cst_231 : f32 to vector<8x32xf32>
    %895 = arith.maximumf %893, %894 : vector<8x32xf32>
    %cst_232 = arith.constant dense<0.000000e+00> : vector<8x8xf32>
    %896 = tpu.matmul %895, %46, %cst_232 {dimension_numbers = #tpu.dot_dimension_numbers<[1], [0], [0], [1], [0, 0, 1, 1], [], []>} : vector<8x32xf32>, vector<32x8xf32>, vector<8x8xf32> -> vector<8x8xf32>
    %897 = arith.addf %896, %49 : vector<8x8xf32>
    %cst_233 = arith.constant dense<0.000000e+00> : vector<8x96xf32>
    %898 = tpu.matmul %897, %0, %cst_233 {dimension_numbers = #tpu.dot_dimension_numbers<[1], [0], [0], [1], [0, 0, 1, 1], [], []>} : vector<8x8xf32>, vector<8x96xf32>, vector<8x96xf32> -> vector<8x96xf32>
    %cst_234 = arith.constant dense<0.000000e+00> : vector<8x96xf32>
    %899 = tpu.matmul %855, %1, %cst_234 {dimension_numbers = #tpu.dot_dimension_numbers<[1], [0], [0], [1], [0, 0, 1, 1], [], []>} : vector<8x32xf32>, vector<32x96xf32>, vector<8x96xf32> -> vector<8x96xf32>
    %900 = vector.extract_strided_slice %898 {offsets = [0, 0], sizes = [8, 32], strides = [1, 1]} : vector<8x96xf32> to vector<8x32xf32>
    %901 = vector.extract_strided_slice %899 {offsets = [0, 0], sizes = [8, 32], strides = [1, 1]} : vector<8x96xf32> to vector<8x32xf32>
    %902 = arith.addf %900, %901 : vector<8x32xf32>
    %903 = arith.addf %902, %6 : vector<8x32xf32>
    %904 = arith.negf %903 : vector<8x32xf32>
    %905 = math.exp %904 : vector<8x32xf32>
    %cst_235 = arith.constant 1.000000e+00 : f32
    %906 = vector.broadcast %cst_235 : f32 to vector<8x32xf32>
    %907 = arith.addf %906, %905 : vector<8x32xf32>
    %908 = arith.divf %906, %907 : vector<8x32xf32>
    %909 = vector.extract_strided_slice %898 {offsets = [0, 32], sizes = [8, 32], strides = [1, 1]} : vector<8x96xf32> to vector<8x32xf32>
    %910 = vector.extract_strided_slice %899 {offsets = [0, 32], sizes = [8, 32], strides = [1, 1]} : vector<8x96xf32> to vector<8x32xf32>
    %911 = arith.addf %909, %910 : vector<8x32xf32>
    %912 = arith.addf %911, %10 : vector<8x32xf32>
    %913 = arith.negf %912 : vector<8x32xf32>
    %914 = math.exp %913 : vector<8x32xf32>
    %cst_236 = arith.constant 1.000000e+00 : f32
    %915 = vector.broadcast %cst_236 : f32 to vector<8x32xf32>
    %916 = arith.addf %915, %914 : vector<8x32xf32>
    %917 = arith.divf %915, %916 : vector<8x32xf32>
    %918 = vector.extract_strided_slice %898 {offsets = [0, 64], sizes = [8, 32], strides = [1, 1]} : vector<8x96xf32> to vector<8x32xf32>
    %919 = arith.addf %918, %14 : vector<8x32xf32>
    %920 = vector.extract_strided_slice %899 {offsets = [0, 64], sizes = [8, 32], strides = [1, 1]} : vector<8x96xf32> to vector<8x32xf32>
    %921 = arith.addf %920, %18 : vector<8x32xf32>
    %922 = arith.mulf %908, %921 : vector<8x32xf32>
    %923 = arith.addf %919, %922 : vector<8x32xf32>
    %924 = math.tanh %923 : vector<8x32xf32>
    %cst_237 = arith.constant 1.000000e+00 : f32
    %925 = vector.broadcast %cst_237 : f32 to vector<8x32xf32>
    %926 = arith.subf %925, %917 : vector<8x32xf32>
    %927 = arith.mulf %926, %924 : vector<8x32xf32>
    %928 = arith.mulf %917, %855 : vector<8x32xf32>
    %929 = arith.addf %927, %928 : vector<8x32xf32>
    %cst_238 = arith.constant dense<0.000000e+00> : vector<8x96xf32>
    %930 = tpu.matmul %929, %19, %cst_238 {dimension_numbers = #tpu.dot_dimension_numbers<[1], [0], [0], [1], [0, 0, 1, 1], [], []>} : vector<8x32xf32>, vector<32x96xf32>, vector<8x96xf32> -> vector<8x96xf32>
    %cst_239 = arith.constant dense<0.000000e+00> : vector<8x96xf32>
    %931 = tpu.matmul %887, %20, %cst_239 {dimension_numbers = #tpu.dot_dimension_numbers<[1], [0], [0], [1], [0, 0, 1, 1], [], []>} : vector<8x32xf32>, vector<32x96xf32>, vector<8x96xf32> -> vector<8x96xf32>
    %932 = vector.extract_strided_slice %930 {offsets = [0, 0], sizes = [8, 32], strides = [1, 1]} : vector<8x96xf32> to vector<8x32xf32>
    %933 = vector.extract_strided_slice %931 {offsets = [0, 0], sizes = [8, 32], strides = [1, 1]} : vector<8x96xf32> to vector<8x32xf32>
    %934 = arith.addf %932, %933 : vector<8x32xf32>
    %935 = arith.addf %934, %25 : vector<8x32xf32>
    %936 = arith.negf %935 : vector<8x32xf32>
    %937 = math.exp %936 : vector<8x32xf32>
    %cst_240 = arith.constant 1.000000e+00 : f32
    %938 = vector.broadcast %cst_240 : f32 to vector<8x32xf32>
    %939 = arith.addf %938, %937 : vector<8x32xf32>
    %940 = arith.divf %938, %939 : vector<8x32xf32>
    %941 = vector.extract_strided_slice %930 {offsets = [0, 32], sizes = [8, 32], strides = [1, 1]} : vector<8x96xf32> to vector<8x32xf32>
    %942 = vector.extract_strided_slice %931 {offsets = [0, 32], sizes = [8, 32], strides = [1, 1]} : vector<8x96xf32> to vector<8x32xf32>
    %943 = arith.addf %941, %942 : vector<8x32xf32>
    %944 = arith.addf %943, %29 : vector<8x32xf32>
    %945 = arith.negf %944 : vector<8x32xf32>
    %946 = math.exp %945 : vector<8x32xf32>
    %cst_241 = arith.constant 1.000000e+00 : f32
    %947 = vector.broadcast %cst_241 : f32 to vector<8x32xf32>
    %948 = arith.addf %947, %946 : vector<8x32xf32>
    %949 = arith.divf %947, %948 : vector<8x32xf32>
    %950 = vector.extract_strided_slice %930 {offsets = [0, 64], sizes = [8, 32], strides = [1, 1]} : vector<8x96xf32> to vector<8x32xf32>
    %951 = arith.addf %950, %33 : vector<8x32xf32>
    %952 = vector.extract_strided_slice %931 {offsets = [0, 64], sizes = [8, 32], strides = [1, 1]} : vector<8x96xf32> to vector<8x32xf32>
    %953 = arith.addf %952, %37 : vector<8x32xf32>
    %954 = arith.mulf %940, %953 : vector<8x32xf32>
    %955 = arith.addf %951, %954 : vector<8x32xf32>
    %956 = math.tanh %955 : vector<8x32xf32>
    %cst_242 = arith.constant 1.000000e+00 : f32
    %957 = vector.broadcast %cst_242 : f32 to vector<8x32xf32>
    %958 = arith.subf %957, %949 : vector<8x32xf32>
    %959 = arith.mulf %958, %956 : vector<8x32xf32>
    %960 = arith.mulf %949, %887 : vector<8x32xf32>
    %961 = arith.addf %959, %960 : vector<8x32xf32>
    %cst_243 = arith.constant dense<0.000000e+00> : vector<8x32xf32>
    %962 = tpu.matmul %961, %38, %cst_243 {dimension_numbers = #tpu.dot_dimension_numbers<[1], [0], [0], [1], [0, 0, 1, 1], [], []>} : vector<8x32xf32>, vector<32x32xf32>, vector<8x32xf32> -> vector<8x32xf32>
    %963 = arith.addf %962, %41 : vector<8x32xf32>
    %cst_244 = arith.constant 0.000000e+00 : f32
    %964 = vector.broadcast %cst_244 : f32 to vector<8x32xf32>
    %965 = arith.maximumf %963, %964 : vector<8x32xf32>
    %cst_245 = arith.constant dense<0.000000e+00> : vector<8x32xf32>
    %966 = tpu.matmul %965, %42, %cst_245 {dimension_numbers = #tpu.dot_dimension_numbers<[1], [0], [0], [1], [0, 0, 1, 1], [], []>} : vector<8x32xf32>, vector<32x32xf32>, vector<8x32xf32> -> vector<8x32xf32>
    %967 = arith.addf %966, %45 : vector<8x32xf32>
    %cst_246 = arith.constant 0.000000e+00 : f32
    %968 = vector.broadcast %cst_246 : f32 to vector<8x32xf32>
    %969 = arith.maximumf %967, %968 : vector<8x32xf32>
    %cst_247 = arith.constant dense<0.000000e+00> : vector<8x8xf32>
    %970 = tpu.matmul %969, %46, %cst_247 {dimension_numbers = #tpu.dot_dimension_numbers<[1], [0], [0], [1], [0, 0, 1, 1], [], []>} : vector<8x32xf32>, vector<32x8xf32>, vector<8x8xf32> -> vector<8x8xf32>
    %971 = arith.addf %970, %49 : vector<8x8xf32>
    %cst_248 = arith.constant dense<0.000000e+00> : vector<8x96xf32>
    %972 = tpu.matmul %971, %0, %cst_248 {dimension_numbers = #tpu.dot_dimension_numbers<[1], [0], [0], [1], [0, 0, 1, 1], [], []>} : vector<8x8xf32>, vector<8x96xf32>, vector<8x96xf32> -> vector<8x96xf32>
    %cst_249 = arith.constant dense<0.000000e+00> : vector<8x96xf32>
    %973 = tpu.matmul %929, %1, %cst_249 {dimension_numbers = #tpu.dot_dimension_numbers<[1], [0], [0], [1], [0, 0, 1, 1], [], []>} : vector<8x32xf32>, vector<32x96xf32>, vector<8x96xf32> -> vector<8x96xf32>
    %974 = vector.extract_strided_slice %972 {offsets = [0, 0], sizes = [8, 32], strides = [1, 1]} : vector<8x96xf32> to vector<8x32xf32>
    %975 = vector.extract_strided_slice %973 {offsets = [0, 0], sizes = [8, 32], strides = [1, 1]} : vector<8x96xf32> to vector<8x32xf32>
    %976 = arith.addf %974, %975 : vector<8x32xf32>
    %977 = arith.addf %976, %6 : vector<8x32xf32>
    %978 = arith.negf %977 : vector<8x32xf32>
    %979 = math.exp %978 : vector<8x32xf32>
    %cst_250 = arith.constant 1.000000e+00 : f32
    %980 = vector.broadcast %cst_250 : f32 to vector<8x32xf32>
    %981 = arith.addf %980, %979 : vector<8x32xf32>
    %982 = arith.divf %980, %981 : vector<8x32xf32>
    %983 = vector.extract_strided_slice %972 {offsets = [0, 32], sizes = [8, 32], strides = [1, 1]} : vector<8x96xf32> to vector<8x32xf32>
    %984 = vector.extract_strided_slice %973 {offsets = [0, 32], sizes = [8, 32], strides = [1, 1]} : vector<8x96xf32> to vector<8x32xf32>
    %985 = arith.addf %983, %984 : vector<8x32xf32>
    %986 = arith.addf %985, %10 : vector<8x32xf32>
    %987 = arith.negf %986 : vector<8x32xf32>
    %988 = math.exp %987 : vector<8x32xf32>
    %cst_251 = arith.constant 1.000000e+00 : f32
    %989 = vector.broadcast %cst_251 : f32 to vector<8x32xf32>
    %990 = arith.addf %989, %988 : vector<8x32xf32>
    %991 = arith.divf %989, %990 : vector<8x32xf32>
    %992 = vector.extract_strided_slice %972 {offsets = [0, 64], sizes = [8, 32], strides = [1, 1]} : vector<8x96xf32> to vector<8x32xf32>
    %993 = arith.addf %992, %14 : vector<8x32xf32>
    %994 = vector.extract_strided_slice %973 {offsets = [0, 64], sizes = [8, 32], strides = [1, 1]} : vector<8x96xf32> to vector<8x32xf32>
    %995 = arith.addf %994, %18 : vector<8x32xf32>
    %996 = arith.mulf %982, %995 : vector<8x32xf32>
    %997 = arith.addf %993, %996 : vector<8x32xf32>
    %998 = math.tanh %997 : vector<8x32xf32>
    %cst_252 = arith.constant 1.000000e+00 : f32
    %999 = vector.broadcast %cst_252 : f32 to vector<8x32xf32>
    %1000 = arith.subf %999, %991 : vector<8x32xf32>
    %1001 = arith.mulf %1000, %998 : vector<8x32xf32>
    %1002 = arith.mulf %991, %929 : vector<8x32xf32>
    %1003 = arith.addf %1001, %1002 : vector<8x32xf32>
    %cst_253 = arith.constant dense<0.000000e+00> : vector<8x96xf32>
    %1004 = tpu.matmul %1003, %19, %cst_253 {dimension_numbers = #tpu.dot_dimension_numbers<[1], [0], [0], [1], [0, 0, 1, 1], [], []>} : vector<8x32xf32>, vector<32x96xf32>, vector<8x96xf32> -> vector<8x96xf32>
    %cst_254 = arith.constant dense<0.000000e+00> : vector<8x96xf32>
    %1005 = tpu.matmul %961, %20, %cst_254 {dimension_numbers = #tpu.dot_dimension_numbers<[1], [0], [0], [1], [0, 0, 1, 1], [], []>} : vector<8x32xf32>, vector<32x96xf32>, vector<8x96xf32> -> vector<8x96xf32>
    %1006 = vector.extract_strided_slice %1004 {offsets = [0, 0], sizes = [8, 32], strides = [1, 1]} : vector<8x96xf32> to vector<8x32xf32>
    %1007 = vector.extract_strided_slice %1005 {offsets = [0, 0], sizes = [8, 32], strides = [1, 1]} : vector<8x96xf32> to vector<8x32xf32>
    %1008 = arith.addf %1006, %1007 : vector<8x32xf32>
    %1009 = arith.addf %1008, %25 : vector<8x32xf32>
    %1010 = arith.negf %1009 : vector<8x32xf32>
    %1011 = math.exp %1010 : vector<8x32xf32>
    %cst_255 = arith.constant 1.000000e+00 : f32
    %1012 = vector.broadcast %cst_255 : f32 to vector<8x32xf32>
    %1013 = arith.addf %1012, %1011 : vector<8x32xf32>
    %1014 = arith.divf %1012, %1013 : vector<8x32xf32>
    %1015 = vector.extract_strided_slice %1004 {offsets = [0, 32], sizes = [8, 32], strides = [1, 1]} : vector<8x96xf32> to vector<8x32xf32>
    %1016 = vector.extract_strided_slice %1005 {offsets = [0, 32], sizes = [8, 32], strides = [1, 1]} : vector<8x96xf32> to vector<8x32xf32>
    %1017 = arith.addf %1015, %1016 : vector<8x32xf32>
    %1018 = arith.addf %1017, %29 : vector<8x32xf32>
    %1019 = arith.negf %1018 : vector<8x32xf32>
    %1020 = math.exp %1019 : vector<8x32xf32>
    %cst_256 = arith.constant 1.000000e+00 : f32
    %1021 = vector.broadcast %cst_256 : f32 to vector<8x32xf32>
    %1022 = arith.addf %1021, %1020 : vector<8x32xf32>
    %1023 = arith.divf %1021, %1022 : vector<8x32xf32>
    %1024 = vector.extract_strided_slice %1004 {offsets = [0, 64], sizes = [8, 32], strides = [1, 1]} : vector<8x96xf32> to vector<8x32xf32>
    %1025 = arith.addf %1024, %33 : vector<8x32xf32>
    %1026 = vector.extract_strided_slice %1005 {offsets = [0, 64], sizes = [8, 32], strides = [1, 1]} : vector<8x96xf32> to vector<8x32xf32>
    %1027 = arith.addf %1026, %37 : vector<8x32xf32>
    %1028 = arith.mulf %1014, %1027 : vector<8x32xf32>
    %1029 = arith.addf %1025, %1028 : vector<8x32xf32>
    %1030 = math.tanh %1029 : vector<8x32xf32>
    %cst_257 = arith.constant 1.000000e+00 : f32
    %1031 = vector.broadcast %cst_257 : f32 to vector<8x32xf32>
    %1032 = arith.subf %1031, %1023 : vector<8x32xf32>
    %1033 = arith.mulf %1032, %1030 : vector<8x32xf32>
    %1034 = arith.mulf %1023, %961 : vector<8x32xf32>
    %1035 = arith.addf %1033, %1034 : vector<8x32xf32>
    %cst_258 = arith.constant dense<0.000000e+00> : vector<8x32xf32>
    %1036 = tpu.matmul %1035, %38, %cst_258 {dimension_numbers = #tpu.dot_dimension_numbers<[1], [0], [0], [1], [0, 0, 1, 1], [], []>} : vector<8x32xf32>, vector<32x32xf32>, vector<8x32xf32> -> vector<8x32xf32>
    %1037 = arith.addf %1036, %41 : vector<8x32xf32>
    %cst_259 = arith.constant 0.000000e+00 : f32
    %1038 = vector.broadcast %cst_259 : f32 to vector<8x32xf32>
    %1039 = arith.maximumf %1037, %1038 : vector<8x32xf32>
    %cst_260 = arith.constant dense<0.000000e+00> : vector<8x32xf32>
    %1040 = tpu.matmul %1039, %42, %cst_260 {dimension_numbers = #tpu.dot_dimension_numbers<[1], [0], [0], [1], [0, 0, 1, 1], [], []>} : vector<8x32xf32>, vector<32x32xf32>, vector<8x32xf32> -> vector<8x32xf32>
    %1041 = arith.addf %1040, %45 : vector<8x32xf32>
    %cst_261 = arith.constant 0.000000e+00 : f32
    %1042 = vector.broadcast %cst_261 : f32 to vector<8x32xf32>
    %1043 = arith.maximumf %1041, %1042 : vector<8x32xf32>
    %cst_262 = arith.constant dense<0.000000e+00> : vector<8x8xf32>
    %1044 = tpu.matmul %1043, %46, %cst_262 {dimension_numbers = #tpu.dot_dimension_numbers<[1], [0], [0], [1], [0, 0, 1, 1], [], []>} : vector<8x32xf32>, vector<32x8xf32>, vector<8x8xf32> -> vector<8x8xf32>
    %1045 = arith.addf %1044, %49 : vector<8x8xf32>
    %1046 = tpu.concatenate %823, %897, %971, %1045 in 1 : vector<8x8xf32>, vector<8x8xf32>, vector<8x8xf32>, vector<8x8xf32> -> vector<8x32xf32>
    %1047 = arith.index_cast %c3_i32 : i32 to index
    %c0_263 = arith.constant 0 : index
    %c0_264 = arith.constant 0 : index
    %1048 = vector.load %arg22[%1047, %c0_263, %c0_264] : memref<8x8x32xf32, #tpu.memory_space<vmem>>, vector<1x8x32xf32>
    %1049 = vector.shape_cast %1048 : vector<1x8x32xf32> to vector<8x32xf32>
    %1050 = vector.shape_cast %1046 : vector<8x32xf32> to vector<1x8x32xf32>
    tpu.vector_store %arg22[%1047, %c0_263, %c0_264], %1050 {strides = array<i32>} : memref<8x8x32xf32, #tpu.memory_space<vmem>>, vector<1x8x32xf32>,
    %c4_i32 = arith.constant 4 : i32
    %1051 = arith.index_cast %c4_i32 : i32 to index
    %c0_265 = arith.constant 0 : index
    %c0_266 = arith.constant 0 : index
    %1052 = vector.load %arg2[%1051, %c0_265, %c0_266] : memref<8x8x8xf32, #tpu.memory_space<vmem>>, vector<1x8x8xf32>
    %1053 = vector.shape_cast %1052 : vector<1x8x8xf32> to vector<8x8xf32>
    %1054 = vector.extract_strided_slice %1053 {offsets = [0, 0], sizes = [8, 4], strides = [1, 1]} : vector<8x8xf32> to vector<8x4xf32>
    %cst_267 = arith.constant dense<0.000000e+00> : vector<8x32xf32>
    %1055 = tpu.matmul %1054, %50, %cst_267 {dimension_numbers = #tpu.dot_dimension_numbers<[1], [0], [0], [1], [0, 0, 1, 1], [], []>} : vector<8x4xf32>, vector<4x32xf32>, vector<8x32xf32> -> vector<8x32xf32>
    %cst_268 = arith.constant dense<0.000000e+00> : vector<8x32xf32>
    %1056 = tpu.matmul %897, %51, %cst_268 {dimension_numbers = #tpu.dot_dimension_numbers<[1], [0], [0], [1], [0, 0, 1, 1], [], []>} : vector<8x8xf32>, vector<8x32xf32>, vector<8x32xf32> -> vector<8x32xf32>
    %1057 = arith.addf %1055, %1056 : vector<8x32xf32>
    %1058 = arith.addf %1057, %54 : vector<8x32xf32>
    %cst_269 = arith.constant 0.000000e+00 : f32
    %1059 = vector.broadcast %cst_269 : f32 to vector<8x32xf32>
    %1060 = arith.maximumf %1058, %1059 : vector<8x32xf32>
    %cst_270 = arith.constant dense<0.000000e+00> : vector<8x32xf32>
    %1061 = tpu.matmul %1060, %55, %cst_270 {dimension_numbers = #tpu.dot_dimension_numbers<[1], [0], [0], [1], [0, 0, 1, 1], [], []>} : vector<8x32xf32>, vector<32x32xf32>, vector<8x32xf32> -> vector<8x32xf32>
    %1062 = arith.addf %1061, %58 : vector<8x32xf32>
    %cst_271 = arith.constant 0.000000e+00 : f32
    %1063 = vector.broadcast %cst_271 : f32 to vector<8x32xf32>
    %1064 = arith.maximumf %1062, %1063 : vector<8x32xf32>
    %cst_272 = arith.constant dense<0.000000e+00> : vector<8x4xf32>
    %1065 = tpu.matmul %1064, %59, %cst_272 {dimension_numbers = #tpu.dot_dimension_numbers<[1], [0], [0], [1], [0, 0, 1, 1], [], []>} : vector<8x32xf32>, vector<32x4xf32>, vector<8x4xf32> -> vector<8x4xf32>
    %1066 = arith.addf %1065, %62 : vector<8x4xf32>
    %1067 = vector.extract_strided_slice %1053 {offsets = [0, 4], sizes = [8, 4], strides = [1, 1]} : vector<8x8xf32> to vector<8x4xf32>
    %1068 = tpu.concatenate %1066, %1067 in 1 : vector<8x4xf32>, vector<8x4xf32> -> vector<8x8xf32>
    %cst_273 = arith.constant dense<0.000000e+00> : vector<8x96xf32>
    %1069 = tpu.matmul %1068, %0, %cst_273 {dimension_numbers = #tpu.dot_dimension_numbers<[1], [0], [0], [1], [0, 0, 1, 1], [], []>} : vector<8x8xf32>, vector<8x96xf32>, vector<8x96xf32> -> vector<8x96xf32>
    %cst_274 = arith.constant dense<0.000000e+00> : vector<8x96xf32>
    %1070 = tpu.matmul %855, %1, %cst_274 {dimension_numbers = #tpu.dot_dimension_numbers<[1], [0], [0], [1], [0, 0, 1, 1], [], []>} : vector<8x32xf32>, vector<32x96xf32>, vector<8x96xf32> -> vector<8x96xf32>
    %1071 = vector.extract_strided_slice %1069 {offsets = [0, 0], sizes = [8, 32], strides = [1, 1]} : vector<8x96xf32> to vector<8x32xf32>
    %1072 = vector.extract_strided_slice %1070 {offsets = [0, 0], sizes = [8, 32], strides = [1, 1]} : vector<8x96xf32> to vector<8x32xf32>
    %1073 = arith.addf %1071, %1072 : vector<8x32xf32>
    %1074 = arith.addf %1073, %6 : vector<8x32xf32>
    %1075 = arith.negf %1074 : vector<8x32xf32>
    %1076 = math.exp %1075 : vector<8x32xf32>
    %cst_275 = arith.constant 1.000000e+00 : f32
    %1077 = vector.broadcast %cst_275 : f32 to vector<8x32xf32>
    %1078 = arith.addf %1077, %1076 : vector<8x32xf32>
    %1079 = arith.divf %1077, %1078 : vector<8x32xf32>
    %1080 = vector.extract_strided_slice %1069 {offsets = [0, 32], sizes = [8, 32], strides = [1, 1]} : vector<8x96xf32> to vector<8x32xf32>
    %1081 = vector.extract_strided_slice %1070 {offsets = [0, 32], sizes = [8, 32], strides = [1, 1]} : vector<8x96xf32> to vector<8x32xf32>
    %1082 = arith.addf %1080, %1081 : vector<8x32xf32>
    %1083 = arith.addf %1082, %10 : vector<8x32xf32>
    %1084 = arith.negf %1083 : vector<8x32xf32>
    %1085 = math.exp %1084 : vector<8x32xf32>
    %cst_276 = arith.constant 1.000000e+00 : f32
    %1086 = vector.broadcast %cst_276 : f32 to vector<8x32xf32>
    %1087 = arith.addf %1086, %1085 : vector<8x32xf32>
    %1088 = arith.divf %1086, %1087 : vector<8x32xf32>
    %1089 = vector.extract_strided_slice %1069 {offsets = [0, 64], sizes = [8, 32], strides = [1, 1]} : vector<8x96xf32> to vector<8x32xf32>
    %1090 = arith.addf %1089, %14 : vector<8x32xf32>
    %1091 = vector.extract_strided_slice %1070 {offsets = [0, 64], sizes = [8, 32], strides = [1, 1]} : vector<8x96xf32> to vector<8x32xf32>
    %1092 = arith.addf %1091, %18 : vector<8x32xf32>
    %1093 = arith.mulf %1079, %1092 : vector<8x32xf32>
    %1094 = arith.addf %1090, %1093 : vector<8x32xf32>
    %1095 = math.tanh %1094 : vector<8x32xf32>
    %cst_277 = arith.constant 1.000000e+00 : f32
    %1096 = vector.broadcast %cst_277 : f32 to vector<8x32xf32>
    %1097 = arith.subf %1096, %1088 : vector<8x32xf32>
    %1098 = arith.mulf %1097, %1095 : vector<8x32xf32>
    %1099 = arith.mulf %1088, %855 : vector<8x32xf32>
    %1100 = arith.addf %1098, %1099 : vector<8x32xf32>
    %cst_278 = arith.constant dense<0.000000e+00> : vector<8x96xf32>
    %1101 = tpu.matmul %1100, %19, %cst_278 {dimension_numbers = #tpu.dot_dimension_numbers<[1], [0], [0], [1], [0, 0, 1, 1], [], []>} : vector<8x32xf32>, vector<32x96xf32>, vector<8x96xf32> -> vector<8x96xf32>
    %cst_279 = arith.constant dense<0.000000e+00> : vector<8x96xf32>
    %1102 = tpu.matmul %887, %20, %cst_279 {dimension_numbers = #tpu.dot_dimension_numbers<[1], [0], [0], [1], [0, 0, 1, 1], [], []>} : vector<8x32xf32>, vector<32x96xf32>, vector<8x96xf32> -> vector<8x96xf32>
    %1103 = vector.extract_strided_slice %1101 {offsets = [0, 0], sizes = [8, 32], strides = [1, 1]} : vector<8x96xf32> to vector<8x32xf32>
    %1104 = vector.extract_strided_slice %1102 {offsets = [0, 0], sizes = [8, 32], strides = [1, 1]} : vector<8x96xf32> to vector<8x32xf32>
    %1105 = arith.addf %1103, %1104 : vector<8x32xf32>
    %1106 = arith.addf %1105, %25 : vector<8x32xf32>
    %1107 = arith.negf %1106 : vector<8x32xf32>
    %1108 = math.exp %1107 : vector<8x32xf32>
    %cst_280 = arith.constant 1.000000e+00 : f32
    %1109 = vector.broadcast %cst_280 : f32 to vector<8x32xf32>
    %1110 = arith.addf %1109, %1108 : vector<8x32xf32>
    %1111 = arith.divf %1109, %1110 : vector<8x32xf32>
    %1112 = vector.extract_strided_slice %1101 {offsets = [0, 32], sizes = [8, 32], strides = [1, 1]} : vector<8x96xf32> to vector<8x32xf32>
    %1113 = vector.extract_strided_slice %1102 {offsets = [0, 32], sizes = [8, 32], strides = [1, 1]} : vector<8x96xf32> to vector<8x32xf32>
    %1114 = arith.addf %1112, %1113 : vector<8x32xf32>
    %1115 = arith.addf %1114, %29 : vector<8x32xf32>
    %1116 = arith.negf %1115 : vector<8x32xf32>
    %1117 = math.exp %1116 : vector<8x32xf32>
    %cst_281 = arith.constant 1.000000e+00 : f32
    %1118 = vector.broadcast %cst_281 : f32 to vector<8x32xf32>
    %1119 = arith.addf %1118, %1117 : vector<8x32xf32>
    %1120 = arith.divf %1118, %1119 : vector<8x32xf32>
    %1121 = vector.extract_strided_slice %1101 {offsets = [0, 64], sizes = [8, 32], strides = [1, 1]} : vector<8x96xf32> to vector<8x32xf32>
    %1122 = arith.addf %1121, %33 : vector<8x32xf32>
    %1123 = vector.extract_strided_slice %1102 {offsets = [0, 64], sizes = [8, 32], strides = [1, 1]} : vector<8x96xf32> to vector<8x32xf32>
    %1124 = arith.addf %1123, %37 : vector<8x32xf32>
    %1125 = arith.mulf %1111, %1124 : vector<8x32xf32>
    %1126 = arith.addf %1122, %1125 : vector<8x32xf32>
    %1127 = math.tanh %1126 : vector<8x32xf32>
    %cst_282 = arith.constant 1.000000e+00 : f32
    %1128 = vector.broadcast %cst_282 : f32 to vector<8x32xf32>
    %1129 = arith.subf %1128, %1120 : vector<8x32xf32>
    %1130 = arith.mulf %1129, %1127 : vector<8x32xf32>
    %1131 = arith.mulf %1120, %887 : vector<8x32xf32>
    %1132 = arith.addf %1130, %1131 : vector<8x32xf32>
    %cst_283 = arith.constant dense<0.000000e+00> : vector<8x32xf32>
    %1133 = tpu.matmul %1132, %38, %cst_283 {dimension_numbers = #tpu.dot_dimension_numbers<[1], [0], [0], [1], [0, 0, 1, 1], [], []>} : vector<8x32xf32>, vector<32x32xf32>, vector<8x32xf32> -> vector<8x32xf32>
    %1134 = arith.addf %1133, %41 : vector<8x32xf32>
    %cst_284 = arith.constant 0.000000e+00 : f32
    %1135 = vector.broadcast %cst_284 : f32 to vector<8x32xf32>
    %1136 = arith.maximumf %1134, %1135 : vector<8x32xf32>
    %cst_285 = arith.constant dense<0.000000e+00> : vector<8x32xf32>
    %1137 = tpu.matmul %1136, %42, %cst_285 {dimension_numbers = #tpu.dot_dimension_numbers<[1], [0], [0], [1], [0, 0, 1, 1], [], []>} : vector<8x32xf32>, vector<32x32xf32>, vector<8x32xf32> -> vector<8x32xf32>
    %1138 = arith.addf %1137, %45 : vector<8x32xf32>
    %cst_286 = arith.constant 0.000000e+00 : f32
    %1139 = vector.broadcast %cst_286 : f32 to vector<8x32xf32>
    %1140 = arith.maximumf %1138, %1139 : vector<8x32xf32>
    %cst_287 = arith.constant dense<0.000000e+00> : vector<8x8xf32>
    %1141 = tpu.matmul %1140, %46, %cst_287 {dimension_numbers = #tpu.dot_dimension_numbers<[1], [0], [0], [1], [0, 0, 1, 1], [], []>} : vector<8x32xf32>, vector<32x8xf32>, vector<8x8xf32> -> vector<8x8xf32>
    %1142 = arith.addf %1141, %49 : vector<8x8xf32>
    %cst_288 = arith.constant dense<0.000000e+00> : vector<8x96xf32>
    %1143 = tpu.matmul %1142, %0, %cst_288 {dimension_numbers = #tpu.dot_dimension_numbers<[1], [0], [0], [1], [0, 0, 1, 1], [], []>} : vector<8x8xf32>, vector<8x96xf32>, vector<8x96xf32> -> vector<8x96xf32>
    %cst_289 = arith.constant dense<0.000000e+00> : vector<8x96xf32>
    %1144 = tpu.matmul %1100, %1, %cst_289 {dimension_numbers = #tpu.dot_dimension_numbers<[1], [0], [0], [1], [0, 0, 1, 1], [], []>} : vector<8x32xf32>, vector<32x96xf32>, vector<8x96xf32> -> vector<8x96xf32>
    %1145 = vector.extract_strided_slice %1143 {offsets = [0, 0], sizes = [8, 32], strides = [1, 1]} : vector<8x96xf32> to vector<8x32xf32>
    %1146 = vector.extract_strided_slice %1144 {offsets = [0, 0], sizes = [8, 32], strides = [1, 1]} : vector<8x96xf32> to vector<8x32xf32>
    %1147 = arith.addf %1145, %1146 : vector<8x32xf32>
    %1148 = arith.addf %1147, %6 : vector<8x32xf32>
    %1149 = arith.negf %1148 : vector<8x32xf32>
    %1150 = math.exp %1149 : vector<8x32xf32>
    %cst_290 = arith.constant 1.000000e+00 : f32
    %1151 = vector.broadcast %cst_290 : f32 to vector<8x32xf32>
    %1152 = arith.addf %1151, %1150 : vector<8x32xf32>
    %1153 = arith.divf %1151, %1152 : vector<8x32xf32>
    %1154 = vector.extract_strided_slice %1143 {offsets = [0, 32], sizes = [8, 32], strides = [1, 1]} : vector<8x96xf32> to vector<8x32xf32>
    %1155 = vector.extract_strided_slice %1144 {offsets = [0, 32], sizes = [8, 32], strides = [1, 1]} : vector<8x96xf32> to vector<8x32xf32>
    %1156 = arith.addf %1154, %1155 : vector<8x32xf32>
    %1157 = arith.addf %1156, %10 : vector<8x32xf32>
    %1158 = arith.negf %1157 : vector<8x32xf32>
    %1159 = math.exp %1158 : vector<8x32xf32>
    %cst_291 = arith.constant 1.000000e+00 : f32
    %1160 = vector.broadcast %cst_291 : f32 to vector<8x32xf32>
    %1161 = arith.addf %1160, %1159 : vector<8x32xf32>
    %1162 = arith.divf %1160, %1161 : vector<8x32xf32>
    %1163 = vector.extract_strided_slice %1143 {offsets = [0, 64], sizes = [8, 32], strides = [1, 1]} : vector<8x96xf32> to vector<8x32xf32>
    %1164 = arith.addf %1163, %14 : vector<8x32xf32>
    %1165 = vector.extract_strided_slice %1144 {offsets = [0, 64], sizes = [8, 32], strides = [1, 1]} : vector<8x96xf32> to vector<8x32xf32>
    %1166 = arith.addf %1165, %18 : vector<8x32xf32>
    %1167 = arith.mulf %1153, %1166 : vector<8x32xf32>
    %1168 = arith.addf %1164, %1167 : vector<8x32xf32>
    %1169 = math.tanh %1168 : vector<8x32xf32>
    %cst_292 = arith.constant 1.000000e+00 : f32
    %1170 = vector.broadcast %cst_292 : f32 to vector<8x32xf32>
    %1171 = arith.subf %1170, %1162 : vector<8x32xf32>
    %1172 = arith.mulf %1171, %1169 : vector<8x32xf32>
    %1173 = arith.mulf %1162, %1100 : vector<8x32xf32>
    %1174 = arith.addf %1172, %1173 : vector<8x32xf32>
    %cst_293 = arith.constant dense<0.000000e+00> : vector<8x96xf32>
    %1175 = tpu.matmul %1174, %19, %cst_293 {dimension_numbers = #tpu.dot_dimension_numbers<[1], [0], [0], [1], [0, 0, 1, 1], [], []>} : vector<8x32xf32>, vector<32x96xf32>, vector<8x96xf32> -> vector<8x96xf32>
    %cst_294 = arith.constant dense<0.000000e+00> : vector<8x96xf32>
    %1176 = tpu.matmul %1132, %20, %cst_294 {dimension_numbers = #tpu.dot_dimension_numbers<[1], [0], [0], [1], [0, 0, 1, 1], [], []>} : vector<8x32xf32>, vector<32x96xf32>, vector<8x96xf32> -> vector<8x96xf32>
    %1177 = vector.extract_strided_slice %1175 {offsets = [0, 0], sizes = [8, 32], strides = [1, 1]} : vector<8x96xf32> to vector<8x32xf32>
    %1178 = vector.extract_strided_slice %1176 {offsets = [0, 0], sizes = [8, 32], strides = [1, 1]} : vector<8x96xf32> to vector<8x32xf32>
    %1179 = arith.addf %1177, %1178 : vector<8x32xf32>
    %1180 = arith.addf %1179, %25 : vector<8x32xf32>
    %1181 = arith.negf %1180 : vector<8x32xf32>
    %1182 = math.exp %1181 : vector<8x32xf32>
    %cst_295 = arith.constant 1.000000e+00 : f32
    %1183 = vector.broadcast %cst_295 : f32 to vector<8x32xf32>
    %1184 = arith.addf %1183, %1182 : vector<8x32xf32>
    %1185 = arith.divf %1183, %1184 : vector<8x32xf32>
    %1186 = vector.extract_strided_slice %1175 {offsets = [0, 32], sizes = [8, 32], strides = [1, 1]} : vector<8x96xf32> to vector<8x32xf32>
    %1187 = vector.extract_strided_slice %1176 {offsets = [0, 32], sizes = [8, 32], strides = [1, 1]} : vector<8x96xf32> to vector<8x32xf32>
    %1188 = arith.addf %1186, %1187 : vector<8x32xf32>
    %1189 = arith.addf %1188, %29 : vector<8x32xf32>
    %1190 = arith.negf %1189 : vector<8x32xf32>
    %1191 = math.exp %1190 : vector<8x32xf32>
    %cst_296 = arith.constant 1.000000e+00 : f32
    %1192 = vector.broadcast %cst_296 : f32 to vector<8x32xf32>
    %1193 = arith.addf %1192, %1191 : vector<8x32xf32>
    %1194 = arith.divf %1192, %1193 : vector<8x32xf32>
    %1195 = vector.extract_strided_slice %1175 {offsets = [0, 64], sizes = [8, 32], strides = [1, 1]} : vector<8x96xf32> to vector<8x32xf32>
    %1196 = arith.addf %1195, %33 : vector<8x32xf32>
    %1197 = vector.extract_strided_slice %1176 {offsets = [0, 64], sizes = [8, 32], strides = [1, 1]} : vector<8x96xf32> to vector<8x32xf32>
    %1198 = arith.addf %1197, %37 : vector<8x32xf32>
    %1199 = arith.mulf %1185, %1198 : vector<8x32xf32>
    %1200 = arith.addf %1196, %1199 : vector<8x32xf32>
    %1201 = math.tanh %1200 : vector<8x32xf32>
    %cst_297 = arith.constant 1.000000e+00 : f32
    %1202 = vector.broadcast %cst_297 : f32 to vector<8x32xf32>
    %1203 = arith.subf %1202, %1194 : vector<8x32xf32>
    %1204 = arith.mulf %1203, %1201 : vector<8x32xf32>
    %1205 = arith.mulf %1194, %1132 : vector<8x32xf32>
    %1206 = arith.addf %1204, %1205 : vector<8x32xf32>
    %cst_298 = arith.constant dense<0.000000e+00> : vector<8x32xf32>
    %1207 = tpu.matmul %1206, %38, %cst_298 {dimension_numbers = #tpu.dot_dimension_numbers<[1], [0], [0], [1], [0, 0, 1, 1], [], []>} : vector<8x32xf32>, vector<32x32xf32>, vector<8x32xf32> -> vector<8x32xf32>
    %1208 = arith.addf %1207, %41 : vector<8x32xf32>
    %cst_299 = arith.constant 0.000000e+00 : f32
    %1209 = vector.broadcast %cst_299 : f32 to vector<8x32xf32>
    %1210 = arith.maximumf %1208, %1209 : vector<8x32xf32>
    %cst_300 = arith.constant dense<0.000000e+00> : vector<8x32xf32>
    %1211 = tpu.matmul %1210, %42, %cst_300 {dimension_numbers = #tpu.dot_dimension_numbers<[1], [0], [0], [1], [0, 0, 1, 1], [], []>} : vector<8x32xf32>, vector<32x32xf32>, vector<8x32xf32> -> vector<8x32xf32>
    %1212 = arith.addf %1211, %45 : vector<8x32xf32>
    %cst_301 = arith.constant 0.000000e+00 : f32
    %1213 = vector.broadcast %cst_301 : f32 to vector<8x32xf32>
    %1214 = arith.maximumf %1212, %1213 : vector<8x32xf32>
    %cst_302 = arith.constant dense<0.000000e+00> : vector<8x8xf32>
    %1215 = tpu.matmul %1214, %46, %cst_302 {dimension_numbers = #tpu.dot_dimension_numbers<[1], [0], [0], [1], [0, 0, 1, 1], [], []>} : vector<8x32xf32>, vector<32x8xf32>, vector<8x8xf32> -> vector<8x8xf32>
    %1216 = arith.addf %1215, %49 : vector<8x8xf32>
    %cst_303 = arith.constant dense<0.000000e+00> : vector<8x96xf32>
    %1217 = tpu.matmul %1216, %0, %cst_303 {dimension_numbers = #tpu.dot_dimension_numbers<[1], [0], [0], [1], [0, 0, 1, 1], [], []>} : vector<8x8xf32>, vector<8x96xf32>, vector<8x96xf32> -> vector<8x96xf32>
    %cst_304 = arith.constant dense<0.000000e+00> : vector<8x96xf32>
    %1218 = tpu.matmul %1174, %1, %cst_304 {dimension_numbers = #tpu.dot_dimension_numbers<[1], [0], [0], [1], [0, 0, 1, 1], [], []>} : vector<8x32xf32>, vector<32x96xf32>, vector<8x96xf32> -> vector<8x96xf32>
    %1219 = vector.extract_strided_slice %1217 {offsets = [0, 0], sizes = [8, 32], strides = [1, 1]} : vector<8x96xf32> to vector<8x32xf32>
    %1220 = vector.extract_strided_slice %1218 {offsets = [0, 0], sizes = [8, 32], strides = [1, 1]} : vector<8x96xf32> to vector<8x32xf32>
    %1221 = arith.addf %1219, %1220 : vector<8x32xf32>
    %1222 = arith.addf %1221, %6 : vector<8x32xf32>
    %1223 = arith.negf %1222 : vector<8x32xf32>
    %1224 = math.exp %1223 : vector<8x32xf32>
    %cst_305 = arith.constant 1.000000e+00 : f32
    %1225 = vector.broadcast %cst_305 : f32 to vector<8x32xf32>
    %1226 = arith.addf %1225, %1224 : vector<8x32xf32>
    %1227 = arith.divf %1225, %1226 : vector<8x32xf32>
    %1228 = vector.extract_strided_slice %1217 {offsets = [0, 32], sizes = [8, 32], strides = [1, 1]} : vector<8x96xf32> to vector<8x32xf32>
    %1229 = vector.extract_strided_slice %1218 {offsets = [0, 32], sizes = [8, 32], strides = [1, 1]} : vector<8x96xf32> to vector<8x32xf32>
    %1230 = arith.addf %1228, %1229 : vector<8x32xf32>
    %1231 = arith.addf %1230, %10 : vector<8x32xf32>
    %1232 = arith.negf %1231 : vector<8x32xf32>
    %1233 = math.exp %1232 : vector<8x32xf32>
    %cst_306 = arith.constant 1.000000e+00 : f32
    %1234 = vector.broadcast %cst_306 : f32 to vector<8x32xf32>
    %1235 = arith.addf %1234, %1233 : vector<8x32xf32>
    %1236 = arith.divf %1234, %1235 : vector<8x32xf32>
    %1237 = vector.extract_strided_slice %1217 {offsets = [0, 64], sizes = [8, 32], strides = [1, 1]} : vector<8x96xf32> to vector<8x32xf32>
    %1238 = arith.addf %1237, %14 : vector<8x32xf32>
    %1239 = vector.extract_strided_slice %1218 {offsets = [0, 64], sizes = [8, 32], strides = [1, 1]} : vector<8x96xf32> to vector<8x32xf32>
    %1240 = arith.addf %1239, %18 : vector<8x32xf32>
    %1241 = arith.mulf %1227, %1240 : vector<8x32xf32>
    %1242 = arith.addf %1238, %1241 : vector<8x32xf32>
    %1243 = math.tanh %1242 : vector<8x32xf32>
    %cst_307 = arith.constant 1.000000e+00 : f32
    %1244 = vector.broadcast %cst_307 : f32 to vector<8x32xf32>
    %1245 = arith.subf %1244, %1236 : vector<8x32xf32>
    %1246 = arith.mulf %1245, %1243 : vector<8x32xf32>
    %1247 = arith.mulf %1236, %1174 : vector<8x32xf32>
    %1248 = arith.addf %1246, %1247 : vector<8x32xf32>
    %cst_308 = arith.constant dense<0.000000e+00> : vector<8x96xf32>
    %1249 = tpu.matmul %1248, %19, %cst_308 {dimension_numbers = #tpu.dot_dimension_numbers<[1], [0], [0], [1], [0, 0, 1, 1], [], []>} : vector<8x32xf32>, vector<32x96xf32>, vector<8x96xf32> -> vector<8x96xf32>
    %cst_309 = arith.constant dense<0.000000e+00> : vector<8x96xf32>
    %1250 = tpu.matmul %1206, %20, %cst_309 {dimension_numbers = #tpu.dot_dimension_numbers<[1], [0], [0], [1], [0, 0, 1, 1], [], []>} : vector<8x32xf32>, vector<32x96xf32>, vector<8x96xf32> -> vector<8x96xf32>
    %1251 = vector.extract_strided_slice %1249 {offsets = [0, 0], sizes = [8, 32], strides = [1, 1]} : vector<8x96xf32> to vector<8x32xf32>
    %1252 = vector.extract_strided_slice %1250 {offsets = [0, 0], sizes = [8, 32], strides = [1, 1]} : vector<8x96xf32> to vector<8x32xf32>
    %1253 = arith.addf %1251, %1252 : vector<8x32xf32>
    %1254 = arith.addf %1253, %25 : vector<8x32xf32>
    %1255 = arith.negf %1254 : vector<8x32xf32>
    %1256 = math.exp %1255 : vector<8x32xf32>
    %cst_310 = arith.constant 1.000000e+00 : f32
    %1257 = vector.broadcast %cst_310 : f32 to vector<8x32xf32>
    %1258 = arith.addf %1257, %1256 : vector<8x32xf32>
    %1259 = arith.divf %1257, %1258 : vector<8x32xf32>
    %1260 = vector.extract_strided_slice %1249 {offsets = [0, 32], sizes = [8, 32], strides = [1, 1]} : vector<8x96xf32> to vector<8x32xf32>
    %1261 = vector.extract_strided_slice %1250 {offsets = [0, 32], sizes = [8, 32], strides = [1, 1]} : vector<8x96xf32> to vector<8x32xf32>
    %1262 = arith.addf %1260, %1261 : vector<8x32xf32>
    %1263 = arith.addf %1262, %29 : vector<8x32xf32>
    %1264 = arith.negf %1263 : vector<8x32xf32>
    %1265 = math.exp %1264 : vector<8x32xf32>
    %cst_311 = arith.constant 1.000000e+00 : f32
    %1266 = vector.broadcast %cst_311 : f32 to vector<8x32xf32>
    %1267 = arith.addf %1266, %1265 : vector<8x32xf32>
    %1268 = arith.divf %1266, %1267 : vector<8x32xf32>
    %1269 = vector.extract_strided_slice %1249 {offsets = [0, 64], sizes = [8, 32], strides = [1, 1]} : vector<8x96xf32> to vector<8x32xf32>
    %1270 = arith.addf %1269, %33 : vector<8x32xf32>
    %1271 = vector.extract_strided_slice %1250 {offsets = [0, 64], sizes = [8, 32], strides = [1, 1]} : vector<8x96xf32> to vector<8x32xf32>
    %1272 = arith.addf %1271, %37 : vector<8x32xf32>
    %1273 = arith.mulf %1259, %1272 : vector<8x32xf32>
    %1274 = arith.addf %1270, %1273 : vector<8x32xf32>
    %1275 = math.tanh %1274 : vector<8x32xf32>
    %cst_312 = arith.constant 1.000000e+00 : f32
    %1276 = vector.broadcast %cst_312 : f32 to vector<8x32xf32>
    %1277 = arith.subf %1276, %1268 : vector<8x32xf32>
    %1278 = arith.mulf %1277, %1275 : vector<8x32xf32>
    %1279 = arith.mulf %1268, %1206 : vector<8x32xf32>
    %1280 = arith.addf %1278, %1279 : vector<8x32xf32>
    %cst_313 = arith.constant dense<0.000000e+00> : vector<8x32xf32>
    %1281 = tpu.matmul %1280, %38, %cst_313 {dimension_numbers = #tpu.dot_dimension_numbers<[1], [0], [0], [1], [0, 0, 1, 1], [], []>} : vector<8x32xf32>, vector<32x32xf32>, vector<8x32xf32> -> vector<8x32xf32>
    %1282 = arith.addf %1281, %41 : vector<8x32xf32>
    %cst_314 = arith.constant 0.000000e+00 : f32
    %1283 = vector.broadcast %cst_314 : f32 to vector<8x32xf32>
    %1284 = arith.maximumf %1282, %1283 : vector<8x32xf32>
    %cst_315 = arith.constant dense<0.000000e+00> : vector<8x32xf32>
    %1285 = tpu.matmul %1284, %42, %cst_315 {dimension_numbers = #tpu.dot_dimension_numbers<[1], [0], [0], [1], [0, 0, 1, 1], [], []>} : vector<8x32xf32>, vector<32x32xf32>, vector<8x32xf32> -> vector<8x32xf32>
    %1286 = arith.addf %1285, %45 : vector<8x32xf32>
    %cst_316 = arith.constant 0.000000e+00 : f32
    %1287 = vector.broadcast %cst_316 : f32 to vector<8x32xf32>
    %1288 = arith.maximumf %1286, %1287 : vector<8x32xf32>
    %cst_317 = arith.constant dense<0.000000e+00> : vector<8x8xf32>
    %1289 = tpu.matmul %1288, %46, %cst_317 {dimension_numbers = #tpu.dot_dimension_numbers<[1], [0], [0], [1], [0, 0, 1, 1], [], []>} : vector<8x32xf32>, vector<32x8xf32>, vector<8x8xf32> -> vector<8x8xf32>
    %1290 = arith.addf %1289, %49 : vector<8x8xf32>
    %1291 = tpu.concatenate %1068, %1142, %1216, %1290 in 1 : vector<8x8xf32>, vector<8x8xf32>, vector<8x8xf32>, vector<8x8xf32> -> vector<8x32xf32>
    %1292 = arith.index_cast %c4_i32 : i32 to index
    %c0_318 = arith.constant 0 : index
    %c0_319 = arith.constant 0 : index
    %1293 = vector.load %arg22[%1292, %c0_318, %c0_319] : memref<8x8x32xf32, #tpu.memory_space<vmem>>, vector<1x8x32xf32>
    %1294 = vector.shape_cast %1293 : vector<1x8x32xf32> to vector<8x32xf32>
    %1295 = vector.shape_cast %1291 : vector<8x32xf32> to vector<1x8x32xf32>
    tpu.vector_store %arg22[%1292, %c0_318, %c0_319], %1295 {strides = array<i32>} : memref<8x8x32xf32, #tpu.memory_space<vmem>>, vector<1x8x32xf32>,
    %c5_i32 = arith.constant 5 : i32
    %1296 = arith.index_cast %c5_i32 : i32 to index
    %c0_320 = arith.constant 0 : index
    %c0_321 = arith.constant 0 : index
    %1297 = vector.load %arg2[%1296, %c0_320, %c0_321] : memref<8x8x8xf32, #tpu.memory_space<vmem>>, vector<1x8x8xf32>
    %1298 = vector.shape_cast %1297 : vector<1x8x8xf32> to vector<8x8xf32>
    %1299 = vector.extract_strided_slice %1298 {offsets = [0, 0], sizes = [8, 4], strides = [1, 1]} : vector<8x8xf32> to vector<8x4xf32>
    %cst_322 = arith.constant dense<0.000000e+00> : vector<8x32xf32>
    %1300 = tpu.matmul %1299, %50, %cst_322 {dimension_numbers = #tpu.dot_dimension_numbers<[1], [0], [0], [1], [0, 0, 1, 1], [], []>} : vector<8x4xf32>, vector<4x32xf32>, vector<8x32xf32> -> vector<8x32xf32>
    %cst_323 = arith.constant dense<0.000000e+00> : vector<8x32xf32>
    %1301 = tpu.matmul %1142, %51, %cst_323 {dimension_numbers = #tpu.dot_dimension_numbers<[1], [0], [0], [1], [0, 0, 1, 1], [], []>} : vector<8x8xf32>, vector<8x32xf32>, vector<8x32xf32> -> vector<8x32xf32>
    %1302 = arith.addf %1300, %1301 : vector<8x32xf32>
    %1303 = arith.addf %1302, %54 : vector<8x32xf32>
    %cst_324 = arith.constant 0.000000e+00 : f32
    %1304 = vector.broadcast %cst_324 : f32 to vector<8x32xf32>
    %1305 = arith.maximumf %1303, %1304 : vector<8x32xf32>
    %cst_325 = arith.constant dense<0.000000e+00> : vector<8x32xf32>
    %1306 = tpu.matmul %1305, %55, %cst_325 {dimension_numbers = #tpu.dot_dimension_numbers<[1], [0], [0], [1], [0, 0, 1, 1], [], []>} : vector<8x32xf32>, vector<32x32xf32>, vector<8x32xf32> -> vector<8x32xf32>
    %1307 = arith.addf %1306, %58 : vector<8x32xf32>
    %cst_326 = arith.constant 0.000000e+00 : f32
    %1308 = vector.broadcast %cst_326 : f32 to vector<8x32xf32>
    %1309 = arith.maximumf %1307, %1308 : vector<8x32xf32>
    %cst_327 = arith.constant dense<0.000000e+00> : vector<8x4xf32>
    %1310 = tpu.matmul %1309, %59, %cst_327 {dimension_numbers = #tpu.dot_dimension_numbers<[1], [0], [0], [1], [0, 0, 1, 1], [], []>} : vector<8x32xf32>, vector<32x4xf32>, vector<8x4xf32> -> vector<8x4xf32>
    %1311 = arith.addf %1310, %62 : vector<8x4xf32>
    %1312 = vector.extract_strided_slice %1298 {offsets = [0, 4], sizes = [8, 4], strides = [1, 1]} : vector<8x8xf32> to vector<8x4xf32>
    %1313 = tpu.concatenate %1311, %1312 in 1 : vector<8x4xf32>, vector<8x4xf32> -> vector<8x8xf32>
    %cst_328 = arith.constant dense<0.000000e+00> : vector<8x96xf32>
    %1314 = tpu.matmul %1313, %0, %cst_328 {dimension_numbers = #tpu.dot_dimension_numbers<[1], [0], [0], [1], [0, 0, 1, 1], [], []>} : vector<8x8xf32>, vector<8x96xf32>, vector<8x96xf32> -> vector<8x96xf32>
    %cst_329 = arith.constant dense<0.000000e+00> : vector<8x96xf32>
    %1315 = tpu.matmul %1100, %1, %cst_329 {dimension_numbers = #tpu.dot_dimension_numbers<[1], [0], [0], [1], [0, 0, 1, 1], [], []>} : vector<8x32xf32>, vector<32x96xf32>, vector<8x96xf32> -> vector<8x96xf32>
    %1316 = vector.extract_strided_slice %1314 {offsets = [0, 0], sizes = [8, 32], strides = [1, 1]} : vector<8x96xf32> to vector<8x32xf32>
    %1317 = vector.extract_strided_slice %1315 {offsets = [0, 0], sizes = [8, 32], strides = [1, 1]} : vector<8x96xf32> to vector<8x32xf32>
    %1318 = arith.addf %1316, %1317 : vector<8x32xf32>
    %1319 = arith.addf %1318, %6 : vector<8x32xf32>
    %1320 = arith.negf %1319 : vector<8x32xf32>
    %1321 = math.exp %1320 : vector<8x32xf32>
    %cst_330 = arith.constant 1.000000e+00 : f32
    %1322 = vector.broadcast %cst_330 : f32 to vector<8x32xf32>
    %1323 = arith.addf %1322, %1321 : vector<8x32xf32>
    %1324 = arith.divf %1322, %1323 : vector<8x32xf32>
    %1325 = vector.extract_strided_slice %1314 {offsets = [0, 32], sizes = [8, 32], strides = [1, 1]} : vector<8x96xf32> to vector<8x32xf32>
    %1326 = vector.extract_strided_slice %1315 {offsets = [0, 32], sizes = [8, 32], strides = [1, 1]} : vector<8x96xf32> to vector<8x32xf32>
    %1327 = arith.addf %1325, %1326 : vector<8x32xf32>
    %1328 = arith.addf %1327, %10 : vector<8x32xf32>
    %1329 = arith.negf %1328 : vector<8x32xf32>
    %1330 = math.exp %1329 : vector<8x32xf32>
    %cst_331 = arith.constant 1.000000e+00 : f32
    %1331 = vector.broadcast %cst_331 : f32 to vector<8x32xf32>
    %1332 = arith.addf %1331, %1330 : vector<8x32xf32>
    %1333 = arith.divf %1331, %1332 : vector<8x32xf32>
    %1334 = vector.extract_strided_slice %1314 {offsets = [0, 64], sizes = [8, 32], strides = [1, 1]} : vector<8x96xf32> to vector<8x32xf32>
    %1335 = arith.addf %1334, %14 : vector<8x32xf32>
    %1336 = vector.extract_strided_slice %1315 {offsets = [0, 64], sizes = [8, 32], strides = [1, 1]} : vector<8x96xf32> to vector<8x32xf32>
    %1337 = arith.addf %1336, %18 : vector<8x32xf32>
    %1338 = arith.mulf %1324, %1337 : vector<8x32xf32>
    %1339 = arith.addf %1335, %1338 : vector<8x32xf32>
    %1340 = math.tanh %1339 : vector<8x32xf32>
    %cst_332 = arith.constant 1.000000e+00 : f32
    %1341 = vector.broadcast %cst_332 : f32 to vector<8x32xf32>
    %1342 = arith.subf %1341, %1333 : vector<8x32xf32>
    %1343 = arith.mulf %1342, %1340 : vector<8x32xf32>
    %1344 = arith.mulf %1333, %1100 : vector<8x32xf32>
    %1345 = arith.addf %1343, %1344 : vector<8x32xf32>
    %cst_333 = arith.constant dense<0.000000e+00> : vector<8x96xf32>
    %1346 = tpu.matmul %1345, %19, %cst_333 {dimension_numbers = #tpu.dot_dimension_numbers<[1], [0], [0], [1], [0, 0, 1, 1], [], []>} : vector<8x32xf32>, vector<32x96xf32>, vector<8x96xf32> -> vector<8x96xf32>
    %cst_334 = arith.constant dense<0.000000e+00> : vector<8x96xf32>
    %1347 = tpu.matmul %1132, %20, %cst_334 {dimension_numbers = #tpu.dot_dimension_numbers<[1], [0], [0], [1], [0, 0, 1, 1], [], []>} : vector<8x32xf32>, vector<32x96xf32>, vector<8x96xf32> -> vector<8x96xf32>
    %1348 = vector.extract_strided_slice %1346 {offsets = [0, 0], sizes = [8, 32], strides = [1, 1]} : vector<8x96xf32> to vector<8x32xf32>
    %1349 = vector.extract_strided_slice %1347 {offsets = [0, 0], sizes = [8, 32], strides = [1, 1]} : vector<8x96xf32> to vector<8x32xf32>
    %1350 = arith.addf %1348, %1349 : vector<8x32xf32>
    %1351 = arith.addf %1350, %25 : vector<8x32xf32>
    %1352 = arith.negf %1351 : vector<8x32xf32>
    %1353 = math.exp %1352 : vector<8x32xf32>
    %cst_335 = arith.constant 1.000000e+00 : f32
    %1354 = vector.broadcast %cst_335 : f32 to vector<8x32xf32>
    %1355 = arith.addf %1354, %1353 : vector<8x32xf32>
    %1356 = arith.divf %1354, %1355 : vector<8x32xf32>
    %1357 = vector.extract_strided_slice %1346 {offsets = [0, 32], sizes = [8, 32], strides = [1, 1]} : vector<8x96xf32> to vector<8x32xf32>
    %1358 = vector.extract_strided_slice %1347 {offsets = [0, 32], sizes = [8, 32], strides = [1, 1]} : vector<8x96xf32> to vector<8x32xf32>
    %1359 = arith.addf %1357, %1358 : vector<8x32xf32>
    %1360 = arith.addf %1359, %29 : vector<8x32xf32>
    %1361 = arith.negf %1360 : vector<8x32xf32>
    %1362 = math.exp %1361 : vector<8x32xf32>
    %cst_336 = arith.constant 1.000000e+00 : f32
    %1363 = vector.broadcast %cst_336 : f32 to vector<8x32xf32>
    %1364 = arith.addf %1363, %1362 : vector<8x32xf32>
    %1365 = arith.divf %1363, %1364 : vector<8x32xf32>
    %1366 = vector.extract_strided_slice %1346 {offsets = [0, 64], sizes = [8, 32], strides = [1, 1]} : vector<8x96xf32> to vector<8x32xf32>
    %1367 = arith.addf %1366, %33 : vector<8x32xf32>
    %1368 = vector.extract_strided_slice %1347 {offsets = [0, 64], sizes = [8, 32], strides = [1, 1]} : vector<8x96xf32> to vector<8x32xf32>
    %1369 = arith.addf %1368, %37 : vector<8x32xf32>
    %1370 = arith.mulf %1356, %1369 : vector<8x32xf32>
    %1371 = arith.addf %1367, %1370 : vector<8x32xf32>
    %1372 = math.tanh %1371 : vector<8x32xf32>
    %cst_337 = arith.constant 1.000000e+00 : f32
    %1373 = vector.broadcast %cst_337 : f32 to vector<8x32xf32>
    %1374 = arith.subf %1373, %1365 : vector<8x32xf32>
    %1375 = arith.mulf %1374, %1372 : vector<8x32xf32>
    %1376 = arith.mulf %1365, %1132 : vector<8x32xf32>
    %1377 = arith.addf %1375, %1376 : vector<8x32xf32>
    %cst_338 = arith.constant dense<0.000000e+00> : vector<8x32xf32>
    %1378 = tpu.matmul %1377, %38, %cst_338 {dimension_numbers = #tpu.dot_dimension_numbers<[1], [0], [0], [1], [0, 0, 1, 1], [], []>} : vector<8x32xf32>, vector<32x32xf32>, vector<8x32xf32> -> vector<8x32xf32>
    %1379 = arith.addf %1378, %41 : vector<8x32xf32>
    %cst_339 = arith.constant 0.000000e+00 : f32
    %1380 = vector.broadcast %cst_339 : f32 to vector<8x32xf32>
    %1381 = arith.maximumf %1379, %1380 : vector<8x32xf32>
    %cst_340 = arith.constant dense<0.000000e+00> : vector<8x32xf32>
    %1382 = tpu.matmul %1381, %42, %cst_340 {dimension_numbers = #tpu.dot_dimension_numbers<[1], [0], [0], [1], [0, 0, 1, 1], [], []>} : vector<8x32xf32>, vector<32x32xf32>, vector<8x32xf32> -> vector<8x32xf32>
    %1383 = arith.addf %1382, %45 : vector<8x32xf32>
    %cst_341 = arith.constant 0.000000e+00 : f32
    %1384 = vector.broadcast %cst_341 : f32 to vector<8x32xf32>
    %1385 = arith.maximumf %1383, %1384 : vector<8x32xf32>
    %cst_342 = arith.constant dense<0.000000e+00> : vector<8x8xf32>
    %1386 = tpu.matmul %1385, %46, %cst_342 {dimension_numbers = #tpu.dot_dimension_numbers<[1], [0], [0], [1], [0, 0, 1, 1], [], []>} : vector<8x32xf32>, vector<32x8xf32>, vector<8x8xf32> -> vector<8x8xf32>
    %1387 = arith.addf %1386, %49 : vector<8x8xf32>
    %cst_343 = arith.constant dense<0.000000e+00> : vector<8x96xf32>
    %1388 = tpu.matmul %1387, %0, %cst_343 {dimension_numbers = #tpu.dot_dimension_numbers<[1], [0], [0], [1], [0, 0, 1, 1], [], []>} : vector<8x8xf32>, vector<8x96xf32>, vector<8x96xf32> -> vector<8x96xf32>
    %cst_344 = arith.constant dense<0.000000e+00> : vector<8x96xf32>
    %1389 = tpu.matmul %1345, %1, %cst_344 {dimension_numbers = #tpu.dot_dimension_numbers<[1], [0], [0], [1], [0, 0, 1, 1], [], []>} : vector<8x32xf32>, vector<32x96xf32>, vector<8x96xf32> -> vector<8x96xf32>
    %1390 = vector.extract_strided_slice %1388 {offsets = [0, 0], sizes = [8, 32], strides = [1, 1]} : vector<8x96xf32> to vector<8x32xf32>
    %1391 = vector.extract_strided_slice %1389 {offsets = [0, 0], sizes = [8, 32], strides = [1, 1]} : vector<8x96xf32> to vector<8x32xf32>
    %1392 = arith.addf %1390, %1391 : vector<8x32xf32>
    %1393 = arith.addf %1392, %6 : vector<8x32xf32>
    %1394 = arith.negf %1393 : vector<8x32xf32>
    %1395 = math.exp %1394 : vector<8x32xf32>
    %cst_345 = arith.constant 1.000000e+00 : f32
    %1396 = vector.broadcast %cst_345 : f32 to vector<8x32xf32>
    %1397 = arith.addf %1396, %1395 : vector<8x32xf32>
    %1398 = arith.divf %1396, %1397 : vector<8x32xf32>
    %1399 = vector.extract_strided_slice %1388 {offsets = [0, 32], sizes = [8, 32], strides = [1, 1]} : vector<8x96xf32> to vector<8x32xf32>
    %1400 = vector.extract_strided_slice %1389 {offsets = [0, 32], sizes = [8, 32], strides = [1, 1]} : vector<8x96xf32> to vector<8x32xf32>
    %1401 = arith.addf %1399, %1400 : vector<8x32xf32>
    %1402 = arith.addf %1401, %10 : vector<8x32xf32>
    %1403 = arith.negf %1402 : vector<8x32xf32>
    %1404 = math.exp %1403 : vector<8x32xf32>
    %cst_346 = arith.constant 1.000000e+00 : f32
    %1405 = vector.broadcast %cst_346 : f32 to vector<8x32xf32>
    %1406 = arith.addf %1405, %1404 : vector<8x32xf32>
    %1407 = arith.divf %1405, %1406 : vector<8x32xf32>
    %1408 = vector.extract_strided_slice %1388 {offsets = [0, 64], sizes = [8, 32], strides = [1, 1]} : vector<8x96xf32> to vector<8x32xf32>
    %1409 = arith.addf %1408, %14 : vector<8x32xf32>
    %1410 = vector.extract_strided_slice %1389 {offsets = [0, 64], sizes = [8, 32], strides = [1, 1]} : vector<8x96xf32> to vector<8x32xf32>
    %1411 = arith.addf %1410, %18 : vector<8x32xf32>
    %1412 = arith.mulf %1398, %1411 : vector<8x32xf32>
    %1413 = arith.addf %1409, %1412 : vector<8x32xf32>
    %1414 = math.tanh %1413 : vector<8x32xf32>
    %cst_347 = arith.constant 1.000000e+00 : f32
    %1415 = vector.broadcast %cst_347 : f32 to vector<8x32xf32>
    %1416 = arith.subf %1415, %1407 : vector<8x32xf32>
    %1417 = arith.mulf %1416, %1414 : vector<8x32xf32>
    %1418 = arith.mulf %1407, %1345 : vector<8x32xf32>
    %1419 = arith.addf %1417, %1418 : vector<8x32xf32>
    %cst_348 = arith.constant dense<0.000000e+00> : vector<8x96xf32>
    %1420 = tpu.matmul %1419, %19, %cst_348 {dimension_numbers = #tpu.dot_dimension_numbers<[1], [0], [0], [1], [0, 0, 1, 1], [], []>} : vector<8x32xf32>, vector<32x96xf32>, vector<8x96xf32> -> vector<8x96xf32>
    %cst_349 = arith.constant dense<0.000000e+00> : vector<8x96xf32>
    %1421 = tpu.matmul %1377, %20, %cst_349 {dimension_numbers = #tpu.dot_dimension_numbers<[1], [0], [0], [1], [0, 0, 1, 1], [], []>} : vector<8x32xf32>, vector<32x96xf32>, vector<8x96xf32> -> vector<8x96xf32>
    %1422 = vector.extract_strided_slice %1420 {offsets = [0, 0], sizes = [8, 32], strides = [1, 1]} : vector<8x96xf32> to vector<8x32xf32>
    %1423 = vector.extract_strided_slice %1421 {offsets = [0, 0], sizes = [8, 32], strides = [1, 1]} : vector<8x96xf32> to vector<8x32xf32>
    %1424 = arith.addf %1422, %1423 : vector<8x32xf32>
    %1425 = arith.addf %1424, %25 : vector<8x32xf32>
    %1426 = arith.negf %1425 : vector<8x32xf32>
    %1427 = math.exp %1426 : vector<8x32xf32>
    %cst_350 = arith.constant 1.000000e+00 : f32
    %1428 = vector.broadcast %cst_350 : f32 to vector<8x32xf32>
    %1429 = arith.addf %1428, %1427 : vector<8x32xf32>
    %1430 = arith.divf %1428, %1429 : vector<8x32xf32>
    %1431 = vector.extract_strided_slice %1420 {offsets = [0, 32], sizes = [8, 32], strides = [1, 1]} : vector<8x96xf32> to vector<8x32xf32>
    %1432 = vector.extract_strided_slice %1421 {offsets = [0, 32], sizes = [8, 32], strides = [1, 1]} : vector<8x96xf32> to vector<8x32xf32>
    %1433 = arith.addf %1431, %1432 : vector<8x32xf32>
    %1434 = arith.addf %1433, %29 : vector<8x32xf32>
    %1435 = arith.negf %1434 : vector<8x32xf32>
    %1436 = math.exp %1435 : vector<8x32xf32>
    %cst_351 = arith.constant 1.000000e+00 : f32
    %1437 = vector.broadcast %cst_351 : f32 to vector<8x32xf32>
    %1438 = arith.addf %1437, %1436 : vector<8x32xf32>
    %1439 = arith.divf %1437, %1438 : vector<8x32xf32>
    %1440 = vector.extract_strided_slice %1420 {offsets = [0, 64], sizes = [8, 32], strides = [1, 1]} : vector<8x96xf32> to vector<8x32xf32>
    %1441 = arith.addf %1440, %33 : vector<8x32xf32>
    %1442 = vector.extract_strided_slice %1421 {offsets = [0, 64], sizes = [8, 32], strides = [1, 1]} : vector<8x96xf32> to vector<8x32xf32>
    %1443 = arith.addf %1442, %37 : vector<8x32xf32>
    %1444 = arith.mulf %1430, %1443 : vector<8x32xf32>
    %1445 = arith.addf %1441, %1444 : vector<8x32xf32>
    %1446 = math.tanh %1445 : vector<8x32xf32>
    %cst_352 = arith.constant 1.000000e+00 : f32
    %1447 = vector.broadcast %cst_352 : f32 to vector<8x32xf32>
    %1448 = arith.subf %1447, %1439 : vector<8x32xf32>
    %1449 = arith.mulf %1448, %1446 : vector<8x32xf32>
    %1450 = arith.mulf %1439, %1377 : vector<8x32xf32>
    %1451 = arith.addf %1449, %1450 : vector<8x32xf32>
    %cst_353 = arith.constant dense<0.000000e+00> : vector<8x32xf32>
    %1452 = tpu.matmul %1451, %38, %cst_353 {dimension_numbers = #tpu.dot_dimension_numbers<[1], [0], [0], [1], [0, 0, 1, 1], [], []>} : vector<8x32xf32>, vector<32x32xf32>, vector<8x32xf32> -> vector<8x32xf32>
    %1453 = arith.addf %1452, %41 : vector<8x32xf32>
    %cst_354 = arith.constant 0.000000e+00 : f32
    %1454 = vector.broadcast %cst_354 : f32 to vector<8x32xf32>
    %1455 = arith.maximumf %1453, %1454 : vector<8x32xf32>
    %cst_355 = arith.constant dense<0.000000e+00> : vector<8x32xf32>
    %1456 = tpu.matmul %1455, %42, %cst_355 {dimension_numbers = #tpu.dot_dimension_numbers<[1], [0], [0], [1], [0, 0, 1, 1], [], []>} : vector<8x32xf32>, vector<32x32xf32>, vector<8x32xf32> -> vector<8x32xf32>
    %1457 = arith.addf %1456, %45 : vector<8x32xf32>
    %cst_356 = arith.constant 0.000000e+00 : f32
    %1458 = vector.broadcast %cst_356 : f32 to vector<8x32xf32>
    %1459 = arith.maximumf %1457, %1458 : vector<8x32xf32>
    %cst_357 = arith.constant dense<0.000000e+00> : vector<8x8xf32>
    %1460 = tpu.matmul %1459, %46, %cst_357 {dimension_numbers = #tpu.dot_dimension_numbers<[1], [0], [0], [1], [0, 0, 1, 1], [], []>} : vector<8x32xf32>, vector<32x8xf32>, vector<8x8xf32> -> vector<8x8xf32>
    %1461 = arith.addf %1460, %49 : vector<8x8xf32>
    %cst_358 = arith.constant dense<0.000000e+00> : vector<8x96xf32>
    %1462 = tpu.matmul %1461, %0, %cst_358 {dimension_numbers = #tpu.dot_dimension_numbers<[1], [0], [0], [1], [0, 0, 1, 1], [], []>} : vector<8x8xf32>, vector<8x96xf32>, vector<8x96xf32> -> vector<8x96xf32>
    %cst_359 = arith.constant dense<0.000000e+00> : vector<8x96xf32>
    %1463 = tpu.matmul %1419, %1, %cst_359 {dimension_numbers = #tpu.dot_dimension_numbers<[1], [0], [0], [1], [0, 0, 1, 1], [], []>} : vector<8x32xf32>, vector<32x96xf32>, vector<8x96xf32> -> vector<8x96xf32>
    %1464 = vector.extract_strided_slice %1462 {offsets = [0, 0], sizes = [8, 32], strides = [1, 1]} : vector<8x96xf32> to vector<8x32xf32>
    %1465 = vector.extract_strided_slice %1463 {offsets = [0, 0], sizes = [8, 32], strides = [1, 1]} : vector<8x96xf32> to vector<8x32xf32>
    %1466 = arith.addf %1464, %1465 : vector<8x32xf32>
    %1467 = arith.addf %1466, %6 : vector<8x32xf32>
    %1468 = arith.negf %1467 : vector<8x32xf32>
    %1469 = math.exp %1468 : vector<8x32xf32>
    %cst_360 = arith.constant 1.000000e+00 : f32
    %1470 = vector.broadcast %cst_360 : f32 to vector<8x32xf32>
    %1471 = arith.addf %1470, %1469 : vector<8x32xf32>
    %1472 = arith.divf %1470, %1471 : vector<8x32xf32>
    %1473 = vector.extract_strided_slice %1462 {offsets = [0, 32], sizes = [8, 32], strides = [1, 1]} : vector<8x96xf32> to vector<8x32xf32>
    %1474 = vector.extract_strided_slice %1463 {offsets = [0, 32], sizes = [8, 32], strides = [1, 1]} : vector<8x96xf32> to vector<8x32xf32>
    %1475 = arith.addf %1473, %1474 : vector<8x32xf32>
    %1476 = arith.addf %1475, %10 : vector<8x32xf32>
    %1477 = arith.negf %1476 : vector<8x32xf32>
    %1478 = math.exp %1477 : vector<8x32xf32>
    %cst_361 = arith.constant 1.000000e+00 : f32
    %1479 = vector.broadcast %cst_361 : f32 to vector<8x32xf32>
    %1480 = arith.addf %1479, %1478 : vector<8x32xf32>
    %1481 = arith.divf %1479, %1480 : vector<8x32xf32>
    %1482 = vector.extract_strided_slice %1462 {offsets = [0, 64], sizes = [8, 32], strides = [1, 1]} : vector<8x96xf32> to vector<8x32xf32>
    %1483 = arith.addf %1482, %14 : vector<8x32xf32>
    %1484 = vector.extract_strided_slice %1463 {offsets = [0, 64], sizes = [8, 32], strides = [1, 1]} : vector<8x96xf32> to vector<8x32xf32>
    %1485 = arith.addf %1484, %18 : vector<8x32xf32>
    %1486 = arith.mulf %1472, %1485 : vector<8x32xf32>
    %1487 = arith.addf %1483, %1486 : vector<8x32xf32>
    %1488 = math.tanh %1487 : vector<8x32xf32>
    %cst_362 = arith.constant 1.000000e+00 : f32
    %1489 = vector.broadcast %cst_362 : f32 to vector<8x32xf32>
    %1490 = arith.subf %1489, %1481 : vector<8x32xf32>
    %1491 = arith.mulf %1490, %1488 : vector<8x32xf32>
    %1492 = arith.mulf %1481, %1419 : vector<8x32xf32>
    %1493 = arith.addf %1491, %1492 : vector<8x32xf32>
    %cst_363 = arith.constant dense<0.000000e+00> : vector<8x96xf32>
    %1494 = tpu.matmul %1493, %19, %cst_363 {dimension_numbers = #tpu.dot_dimension_numbers<[1], [0], [0], [1], [0, 0, 1, 1], [], []>} : vector<8x32xf32>, vector<32x96xf32>, vector<8x96xf32> -> vector<8x96xf32>
    %cst_364 = arith.constant dense<0.000000e+00> : vector<8x96xf32>
    %1495 = tpu.matmul %1451, %20, %cst_364 {dimension_numbers = #tpu.dot_dimension_numbers<[1], [0], [0], [1], [0, 0, 1, 1], [], []>} : vector<8x32xf32>, vector<32x96xf32>, vector<8x96xf32> -> vector<8x96xf32>
    %1496 = vector.extract_strided_slice %1494 {offsets = [0, 0], sizes = [8, 32], strides = [1, 1]} : vector<8x96xf32> to vector<8x32xf32>
    %1497 = vector.extract_strided_slice %1495 {offsets = [0, 0], sizes = [8, 32], strides = [1, 1]} : vector<8x96xf32> to vector<8x32xf32>
    %1498 = arith.addf %1496, %1497 : vector<8x32xf32>
    %1499 = arith.addf %1498, %25 : vector<8x32xf32>
    %1500 = arith.negf %1499 : vector<8x32xf32>
    %1501 = math.exp %1500 : vector<8x32xf32>
    %cst_365 = arith.constant 1.000000e+00 : f32
    %1502 = vector.broadcast %cst_365 : f32 to vector<8x32xf32>
    %1503 = arith.addf %1502, %1501 : vector<8x32xf32>
    %1504 = arith.divf %1502, %1503 : vector<8x32xf32>
    %1505 = vector.extract_strided_slice %1494 {offsets = [0, 32], sizes = [8, 32], strides = [1, 1]} : vector<8x96xf32> to vector<8x32xf32>
    %1506 = vector.extract_strided_slice %1495 {offsets = [0, 32], sizes = [8, 32], strides = [1, 1]} : vector<8x96xf32> to vector<8x32xf32>
    %1507 = arith.addf %1505, %1506 : vector<8x32xf32>
    %1508 = arith.addf %1507, %29 : vector<8x32xf32>
    %1509 = arith.negf %1508 : vector<8x32xf32>
    %1510 = math.exp %1509 : vector<8x32xf32>
    %cst_366 = arith.constant 1.000000e+00 : f32
    %1511 = vector.broadcast %cst_366 : f32 to vector<8x32xf32>
    %1512 = arith.addf %1511, %1510 : vector<8x32xf32>
    %1513 = arith.divf %1511, %1512 : vector<8x32xf32>
    %1514 = vector.extract_strided_slice %1494 {offsets = [0, 64], sizes = [8, 32], strides = [1, 1]} : vector<8x96xf32> to vector<8x32xf32>
    %1515 = arith.addf %1514, %33 : vector<8x32xf32>
    %1516 = vector.extract_strided_slice %1495 {offsets = [0, 64], sizes = [8, 32], strides = [1, 1]} : vector<8x96xf32> to vector<8x32xf32>
    %1517 = arith.addf %1516, %37 : vector<8x32xf32>
    %1518 = arith.mulf %1504, %1517 : vector<8x32xf32>
    %1519 = arith.addf %1515, %1518 : vector<8x32xf32>
    %1520 = math.tanh %1519 : vector<8x32xf32>
    %cst_367 = arith.constant 1.000000e+00 : f32
    %1521 = vector.broadcast %cst_367 : f32 to vector<8x32xf32>
    %1522 = arith.subf %1521, %1513 : vector<8x32xf32>
    %1523 = arith.mulf %1522, %1520 : vector<8x32xf32>
    %1524 = arith.mulf %1513, %1451 : vector<8x32xf32>
    %1525 = arith.addf %1523, %1524 : vector<8x32xf32>
    %cst_368 = arith.constant dense<0.000000e+00> : vector<8x32xf32>
    %1526 = tpu.matmul %1525, %38, %cst_368 {dimension_numbers = #tpu.dot_dimension_numbers<[1], [0], [0], [1], [0, 0, 1, 1], [], []>} : vector<8x32xf32>, vector<32x32xf32>, vector<8x32xf32> -> vector<8x32xf32>
    %1527 = arith.addf %1526, %41 : vector<8x32xf32>
    %cst_369 = arith.constant 0.000000e+00 : f32
    %1528 = vector.broadcast %cst_369 : f32 to vector<8x32xf32>
    %1529 = arith.maximumf %1527, %1528 : vector<8x32xf32>
    %cst_370 = arith.constant dense<0.000000e+00> : vector<8x32xf32>
    %1530 = tpu.matmul %1529, %42, %cst_370 {dimension_numbers = #tpu.dot_dimension_numbers<[1], [0], [0], [1], [0, 0, 1, 1], [], []>} : vector<8x32xf32>, vector<32x32xf32>, vector<8x32xf32> -> vector<8x32xf32>
    %1531 = arith.addf %1530, %45 : vector<8x32xf32>
    %cst_371 = arith.constant 0.000000e+00 : f32
    %1532 = vector.broadcast %cst_371 : f32 to vector<8x32xf32>
    %1533 = arith.maximumf %1531, %1532 : vector<8x32xf32>
    %cst_372 = arith.constant dense<0.000000e+00> : vector<8x8xf32>
    %1534 = tpu.matmul %1533, %46, %cst_372 {dimension_numbers = #tpu.dot_dimension_numbers<[1], [0], [0], [1], [0, 0, 1, 1], [], []>} : vector<8x32xf32>, vector<32x8xf32>, vector<8x8xf32> -> vector<8x8xf32>
    %1535 = arith.addf %1534, %49 : vector<8x8xf32>
    %1536 = tpu.concatenate %1313, %1387, %1461, %1535 in 1 : vector<8x8xf32>, vector<8x8xf32>, vector<8x8xf32>, vector<8x8xf32> -> vector<8x32xf32>
    %1537 = arith.index_cast %c5_i32 : i32 to index
    %c0_373 = arith.constant 0 : index
    %c0_374 = arith.constant 0 : index
    %1538 = vector.load %arg22[%1537, %c0_373, %c0_374] : memref<8x8x32xf32, #tpu.memory_space<vmem>>, vector<1x8x32xf32>
    %1539 = vector.shape_cast %1538 : vector<1x8x32xf32> to vector<8x32xf32>
    %1540 = vector.shape_cast %1536 : vector<8x32xf32> to vector<1x8x32xf32>
    tpu.vector_store %arg22[%1537, %c0_373, %c0_374], %1540 {strides = array<i32>} : memref<8x8x32xf32, #tpu.memory_space<vmem>>, vector<1x8x32xf32>,
    %c6_i32 = arith.constant 6 : i32
    %1541 = arith.index_cast %c6_i32 : i32 to index
    %c0_375 = arith.constant 0 : index
    %c0_376 = arith.constant 0 : index
    %1542 = vector.load %arg2[%1541, %c0_375, %c0_376] : memref<8x8x8xf32, #tpu.memory_space<vmem>>, vector<1x8x8xf32>
    %1543 = vector.shape_cast %1542 : vector<1x8x8xf32> to vector<8x8xf32>
    %1544 = vector.extract_strided_slice %1543 {offsets = [0, 0], sizes = [8, 4], strides = [1, 1]} : vector<8x8xf32> to vector<8x4xf32>
    %cst_377 = arith.constant dense<0.000000e+00> : vector<8x32xf32>
    %1545 = tpu.matmul %1544, %50, %cst_377 {dimension_numbers = #tpu.dot_dimension_numbers<[1], [0], [0], [1], [0, 0, 1, 1], [], []>} : vector<8x4xf32>, vector<4x32xf32>, vector<8x32xf32> -> vector<8x32xf32>
    %cst_378 = arith.constant dense<0.000000e+00> : vector<8x32xf32>
    %1546 = tpu.matmul %1387, %51, %cst_378 {dimension_numbers = #tpu.dot_dimension_numbers<[1], [0], [0], [1], [0, 0, 1, 1], [], []>} : vector<8x8xf32>, vector<8x32xf32>, vector<8x32xf32> -> vector<8x32xf32>
    %1547 = arith.addf %1545, %1546 : vector<8x32xf32>
    %1548 = arith.addf %1547, %54 : vector<8x32xf32>
    %cst_379 = arith.constant 0.000000e+00 : f32
    %1549 = vector.broadcast %cst_379 : f32 to vector<8x32xf32>
    %1550 = arith.maximumf %1548, %1549 : vector<8x32xf32>
    %cst_380 = arith.constant dense<0.000000e+00> : vector<8x32xf32>
    %1551 = tpu.matmul %1550, %55, %cst_380 {dimension_numbers = #tpu.dot_dimension_numbers<[1], [0], [0], [1], [0, 0, 1, 1], [], []>} : vector<8x32xf32>, vector<32x32xf32>, vector<8x32xf32> -> vector<8x32xf32>
    %1552 = arith.addf %1551, %58 : vector<8x32xf32>
    %cst_381 = arith.constant 0.000000e+00 : f32
    %1553 = vector.broadcast %cst_381 : f32 to vector<8x32xf32>
    %1554 = arith.maximumf %1552, %1553 : vector<8x32xf32>
    %cst_382 = arith.constant dense<0.000000e+00> : vector<8x4xf32>
    %1555 = tpu.matmul %1554, %59, %cst_382 {dimension_numbers = #tpu.dot_dimension_numbers<[1], [0], [0], [1], [0, 0, 1, 1], [], []>} : vector<8x32xf32>, vector<32x4xf32>, vector<8x4xf32> -> vector<8x4xf32>
    %1556 = arith.addf %1555, %62 : vector<8x4xf32>
    %1557 = vector.extract_strided_slice %1543 {offsets = [0, 4], sizes = [8, 4], strides = [1, 1]} : vector<8x8xf32> to vector<8x4xf32>
    %1558 = tpu.concatenate %1556, %1557 in 1 : vector<8x4xf32>, vector<8x4xf32> -> vector<8x8xf32>
    %cst_383 = arith.constant dense<0.000000e+00> : vector<8x96xf32>
    %1559 = tpu.matmul %1558, %0, %cst_383 {dimension_numbers = #tpu.dot_dimension_numbers<[1], [0], [0], [1], [0, 0, 1, 1], [], []>} : vector<8x8xf32>, vector<8x96xf32>, vector<8x96xf32> -> vector<8x96xf32>
    %cst_384 = arith.constant dense<0.000000e+00> : vector<8x96xf32>
    %1560 = tpu.matmul %1345, %1, %cst_384 {dimension_numbers = #tpu.dot_dimension_numbers<[1], [0], [0], [1], [0, 0, 1, 1], [], []>} : vector<8x32xf32>, vector<32x96xf32>, vector<8x96xf32> -> vector<8x96xf32>
    %1561 = vector.extract_strided_slice %1559 {offsets = [0, 0], sizes = [8, 32], strides = [1, 1]} : vector<8x96xf32> to vector<8x32xf32>
    %1562 = vector.extract_strided_slice %1560 {offsets = [0, 0], sizes = [8, 32], strides = [1, 1]} : vector<8x96xf32> to vector<8x32xf32>
    %1563 = arith.addf %1561, %1562 : vector<8x32xf32>
    %1564 = arith.addf %1563, %6 : vector<8x32xf32>
    %1565 = arith.negf %1564 : vector<8x32xf32>
    %1566 = math.exp %1565 : vector<8x32xf32>
    %cst_385 = arith.constant 1.000000e+00 : f32
    %1567 = vector.broadcast %cst_385 : f32 to vector<8x32xf32>
    %1568 = arith.addf %1567, %1566 : vector<8x32xf32>
    %1569 = arith.divf %1567, %1568 : vector<8x32xf32>
    %1570 = vector.extract_strided_slice %1559 {offsets = [0, 32], sizes = [8, 32], strides = [1, 1]} : vector<8x96xf32> to vector<8x32xf32>
    %1571 = vector.extract_strided_slice %1560 {offsets = [0, 32], sizes = [8, 32], strides = [1, 1]} : vector<8x96xf32> to vector<8x32xf32>
    %1572 = arith.addf %1570, %1571 : vector<8x32xf32>
    %1573 = arith.addf %1572, %10 : vector<8x32xf32>
    %1574 = arith.negf %1573 : vector<8x32xf32>
    %1575 = math.exp %1574 : vector<8x32xf32>
    %cst_386 = arith.constant 1.000000e+00 : f32
    %1576 = vector.broadcast %cst_386 : f32 to vector<8x32xf32>
    %1577 = arith.addf %1576, %1575 : vector<8x32xf32>
    %1578 = arith.divf %1576, %1577 : vector<8x32xf32>
    %1579 = vector.extract_strided_slice %1559 {offsets = [0, 64], sizes = [8, 32], strides = [1, 1]} : vector<8x96xf32> to vector<8x32xf32>
    %1580 = arith.addf %1579, %14 : vector<8x32xf32>
    %1581 = vector.extract_strided_slice %1560 {offsets = [0, 64], sizes = [8, 32], strides = [1, 1]} : vector<8x96xf32> to vector<8x32xf32>
    %1582 = arith.addf %1581, %18 : vector<8x32xf32>
    %1583 = arith.mulf %1569, %1582 : vector<8x32xf32>
    %1584 = arith.addf %1580, %1583 : vector<8x32xf32>
    %1585 = math.tanh %1584 : vector<8x32xf32>
    %cst_387 = arith.constant 1.000000e+00 : f32
    %1586 = vector.broadcast %cst_387 : f32 to vector<8x32xf32>
    %1587 = arith.subf %1586, %1578 : vector<8x32xf32>
    %1588 = arith.mulf %1587, %1585 : vector<8x32xf32>
    %1589 = arith.mulf %1578, %1345 : vector<8x32xf32>
    %1590 = arith.addf %1588, %1589 : vector<8x32xf32>
    %cst_388 = arith.constant dense<0.000000e+00> : vector<8x96xf32>
    %1591 = tpu.matmul %1590, %19, %cst_388 {dimension_numbers = #tpu.dot_dimension_numbers<[1], [0], [0], [1], [0, 0, 1, 1], [], []>} : vector<8x32xf32>, vector<32x96xf32>, vector<8x96xf32> -> vector<8x96xf32>
    %cst_389 = arith.constant dense<0.000000e+00> : vector<8x96xf32>
    %1592 = tpu.matmul %1377, %20, %cst_389 {dimension_numbers = #tpu.dot_dimension_numbers<[1], [0], [0], [1], [0, 0, 1, 1], [], []>} : vector<8x32xf32>, vector<32x96xf32>, vector<8x96xf32> -> vector<8x96xf32>
    %1593 = vector.extract_strided_slice %1591 {offsets = [0, 0], sizes = [8, 32], strides = [1, 1]} : vector<8x96xf32> to vector<8x32xf32>
    %1594 = vector.extract_strided_slice %1592 {offsets = [0, 0], sizes = [8, 32], strides = [1, 1]} : vector<8x96xf32> to vector<8x32xf32>
    %1595 = arith.addf %1593, %1594 : vector<8x32xf32>
    %1596 = arith.addf %1595, %25 : vector<8x32xf32>
    %1597 = arith.negf %1596 : vector<8x32xf32>
    %1598 = math.exp %1597 : vector<8x32xf32>
    %cst_390 = arith.constant 1.000000e+00 : f32
    %1599 = vector.broadcast %cst_390 : f32 to vector<8x32xf32>
    %1600 = arith.addf %1599, %1598 : vector<8x32xf32>
    %1601 = arith.divf %1599, %1600 : vector<8x32xf32>
    %1602 = vector.extract_strided_slice %1591 {offsets = [0, 32], sizes = [8, 32], strides = [1, 1]} : vector<8x96xf32> to vector<8x32xf32>
    %1603 = vector.extract_strided_slice %1592 {offsets = [0, 32], sizes = [8, 32], strides = [1, 1]} : vector<8x96xf32> to vector<8x32xf32>
    %1604 = arith.addf %1602, %1603 : vector<8x32xf32>
    %1605 = arith.addf %1604, %29 : vector<8x32xf32>
    %1606 = arith.negf %1605 : vector<8x32xf32>
    %1607 = math.exp %1606 : vector<8x32xf32>
    %cst_391 = arith.constant 1.000000e+00 : f32
    %1608 = vector.broadcast %cst_391 : f32 to vector<8x32xf32>
    %1609 = arith.addf %1608, %1607 : vector<8x32xf32>
    %1610 = arith.divf %1608, %1609 : vector<8x32xf32>
    %1611 = vector.extract_strided_slice %1591 {offsets = [0, 64], sizes = [8, 32], strides = [1, 1]} : vector<8x96xf32> to vector<8x32xf32>
    %1612 = arith.addf %1611, %33 : vector<8x32xf32>
    %1613 = vector.extract_strided_slice %1592 {offsets = [0, 64], sizes = [8, 32], strides = [1, 1]} : vector<8x96xf32> to vector<8x32xf32>
    %1614 = arith.addf %1613, %37 : vector<8x32xf32>
    %1615 = arith.mulf %1601, %1614 : vector<8x32xf32>
    %1616 = arith.addf %1612, %1615 : vector<8x32xf32>
    %1617 = math.tanh %1616 : vector<8x32xf32>
    %cst_392 = arith.constant 1.000000e+00 : f32
    %1618 = vector.broadcast %cst_392 : f32 to vector<8x32xf32>
    %1619 = arith.subf %1618, %1610 : vector<8x32xf32>
    %1620 = arith.mulf %1619, %1617 : vector<8x32xf32>
    %1621 = arith.mulf %1610, %1377 : vector<8x32xf32>
    %1622 = arith.addf %1620, %1621 : vector<8x32xf32>
    %cst_393 = arith.constant dense<0.000000e+00> : vector<8x32xf32>
    %1623 = tpu.matmul %1622, %38, %cst_393 {dimension_numbers = #tpu.dot_dimension_numbers<[1], [0], [0], [1], [0, 0, 1, 1], [], []>} : vector<8x32xf32>, vector<32x32xf32>, vector<8x32xf32> -> vector<8x32xf32>
    %1624 = arith.addf %1623, %41 : vector<8x32xf32>
    %cst_394 = arith.constant 0.000000e+00 : f32
    %1625 = vector.broadcast %cst_394 : f32 to vector<8x32xf32>
    %1626 = arith.maximumf %1624, %1625 : vector<8x32xf32>
    %cst_395 = arith.constant dense<0.000000e+00> : vector<8x32xf32>
    %1627 = tpu.matmul %1626, %42, %cst_395 {dimension_numbers = #tpu.dot_dimension_numbers<[1], [0], [0], [1], [0, 0, 1, 1], [], []>} : vector<8x32xf32>, vector<32x32xf32>, vector<8x32xf32> -> vector<8x32xf32>
    %1628 = arith.addf %1627, %45 : vector<8x32xf32>
    %cst_396 = arith.constant 0.000000e+00 : f32
    %1629 = vector.broadcast %cst_396 : f32 to vector<8x32xf32>
    %1630 = arith.maximumf %1628, %1629 : vector<8x32xf32>
    %cst_397 = arith.constant dense<0.000000e+00> : vector<8x8xf32>
    %1631 = tpu.matmul %1630, %46, %cst_397 {dimension_numbers = #tpu.dot_dimension_numbers<[1], [0], [0], [1], [0, 0, 1, 1], [], []>} : vector<8x32xf32>, vector<32x8xf32>, vector<8x8xf32> -> vector<8x8xf32>
    %1632 = arith.addf %1631, %49 : vector<8x8xf32>
    %cst_398 = arith.constant dense<0.000000e+00> : vector<8x96xf32>
    %1633 = tpu.matmul %1632, %0, %cst_398 {dimension_numbers = #tpu.dot_dimension_numbers<[1], [0], [0], [1], [0, 0, 1, 1], [], []>} : vector<8x8xf32>, vector<8x96xf32>, vector<8x96xf32> -> vector<8x96xf32>
    %cst_399 = arith.constant dense<0.000000e+00> : vector<8x96xf32>
    %1634 = tpu.matmul %1590, %1, %cst_399 {dimension_numbers = #tpu.dot_dimension_numbers<[1], [0], [0], [1], [0, 0, 1, 1], [], []>} : vector<8x32xf32>, vector<32x96xf32>, vector<8x96xf32> -> vector<8x96xf32>
    %1635 = vector.extract_strided_slice %1633 {offsets = [0, 0], sizes = [8, 32], strides = [1, 1]} : vector<8x96xf32> to vector<8x32xf32>
    %1636 = vector.extract_strided_slice %1634 {offsets = [0, 0], sizes = [8, 32], strides = [1, 1]} : vector<8x96xf32> to vector<8x32xf32>
    %1637 = arith.addf %1635, %1636 : vector<8x32xf32>
    %1638 = arith.addf %1637, %6 : vector<8x32xf32>
    %1639 = arith.negf %1638 : vector<8x32xf32>
    %1640 = math.exp %1639 : vector<8x32xf32>
    %cst_400 = arith.constant 1.000000e+00 : f32
    %1641 = vector.broadcast %cst_400 : f32 to vector<8x32xf32>
    %1642 = arith.addf %1641, %1640 : vector<8x32xf32>
    %1643 = arith.divf %1641, %1642 : vector<8x32xf32>
    %1644 = vector.extract_strided_slice %1633 {offsets = [0, 32], sizes = [8, 32], strides = [1, 1]} : vector<8x96xf32> to vector<8x32xf32>
    %1645 = vector.extract_strided_slice %1634 {offsets = [0, 32], sizes = [8, 32], strides = [1, 1]} : vector<8x96xf32> to vector<8x32xf32>
    %1646 = arith.addf %1644, %1645 : vector<8x32xf32>
    %1647 = arith.addf %1646, %10 : vector<8x32xf32>
    %1648 = arith.negf %1647 : vector<8x32xf32>
    %1649 = math.exp %1648 : vector<8x32xf32>
    %cst_401 = arith.constant 1.000000e+00 : f32
    %1650 = vector.broadcast %cst_401 : f32 to vector<8x32xf32>
    %1651 = arith.addf %1650, %1649 : vector<8x32xf32>
    %1652 = arith.divf %1650, %1651 : vector<8x32xf32>
    %1653 = vector.extract_strided_slice %1633 {offsets = [0, 64], sizes = [8, 32], strides = [1, 1]} : vector<8x96xf32> to vector<8x32xf32>
    %1654 = arith.addf %1653, %14 : vector<8x32xf32>
    %1655 = vector.extract_strided_slice %1634 {offsets = [0, 64], sizes = [8, 32], strides = [1, 1]} : vector<8x96xf32> to vector<8x32xf32>
    %1656 = arith.addf %1655, %18 : vector<8x32xf32>
    %1657 = arith.mulf %1643, %1656 : vector<8x32xf32>
    %1658 = arith.addf %1654, %1657 : vector<8x32xf32>
    %1659 = math.tanh %1658 : vector<8x32xf32>
    %cst_402 = arith.constant 1.000000e+00 : f32
    %1660 = vector.broadcast %cst_402 : f32 to vector<8x32xf32>
    %1661 = arith.subf %1660, %1652 : vector<8x32xf32>
    %1662 = arith.mulf %1661, %1659 : vector<8x32xf32>
    %1663 = arith.mulf %1652, %1590 : vector<8x32xf32>
    %1664 = arith.addf %1662, %1663 : vector<8x32xf32>
    %cst_403 = arith.constant dense<0.000000e+00> : vector<8x96xf32>
    %1665 = tpu.matmul %1664, %19, %cst_403 {dimension_numbers = #tpu.dot_dimension_numbers<[1], [0], [0], [1], [0, 0, 1, 1], [], []>} : vector<8x32xf32>, vector<32x96xf32>, vector<8x96xf32> -> vector<8x96xf32>
    %cst_404 = arith.constant dense<0.000000e+00> : vector<8x96xf32>
    %1666 = tpu.matmul %1622, %20, %cst_404 {dimension_numbers = #tpu.dot_dimension_numbers<[1], [0], [0], [1], [0, 0, 1, 1], [], []>} : vector<8x32xf32>, vector<32x96xf32>, vector<8x96xf32> -> vector<8x96xf32>
    %1667 = vector.extract_strided_slice %1665 {offsets = [0, 0], sizes = [8, 32], strides = [1, 1]} : vector<8x96xf32> to vector<8x32xf32>
    %1668 = vector.extract_strided_slice %1666 {offsets = [0, 0], sizes = [8, 32], strides = [1, 1]} : vector<8x96xf32> to vector<8x32xf32>
    %1669 = arith.addf %1667, %1668 : vector<8x32xf32>
    %1670 = arith.addf %1669, %25 : vector<8x32xf32>
    %1671 = arith.negf %1670 : vector<8x32xf32>
    %1672 = math.exp %1671 : vector<8x32xf32>
    %cst_405 = arith.constant 1.000000e+00 : f32
    %1673 = vector.broadcast %cst_405 : f32 to vector<8x32xf32>
    %1674 = arith.addf %1673, %1672 : vector<8x32xf32>
    %1675 = arith.divf %1673, %1674 : vector<8x32xf32>
    %1676 = vector.extract_strided_slice %1665 {offsets = [0, 32], sizes = [8, 32], strides = [1, 1]} : vector<8x96xf32> to vector<8x32xf32>
    %1677 = vector.extract_strided_slice %1666 {offsets = [0, 32], sizes = [8, 32], strides = [1, 1]} : vector<8x96xf32> to vector<8x32xf32>
    %1678 = arith.addf %1676, %1677 : vector<8x32xf32>
    %1679 = arith.addf %1678, %29 : vector<8x32xf32>
    %1680 = arith.negf %1679 : vector<8x32xf32>
    %1681 = math.exp %1680 : vector<8x32xf32>
    %cst_406 = arith.constant 1.000000e+00 : f32
    %1682 = vector.broadcast %cst_406 : f32 to vector<8x32xf32>
    %1683 = arith.addf %1682, %1681 : vector<8x32xf32>
    %1684 = arith.divf %1682, %1683 : vector<8x32xf32>
    %1685 = vector.extract_strided_slice %1665 {offsets = [0, 64], sizes = [8, 32], strides = [1, 1]} : vector<8x96xf32> to vector<8x32xf32>
    %1686 = arith.addf %1685, %33 : vector<8x32xf32>
    %1687 = vector.extract_strided_slice %1666 {offsets = [0, 64], sizes = [8, 32], strides = [1, 1]} : vector<8x96xf32> to vector<8x32xf32>
    %1688 = arith.addf %1687, %37 : vector<8x32xf32>
    %1689 = arith.mulf %1675, %1688 : vector<8x32xf32>
    %1690 = arith.addf %1686, %1689 : vector<8x32xf32>
    %1691 = math.tanh %1690 : vector<8x32xf32>
    %cst_407 = arith.constant 1.000000e+00 : f32
    %1692 = vector.broadcast %cst_407 : f32 to vector<8x32xf32>
    %1693 = arith.subf %1692, %1684 : vector<8x32xf32>
    %1694 = arith.mulf %1693, %1691 : vector<8x32xf32>
    %1695 = arith.mulf %1684, %1622 : vector<8x32xf32>
    %1696 = arith.addf %1694, %1695 : vector<8x32xf32>
    %cst_408 = arith.constant dense<0.000000e+00> : vector<8x32xf32>
    %1697 = tpu.matmul %1696, %38, %cst_408 {dimension_numbers = #tpu.dot_dimension_numbers<[1], [0], [0], [1], [0, 0, 1, 1], [], []>} : vector<8x32xf32>, vector<32x32xf32>, vector<8x32xf32> -> vector<8x32xf32>
    %1698 = arith.addf %1697, %41 : vector<8x32xf32>
    %cst_409 = arith.constant 0.000000e+00 : f32
    %1699 = vector.broadcast %cst_409 : f32 to vector<8x32xf32>
    %1700 = arith.maximumf %1698, %1699 : vector<8x32xf32>
    %cst_410 = arith.constant dense<0.000000e+00> : vector<8x32xf32>
    %1701 = tpu.matmul %1700, %42, %cst_410 {dimension_numbers = #tpu.dot_dimension_numbers<[1], [0], [0], [1], [0, 0, 1, 1], [], []>} : vector<8x32xf32>, vector<32x32xf32>, vector<8x32xf32> -> vector<8x32xf32>
    %1702 = arith.addf %1701, %45 : vector<8x32xf32>
    %cst_411 = arith.constant 0.000000e+00 : f32
    %1703 = vector.broadcast %cst_411 : f32 to vector<8x32xf32>
    %1704 = arith.maximumf %1702, %1703 : vector<8x32xf32>
    %cst_412 = arith.constant dense<0.000000e+00> : vector<8x8xf32>
    %1705 = tpu.matmul %1704, %46, %cst_412 {dimension_numbers = #tpu.dot_dimension_numbers<[1], [0], [0], [1], [0, 0, 1, 1], [], []>} : vector<8x32xf32>, vector<32x8xf32>, vector<8x8xf32> -> vector<8x8xf32>
    %1706 = arith.addf %1705, %49 : vector<8x8xf32>
    %cst_413 = arith.constant dense<0.000000e+00> : vector<8x96xf32>
    %1707 = tpu.matmul %1706, %0, %cst_413 {dimension_numbers = #tpu.dot_dimension_numbers<[1], [0], [0], [1], [0, 0, 1, 1], [], []>} : vector<8x8xf32>, vector<8x96xf32>, vector<8x96xf32> -> vector<8x96xf32>
    %cst_414 = arith.constant dense<0.000000e+00> : vector<8x96xf32>
    %1708 = tpu.matmul %1664, %1, %cst_414 {dimension_numbers = #tpu.dot_dimension_numbers<[1], [0], [0], [1], [0, 0, 1, 1], [], []>} : vector<8x32xf32>, vector<32x96xf32>, vector<8x96xf32> -> vector<8x96xf32>
    %1709 = vector.extract_strided_slice %1707 {offsets = [0, 0], sizes = [8, 32], strides = [1, 1]} : vector<8x96xf32> to vector<8x32xf32>
    %1710 = vector.extract_strided_slice %1708 {offsets = [0, 0], sizes = [8, 32], strides = [1, 1]} : vector<8x96xf32> to vector<8x32xf32>
    %1711 = arith.addf %1709, %1710 : vector<8x32xf32>
    %1712 = arith.addf %1711, %6 : vector<8x32xf32>
    %1713 = arith.negf %1712 : vector<8x32xf32>
    %1714 = math.exp %1713 : vector<8x32xf32>
    %cst_415 = arith.constant 1.000000e+00 : f32
    %1715 = vector.broadcast %cst_415 : f32 to vector<8x32xf32>
    %1716 = arith.addf %1715, %1714 : vector<8x32xf32>
    %1717 = arith.divf %1715, %1716 : vector<8x32xf32>
    %1718 = vector.extract_strided_slice %1707 {offsets = [0, 32], sizes = [8, 32], strides = [1, 1]} : vector<8x96xf32> to vector<8x32xf32>
    %1719 = vector.extract_strided_slice %1708 {offsets = [0, 32], sizes = [8, 32], strides = [1, 1]} : vector<8x96xf32> to vector<8x32xf32>
    %1720 = arith.addf %1718, %1719 : vector<8x32xf32>
    %1721 = arith.addf %1720, %10 : vector<8x32xf32>
    %1722 = arith.negf %1721 : vector<8x32xf32>
    %1723 = math.exp %1722 : vector<8x32xf32>
    %cst_416 = arith.constant 1.000000e+00 : f32
    %1724 = vector.broadcast %cst_416 : f32 to vector<8x32xf32>
    %1725 = arith.addf %1724, %1723 : vector<8x32xf32>
    %1726 = arith.divf %1724, %1725 : vector<8x32xf32>
    %1727 = vector.extract_strided_slice %1707 {offsets = [0, 64], sizes = [8, 32], strides = [1, 1]} : vector<8x96xf32> to vector<8x32xf32>
    %1728 = arith.addf %1727, %14 : vector<8x32xf32>
    %1729 = vector.extract_strided_slice %1708 {offsets = [0, 64], sizes = [8, 32], strides = [1, 1]} : vector<8x96xf32> to vector<8x32xf32>
    %1730 = arith.addf %1729, %18 : vector<8x32xf32>
    %1731 = arith.mulf %1717, %1730 : vector<8x32xf32>
    %1732 = arith.addf %1728, %1731 : vector<8x32xf32>
    %1733 = math.tanh %1732 : vector<8x32xf32>
    %cst_417 = arith.constant 1.000000e+00 : f32
    %1734 = vector.broadcast %cst_417 : f32 to vector<8x32xf32>
    %1735 = arith.subf %1734, %1726 : vector<8x32xf32>
    %1736 = arith.mulf %1735, %1733 : vector<8x32xf32>
    %1737 = arith.mulf %1726, %1664 : vector<8x32xf32>
    %1738 = arith.addf %1736, %1737 : vector<8x32xf32>
    %cst_418 = arith.constant dense<0.000000e+00> : vector<8x96xf32>
    %1739 = tpu.matmul %1738, %19, %cst_418 {dimension_numbers = #tpu.dot_dimension_numbers<[1], [0], [0], [1], [0, 0, 1, 1], [], []>} : vector<8x32xf32>, vector<32x96xf32>, vector<8x96xf32> -> vector<8x96xf32>
    %cst_419 = arith.constant dense<0.000000e+00> : vector<8x96xf32>
    %1740 = tpu.matmul %1696, %20, %cst_419 {dimension_numbers = #tpu.dot_dimension_numbers<[1], [0], [0], [1], [0, 0, 1, 1], [], []>} : vector<8x32xf32>, vector<32x96xf32>, vector<8x96xf32> -> vector<8x96xf32>
    %1741 = vector.extract_strided_slice %1739 {offsets = [0, 0], sizes = [8, 32], strides = [1, 1]} : vector<8x96xf32> to vector<8x32xf32>
    %1742 = vector.extract_strided_slice %1740 {offsets = [0, 0], sizes = [8, 32], strides = [1, 1]} : vector<8x96xf32> to vector<8x32xf32>
    %1743 = arith.addf %1741, %1742 : vector<8x32xf32>
    %1744 = arith.addf %1743, %25 : vector<8x32xf32>
    %1745 = arith.negf %1744 : vector<8x32xf32>
    %1746 = math.exp %1745 : vector<8x32xf32>
    %cst_420 = arith.constant 1.000000e+00 : f32
    %1747 = vector.broadcast %cst_420 : f32 to vector<8x32xf32>
    %1748 = arith.addf %1747, %1746 : vector<8x32xf32>
    %1749 = arith.divf %1747, %1748 : vector<8x32xf32>
    %1750 = vector.extract_strided_slice %1739 {offsets = [0, 32], sizes = [8, 32], strides = [1, 1]} : vector<8x96xf32> to vector<8x32xf32>
    %1751 = vector.extract_strided_slice %1740 {offsets = [0, 32], sizes = [8, 32], strides = [1, 1]} : vector<8x96xf32> to vector<8x32xf32>
    %1752 = arith.addf %1750, %1751 : vector<8x32xf32>
    %1753 = arith.addf %1752, %29 : vector<8x32xf32>
    %1754 = arith.negf %1753 : vector<8x32xf32>
    %1755 = math.exp %1754 : vector<8x32xf32>
    %cst_421 = arith.constant 1.000000e+00 : f32
    %1756 = vector.broadcast %cst_421 : f32 to vector<8x32xf32>
    %1757 = arith.addf %1756, %1755 : vector<8x32xf32>
    %1758 = arith.divf %1756, %1757 : vector<8x32xf32>
    %1759 = vector.extract_strided_slice %1739 {offsets = [0, 64], sizes = [8, 32], strides = [1, 1]} : vector<8x96xf32> to vector<8x32xf32>
    %1760 = arith.addf %1759, %33 : vector<8x32xf32>
    %1761 = vector.extract_strided_slice %1740 {offsets = [0, 64], sizes = [8, 32], strides = [1, 1]} : vector<8x96xf32> to vector<8x32xf32>
    %1762 = arith.addf %1761, %37 : vector<8x32xf32>
    %1763 = arith.mulf %1749, %1762 : vector<8x32xf32>
    %1764 = arith.addf %1760, %1763 : vector<8x32xf32>
    %1765 = math.tanh %1764 : vector<8x32xf32>
    %cst_422 = arith.constant 1.000000e+00 : f32
    %1766 = vector.broadcast %cst_422 : f32 to vector<8x32xf32>
    %1767 = arith.subf %1766, %1758 : vector<8x32xf32>
    %1768 = arith.mulf %1767, %1765 : vector<8x32xf32>
    %1769 = arith.mulf %1758, %1696 : vector<8x32xf32>
    %1770 = arith.addf %1768, %1769 : vector<8x32xf32>
    %cst_423 = arith.constant dense<0.000000e+00> : vector<8x32xf32>
    %1771 = tpu.matmul %1770, %38, %cst_423 {dimension_numbers = #tpu.dot_dimension_numbers<[1], [0], [0], [1], [0, 0, 1, 1], [], []>} : vector<8x32xf32>, vector<32x32xf32>, vector<8x32xf32> -> vector<8x32xf32>
    %1772 = arith.addf %1771, %41 : vector<8x32xf32>
    %cst_424 = arith.constant 0.000000e+00 : f32
    %1773 = vector.broadcast %cst_424 : f32 to vector<8x32xf32>
    %1774 = arith.maximumf %1772, %1773 : vector<8x32xf32>
    %cst_425 = arith.constant dense<0.000000e+00> : vector<8x32xf32>
    %1775 = tpu.matmul %1774, %42, %cst_425 {dimension_numbers = #tpu.dot_dimension_numbers<[1], [0], [0], [1], [0, 0, 1, 1], [], []>} : vector<8x32xf32>, vector<32x32xf32>, vector<8x32xf32> -> vector<8x32xf32>
    %1776 = arith.addf %1775, %45 : vector<8x32xf32>
    %cst_426 = arith.constant 0.000000e+00 : f32
    %1777 = vector.broadcast %cst_426 : f32 to vector<8x32xf32>
    %1778 = arith.maximumf %1776, %1777 : vector<8x32xf32>
    %cst_427 = arith.constant dense<0.000000e+00> : vector<8x8xf32>
    %1779 = tpu.matmul %1778, %46, %cst_427 {dimension_numbers = #tpu.dot_dimension_numbers<[1], [0], [0], [1], [0, 0, 1, 1], [], []>} : vector<8x32xf32>, vector<32x8xf32>, vector<8x8xf32> -> vector<8x8xf32>
    %1780 = arith.addf %1779, %49 : vector<8x8xf32>
    %1781 = tpu.concatenate %1558, %1632, %1706, %1780 in 1 : vector<8x8xf32>, vector<8x8xf32>, vector<8x8xf32>, vector<8x8xf32> -> vector<8x32xf32>
    %1782 = arith.index_cast %c6_i32 : i32 to index
    %c0_428 = arith.constant 0 : index
    %c0_429 = arith.constant 0 : index
    %1783 = vector.load %arg22[%1782, %c0_428, %c0_429] : memref<8x8x32xf32, #tpu.memory_space<vmem>>, vector<1x8x32xf32>
    %1784 = vector.shape_cast %1783 : vector<1x8x32xf32> to vector<8x32xf32>
    %1785 = vector.shape_cast %1781 : vector<8x32xf32> to vector<1x8x32xf32>
    tpu.vector_store %arg22[%1782, %c0_428, %c0_429], %1785 {strides = array<i32>} : memref<8x8x32xf32, #tpu.memory_space<vmem>>, vector<1x8x32xf32>,
    %c7_i32 = arith.constant 7 : i32
    %1786 = arith.index_cast %c7_i32 : i32 to index
    %c0_430 = arith.constant 0 : index
    %c0_431 = arith.constant 0 : index
    %1787 = vector.load %arg2[%1786, %c0_430, %c0_431] : memref<8x8x8xf32, #tpu.memory_space<vmem>>, vector<1x8x8xf32>
    %1788 = vector.shape_cast %1787 : vector<1x8x8xf32> to vector<8x8xf32>
    %1789 = vector.extract_strided_slice %1788 {offsets = [0, 0], sizes = [8, 4], strides = [1, 1]} : vector<8x8xf32> to vector<8x4xf32>
    %cst_432 = arith.constant dense<0.000000e+00> : vector<8x32xf32>
    %1790 = tpu.matmul %1789, %50, %cst_432 {dimension_numbers = #tpu.dot_dimension_numbers<[1], [0], [0], [1], [0, 0, 1, 1], [], []>} : vector<8x4xf32>, vector<4x32xf32>, vector<8x32xf32> -> vector<8x32xf32>
    %cst_433 = arith.constant dense<0.000000e+00> : vector<8x32xf32>
    %1791 = tpu.matmul %1632, %51, %cst_433 {dimension_numbers = #tpu.dot_dimension_numbers<[1], [0], [0], [1], [0, 0, 1, 1], [], []>} : vector<8x8xf32>, vector<8x32xf32>, vector<8x32xf32> -> vector<8x32xf32>
    %1792 = arith.addf %1790, %1791 : vector<8x32xf32>
    %1793 = arith.addf %1792, %54 : vector<8x32xf32>
    %cst_434 = arith.constant 0.000000e+00 : f32
    %1794 = vector.broadcast %cst_434 : f32 to vector<8x32xf32>
    %1795 = arith.maximumf %1793, %1794 : vector<8x32xf32>
    %cst_435 = arith.constant dense<0.000000e+00> : vector<8x32xf32>
    %1796 = tpu.matmul %1795, %55, %cst_435 {dimension_numbers = #tpu.dot_dimension_numbers<[1], [0], [0], [1], [0, 0, 1, 1], [], []>} : vector<8x32xf32>, vector<32x32xf32>, vector<8x32xf32> -> vector<8x32xf32>
    %1797 = arith.addf %1796, %58 : vector<8x32xf32>
    %cst_436 = arith.constant 0.000000e+00 : f32
    %1798 = vector.broadcast %cst_436 : f32 to vector<8x32xf32>
    %1799 = arith.maximumf %1797, %1798 : vector<8x32xf32>
    %cst_437 = arith.constant dense<0.000000e+00> : vector<8x4xf32>
    %1800 = tpu.matmul %1799, %59, %cst_437 {dimension_numbers = #tpu.dot_dimension_numbers<[1], [0], [0], [1], [0, 0, 1, 1], [], []>} : vector<8x32xf32>, vector<32x4xf32>, vector<8x4xf32> -> vector<8x4xf32>
    %1801 = arith.addf %1800, %62 : vector<8x4xf32>
    %1802 = vector.extract_strided_slice %1788 {offsets = [0, 4], sizes = [8, 4], strides = [1, 1]} : vector<8x8xf32> to vector<8x4xf32>
    %1803 = tpu.concatenate %1801, %1802 in 1 : vector<8x4xf32>, vector<8x4xf32> -> vector<8x8xf32>
    %cst_438 = arith.constant dense<0.000000e+00> : vector<8x96xf32>
    %1804 = tpu.matmul %1803, %0, %cst_438 {dimension_numbers = #tpu.dot_dimension_numbers<[1], [0], [0], [1], [0, 0, 1, 1], [], []>} : vector<8x8xf32>, vector<8x96xf32>, vector<8x96xf32> -> vector<8x96xf32>
    %cst_439 = arith.constant dense<0.000000e+00> : vector<8x96xf32>
    %1805 = tpu.matmul %1590, %1, %cst_439 {dimension_numbers = #tpu.dot_dimension_numbers<[1], [0], [0], [1], [0, 0, 1, 1], [], []>} : vector<8x32xf32>, vector<32x96xf32>, vector<8x96xf32> -> vector<8x96xf32>
    %1806 = vector.extract_strided_slice %1804 {offsets = [0, 0], sizes = [8, 32], strides = [1, 1]} : vector<8x96xf32> to vector<8x32xf32>
    %1807 = vector.extract_strided_slice %1805 {offsets = [0, 0], sizes = [8, 32], strides = [1, 1]} : vector<8x96xf32> to vector<8x32xf32>
    %1808 = arith.addf %1806, %1807 : vector<8x32xf32>
    %1809 = arith.addf %1808, %6 : vector<8x32xf32>
    %1810 = arith.negf %1809 : vector<8x32xf32>
    %1811 = math.exp %1810 : vector<8x32xf32>
    %cst_440 = arith.constant 1.000000e+00 : f32
    %1812 = vector.broadcast %cst_440 : f32 to vector<8x32xf32>
    %1813 = arith.addf %1812, %1811 : vector<8x32xf32>
    %1814 = arith.divf %1812, %1813 : vector<8x32xf32>
    %1815 = vector.extract_strided_slice %1804 {offsets = [0, 32], sizes = [8, 32], strides = [1, 1]} : vector<8x96xf32> to vector<8x32xf32>
    %1816 = vector.extract_strided_slice %1805 {offsets = [0, 32], sizes = [8, 32], strides = [1, 1]} : vector<8x96xf32> to vector<8x32xf32>
    %1817 = arith.addf %1815, %1816 : vector<8x32xf32>
    %1818 = arith.addf %1817, %10 : vector<8x32xf32>
    %1819 = arith.negf %1818 : vector<8x32xf32>
    %1820 = math.exp %1819 : vector<8x32xf32>
    %cst_441 = arith.constant 1.000000e+00 : f32
    %1821 = vector.broadcast %cst_441 : f32 to vector<8x32xf32>
    %1822 = arith.addf %1821, %1820 : vector<8x32xf32>
    %1823 = arith.divf %1821, %1822 : vector<8x32xf32>
    %1824 = vector.extract_strided_slice %1804 {offsets = [0, 64], sizes = [8, 32], strides = [1, 1]} : vector<8x96xf32> to vector<8x32xf32>
    %1825 = arith.addf %1824, %14 : vector<8x32xf32>
    %1826 = vector.extract_strided_slice %1805 {offsets = [0, 64], sizes = [8, 32], strides = [1, 1]} : vector<8x96xf32> to vector<8x32xf32>
    %1827 = arith.addf %1826, %18 : vector<8x32xf32>
    %1828 = arith.mulf %1814, %1827 : vector<8x32xf32>
    %1829 = arith.addf %1825, %1828 : vector<8x32xf32>
    %1830 = math.tanh %1829 : vector<8x32xf32>
    %cst_442 = arith.constant 1.000000e+00 : f32
    %1831 = vector.broadcast %cst_442 : f32 to vector<8x32xf32>
    %1832 = arith.subf %1831, %1823 : vector<8x32xf32>
    %1833 = arith.mulf %1832, %1830 : vector<8x32xf32>
    %1834 = arith.mulf %1823, %1590 : vector<8x32xf32>
    %1835 = arith.addf %1833, %1834 : vector<8x32xf32>
    %cst_443 = arith.constant dense<0.000000e+00> : vector<8x96xf32>
    %1836 = tpu.matmul %1835, %19, %cst_443 {dimension_numbers = #tpu.dot_dimension_numbers<[1], [0], [0], [1], [0, 0, 1, 1], [], []>} : vector<8x32xf32>, vector<32x96xf32>, vector<8x96xf32> -> vector<8x96xf32>
    %cst_444 = arith.constant dense<0.000000e+00> : vector<8x96xf32>
    %1837 = tpu.matmul %1622, %20, %cst_444 {dimension_numbers = #tpu.dot_dimension_numbers<[1], [0], [0], [1], [0, 0, 1, 1], [], []>} : vector<8x32xf32>, vector<32x96xf32>, vector<8x96xf32> -> vector<8x96xf32>
    %1838 = vector.extract_strided_slice %1836 {offsets = [0, 0], sizes = [8, 32], strides = [1, 1]} : vector<8x96xf32> to vector<8x32xf32>
    %1839 = vector.extract_strided_slice %1837 {offsets = [0, 0], sizes = [8, 32], strides = [1, 1]} : vector<8x96xf32> to vector<8x32xf32>
    %1840 = arith.addf %1838, %1839 : vector<8x32xf32>
    %1841 = arith.addf %1840, %25 : vector<8x32xf32>
    %1842 = arith.negf %1841 : vector<8x32xf32>
    %1843 = math.exp %1842 : vector<8x32xf32>
    %cst_445 = arith.constant 1.000000e+00 : f32
    %1844 = vector.broadcast %cst_445 : f32 to vector<8x32xf32>
    %1845 = arith.addf %1844, %1843 : vector<8x32xf32>
    %1846 = arith.divf %1844, %1845 : vector<8x32xf32>
    %1847 = vector.extract_strided_slice %1836 {offsets = [0, 32], sizes = [8, 32], strides = [1, 1]} : vector<8x96xf32> to vector<8x32xf32>
    %1848 = vector.extract_strided_slice %1837 {offsets = [0, 32], sizes = [8, 32], strides = [1, 1]} : vector<8x96xf32> to vector<8x32xf32>
    %1849 = arith.addf %1847, %1848 : vector<8x32xf32>
    %1850 = arith.addf %1849, %29 : vector<8x32xf32>
    %1851 = arith.negf %1850 : vector<8x32xf32>
    %1852 = math.exp %1851 : vector<8x32xf32>
    %cst_446 = arith.constant 1.000000e+00 : f32
    %1853 = vector.broadcast %cst_446 : f32 to vector<8x32xf32>
    %1854 = arith.addf %1853, %1852 : vector<8x32xf32>
    %1855 = arith.divf %1853, %1854 : vector<8x32xf32>
    %1856 = vector.extract_strided_slice %1836 {offsets = [0, 64], sizes = [8, 32], strides = [1, 1]} : vector<8x96xf32> to vector<8x32xf32>
    %1857 = arith.addf %1856, %33 : vector<8x32xf32>
    %1858 = vector.extract_strided_slice %1837 {offsets = [0, 64], sizes = [8, 32], strides = [1, 1]} : vector<8x96xf32> to vector<8x32xf32>
    %1859 = arith.addf %1858, %37 : vector<8x32xf32>
    %1860 = arith.mulf %1846, %1859 : vector<8x32xf32>
    %1861 = arith.addf %1857, %1860 : vector<8x32xf32>
    %1862 = math.tanh %1861 : vector<8x32xf32>
    %cst_447 = arith.constant 1.000000e+00 : f32
    %1863 = vector.broadcast %cst_447 : f32 to vector<8x32xf32>
    %1864 = arith.subf %1863, %1855 : vector<8x32xf32>
    %1865 = arith.mulf %1864, %1862 : vector<8x32xf32>
    %1866 = arith.mulf %1855, %1622 : vector<8x32xf32>
    %1867 = arith.addf %1865, %1866 : vector<8x32xf32>
    %cst_448 = arith.constant dense<0.000000e+00> : vector<8x32xf32>
    %1868 = tpu.matmul %1867, %38, %cst_448 {dimension_numbers = #tpu.dot_dimension_numbers<[1], [0], [0], [1], [0, 0, 1, 1], [], []>} : vector<8x32xf32>, vector<32x32xf32>, vector<8x32xf32> -> vector<8x32xf32>
    %1869 = arith.addf %1868, %41 : vector<8x32xf32>
    %cst_449 = arith.constant 0.000000e+00 : f32
    %1870 = vector.broadcast %cst_449 : f32 to vector<8x32xf32>
    %1871 = arith.maximumf %1869, %1870 : vector<8x32xf32>
    %cst_450 = arith.constant dense<0.000000e+00> : vector<8x32xf32>
    %1872 = tpu.matmul %1871, %42, %cst_450 {dimension_numbers = #tpu.dot_dimension_numbers<[1], [0], [0], [1], [0, 0, 1, 1], [], []>} : vector<8x32xf32>, vector<32x32xf32>, vector<8x32xf32> -> vector<8x32xf32>
    %1873 = arith.addf %1872, %45 : vector<8x32xf32>
    %cst_451 = arith.constant 0.000000e+00 : f32
    %1874 = vector.broadcast %cst_451 : f32 to vector<8x32xf32>
    %1875 = arith.maximumf %1873, %1874 : vector<8x32xf32>
    %cst_452 = arith.constant dense<0.000000e+00> : vector<8x8xf32>
    %1876 = tpu.matmul %1875, %46, %cst_452 {dimension_numbers = #tpu.dot_dimension_numbers<[1], [0], [0], [1], [0, 0, 1, 1], [], []>} : vector<8x32xf32>, vector<32x8xf32>, vector<8x8xf32> -> vector<8x8xf32>
    %1877 = arith.addf %1876, %49 : vector<8x8xf32>
    %cst_453 = arith.constant dense<0.000000e+00> : vector<8x96xf32>
    %1878 = tpu.matmul %1877, %0, %cst_453 {dimension_numbers = #tpu.dot_dimension_numbers<[1], [0], [0], [1], [0, 0, 1, 1], [], []>} : vector<8x8xf32>, vector<8x96xf32>, vector<8x96xf32> -> vector<8x96xf32>
    %cst_454 = arith.constant dense<0.000000e+00> : vector<8x96xf32>
    %1879 = tpu.matmul %1835, %1, %cst_454 {dimension_numbers = #tpu.dot_dimension_numbers<[1], [0], [0], [1], [0, 0, 1, 1], [], []>} : vector<8x32xf32>, vector<32x96xf32>, vector<8x96xf32> -> vector<8x96xf32>
    %1880 = vector.extract_strided_slice %1878 {offsets = [0, 0], sizes = [8, 32], strides = [1, 1]} : vector<8x96xf32> to vector<8x32xf32>
    %1881 = vector.extract_strided_slice %1879 {offsets = [0, 0], sizes = [8, 32], strides = [1, 1]} : vector<8x96xf32> to vector<8x32xf32>
    %1882 = arith.addf %1880, %1881 : vector<8x32xf32>
    %1883 = arith.addf %1882, %6 : vector<8x32xf32>
    %1884 = arith.negf %1883 : vector<8x32xf32>
    %1885 = math.exp %1884 : vector<8x32xf32>
    %cst_455 = arith.constant 1.000000e+00 : f32
    %1886 = vector.broadcast %cst_455 : f32 to vector<8x32xf32>
    %1887 = arith.addf %1886, %1885 : vector<8x32xf32>
    %1888 = arith.divf %1886, %1887 : vector<8x32xf32>
    %1889 = vector.extract_strided_slice %1878 {offsets = [0, 32], sizes = [8, 32], strides = [1, 1]} : vector<8x96xf32> to vector<8x32xf32>
    %1890 = vector.extract_strided_slice %1879 {offsets = [0, 32], sizes = [8, 32], strides = [1, 1]} : vector<8x96xf32> to vector<8x32xf32>
    %1891 = arith.addf %1889, %1890 : vector<8x32xf32>
    %1892 = arith.addf %1891, %10 : vector<8x32xf32>
    %1893 = arith.negf %1892 : vector<8x32xf32>
    %1894 = math.exp %1893 : vector<8x32xf32>
    %cst_456 = arith.constant 1.000000e+00 : f32
    %1895 = vector.broadcast %cst_456 : f32 to vector<8x32xf32>
    %1896 = arith.addf %1895, %1894 : vector<8x32xf32>
    %1897 = arith.divf %1895, %1896 : vector<8x32xf32>
    %1898 = vector.extract_strided_slice %1878 {offsets = [0, 64], sizes = [8, 32], strides = [1, 1]} : vector<8x96xf32> to vector<8x32xf32>
    %1899 = arith.addf %1898, %14 : vector<8x32xf32>
    %1900 = vector.extract_strided_slice %1879 {offsets = [0, 64], sizes = [8, 32], strides = [1, 1]} : vector<8x96xf32> to vector<8x32xf32>
    %1901 = arith.addf %1900, %18 : vector<8x32xf32>
    %1902 = arith.mulf %1888, %1901 : vector<8x32xf32>
    %1903 = arith.addf %1899, %1902 : vector<8x32xf32>
    %1904 = math.tanh %1903 : vector<8x32xf32>
    %cst_457 = arith.constant 1.000000e+00 : f32
    %1905 = vector.broadcast %cst_457 : f32 to vector<8x32xf32>
    %1906 = arith.subf %1905, %1897 : vector<8x32xf32>
    %1907 = arith.mulf %1906, %1904 : vector<8x32xf32>
    %1908 = arith.mulf %1897, %1835 : vector<8x32xf32>
    %1909 = arith.addf %1907, %1908 : vector<8x32xf32>
    %cst_458 = arith.constant dense<0.000000e+00> : vector<8x96xf32>
    %1910 = tpu.matmul %1909, %19, %cst_458 {dimension_numbers = #tpu.dot_dimension_numbers<[1], [0], [0], [1], [0, 0, 1, 1], [], []>} : vector<8x32xf32>, vector<32x96xf32>, vector<8x96xf32> -> vector<8x96xf32>
    %cst_459 = arith.constant dense<0.000000e+00> : vector<8x96xf32>
    %1911 = tpu.matmul %1867, %20, %cst_459 {dimension_numbers = #tpu.dot_dimension_numbers<[1], [0], [0], [1], [0, 0, 1, 1], [], []>} : vector<8x32xf32>, vector<32x96xf32>, vector<8x96xf32> -> vector<8x96xf32>
    %1912 = vector.extract_strided_slice %1910 {offsets = [0, 0], sizes = [8, 32], strides = [1, 1]} : vector<8x96xf32> to vector<8x32xf32>
    %1913 = vector.extract_strided_slice %1911 {offsets = [0, 0], sizes = [8, 32], strides = [1, 1]} : vector<8x96xf32> to vector<8x32xf32>
    %1914 = arith.addf %1912, %1913 : vector<8x32xf32>
    %1915 = arith.addf %1914, %25 : vector<8x32xf32>
    %1916 = arith.negf %1915 : vector<8x32xf32>
    %1917 = math.exp %1916 : vector<8x32xf32>
    %cst_460 = arith.constant 1.000000e+00 : f32
    %1918 = vector.broadcast %cst_460 : f32 to vector<8x32xf32>
    %1919 = arith.addf %1918, %1917 : vector<8x32xf32>
    %1920 = arith.divf %1918, %1919 : vector<8x32xf32>
    %1921 = vector.extract_strided_slice %1910 {offsets = [0, 32], sizes = [8, 32], strides = [1, 1]} : vector<8x96xf32> to vector<8x32xf32>
    %1922 = vector.extract_strided_slice %1911 {offsets = [0, 32], sizes = [8, 32], strides = [1, 1]} : vector<8x96xf32> to vector<8x32xf32>
    %1923 = arith.addf %1921, %1922 : vector<8x32xf32>
    %1924 = arith.addf %1923, %29 : vector<8x32xf32>
    %1925 = arith.negf %1924 : vector<8x32xf32>
    %1926 = math.exp %1925 : vector<8x32xf32>
    %cst_461 = arith.constant 1.000000e+00 : f32
    %1927 = vector.broadcast %cst_461 : f32 to vector<8x32xf32>
    %1928 = arith.addf %1927, %1926 : vector<8x32xf32>
    %1929 = arith.divf %1927, %1928 : vector<8x32xf32>
    %1930 = vector.extract_strided_slice %1910 {offsets = [0, 64], sizes = [8, 32], strides = [1, 1]} : vector<8x96xf32> to vector<8x32xf32>
    %1931 = arith.addf %1930, %33 : vector<8x32xf32>
    %1932 = vector.extract_strided_slice %1911 {offsets = [0, 64], sizes = [8, 32], strides = [1, 1]} : vector<8x96xf32> to vector<8x32xf32>
    %1933 = arith.addf %1932, %37 : vector<8x32xf32>
    %1934 = arith.mulf %1920, %1933 : vector<8x32xf32>
    %1935 = arith.addf %1931, %1934 : vector<8x32xf32>
    %1936 = math.tanh %1935 : vector<8x32xf32>
    %cst_462 = arith.constant 1.000000e+00 : f32
    %1937 = vector.broadcast %cst_462 : f32 to vector<8x32xf32>
    %1938 = arith.subf %1937, %1929 : vector<8x32xf32>
    %1939 = arith.mulf %1938, %1936 : vector<8x32xf32>
    %1940 = arith.mulf %1929, %1867 : vector<8x32xf32>
    %1941 = arith.addf %1939, %1940 : vector<8x32xf32>
    %cst_463 = arith.constant dense<0.000000e+00> : vector<8x32xf32>
    %1942 = tpu.matmul %1941, %38, %cst_463 {dimension_numbers = #tpu.dot_dimension_numbers<[1], [0], [0], [1], [0, 0, 1, 1], [], []>} : vector<8x32xf32>, vector<32x32xf32>, vector<8x32xf32> -> vector<8x32xf32>
    %1943 = arith.addf %1942, %41 : vector<8x32xf32>
    %cst_464 = arith.constant 0.000000e+00 : f32
    %1944 = vector.broadcast %cst_464 : f32 to vector<8x32xf32>
    %1945 = arith.maximumf %1943, %1944 : vector<8x32xf32>
    %cst_465 = arith.constant dense<0.000000e+00> : vector<8x32xf32>
    %1946 = tpu.matmul %1945, %42, %cst_465 {dimension_numbers = #tpu.dot_dimension_numbers<[1], [0], [0], [1], [0, 0, 1, 1], [], []>} : vector<8x32xf32>, vector<32x32xf32>, vector<8x32xf32> -> vector<8x32xf32>
    %1947 = arith.addf %1946, %45 : vector<8x32xf32>
    %cst_466 = arith.constant 0.000000e+00 : f32
    %1948 = vector.broadcast %cst_466 : f32 to vector<8x32xf32>
    %1949 = arith.maximumf %1947, %1948 : vector<8x32xf32>
    %cst_467 = arith.constant dense<0.000000e+00> : vector<8x8xf32>
    %1950 = tpu.matmul %1949, %46, %cst_467 {dimension_numbers = #tpu.dot_dimension_numbers<[1], [0], [0], [1], [0, 0, 1, 1], [], []>} : vector<8x32xf32>, vector<32x8xf32>, vector<8x8xf32> -> vector<8x8xf32>
    %1951 = arith.addf %1950, %49 : vector<8x8xf32>
    %cst_468 = arith.constant dense<0.000000e+00> : vector<8x96xf32>
    %1952 = tpu.matmul %1951, %0, %cst_468 {dimension_numbers = #tpu.dot_dimension_numbers<[1], [0], [0], [1], [0, 0, 1, 1], [], []>} : vector<8x8xf32>, vector<8x96xf32>, vector<8x96xf32> -> vector<8x96xf32>
    %cst_469 = arith.constant dense<0.000000e+00> : vector<8x96xf32>
    %1953 = tpu.matmul %1909, %1, %cst_469 {dimension_numbers = #tpu.dot_dimension_numbers<[1], [0], [0], [1], [0, 0, 1, 1], [], []>} : vector<8x32xf32>, vector<32x96xf32>, vector<8x96xf32> -> vector<8x96xf32>
    %1954 = vector.extract_strided_slice %1952 {offsets = [0, 0], sizes = [8, 32], strides = [1, 1]} : vector<8x96xf32> to vector<8x32xf32>
    %1955 = vector.extract_strided_slice %1953 {offsets = [0, 0], sizes = [8, 32], strides = [1, 1]} : vector<8x96xf32> to vector<8x32xf32>
    %1956 = arith.addf %1954, %1955 : vector<8x32xf32>
    %1957 = arith.addf %1956, %6 : vector<8x32xf32>
    %1958 = arith.negf %1957 : vector<8x32xf32>
    %1959 = math.exp %1958 : vector<8x32xf32>
    %cst_470 = arith.constant 1.000000e+00 : f32
    %1960 = vector.broadcast %cst_470 : f32 to vector<8x32xf32>
    %1961 = arith.addf %1960, %1959 : vector<8x32xf32>
    %1962 = arith.divf %1960, %1961 : vector<8x32xf32>
    %1963 = vector.extract_strided_slice %1952 {offsets = [0, 32], sizes = [8, 32], strides = [1, 1]} : vector<8x96xf32> to vector<8x32xf32>
    %1964 = vector.extract_strided_slice %1953 {offsets = [0, 32], sizes = [8, 32], strides = [1, 1]} : vector<8x96xf32> to vector<8x32xf32>
    %1965 = arith.addf %1963, %1964 : vector<8x32xf32>
    %1966 = arith.addf %1965, %10 : vector<8x32xf32>
    %1967 = arith.negf %1966 : vector<8x32xf32>
    %1968 = math.exp %1967 : vector<8x32xf32>
    %cst_471 = arith.constant 1.000000e+00 : f32
    %1969 = vector.broadcast %cst_471 : f32 to vector<8x32xf32>
    %1970 = arith.addf %1969, %1968 : vector<8x32xf32>
    %1971 = arith.divf %1969, %1970 : vector<8x32xf32>
    %1972 = vector.extract_strided_slice %1952 {offsets = [0, 64], sizes = [8, 32], strides = [1, 1]} : vector<8x96xf32> to vector<8x32xf32>
    %1973 = arith.addf %1972, %14 : vector<8x32xf32>
    %1974 = vector.extract_strided_slice %1953 {offsets = [0, 64], sizes = [8, 32], strides = [1, 1]} : vector<8x96xf32> to vector<8x32xf32>
    %1975 = arith.addf %1974, %18 : vector<8x32xf32>
    %1976 = arith.mulf %1962, %1975 : vector<8x32xf32>
    %1977 = arith.addf %1973, %1976 : vector<8x32xf32>
    %1978 = math.tanh %1977 : vector<8x32xf32>
    %cst_472 = arith.constant 1.000000e+00 : f32
    %1979 = vector.broadcast %cst_472 : f32 to vector<8x32xf32>
    %1980 = arith.subf %1979, %1971 : vector<8x32xf32>
    %1981 = arith.mulf %1980, %1978 : vector<8x32xf32>
    %1982 = arith.mulf %1971, %1909 : vector<8x32xf32>
    %1983 = arith.addf %1981, %1982 : vector<8x32xf32>
    %cst_473 = arith.constant dense<0.000000e+00> : vector<8x96xf32>
    %1984 = tpu.matmul %1983, %19, %cst_473 {dimension_numbers = #tpu.dot_dimension_numbers<[1], [0], [0], [1], [0, 0, 1, 1], [], []>} : vector<8x32xf32>, vector<32x96xf32>, vector<8x96xf32> -> vector<8x96xf32>
    %cst_474 = arith.constant dense<0.000000e+00> : vector<8x96xf32>
    %1985 = tpu.matmul %1941, %20, %cst_474 {dimension_numbers = #tpu.dot_dimension_numbers<[1], [0], [0], [1], [0, 0, 1, 1], [], []>} : vector<8x32xf32>, vector<32x96xf32>, vector<8x96xf32> -> vector<8x96xf32>
    %1986 = vector.extract_strided_slice %1984 {offsets = [0, 0], sizes = [8, 32], strides = [1, 1]} : vector<8x96xf32> to vector<8x32xf32>
    %1987 = vector.extract_strided_slice %1985 {offsets = [0, 0], sizes = [8, 32], strides = [1, 1]} : vector<8x96xf32> to vector<8x32xf32>
    %1988 = arith.addf %1986, %1987 : vector<8x32xf32>
    %1989 = arith.addf %1988, %25 : vector<8x32xf32>
    %1990 = arith.negf %1989 : vector<8x32xf32>
    %1991 = math.exp %1990 : vector<8x32xf32>
    %cst_475 = arith.constant 1.000000e+00 : f32
    %1992 = vector.broadcast %cst_475 : f32 to vector<8x32xf32>
    %1993 = arith.addf %1992, %1991 : vector<8x32xf32>
    %1994 = arith.divf %1992, %1993 : vector<8x32xf32>
    %1995 = vector.extract_strided_slice %1984 {offsets = [0, 32], sizes = [8, 32], strides = [1, 1]} : vector<8x96xf32> to vector<8x32xf32>
    %1996 = vector.extract_strided_slice %1985 {offsets = [0, 32], sizes = [8, 32], strides = [1, 1]} : vector<8x96xf32> to vector<8x32xf32>
    %1997 = arith.addf %1995, %1996 : vector<8x32xf32>
    %1998 = arith.addf %1997, %29 : vector<8x32xf32>
    %1999 = arith.negf %1998 : vector<8x32xf32>
    %2000 = math.exp %1999 : vector<8x32xf32>
    %cst_476 = arith.constant 1.000000e+00 : f32
    %2001 = vector.broadcast %cst_476 : f32 to vector<8x32xf32>
    %2002 = arith.addf %2001, %2000 : vector<8x32xf32>
    %2003 = arith.divf %2001, %2002 : vector<8x32xf32>
    %2004 = vector.extract_strided_slice %1984 {offsets = [0, 64], sizes = [8, 32], strides = [1, 1]} : vector<8x96xf32> to vector<8x32xf32>
    %2005 = arith.addf %2004, %33 : vector<8x32xf32>
    %2006 = vector.extract_strided_slice %1985 {offsets = [0, 64], sizes = [8, 32], strides = [1, 1]} : vector<8x96xf32> to vector<8x32xf32>
    %2007 = arith.addf %2006, %37 : vector<8x32xf32>
    %2008 = arith.mulf %1994, %2007 : vector<8x32xf32>
    %2009 = arith.addf %2005, %2008 : vector<8x32xf32>
    %2010 = math.tanh %2009 : vector<8x32xf32>
    %cst_477 = arith.constant 1.000000e+00 : f32
    %2011 = vector.broadcast %cst_477 : f32 to vector<8x32xf32>
    %2012 = arith.subf %2011, %2003 : vector<8x32xf32>
    %2013 = arith.mulf %2012, %2010 : vector<8x32xf32>
    %2014 = arith.mulf %2003, %1941 : vector<8x32xf32>
    %2015 = arith.addf %2013, %2014 : vector<8x32xf32>
    %cst_478 = arith.constant dense<0.000000e+00> : vector<8x32xf32>
    %2016 = tpu.matmul %2015, %38, %cst_478 {dimension_numbers = #tpu.dot_dimension_numbers<[1], [0], [0], [1], [0, 0, 1, 1], [], []>} : vector<8x32xf32>, vector<32x32xf32>, vector<8x32xf32> -> vector<8x32xf32>
    %2017 = arith.addf %2016, %41 : vector<8x32xf32>
    %cst_479 = arith.constant 0.000000e+00 : f32
    %2018 = vector.broadcast %cst_479 : f32 to vector<8x32xf32>
    %2019 = arith.maximumf %2017, %2018 : vector<8x32xf32>
    %cst_480 = arith.constant dense<0.000000e+00> : vector<8x32xf32>
    %2020 = tpu.matmul %2019, %42, %cst_480 {dimension_numbers = #tpu.dot_dimension_numbers<[1], [0], [0], [1], [0, 0, 1, 1], [], []>} : vector<8x32xf32>, vector<32x32xf32>, vector<8x32xf32> -> vector<8x32xf32>
    %2021 = arith.addf %2020, %45 : vector<8x32xf32>
    %cst_481 = arith.constant 0.000000e+00 : f32
    %2022 = vector.broadcast %cst_481 : f32 to vector<8x32xf32>
    %2023 = arith.maximumf %2021, %2022 : vector<8x32xf32>
    %cst_482 = arith.constant dense<0.000000e+00> : vector<8x8xf32>
    %2024 = tpu.matmul %2023, %46, %cst_482 {dimension_numbers = #tpu.dot_dimension_numbers<[1], [0], [0], [1], [0, 0, 1, 1], [], []>} : vector<8x32xf32>, vector<32x8xf32>, vector<8x8xf32> -> vector<8x8xf32>
    %2025 = arith.addf %2024, %49 : vector<8x8xf32>
    %2026 = tpu.concatenate %1803, %1877, %1951, %2025 in 1 : vector<8x8xf32>, vector<8x8xf32>, vector<8x8xf32>, vector<8x8xf32> -> vector<8x32xf32>
    %2027 = arith.index_cast %c7_i32 : i32 to index
    %c0_483 = arith.constant 0 : index
    %c0_484 = arith.constant 0 : index
    %2028 = vector.load %arg22[%2027, %c0_483, %c0_484] : memref<8x8x32xf32, #tpu.memory_space<vmem>>, vector<1x8x32xf32>
    %2029 = vector.shape_cast %2028 : vector<1x8x32xf32> to vector<8x32xf32>
    %2030 = vector.shape_cast %2026 : vector<8x32xf32> to vector<1x8x32xf32>
    tpu.vector_store %arg22[%2027, %c0_483, %c0_484], %2030 {strides = array<i32>} : memref<8x8x32xf32, #tpu.memory_space<vmem>>, vector<1x8x32xf32>,
    %c8_i32 = arith.constant 8 : i32
    %c0_485 = arith.constant 0 : index
    %c0_486 = arith.constant 0 : index
    %c0_487 = arith.constant 0 : index
    %2031 = vector.load %arg24[%c0_485, %c0_486, %c0_487] : memref<2x8x32xf32, #tpu.memory_space<vmem>>, vector<1x8x32xf32>
    %2032 = vector.shape_cast %2031 : vector<1x8x32xf32> to vector<8x32xf32>
    %2033 = vector.shape_cast %1835 : vector<8x32xf32> to vector<1x8x32xf32>
    tpu.vector_store %arg24[%c0_485, %c0_486, %c0_487], %2033 {strides = array<i32>} : memref<2x8x32xf32, #tpu.memory_space<vmem>>, vector<1x8x32xf32>,
    %c1_488 = arith.constant 1 : index
    %c0_489 = arith.constant 0 : index
    %c0_490 = arith.constant 0 : index
    %2034 = vector.load %arg24[%c1_488, %c0_489, %c0_490] : memref<2x8x32xf32, #tpu.memory_space<vmem>>, vector<1x8x32xf32>
    %2035 = vector.shape_cast %2034 : vector<1x8x32xf32> to vector<8x32xf32>
    %2036 = vector.shape_cast %1867 : vector<8x32xf32> to vector<1x8x32xf32>
    tpu.vector_store %arg24[%c1_488, %c0_489, %c0_490], %2036 {strides = array<i32>} : memref<2x8x32xf32, #tpu.memory_space<vmem>>, vector<1x8x32xf32>,
    %c0_491 = arith.constant 0 : index
    %c0_492 = arith.constant 0 : index
    %2037 = vector.load %arg25[%c0_491, %c0_492] : memref<8x8xf32, #tpu.memory_space<vmem>>, vector<8x8xf32>
    tpu.vector_store %arg25[%c0_491, %c0_492], %1877 {strides = array<i32>} : memref<8x8xf32, #tpu.memory_space<vmem>>, vector<8x8xf32>,
    %c0_493 = arith.constant 0 : index
    %c0_494 = arith.constant 0 : index
    %c0_495 = arith.constant 0 : index
    %2038 = vector.load %arg23[%c0_493, %c0_494, %c0_495] : memref<2x8x32xf32, #tpu.memory_space<vmem>>, vector<1x8x32xf32>
    %2039 = vector.shape_cast %2038 : vector<1x8x32xf32> to vector<8x32xf32>
    %2040 = vector.shape_cast %1835 : vector<8x32xf32> to vector<1x8x32xf32>
    tpu.vector_store %arg23[%c0_493, %c0_494, %c0_495], %2040 {strides = array<i32>} : memref<2x8x32xf32, #tpu.memory_space<vmem>>, vector<1x8x32xf32>,
    %c1_496 = arith.constant 1 : index
    %c0_497 = arith.constant 0 : index
    %c0_498 = arith.constant 0 : index
    %2041 = vector.load %arg23[%c1_496, %c0_497, %c0_498] : memref<2x8x32xf32, #tpu.memory_space<vmem>>, vector<1x8x32xf32>
    %2042 = vector.shape_cast %2041 : vector<1x8x32xf32> to vector<8x32xf32>
    %2043 = vector.shape_cast %1867 : vector<8x32xf32> to vector<1x8x32xf32>
    tpu.vector_store %arg23[%c1_496, %c0_497, %c0_498], %2043 {strides = array<i32>} : memref<2x8x32xf32, #tpu.memory_space<vmem>>, vector<1x8x32xf32>,
    return
  }
  func.func @transform_0(%arg0: i32, %arg1: i32) -> (i32, i32, i32) {
    %c0_i32 = arith.constant 0 : i32
    %c0_i32_0 = arith.constant 0 : i32
    return %arg1, %arg0, %c0_i32 : i32, i32, i32
  }
  func.func @transform_1(%arg0: i32, %arg1: i32) -> (i32, i32) {
    %c0_i32 = arith.constant 0 : i32
    %c0_i32_0 = arith.constant 0 : i32
    %c0_i32_1 = arith.constant 0 : i32
    return %c0_i32, %c0_i32_0 : i32, i32
  }
  func.func @transform_2(%arg0: i32, %arg1: i32) -> (i32, i32) {
    %c0_i32 = arith.constant 0 : i32
    %c0_i32_0 = arith.constant 0 : i32
    %c0_i32_1 = arith.constant 0 : i32
    return %c0_i32, %c0_i32_0 : i32, i32
  }
  func.func @transform_3(%arg0: i32, %arg1: i32) -> (i32, i32) {
    %c0_i32 = arith.constant 0 : i32
    %c0_i32_0 = arith.constant 0 : i32
    %c0_i32_1 = arith.constant 0 : i32
    return %c0_i32, %c0_i32_0 : i32, i32
  }
  func.func @transform_4(%arg0: i32, %arg1: i32) -> (i32, i32) {
    %c0_i32 = arith.constant 0 : i32
    %c0_i32_0 = arith.constant 0 : i32
    %c0_i32_1 = arith.constant 0 : i32
    return %c0_i32, %c0_i32_0 : i32, i32
  }
  func.func @transform_5(%arg0: i32, %arg1: i32) -> (i32, i32) {
    %c0_i32 = arith.constant 0 : i32
    %c0_i32_0 = arith.constant 0 : i32
    %c0_i32_1 = arith.constant 0 : i32
    return %c0_i32, %c0_i32_0 : i32, i32
  }
  func.func @transform_6(%arg0: i32, %arg1: i32) -> (i32, i32) {
    %c0_i32 = arith.constant 0 : i32
    %c0_i32_0 = arith.constant 0 : i32
    %c0_i32_1 = arith.constant 0 : i32
    return %c0_i32, %c0_i32_0 : i32, i32
  }
  func.func @transform_7(%arg0: i32, %arg1: i32) -> (i32, i32) {
    %c0_i32 = arith.constant 0 : i32
    %c0_i32_0 = arith.constant 0 : i32
    %c0_i32_1 = arith.constant 0 : i32
    return %c0_i32, %c0_i32_0 : i32, i32
  }
  func.func @transform_8(%arg0: i32, %arg1: i32) -> (i32, i32) {
    %c0_i32 = arith.constant 0 : i32
    %c0_i32_0 = arith.constant 0 : i32
    %c0_i32_1 = arith.constant 0 : i32
    return %c0_i32, %c0_i32_0 : i32, i32
  }
  func.func @transform_9(%arg0: i32, %arg1: i32) -> (i32, i32) {
    %c0_i32 = arith.constant 0 : i32
    %c0_i32_0 = arith.constant 0 : i32
    %c0_i32_1 = arith.constant 0 : i32
    return %c0_i32, %c0_i32_0 : i32, i32
  }
  func.func @transform_10(%arg0: i32, %arg1: i32) -> (i32, i32) {
    %c0_i32 = arith.constant 0 : i32
    %c0_i32_0 = arith.constant 0 : i32
    %c0_i32_1 = arith.constant 0 : i32
    return %c0_i32, %c0_i32_0 : i32, i32
  }
  func.func @transform_11(%arg0: i32, %arg1: i32) -> (i32, i32) {
    %c0_i32 = arith.constant 0 : i32
    %c0_i32_0 = arith.constant 0 : i32
    %c0_i32_1 = arith.constant 0 : i32
    return %c0_i32, %c0_i32_0 : i32, i32
  }
  func.func @transform_12(%arg0: i32, %arg1: i32) -> (i32, i32) {
    %c0_i32 = arith.constant 0 : i32
    %c0_i32_0 = arith.constant 0 : i32
    %c0_i32_1 = arith.constant 0 : i32
    return %c0_i32, %c0_i32_0 : i32, i32
  }
  func.func @transform_13(%arg0: i32, %arg1: i32) -> (i32, i32) {
    %c0_i32 = arith.constant 0 : i32
    %c0_i32_0 = arith.constant 0 : i32
    %c0_i32_1 = arith.constant 0 : i32
    return %c0_i32, %c0_i32_0 : i32, i32
  }
  func.func @transform_14(%arg0: i32, %arg1: i32) -> (i32, i32) {
    %c0_i32 = arith.constant 0 : i32
    %c0_i32_0 = arith.constant 0 : i32
    %c0_i32_1 = arith.constant 0 : i32
    return %c0_i32, %c0_i32_0 : i32, i32
  }
  func.func @transform_15(%arg0: i32, %arg1: i32) -> (i32, i32) {
    %c0_i32 = arith.constant 0 : i32
    %c0_i32_0 = arith.constant 0 : i32
    %c0_i32_1 = arith.constant 0 : i32
    return %c0_i32, %c0_i32_0 : i32, i32
  }
  func.func @transform_16(%arg0: i32, %arg1: i32) -> (i32, i32) {
    %c0_i32 = arith.constant 0 : i32
    %c0_i32_0 = arith.constant 0 : i32
    %c0_i32_1 = arith.constant 0 : i32
    return %c0_i32, %c0_i32_0 : i32, i32
  }
  func.func @transform_17(%arg0: i32, %arg1: i32) -> (i32, i32) {
    %c0_i32 = arith.constant 0 : i32
    %c0_i32_0 = arith.constant 0 : i32
    %c0_i32_1 = arith.constant 0 : i32
    return %c0_i32, %c0_i32_0 : i32, i32
  }
  func.func @transform_18(%arg0: i32, %arg1: i32) -> (i32, i32) {
    %c0_i32 = arith.constant 0 : i32
    %c0_i32_0 = arith.constant 0 : i32
    %c0_i32_1 = arith.constant 0 : i32
    return %c0_i32, %c0_i32_0 : i32, i32
  }
  func.func @transform_19(%arg0: i32, %arg1: i32) -> (i32, i32) {
    %c0_i32 = arith.constant 0 : i32
    %c0_i32_0 = arith.constant 0 : i32
    %c0_i32_1 = arith.constant 0 : i32
    return %c0_i32, %c0_i32_0 : i32, i32
  }
  func.func @transform_20(%arg0: i32, %arg1: i32) -> (i32, i32, i32) {
    %c0_i32 = arith.constant 0 : i32
    %c0_i32_0 = arith.constant 0 : i32
    return %arg1, %arg0, %c0_i32 : i32, i32, i32
  }
  func.func @transform_21(%arg0: i32, %arg1: i32) -> (i32, i32, i32) {
    %c0_i32 = arith.constant 0 : i32
    %c0_i32_0 = arith.constant 0 : i32
    %c0_i32_1 = arith.constant 0 : i32
    return %c0_i32, %arg0, %c0_i32_0 : i32, i32, i32
  }
}

</mosaic_0001>

<bundles_post_ra>
// kernel: tpu_custom_call.1
= control target key start
LH: loop header
LB: loop body
LE: loop exit
PB: predicated region body
PF: predicated region fallthrough
CT: control target
= control target key end

     0   :  { %s23365_s0 = inlined_call_operand.vmem [shape: f32[8,8,8], index: 0, kind: input, shape index: {}]   ;;  %s23366_s1 = inlined_call_operand.hbm [shape: f32[8,96], index: 1, kind: input, shape index: {}]   ;;  %s23367_s2 = inlined_call_operand.hbm [shape: f32[32,96], index: 2, kind: input, shape index: {}]   ;;  %s23368_s3 = inlined_call_operand.hbm [shape: f32[4,32], index: 3, kind: input, shape index: {}]   ;;  %s23369_s4 = inlined_call_operand.hbm [shape: f32[32,96], index: 4, kind: input, shape index: {}]   ;;  %s23370_s5 = inlined_call_operand.hbm [shape: f32[32,96], index: 5, kind: input, shape index: {}]   ;;  %s23371_s6 = inlined_call_operand.hbm [shape: f32[4,32], index: 6, kind: input, shape index: {}]   ;;  %s23372_s7 = inlined_call_operand.vmem [shape: f32[32,32], index: 7, kind: input, shape index: {}]   ;;  %s23373_s8 = inlined_call_operand.hbm [shape: f32[1,32], index: 8, kind: input, shape index: {}]   ;;  %s23374_s9 = inlined_call_operand.hbm [shape: f32[32,32], index: 9, kind: input, shape index: {}]   ;;  %s23375_s10 = inlined_call_operand.hbm [shape: f32[1,32], index: 10, kind: input, shape index: {}]   ;;  %s23376_s11 = inlined_call_operand.vmem [shape: f32[32,8], index: 11, kind: input, shape index: {}]   ;;  %s23377_s12 = inlined_call_operand.hbm [shape: f32[1,8], index: 12, kind: input, shape index: {}]   ;;  %s23378_s13 = inlined_call_operand.hbm [shape: f32[4,32], index: 13, kind: input, shape index: {}]   ;;  %s23379_s14 = inlined_call_operand.hbm [shape: f32[8,32], index: 14, kind: input, shape index: {}]   ;;  %s23380_s15 = inlined_call_operand.hbm [shape: f32[1,32], index: 15, kind: input, shape index: {}]   ;;  %s23381_s16 = inlined_call_operand.vmem [shape: f32[32,32], index: 16, kind: input, shape index: {}]   ;;  %s23382_s17 = inlined_call_operand.vmem [shape: f32[1,32], index: 17, kind: input, shape index: {}]   ;;  %s23383_s18 = inlined_call_operand.vmem [shape: f32[32,4], index: 18, kind: input, shape index: {}]   ;;  %s23384_s19 = inlined_call_operand.vmem [shape: f32[1,4], index: 19, kind: input, shape index: {}]   ;;  %s23385_s20 = inlined_call_operand.hbm [shape: f32[8,8,32], index: 20, kind: output, shape index: {0}]   ;;  %s23386_s21 = inlined_call_operand.hbm [shape: f32[2,8,32], index: 21, kind: output, shape index: {1}]  }
   0x1   :  { %23413 = sst [smem:[#allocation56_spill]] %s23365_s0 }
   0x2   :  { %23414 = sst [smem:[#allocation57_spill]] %s23366_s1 }
   0x3   :  { %23415 = sst [smem:[#allocation58_spill]] %s23367_s2 }
   0x4   :  { %23416 = sst [smem:[#allocation59_spill]] %s23368_s3 }
   0x5   :  { %23417 = sst [smem:[#allocation60_spill]] %s23369_s4 }
   0x6   :  { %23418 = sst [smem:[#allocation61_spill]] %s23370_s5 }
   0x7   :  { %23419 = sst [smem:[#allocation62_spill]] %s23376_s11 }
   0x8   :  { %23420 = sst [smem:[#allocation63_spill]] %s23385_s20 }
   0x9   :  { %23421 = sst [smem:[#allocation64_spill]] %s23386_s21 }
   0xa   :  { %27 = vsyncpa [#allocation5], 0 }
   0xb   :  { %28 = vsyncpa [#allocation8], 0 }
   0xc   :  { %29 = vsyncpa [#allocation11], 0 }
   0xd   :  { %30 = vsyncpa [#allocation14], 0 }
   0xe   :  { %31 = vsyncpa [#allocation17], 0 }
   0xf   :  { %32 = vsyncpa [#allocation20], 0 }
  0x10   :  { %33 = vsyncpa [#allocation23], 0 }
  0x11   :  { %34 = vsyncpa [#allocation6], 0 }
  0x12   :  { %35 = vsyncpa [#allocation27], 0  ;;  %s20553_s2 = smov [#allocation7]   ;;  %s23422_s3 = sld [smem:[#allocation58_spill]] }
  0x13   :  { %s53_s25 = sshll.u32 %s20553_s2, 4  ;;  %s54_s25 = int_to_ptr.vmem [resolvable:$true] %s53_s25 }
  0x18   :  { %s20205_s28 = scalar_lea.hbm %s23422_s3, 512 }
  0x19   :  { %p20206_p0 = scmp.ne.s32.totalorder %s23422_s3, %s20205_s28  ;;  %p20209_p1 = scmp.lt.u32.totalorder %s20205_s28, %s23422_s3 }
  0x1b   :  { %p20211_p2 = pnand %p20209_p1, %p20206_p0 }
  0x1d   :  { %20214 = shalt.err (!%p20211_p2)
}
  0x1e   :  { %s20215_s5 = scalar_lea.vmem %s54_s25, 512  ;;  %p20220_p4 = scmp.lt.s32.totalorder %s54_s25, %s54_s25 }
  0x1f   :  { %p20216_p3 = scmp.ne.s32.totalorder %s54_s25, %s20215_s5  ;;  %p20221_p5 = scmp.lt.s32.totalorder %s20215_s5, %s20215_s5 }
  0x21   :  { %p20222_p6 = por %p20221_p5, %p20220_p4 }
  0x23   :  { %p20223_p7 = pnand %p20222_p6, %p20216_p3 }
  0x25   :  { %20226 = shalt.err (!%p20223_p7)
}
  0x26   :  { %s20554_s22 = smov 128   ;;  %s20555_s23 = smov 8  }
  0x27   :  { %59 = dma.hbm_to_vmem [thread:$0]  %s23422_s3, 512, %s54_s25, [#allocation8], %s20554_s22, %s20554_s22, %s20555_s23  }
  0x28   :  { %s20556_s2 = smov [#allocation10]   ;;  %s20557_s27 = smov [#allocation13]  }
  0x29   :  { %s75_s26 = sshll.u32 %s20556_s2, 4  ;;  %s100_s28 = sshll.u32 %s20557_s27, 4  ;;  %s76_s26 = int_to_ptr.vmem [resolvable:$true] %s75_s26  ;;  %s101_s28 = int_to_ptr.vmem [resolvable:$true] %s100_s28 }
  0x2a   :  { %s23423_s4 = sld [smem:[#allocation60_spill]] }
  0x30   :  { %s20227_s30 = scalar_lea.hbm %s23423_s4, 512 }
  0x31   :  { %p20228_p8 = scmp.ne.s32.totalorder %s23423_s4, %s20227_s30  ;;  %p20231_p9 = scmp.lt.u32.totalorder %s20227_s30, %s23423_s4 }
  0x33   :  { %p20233_p10 = pnand %p20231_p9, %p20228_p8 }
  0x35   :  { %20236 = shalt.err (!%p20233_p10)
}
  0x36   :  { %s20237_s25 = scalar_lea.vmem %s76_s26, 512  ;;  %p20242_p12 = scmp.lt.s32.totalorder %s76_s26, %s76_s26 }
  0x37   :  { %p20238_p11 = scmp.ne.s32.totalorder %s76_s26, %s20237_s25  ;;  %p20243_p13 = scmp.lt.s32.totalorder %s20237_s25, %s20237_s25 }
  0x39   :  { %p20244_p0 = por %p20243_p13, %p20242_p12 }
  0x3b   :  { %p20245_p1 = pnand %p20244_p0, %p20238_p11 }
  0x3d   :  { %20248 = shalt.err (!%p20245_p1)
}
  0x3e   :  { %81 = dma.hbm_to_vmem [thread:$0]  %s23423_s4, 512, %s76_s26, [#allocation11], %s20554_s22, %s20554_s22, %s20555_s23  }
  0x3f   :  { %s20249_s21 = scalar_lea.hbm %s23371_s6, 64 }
  0x40   :  { %p20250_p2 = scmp.ne.s32.totalorder %s23371_s6, %s20249_s21  ;;  %p20253_p3 = scmp.lt.u32.totalorder %s20249_s21, %s23371_s6 }
  0x42   :  { %p20255_p4 = pnand %p20253_p3, %p20250_p2 }
  0x44   :  { %20258 = shalt.err (!%p20255_p4)
}
  0x45   :  { %s20259_s0 = scalar_lea.vmem %s101_s28, 64  ;;  %p20264_p6 = scmp.lt.s32.totalorder %s101_s28, %s101_s28 }
  0x46   :  { %p20260_p5 = scmp.ne.s32.totalorder %s101_s28, %s20259_s0  ;;  %p20265_p7 = scmp.lt.s32.totalorder %s20259_s0, %s20259_s0 }
  0x48   :  { %p20266_p8 = por %p20265_p7, %p20264_p6 }
  0x4a   :  { %p20267_p9 = pnand %p20266_p8, %p20260_p5 }
  0x4c   :  { %20270 = shalt.err (!%p20267_p9)
}
  0x4d   :  { %103 = dma.hbm_to_vmem [thread:$0]  %s23371_s6, 64, %s101_s28, [#allocation14]  }
  0x4e   :  { %s20558_s30 = smov [#allocation16]   ;;  %s20559_s25 = smov [#allocation19]  }
  0x4f   :  { %s121_s5 = sshll.u32 %s20558_s30, 4  ;;  %s146_s3 = sshll.u32 %s20559_s25, 4  ;;  %s122_s5 = int_to_ptr.vmem [resolvable:$true] %s121_s5  ;;  %s147_s3 = int_to_ptr.vmem [resolvable:$true] %s146_s3 }
  0x50   :  { %s20271_s11 = scalar_lea.hbm %s23374_s9, 512 }
  0x51   :  { %p20272_p10 = scmp.ne.s32.totalorder %s23374_s9, %s20271_s11  ;;  %p20275_p11 = scmp.lt.u32.totalorder %s20271_s11, %s23374_s9 }
  0x53   :  { %p20277_p12 = pnand %p20275_p11, %p20272_p10 }
  0x55   :  { %20280 = shalt.err (!%p20277_p12)
}
  0x56   :  { %s20281_s6 = scalar_lea.vmem %s122_s5, 512  ;;  %p20286_p0 = scmp.lt.s32.totalorder %s122_s5, %s122_s5 }
  0x57   :  { %p20282_p13 = scmp.ne.s32.totalorder %s122_s5, %s20281_s6  ;;  %p20287_p1 = scmp.lt.s32.totalorder %s20281_s6, %s20281_s6 }
  0x59   :  { %p20288_p2 = por %p20287_p1, %p20286_p0 }
  0x5b   :  { %p20289_p3 = pnand %p20288_p2, %p20282_p13 }
  0x5d   :  { %20292 = shalt.err (!%p20289_p3)
}
  0x5e   :  { %127 = dma.hbm_to_vmem [thread:$0]  %s23374_s9, 512, %s122_s5, [#allocation17], %s20554_s22, %s20554_s22, %s20555_s23  }
  0x5f   :  { %s20293_s4 = scalar_lea.hbm %s23377_s12, 16 }
  0x60   :  { %p20294_p4 = scmp.ne.s32.totalorder %s23377_s12, %s20293_s4  ;;  %p20297_p5 = scmp.lt.u32.totalorder %s20293_s4, %s23377_s12 }
  0x62   :  { %p20299_p6 = pnand %p20297_p5, %p20294_p4 }
  0x64   :  { %20302 = shalt.err (!%p20299_p6)
}
  0x65   :  { %s20303_s11 = scalar_lea.vmem %s147_s3, 16  ;;  %s20307_s21 = scalar_lea.vmem %s147_s3, 32 }
  0x66   :  { %p20304_p7 = scmp.ne.s32.totalorder %s147_s3, %s20303_s11  ;;  %p20308_p8 = scmp.lt.s32.totalorder %s147_s3, %s147_s3 }
  0x67   :  { %p20309_p9 = scmp.lt.s32.totalorder %s20307_s21, %s20303_s11 }
  0x69   :  { %p20310_p10 = por %p20309_p9, %p20308_p8 }
  0x6b   :  { %p20311_p11 = pnand %p20310_p10, %p20304_p7 }
  0x6d   :  { %20314 = shalt.err (!%p20311_p11)
}
  0x6e   :  { %149 = dma.hbm_to_vmem [thread:$0]  %s23377_s12, 16, %s147_s3, [#allocation20]  }
  0x6f   :  { %s20560_s24 = smov [#allocation22]   ;;  %s20561_s27 = smov [#allocation4]  }
  0x70   :  { %s166_s2 = sshll.u32 %s20560_s24, 4  ;;  %s44_s6 = sshll.u32 %s20561_s27, 4  ;;  %s167_s2 = int_to_ptr.vmem [resolvable:$true] %s166_s2  ;;  %s45_s6 = int_to_ptr.vmem [resolvable:$true] %s44_s6 }
  0x71   :  { %s20315_s0 = scalar_lea.hbm %s23379_s14, 128 }
  0x72   :  { %p20316_p12 = scmp.ne.s32.totalorder %s23379_s14, %s20315_s0  ;;  %p20319_p13 = scmp.lt.u32.totalorder %s20315_s0, %s23379_s14 }
  0x74   :  { %p20321_p0 = pnand %p20319_p13, %p20316_p12 }
  0x76   :  { %20324 = shalt.err (!%p20321_p0)
}
  0x77   :  { %s20325_s12 = scalar_lea.vmem %s167_s2, 128  ;;  %p20330_p2 = scmp.lt.s32.totalorder %s167_s2, %s167_s2 }
  0x78   :  { %p20326_p1 = scmp.ne.s32.totalorder %s167_s2, %s20325_s12  ;;  %p20331_p3 = scmp.lt.s32.totalorder %s20325_s12, %s20325_s12 }
  0x7a   :  { %p20332_p4 = por %p20331_p3, %p20330_p2 }
  0x7c   :  { %p20333_p5 = pnand %p20332_p4, %p20326_p1 }
  0x7e   :  { %20336 = shalt.err (!%p20333_p5)
}
  0x7f   :  { %169 = dma.hbm_to_vmem [thread:$0]  %s23379_s14, 128, %s167_s2, [#allocation23]  }
  0x80   :  { %s23424_s21 = sld [smem:[#allocation57_spill]] }
  0x86   :  { %s20337_s9 = scalar_lea.hbm %s23424_s21, 128 }
  0x87   :  { %p20338_p6 = scmp.ne.s32.totalorder %s23424_s21, %s20337_s9  ;;  %p20341_p7 = scmp.lt.u32.totalorder %s20337_s9, %s23424_s21 }
  0x89   :  { %p20343_p8 = pnand %p20341_p7, %p20338_p6 }
  0x8b   :  { %20346 = shalt.err (!%p20343_p8)
}
  0x8c   :  { %s20347_s29 = scalar_lea.vmem %s45_s6, 128  ;;  %p20352_p10 = scmp.lt.s32.totalorder %s45_s6, %s45_s6 }
  0x8d   :  { %p20348_p9 = scmp.ne.s32.totalorder %s45_s6, %s20347_s29  ;;  %p20353_p11 = scmp.lt.s32.totalorder %s20347_s29, %s20347_s29 }
  0x8f   :  { %p20354_p12 = por %p20353_p11, %p20352_p10 }
  0x91   :  { %p20355_p13 = pnand %p20354_p12, %p20348_p9 }
  0x93   :  { %20358 = shalt.err (!%p20355_p13)
}
  0x94   :  { %47 = dma.hbm_to_vmem [thread:$0]  %s23424_s21, 128, %s45_s6, [#allocation5]  }
  0x95   :  { %s20562_s0 = smov [#allocation9]   ;;  %s20563_s4 = smov [#allocation12]  }
  0x96   :  { %s66_s26 = sshll.u32 %s20562_s0, 4  ;;  %s87_s30 = sshll.u32 %s20563_s4, 4  ;;  %s67_s26 = int_to_ptr.vmem [resolvable:$true] %s66_s26  ;;  %s88_s30 = int_to_ptr.vmem [resolvable:$true] %s87_s30 }
  0x97   :  { %s23425_s3 = sld [smem:[#allocation59_spill]] }
  0x9d   :  { %s20359_s1 = scalar_lea.hbm %s23425_s3, 64 }
  0x9e   :  { %p20360_p0 = scmp.ne.s32.totalorder %s23425_s3, %s20359_s1  ;;  %p20363_p1 = scmp.lt.u32.totalorder %s20359_s1, %s23425_s3 }
  0xa0   :  { %p20365_p2 = pnand %p20363_p1, %p20360_p0 }
  0xa2   :  { %20368 = shalt.err (!%p20365_p2)
}
  0xa3   :  { %s20369_s6 = scalar_lea.vmem %s67_s26, 64  ;;  %p20374_p4 = scmp.lt.s32.totalorder %s67_s26, %s67_s26 }
  0xa4   :  { %p20370_p3 = scmp.ne.s32.totalorder %s67_s26, %s20369_s6  ;;  %p20375_p5 = scmp.lt.s32.totalorder %s20369_s6, %s20369_s6 }
  0xa6   :  { %p20376_p6 = por %p20375_p5, %p20374_p4 }
  0xa8   :  { %p20377_p7 = pnand %p20376_p6, %p20370_p3 }
  0xaa   :  { %20380 = shalt.err (!%p20377_p7)
}
  0xab   :  { %69 = dma.hbm_to_vmem [thread:$0]  %s23425_s3, 64, %s67_s26, [#allocation8]  }
  0xac   :  { %s23426_s29 = sld [smem:[#allocation61_spill]] }
  0xb2   :  { %s20381_s14 = scalar_lea.hbm %s23426_s29, 512 }
  0xb3   :  { %p20382_p8 = scmp.ne.s32.totalorder %s23426_s29, %s20381_s14  ;;  %p20385_p9 = scmp.lt.u32.totalorder %s20381_s14, %s23426_s29 }
  0xb5   :  { %p20387_p10 = pnand %p20385_p9, %p20382_p8 }
  0xb7   :  { %20390 = shalt.err (!%p20387_p10)
}
  0xb8   :  { %s20391_s12 = scalar_lea.vmem %s88_s30, 512  ;;  %p20396_p12 = scmp.lt.s32.totalorder %s88_s30, %s88_s30 }
  0xb9   :  { %p20392_p11 = scmp.ne.s32.totalorder %s88_s30, %s20391_s12  ;;  %p20397_p13 = scmp.lt.s32.totalorder %s20391_s12, %s20391_s12 }
  0xbb   :  { %p20398_p0 = por %p20397_p13, %p20396_p12 }
  0xbd   :  { %p20399_p1 = pnand %p20398_p0, %p20392_p11 }
  0xbf   :  { %20402 = shalt.err (!%p20399_p1)
}
  0xc0   :  { %93 = dma.hbm_to_vmem [thread:$0]  %s23426_s29, 512, %s88_s30, [#allocation11], %s20554_s22, %s20554_s22, %s20555_s23  }
  0xc1   :  { %s20564_s1 = smov [#allocation15]   ;;  %s20565_s11 = smov [#allocation18]  }
  0xc2   :  { %s112_s20 = sshll.u32 %s20564_s1, 4  ;;  %s134_s9 = sshll.u32 %s20565_s11, 4  ;;  %s113_s20 = int_to_ptr.vmem [resolvable:$true] %s112_s20  ;;  %s135_s9 = int_to_ptr.vmem [resolvable:$true] %s134_s9 }
  0xc3   :  { %s20403_s21 = scalar_lea.hbm %s23373_s8, 16 }
  0xc4   :  { %p20404_p2 = scmp.ne.s32.totalorder %s23373_s8, %s20403_s21  ;;  %p20407_p3 = scmp.lt.u32.totalorder %s20403_s21, %s23373_s8 }
  0xc6   :  { %p20409_p4 = pnand %p20407_p3, %p20404_p2 }
  0xc8   :  { %20412 = shalt.err (!%p20409_p4)
}
  0xc9   :  { %s20413_s30 = scalar_lea.vmem %s113_s20, 16  ;;  %s20417_s29 = scalar_lea.vmem %s113_s20, 32 }
  0xca   :  { %p20414_p5 = scmp.ne.s32.totalorder %s113_s20, %s20413_s30  ;;  %p20418_p6 = scmp.lt.s32.totalorder %s113_s20, %s113_s20 }
  0xcb   :  { %p20419_p7 = scmp.lt.s32.totalorder %s20417_s29, %s20413_s30 }
  0xcd   :  { %p20420_p8 = por %p20419_p7, %p20418_p6 }
  0xcf   :  { %p20421_p9 = pnand %p20420_p8, %p20414_p5 }
  0xd1   :  { %20424 = shalt.err (!%p20421_p9)
}
  0xd2   :  { %115 = dma.hbm_to_vmem [thread:$0]  %s23373_s8, 16, %s113_s20, [#allocation14]  }
  0xd3   :  { %s20425_s12 = scalar_lea.hbm %s23375_s10, 16 }
  0xd4   :  { %p20426_p10 = scmp.ne.s32.totalorder %s23375_s10, %s20425_s12  ;;  %p20429_p11 = scmp.lt.u32.totalorder %s20425_s12, %s23375_s10 }
  0xd6   :  { %p20431_p12 = pnand %p20429_p11, %p20426_p10 }
  0xd8   :  { %20434 = shalt.err (!%p20431_p12)
}
  0xd9   :  { %s20435_s5 = scalar_lea.vmem %s135_s9, 16  ;;  %s20439_s6 = scalar_lea.vmem %s135_s9, 32 }
  0xda   :  { %p20436_p13 = scmp.ne.s32.totalorder %s135_s9, %s20435_s5  ;;  %p20440_p0 = scmp.lt.s32.totalorder %s135_s9, %s135_s9 }
  0xdb   :  { %p20441_p1 = scmp.lt.s32.totalorder %s20439_s6, %s20435_s5 }
  0xdd   :  { %p20442_p2 = por %p20441_p1, %p20440_p0 }
  0xdf   :  { %p20443_p3 = pnand %p20442_p2, %p20436_p13 }
  0xe1   :  { %20446 = shalt.err (!%p20443_p3)
}
  0xe2   :  { %137 = dma.hbm_to_vmem [thread:$0]  %s23375_s10, 16, %s135_s9, [#allocation17]  }
  0xe3   :  { %s20566_s21 = smov [#allocation21]   ;;  %s20567_s27 = smov [#allocation24]  }
  0xe4   :  { %s156_s24 = sshll.u32 %s20566_s21, 4  ;;  %s176_s28 = sshll.u32 %s20567_s27, 4  ;;  %s157_s24 = int_to_ptr.vmem [resolvable:$true] %s156_s24  ;;  %s177_s28 = int_to_ptr.vmem [resolvable:$true] %s176_s28 }
  0xe5   :  { %s20447_s29 = scalar_lea.hbm %s23378_s13, 64 }
  0xe6   :  { %p20448_p4 = scmp.ne.s32.totalorder %s23378_s13, %s20447_s29  ;;  %p20451_p5 = scmp.lt.u32.totalorder %s20447_s29, %s23378_s13 }
  0xe8   :  { %p20453_p6 = pnand %p20451_p5, %p20448_p4 }
  0xea   :  { %20456 = shalt.err (!%p20453_p6)
}
  0xeb   :  { %s20457_s10 = scalar_lea.vmem %s157_s24, 64  ;;  %p20462_p8 = scmp.lt.s32.totalorder %s157_s24, %s157_s24 }
  0xec   :  { %p20458_p7 = scmp.ne.s32.totalorder %s157_s24, %s20457_s10  ;;  %p20463_p9 = scmp.lt.s32.totalorder %s20457_s10, %s20457_s10 }
  0xee   :  { %p20464_p10 = por %p20463_p9, %p20462_p8 }
  0xf0   :  { %p20465_p11 = pnand %p20464_p10, %p20458_p7 }
  0xf2   :  { %20468 = shalt.err (!%p20465_p11)
}
  0xf3   :  { %159 = dma.hbm_to_vmem [thread:$0]  %s23378_s13, 64, %s157_s24, [#allocation20]  }
  0xf4   :  { %s20469_s1 = scalar_lea.hbm %s23380_s15, 16 }
  0xf5   :  { %p20470_p12 = scmp.ne.s32.totalorder %s23380_s15, %s20469_s1  ;;  %p20473_p13 = scmp.lt.u32.totalorder %s20469_s1, %s23380_s15 }
  0xf7   :  { %p20475_p0 = pnand %p20473_p13, %p20470_p12 }
  0xf9   :  { %20478 = shalt.err (!%p20475_p0)
}
  0xfa   :  { %s20479_s20 = scalar_lea.vmem %s177_s28, 16  ;;  %s20483_s21 = scalar_lea.vmem %s177_s28, 32 }
  0xfb   :  { %p20480_p1 = scmp.ne.s32.totalorder %s177_s28, %s20479_s20  ;;  %p20484_p2 = scmp.lt.s32.totalorder %s177_s28, %s177_s28 }
  0xfc   :  { %p20485_p3 = scmp.lt.s32.totalorder %s20483_s21, %s20479_s20 }
  0xfe   :  { %p20486_p4 = por %p20485_p3, %p20484_p2 }
 0x100   :  { %p20487_p5 = pnand %p20486_p4, %p20480_p1 }
 0x102   :  { %20490 = shalt.err (!%p20487_p5)
}
 0x103   :  { %179 = dma.hbm_to_vmem [thread:$0]  %s23380_s15, 16, %s177_s28, [#allocation23]  }
 0x104   :  { %20535 = dma.done.wait [#allocation5], 128  }
 0x105   :  { %20536 = vsyncadd [#allocation5], 4294967168 }
 0x106   :  { %20537 = dma.done.wait [#allocation8], 576  }
 0x107   :  { %20538 = vsyncadd [#allocation8], 4294966720 }
 0x108   :  { %20539 = dma.done.wait [#allocation11], 1024  }
 0x109   :  { %20540 = vsyncadd [#allocation11], 4294966272 }
 0x10a   :  { %20541 = dma.done.wait [#allocation14], 80  }
 0x10b   :  { %20542 = vsyncadd [#allocation14], 4294967216 }
 0x10c   :  { %20543 = dma.done.wait [#allocation17], 528  }
 0x10d   :  { %20544 = vsyncadd [#allocation17], 4294966768 }
 0x10e   :  { %20545 = dma.done.wait [#allocation20], 80  }
 0x10f   :  { %20546 = vsyncadd [#allocation20], 4294967216 }
 0x110   :  { %20547 = dma.done.wait [#allocation23], 144  }
 0x111   :  { %20548 = vsyncadd [#allocation23], 4294967152  ;;  %vm345_vm0 = vcmask 31744   ;;  %v23398_v0 = vmov 0.0   ;;  %vm347_vm1 = vcmask 64512   ;;  %vm20569_vm2 = vmmov 0  }
 0x112   :  { %16986 = vmatprep.subr.mxu1 %v23398_v0  ;;  %16981 = vmatprep.subr.mxu0 %v23398_v0  ;;  %v20570_v1 = vmov 1.0   ;;  %vm432_vm3 = vcmask 1043456   ;;  %v307_v3 = vld [vmem:[#allocation21] sm:$0xf]  ;;  %v20865_v4 = vld [vmem:[#allocation22] sm:$0xff]  ;;  %s23427_s28 = sld [smem:[#allocation56_spill]]  ;;  %v233_v28 = vlaneseq }
 0x113   :  { %16988 = vmatprep.mubr.msk.f32.mxu1 %vm20569_vm2, %v23398_v0  ;;  %16983 = vmatprep.mubr.msk.f32.mxu0 %vm20569_vm2, %v23398_v0  ;;  %v346_v2 = vsel %vm345_vm0, 0.0, %v20570_v1  ;;  %v316_v7 = vld [vmem:[%s23381_s16] sm:$0xff]  ;;  %v317_v8 = vld [vmem:[%s23381_s16 + $0x8] sm:$0xff]  ;;  %v23396_v10 = vmov 0.0|0.0   ;;  %v318_v11 = vld [vmem:[%s23381_s16 + $0x10] sm:$0xff]  ;;  %vm342_vm4 = vcmask 261120  }
 0x114   :  { %348 = vst.msk [vmem:[#allocation3] sm:$0xff] %vm347_vm1, %v346_v2  ;;  %16987 = vmatpush3.msk.msra.mxu1 %vm432_vm3, %v307_v3  ;;  %16982 = vmatpush3.msra.mxu0 %v20865_v4  ;;  %v20887_v9 = vpack.c.bf16 %v317_v8, %v316_v7  ;;  %v319_v12 = vld [vmem:[%s23381_s16 + $0x18] sm:$0xff]  ;;  %v327_v14 = vld [vmem:[%s23383_s18] sm:$0xff]  ;;  %v328_v15 = vld [vmem:[%s23383_s18 + $0x8] sm:$0xff]  ;;  %v20933_v29 = vshrl.u32 %v233_v28, 7  ;;  %s20572_s6 = smov 64  }
 0x115   :  { %18787 = vmatprep.subr.bf16.mxu0 %v23396_v10  ;;  %18793 = vmatprep.subr.bf16.mxu1 %v23396_v10  ;;  %v20899_v13 = vpack.c.bf16 %v319_v12, %v318_v11  ;;  %343 = vst.msk [vmem:[#allocation2] sm:$0xff] %vm342_vm4, %v23398_v0  ;;  %344 = vst.msk [vmem:[#allocation2 + $0x8] sm:$0xff] %vm342_vm4, %v23398_v0  ;;  %v20913_v16 = vpack.c.bf16 %v328_v15, %v327_v14  ;;  %v20917_v19 = vld [vmem:[#allocation24] ss:$0 sm:$0xff]  ;;  %v329_v25 = vld [vmem:[%s23383_s18 + $0x10] sm:$0xff]  ;;  %s20573_s13 = smov 32  }
 0x116   :  { %v330_v26 = vld [vmem:[%s23383_s18 + $0x18] sm:$0xff]  ;;  %v232_v30 = vld [vmem:[#allocation9] sm:$0xf]  ;;  %v247_v31 = vsub.s32 3, %v20933_v29  ;;  %v229_v35 = vld [vmem:[#allocation7 + $0x8] sm:$0xff]  ;;  %v243_v46 = vsub.s32 2, %v20933_v29 }
 0x117   :  { %v20929_v27 = vpack.c.bf16 %v330_v26, %v329_v25  ;;  %v20942_v33 = vld [vmem:[%s23382_s17] ss:$0 sm:$0xff]  ;;  %v230_v41 = vld [vmem:[#allocation7 + $0x10] sm:$0xff]  ;;  %v231_v42 = vld [vmem:[#allocation7 + $0x18] sm:$0xff]  ;;  %v239_v54 = vsub.s32 1, %v20933_v29  ;;  %v235_v59 = vsub.s32 0, %v20933_v29 }
 0x118   :  { %v20870_v5 = vld [vmem:[%s23427_s28] sm:$0xff]  ;;  %v248_v32 = vrot.slane %v232_v30, %v247_v31  ;;  %v20949_v43 = vpack.c.bf16 %v231_v42, %v230_v41  ;;  %v20959_v45 = vld [vmem:[#allocation4] sm:$0xff]  ;;  %v244_v47 = vrot.slane %v232_v30, %v243_v46  ;;  %s20574_s24 = smov 96   ;;  %s23429_s10 = sld [smem:[#allocation62_spill]]  ;;  %vm2453_vm5 = vcmask 130048  }
 0x119   :  { %16989 = vmatmul.mubr.msk.f32.vlgmr.msra.gmra.mrb[0].mxu1 %vm345_vm0, %v20870_v5  ;;  %v228_v34 = vld [vmem:[#allocation7] sm:$0xff]  ;;  %v240_v58 = vrot.slane %v232_v30, %v239_v54  ;;  %v20993_v60 = vrot.slane %v232_v30, %v235_v59  ;;  %v251_v25 = vld [vmem:[#allocation10 + $0x10] sm:$0xff]  ;;  %vm2455_vm6 = vcmask 195584  }
 0x11a   :  { %17010 = vmatprep.mubr.msk.f32.mxu1 %vm20569_vm2, %v23398_v0  ;;  %18795 = vmatpush3.bf16.msra.mxu1 %v20913_v16  ;;  %v20945_v39 = vpack.c.bf16 %v229_v35, %v228_v34  ;;  %v20970_v48 = vld [vmem:[%s23384_s19] ss:$0 sm:$0xff]  ;;  %v257_v42 = vld [vmem:[#allocation13] sm:$0xf] }
 0x11b   :  { %v352_v6 = vld [vmem:[#allocation3] sm:$0xff]  ;;  %18796 = vmatprep.subr.bf16.mxu1 %v23396_v10  ;;  %828 = vrot.lane.b32.xlu0 %v248_v32, %s20572_s6  ;;  %v252_v26 = vld [vmem:[#allocation10 + $0x18] sm:$0xff] }
 0x11c   :  { %16984 = vmatmul.mubr.msk.f32.vlgmr.msra.gmra.mrb[0].mxu0 %vm347_vm1, %v352_v6  ;;  %v349_v44 = vld [vmem:[#allocation2] sm:$0xff]  ;;  %823 = vrot.lane.b32.xlu1 %v244_v47, %s20572_s6  ;;  %v21009_v32 = vpack.c.bf16 %v252_v26, %v251_v25  ;;  %v351_v34 = vld [vmem:[#allocation2 + $0x8] sm:$0xff]  ;;  %v269_v47 = vrot.slane %v257_v42, %v243_v46  ;;  %v277_v26 = vld [vmem:[%s23372_s7 + $0x18] sm:$0xff] }
 0x11d   :  { %16999 = vmatprep.mubr.msk.f32.mxu0 %vm20569_vm2, %v23398_v0  ;;  %18789 = vmatpush3.bf16.msra.mxu0 %v20887_v9 }
 0x11e   :  { %18790 = vmatprep.subr.bf16.mxu0 %v23396_v10  ;;  %18798 = vmatpush3.bf16.msra.mxu1 %v20929_v27 }
 0x11f   :  { %18799 = vmatprep.subr.bf16.mxu1 %v23396_v10 }
 0x121   :  { %18792 = vmatpush3.bf16.msra.mxu0 %v20899_v13 }
 0x122   :  { %17013 = vmatprep.subr.mxu0 %v23398_v0 }
 0x18d   :  { %v20981_v53 = vpop.permute.xlu0 %828 }
 0x18e   :  { %v20997_v11 = vpop.permute.xlu1 %823 }
 0x1ec   :  { %v502_v17 = vpop.f32.mrb[0].mxu1 }
 0x1ed   :  { %v16990_v18 = vpop.f32.mrb[1].mxu1 }
 0x1ee   :  { %v254_v18 = vld [vmem:[#allocation12 + $0x8] sm:$0xff] }
 0x1ef   :  { %v424_v20 = vpop.f32.mrb[0].mxu0 }
 0x1f0   :  { %v503_v21 = vadd.f32 %v502_v17, %v424_v20  ;;  %v16985_v22 = vpop.f32.mrb[1].mxu0  ;;  %v253_v17 = vld [vmem:[#allocation12] sm:$0xff]  ;;  %v255_v20 = vld [vmem:[#allocation12 + $0x10] sm:$0xff] }
 0x1f1   :  { %v256_v22 = vld [vmem:[#allocation12 + $0x18] sm:$0xff] }
 0x1f2   :  { %v506_v23 = vadd.f32 %v20917_v19, %v503_v21  ;;  %v21000_v21 = vpack.c.bf16 %v254_v18, %v253_v17  ;;  %v21003_v28 = vpack.c.bf16 %v256_v22, %v255_v20  ;;  %v274_v22 = vld [vmem:[%s23372_s7] sm:$0xff] }
 0x1f4   :  { %v507_v24 = vmax.f32 %v506_v23, 0.0  ;;  %v249_v23 = vld [vmem:[#allocation10] sm:$0xff] }
 0x1f6   :  { %17000 = vmatmul.mubr.msk.f32.vlgmr.msra.gmra.mrb[2].mxu0 %vm342_vm4, %v507_v24  ;;  %v250_v24 = vld [vmem:[#allocation10 + $0x8] sm:$0xff] }
 0x1f7   :  { %17015 = vmatprep.mubr.msk.f32.mxu0 %vm20569_vm2, %v23398_v0  ;;  %17014 = vmatpush3.msra.mxu0 %v20959_v45  ;;  %v21005_v30 = vpack.c.bf16 %v250_v24, %v249_v23  ;;  %v275_v23 = vld [vmem:[%s23372_s7 + $0x8] sm:$0xff]  ;;  %v276_v24 = vld [vmem:[%s23372_s7 + $0x10] sm:$0xff] }
 0x1f8   :  { %18805 = vmatprep.subr.bf16.mxu0 %v23396_v10  ;;  %v21065_v25 = vpack.c.bf16 %v275_v23, %v274_v22  ;;  %v21123_v22 = vld [vmem:[#allocation18] ss:$0 sm:$0xff] }
 0x2c9   :  { %v578_v36 = vpop.f32.mrb[2].mxu0 }
 0x2ca   :  { %v579_v37 = vadd.f32 %v20942_v33, %v578_v36  ;;  %v17001_v38 = vpop.f32.mrb[3].mxu0 }
 0x2cc   :  { %v582_v40 = vmax.f32 %v579_v37, 0.0 }
 0x2ce   :  { %17011 = vmatmul.mubr.msk.f32.vlgmr.msra.gmra.mrb[2].mxu1 %vm342_vm4, %v582_v40 }
 0x2cf   :  { %18801 = vmatpush3.bf16.msra.mxu1 %v20945_v39  ;;  %17026 = vmatprep.mubr.msk.f32.mxu1 %vm20569_vm2, %v23398_v0 }
 0x2d0   :  { %18802 = vmatprep.subr.bf16.mxu1 %v23396_v10 }
 0x2d3   :  { %18804 = vmatpush3.bf16.msra.mxu1 %v20949_v43 }
 0x2d4   :  { %18811 = vmatprep.subr.bf16.mxu1 %v23396_v10 }
 0x2d6   :  { %17027 = vmatmul.mubr.msk.f32.vlgmr.msra.gmra.mrb[4].mxu1 %vm342_vm4, %v349_v44 }
 0x2d7   :  { %17048 = vmatprep.mubr.msk.f32.mxu1 %vm20569_vm2, %v23398_v0  ;;  %18813 = vmatpush3.bf16.msra.mxu1 %v21000_v21 }
 0x2d8   :  { %18814 = vmatprep.subr.bf16.mxu1 %v23396_v10 }
 0x2db   :  { %18816 = vmatpush3.bf16.msra.mxu1 %v21003_v28 }
 0x2dc   :  { %18823 = vmatprep.subr.bf16.mxu1 %v23396_v10 }
 0x2de   :  { %17049 = vmatmul.mubr.msk.f32.vlgmr.msra.gmra.mrb[6].mxu1 %vm342_vm4, %v351_v34 }
 0x2df   :  { %17070 = vmatprep.mubr.msk.f32.mxu1 %vm20569_vm2, %v23398_v0 }
 0x3a1   :  { %v652_v49 = vpop.f32.mrb[2].mxu1 }
 0x3a2   :  { %v653_v50 = vadd.f32 %v20970_v48, %v652_v49  ;;  %v17012_v51 = vpop.f32.mrb[3].mxu1 }
 0x3a4   :  { %v20975_v52 = vsel %vm345_vm0, %v653_v50, %v20870_v5 }
 0x3a5   :  { %23428 = vst [vmem:[#allocation37_spill] sm:$0xff] %v20975_v52  ;;  %17016 = vmatmul.mubr.msk.f32.vlgmr.msra.gmra.mrb[4].mxu0 %vm347_vm1, %v20975_v52 }
 0x3a6   :  { %17037 = vmatprep.mubr.msk.f32.mxu0 %vm20569_vm2, %v23398_v0  ;;  %18807 = vmatpush3.bf16.msra.mxu0 %v21005_v30 }
 0x3a7   :  { %18808 = vmatprep.subr.bf16.mxu0 %v23396_v10 }
 0x3a9   :  { %v799_v55 = vpop.f32.mrb[4].mxu1 }
 0x3aa   :  { %v831_v56 = vadd.f32 %v20981_v53, %v799_v55  ;;  %v17028_v57 = vpop.f32.mrb[5].mxu1  ;;  %18810 = vmatpush3.bf16.msra.mxu0 %v21009_v32 }
 0x3ab   :  { %18817 = vmatprep.subr.bf16.mxu0 %v23396_v10 }
 0x3ac   :  { %833 = vrot.lane.b32.xlu0 %v831_v56, %s20572_s6 }
 0x3b0   :  { %812 = vrot.lane.b32.xlu0 %v240_v58, %s20573_s13 }
 0x3b4   :  { %849 = vrot.lane.b32.xlu0 %v349_v44, %s20573_s13  ;;  %v273_v44 = vrot.slane %v257_v42, %v247_v31  ;;  %v998_v31 = vpop.f32.mrb[6].mxu1 }
 0x3b5   :  { %v17050_v46 = vpop.f32.mrb[7].mxu1 }
 0x3b8   :  { %1027 = vrot.lane.b32.xlu0 %v273_v44, %s20572_s6  ;;  %v285_v44 = vld [vmem:[#allocation16] sm:$0xff] }
 0x3bc   :  { %1022 = vrot.lane.b32.xlu0 %v269_v47, %s20572_s6  ;;  %v286_v47 = vld [vmem:[#allocation16 + $0x8] sm:$0xff] }
 0x41e   :  { %v834_v7 = vpop.permute.xlu0 %833 }
 0x422   :  { %v21020_v36 = vpop.permute.xlu0 %812 }
 0x426   :  { %v850_v50 = vpop.permute.xlu0 %849 }
 0x478   :  { %v726_v61 = vpop.f32.mrb[4].mxu0 }
 0x479   :  { %v803_v62 = vadd.f32 %v799_v55, %v726_v61  ;;  %v17017_v63 = vpop.f32.mrb[5].mxu0  ;;  %v826_v12 = vadd.f32 %v20997_v11, %v726_v61  ;;  %v265_v55 = vrot.slane %v257_v42, %v239_v54 }
 0x47b   :  { %v804_v1 = vadd.f32 %v803_v62, %v20993_v60  ;;  %v815_v37 = vadd.f32 %v21020_v36, %v803_v62  ;;  %1011 = vrot.lane.b32.xlu0 %v265_v55, %s20573_s13  ;;  %v21037_v62 = vpop.permute.xlu0 %1027 }
 0x47c   :  { %v1030_v63 = vadd.f32 %v21037_v62, %v998_v31 }
 0x47d   :  { %v15881_v2 = vmul.f32 -1.442695, %v804_v1  ;;  %v15882_v38 = vmul.f32 -1.442695, %v815_v37  ;;  %v21049_v1 = vrot.slane %v257_v42, %v235_v59 }
 0x47f   :  { %19689 = vpow2.f32 %v15881_v2  ;;  %1048 = vrot.lane.b32.xlu0 %v351_v34, %s20573_s13  ;;  %v21053_v18 = vpop.permute.xlu0 %1022  ;;  %v21071_v34 = vpack.c.bf16 %v277_v26, %v276_v24 }
 0x489   :  { %v19690_v3 = vpop.eup %19689 }
 0x48a   :  { %v808_v5 = vadd.f32 1.0, %v19690_v3 }
 0x48c   :  { %19691 = vrcp.f32 %v808_v5 }
 0x496   :  { %v19692_v6 = vpop.eup %19691 }
 0x497   :  { %v836_v8 = vmul.f32 %v19692_v6, %v834_v7 }
 0x499   :  { %838 = vrot.lane.b32.xlu1 %v836_v8, %s20572_s6 }
 0x4ed   :  { %v21077_v37 = vpop.permute.xlu0 %1011 }
 0x50b   :  { %v839_v14 = vpop.permute.xlu1 %838 }
 0x50c   :  { %v841_v15 = vadd.f32 %v839_v14, %v826_v12 }
 0x50e   :  { %19693 = vtanh.f32 %v841_v15 }
 0x50f   :  { %19695 = vpow2.f32 %v15882_v38 }
 0x518   :  { %v19694_v35 = vpop.eup %19693 }
 0x519   :  { %845 = vrot.lane.b32.xlu1 %v19694_v35, %s20574_s24  ;;  %v19696_v40 = vpop.eup %19695 }
 0x51a   :  { %v819_v41 = vadd.f32 1.0, %v19696_v40 }
 0x51c   :  { %19697 = vrcp.f32 %v819_v41 }
 0x526   :  { %v19698_v49 = vpop.eup %19697 }
 0x527   :  { %v843_v51 = vsub.f32 1.0, %v19698_v49  ;;  %v852_v57 = vmul.f32 %v19698_v49, %v850_v50  ;;  %v21080_v49 = vpack.c.bf16 %v286_v47, %v285_v44 }
 0x529   :  { %18825 = vmatpush3.bf16.msra.mxu1 %v21080_v49 }
 0x52a   :  { %18826 = vmatprep.subr.bf16.mxu1 %v23396_v10 }
 0x58b   :  { %v846_v56 = vpop.permute.xlu1 %845 }
 0x58c   :  { %v848_v58 = vmul.f32 %v846_v56, %v843_v51  ;;  %v1049_v51 = vpop.permute.xlu0 %1048 }
 0x58e   :  { %v21031_v61 = vadd.f32 %v852_v57, %v848_v58 }
 0x590   :  { %855 = vrot.lane.b32.xlu1 %v21031_v61, %s20574_s24 }
 0x594   :  { %1032 = vrot.lane.b32.xlu1 %v1030_v63, %s20572_s6  ;;  %v287_v63 = vld [vmem:[#allocation16 + $0x10] sm:$0xff] }
 0x602   :  { %v21041_v54 = vpop.permute.xlu1 %855 }
 0x603   :  { %17038 = vmatmul.mubr.msk.f32.vlgmr.msra.gmra.mrb[6].mxu0 %vm342_vm4, %v21041_v54 }
 0x604   :  { %17059 = vmatprep.mubr.msk.f32.mxu0 %vm20569_vm2, %v23398_v0  ;;  %18819 = vmatpush3.bf16.msra.mxu0 %v21065_v25 }
 0x605   :  { %18820 = vmatprep.subr.bf16.mxu0 %v23396_v10 }
 0x606   :  { %v1033_v14 = vpop.permute.xlu1 %1032 }
 0x608   :  { %18822 = vmatpush3.bf16.msra.mxu0 %v21071_v34 }
 0x609   :  { %18829 = vmatprep.subr.bf16.mxu0 %v23396_v10 }
 0x6d6   :  { %v925_v2 = vpop.f32.mrb[6].mxu0 }
 0x6d7   :  { %v1002_v3 = vadd.f32 %v998_v31, %v925_v2  ;;  %v17039_v5 = vpop.f32.mrb[7].mxu0  ;;  %v1025_v29 = vadd.f32 %v21053_v18, %v925_v2  ;;  %v288_v2 = vld [vmem:[#allocation16 + $0x18] sm:$0xff] }
 0x6d8   :  { %v296_v5 = vld [vmem:[%s23429_s10] sm:$0xff] }
 0x6d9   :  { %v1003_v6 = vadd.f32 %v1002_v3, %v21049_v1  ;;  %v1014_v38 = vadd.f32 %v21077_v37, %v1002_v3  ;;  %v21091_v3 = vpack.c.bf16 %v288_v2, %v287_v63 }
 0x6db   :  { %v15885_v7 = vmul.f32 -1.442695, %v1003_v6  ;;  %v15886_v40 = vmul.f32 -1.442695, %v1014_v38  ;;  %18828 = vmatpush3.bf16.msra.mxu1 %v21091_v3  ;;  %v297_v6 = vld [vmem:[%s23429_s10 + $0x8] sm:$0xff] }
 0x6dc   :  { %17084 = vmatprep.subr.mxu1 %v23398_v0 }
 0x6dd   :  { %19699 = vpow2.f32 %v15885_v7  ;;  %v21101_v7 = vpack.c.bf16 %v297_v6, %v296_v5 }
 0x6e7   :  { %v19700_v8 = vpop.eup %19699 }
 0x6e8   :  { %v1007_v12 = vadd.f32 1.0, %v19700_v8  ;;  %v21105_v8 = vld [vmem:[#allocation15] ss:$0 sm:$0xff] }
 0x6ea   :  { %19701 = vrcp.f32 %v1007_v12 }
 0x6f4   :  { %v19702_v15 = vpop.eup %19701 }
 0x6f5   :  { %v1035_v17 = vmul.f32 %v19702_v15, %v1033_v14 }
 0x6f7   :  { %1037 = vrot.lane.b32.xlu1 %v1035_v17, %s20572_s6 }
 0x769   :  { %v1038_v59 = vpop.permute.xlu1 %1037 }
 0x76a   :  { %v1040_v20 = vadd.f32 %v1038_v59, %v1025_v29  ;;  %v298_v29 = vld [vmem:[%s23429_s10 + $0x10] sm:$0xff]  ;;  %v299_v59 = vld [vmem:[%s23429_s10 + $0x18] sm:$0xff] }
 0x76c   :  { %19703 = vtanh.f32 %v1040_v20  ;;  %v21119_v20 = vpack.c.bf16 %v299_v59, %v298_v29 }
 0x76d   :  { %19705 = vpow2.f32 %v15886_v40 }
 0x776   :  { %v19704_v35 = vpop.eup %19703 }
 0x777   :  { %1044 = vrot.lane.b32.xlu1 %v19704_v35, %s20574_s24  ;;  %v19706_v41 = vpop.eup %19705 }
 0x778   :  { %v1018_v42 = vadd.f32 1.0, %v19706_v41 }
 0x77a   :  { %19707 = vrcp.f32 %v1018_v42 }
 0x784   :  { %v19708_v50 = vpop.eup %19707 }
 0x785   :  { %v1042_v55 = vsub.f32 1.0, %v19708_v50  ;;  %v1051_v57 = vmul.f32 %v19708_v50, %v1049_v51 }
 0x7e9   :  { %v1045_v56 = vpop.permute.xlu1 %1044 }
 0x7ea   :  { %v1047_v58 = vmul.f32 %v1045_v56, %v1042_v55 }
 0x7ec   :  { %v21084_v31 = vadd.f32 %v1051_v57, %v1047_v58 }
 0x7ee   :  { %1054 = vrot.lane.b32.xlu1 %v21084_v31, %s20574_s24 }
 0x860   :  { %v1055_v46 = vpop.permute.xlu1 %1054 }
 0x861   :  { %17060 = vmatmul.mubr.msk.f32.vlgmr.msra.gmra.mrb[8].mxu0 %vm342_vm4, %v1055_v46 }
 0x862   :  { %17081 = vmatprep.mubr.msk.f32.mxu0 %vm20569_vm2, %v23398_v0  ;;  %18831 = vmatpush3.bf16.msra.mxu0 %v21101_v7 }
 0x863   :  { %18832 = vmatprep.subr.bf16.mxu0 %v23396_v10 }
 0x866   :  { %18834 = vmatpush3.bf16.msra.mxu0 %v21119_v20 }
 0x867   :  { %18835 = vmatprep.subr.bf16.mxu0 %v23396_v10 }
 0x934   :  { %v1124_v12 = vpop.f32.mrb[8].mxu0 }
 0x935   :  { %v1125_v14 = vadd.f32 %v21105_v8, %v1124_v12  ;;  %v17061_v15 = vpop.f32.mrb[9].mxu0 }
 0x937   :  { %v1128_v17 = vmax.f32 %v1125_v14, 0.0 }
 0x939   :  { %17071 = vmatmul.mubr.msk.f32.vlgmr.msra.gmra.mrb[8].mxu1 %vm342_vm4, %v1128_v17 }
 0x93a   :  { %17085 = vmatpush3.msra.mxu1 %v20959_v45  ;;  %17086 = vmatprep.mubr.msk.f32.mxu1 %vm20569_vm2, %v23398_v0 }
 0x93b   :  { %18841 = vmatprep.subr.bf16.mxu1 %v23396_v10 }
 0xa0c   :  { %v1198_v23 = vpop.f32.mrb[8].mxu1 }
 0xa0d   :  { %v1199_v24 = vadd.f32 %v21123_v22, %v1198_v23  ;;  %v17072_v26 = vpop.f32.mrb[9].mxu1 }
 0xa0f   :  { %v1202_v35 = vmax.f32 %v1199_v24, 0.0 }
 0xa11   :  { %17082 = vmatmul.mubr.msk.f32.vlgmr.msra.gmra.mrb[10].mxu0 %vm342_vm4, %v1202_v35 }
 0xa12   :  { %18837 = vmatpush3.bf16.msra.mxu0 %v20945_v39  ;;  %17097 = vmatprep.mubr.msk.f32.mxu0 %vm20569_vm2, %v23398_v0 }
 0xa13   :  { %18838 = vmatprep.subr.bf16.mxu0 %v23396_v10 }
 0xa16   :  { %18840 = vmatpush3.bf16.msra.mxu0 %v20949_v43 }
 0xa17   :  { %18847 = vmatprep.subr.bf16.mxu0 %v23396_v10 }
 0xa19   :  { %17098 = vmatmul.mubr.msk.f32.vlgmr.msra.gmra.mrb[12].mxu0 %vm342_vm4, %v21041_v54  ;;  %v21148_v54 = vld [vmem:[#allocation19] ss:$0 sm:$0xff] }
 0xa1a   :  { %18849 = vmatpush3.bf16.msra.mxu0 %v21000_v21  ;;  %17119 = vmatprep.mubr.msk.f32.mxu0 %vm20569_vm2, %v23398_v0 }
 0xa1b   :  { %18850 = vmatprep.subr.bf16.mxu0 %v23396_v10 }
 0xa1e   :  { %18852 = vmatpush3.bf16.msra.mxu0 %v21003_v28 }
 0xa1f   :  { %18859 = vmatprep.subr.bf16.mxu0 %v23396_v10 }
 0xa21   :  { %17120 = vmatmul.mubr.msk.f32.vlgmr.msra.gmra.mrb[14].mxu0 %vm342_vm4, %v1055_v46 }
 0xa22   :  { %18861 = vmatpush3.bf16.msra.mxu0 %v21080_v49  ;;  %17141 = vmatprep.mubr.msk.f32.mxu0 %vm20569_vm2, %v23398_v0 }
 0xa23   :  { %18862 = vmatprep.subr.bf16.mxu0 %v23396_v10 }
 0xa26   :  { %18864 = vmatpush3.bf16.msra.mxu0 %v21091_v3 }
 0xa27   :  { %17155 = vmatprep.subr.mxu0 %v23398_v0 }
 0xae4   :  { %v1272_v38 = vpop.f32.mrb[10].mxu0 }
 0xae5   :  { %v21151_v40 = vadd.f32 %v21148_v54, %v1272_v38  ;;  %v17083_v41 = vpop.f32.mrb[11].mxu0 }
 0xae7   :  { %17087 = vmatmul.mubr.msk.f32.vlgmr.msra.gmra.mrb[10].mxu1 %vm347_vm1, %v21151_v40 }
 0xae8   :  { %18843 = vmatpush3.bf16.msra.mxu1 %v21005_v30  ;;  %17108 = vmatprep.mubr.msk.f32.mxu1 %vm20569_vm2, %v23398_v0 }
 0xae9   :  { %18844 = vmatprep.subr.bf16.mxu1 %v23396_v10 }
 0xaec   :  { %v21159_v42 = vpop.f32.mrb[12].mxu0  ;;  %18846 = vmatpush3.bf16.msra.mxu1 %v21009_v32 }
 0xaed   :  { %v1435_v44 = vadd.f32 %v21159_v42, %v20981_v53  ;;  %v17099_v47 = vpop.f32.mrb[13].mxu0  ;;  %18853 = vmatprep.subr.bf16.mxu1 %v23396_v10 }
 0xaef   :  { %1437 = vrot.lane.b32.xlu0 %v1435_v44, %s20572_s6 }
 0xaf4   :  { %v21166_v50 = vpop.f32.mrb[14].mxu0 }
 0xaf5   :  { %v17121_v51 = vpop.f32.mrb[15].mxu0  ;;  %v1616_v59 = vadd.f32 %v21166_v50, %v21037_v62 }
 0xb61   :  { %v21170_v6 = vpop.permute.xlu0 %1437 }
 0xbba   :  { %v1345_v55 = vpop.f32.mrb[10].mxu1 }
 0xbbb   :  { %v1419_v56 = vadd.f32 %v21159_v42, %v1345_v55  ;;  %v17088_v57 = vpop.f32.mrb[11].mxu1  ;;  %v1434_v14 = vadd.f32 %v1345_v55, %v20997_v11 }
 0xbbd   :  { %v1420_v58 = vadd.f32 %v1419_v56, %v20993_v60  ;;  %v1427_v23 = vadd.f32 %v1419_v56, %v21020_v36 }
 0xbbf   :  { %v15892_v46 = vmul.f32 -1.442695, %v1420_v58  ;;  %v15893_v24 = vmul.f32 -1.442695, %v1427_v23 }
 0xbc1   :  { %19709 = vpow2.f32 %v15892_v46 }
 0xbcb   :  { %v19710_v63 = vpop.eup %19709 }
 0xbcc   :  { %v1424_v2 = vadd.f32 1.0, %v19710_v63 }
 0xbce   :  { %19711 = vrcp.f32 %v1424_v2 }
 0xbd8   :  { %v19712_v5 = vpop.eup %19711 }
 0xbd9   :  { %v1440_v12 = vmul.f32 %v19712_v5, %v21170_v6 }
 0xbdb   :  { %1442 = vrot.lane.b32.xlu1 %v1440_v12, %s20572_s6 }
 0xc4d   :  { %v1443_v15 = vpop.permute.xlu1 %1442 }
 0xc4e   :  { %v1445_v17 = vadd.f32 %v1443_v15, %v1434_v14 }
 0xc50   :  { %19713 = vtanh.f32 %v1445_v17 }
 0xc51   :  { %19715 = vpow2.f32 %v15893_v24 }
 0xc5a   :  { %v19714_v29 = vpop.eup %19713 }
 0xc5b   :  { %1449 = vrot.lane.b32.xlu0 %v19714_v29, %s20574_s24  ;;  %v19716_v26 = vpop.eup %19715 }
 0xc5c   :  { %v1431_v35 = vadd.f32 1.0, %v19716_v26 }
 0xc5e   :  { %19717 = vrcp.f32 %v1431_v35 }
 0xc5f   :  { %1618 = vrot.lane.b32.xlu0 %v1616_v59, %s20572_s6 }
 0xc68   :  { %v19718_v38 = vpop.eup %19717 }
 0xc69   :  { %v1447_v41 = vsub.f32 1.0, %v19718_v38  ;;  %v1453_v47 = vmul.f32 %v19718_v38, %v21031_v61 }
 0xccd   :  { %v1450_v44 = vpop.permute.xlu0 %1449 }
 0xcce   :  { %v1452_v51 = vmul.f32 %v1450_v44, %v1447_v41 }
 0xcd0   :  { %v21181_v55 = vadd.f32 %v1453_v47, %v1452_v51 }
 0xcd1   :  { %v21197_v15 = vpop.permute.xlu0 %1618 }
 0xcd2   :  { %1456 = vrot.lane.b32.xlu1 %v21181_v55, %s20574_s24 }
 0xd44   :  { %v21185_v57 = vpop.permute.xlu1 %1456 }
 0xd45   :  { %17109 = vmatmul.mubr.msk.f32.vlgmr.msra.gmra.mrb[12].mxu1 %vm342_vm4, %v21185_v57 }
 0xd46   :  { %18855 = vmatpush3.bf16.msra.mxu1 %v21065_v25  ;;  %17130 = vmatprep.mubr.msk.f32.mxu1 %vm20569_vm2, %v23398_v0 }
 0xd47   :  { %18856 = vmatprep.subr.bf16.mxu1 %v23396_v10 }
 0xd4a   :  { %18858 = vmatpush3.bf16.msra.mxu1 %v21071_v34 }
 0xd4b   :  { %18865 = vmatprep.subr.bf16.mxu1 %v23396_v10 }
 0xe18   :  { %v1526_v56 = vpop.f32.mrb[12].mxu1 }
 0xe19   :  { %v1600_v58 = vadd.f32 %v21166_v50, %v1526_v56  ;;  %v17110_v46 = vpop.f32.mrb[13].mxu1  ;;  %v1615_v29 = vadd.f32 %v1526_v56, %v21053_v18 }
 0xe1b   :  { %v1601_v63 = vadd.f32 %v1600_v58, %v21049_v1  ;;  %v1608_v26 = vadd.f32 %v1600_v58, %v21077_v37 }
 0xe1d   :  { %v15896_v2 = vmul.f32 -1.442695, %v1601_v63  ;;  %v15897_v35 = vmul.f32 -1.442695, %v1608_v26 }
 0xe1f   :  { %19719 = vpow2.f32 %v15896_v2 }
 0xe29   :  { %v19720_v5 = vpop.eup %19719 }
 0xe2a   :  { %v1605_v12 = vadd.f32 1.0, %v19720_v5 }
 0xe2c   :  { %19721 = vrcp.f32 %v1605_v12 }
 0xe36   :  { %v19722_v14 = vpop.eup %19721 }
 0xe37   :  { %v1621_v17 = vmul.f32 %v19722_v14, %v21197_v15 }
 0xe39   :  { %1623 = vrot.lane.b32.xlu1 %v1621_v17, %s20572_s6 }
 0xeab   :  { %v1624_v59 = vpop.permute.xlu1 %1623 }
 0xeac   :  { %v1626_v23 = vadd.f32 %v1624_v59, %v1615_v29 }
 0xeae   :  { %19723 = vtanh.f32 %v1626_v23 }
 0xeaf   :  { %19725 = vpow2.f32 %v15897_v35 }
 0xeb8   :  { %v19724_v24 = vpop.eup %19723 }
 0xeb9   :  { %1630 = vrot.lane.b32.xlu0 %v19724_v24, %s20574_s24  ;;  %v19726_v38 = vpop.eup %19725 }
 0xeba   :  { %v1612_v41 = vadd.f32 1.0, %v19726_v38 }
 0xebc   :  { %19727 = vrcp.f32 %v1612_v41 }
 0xec6   :  { %v19728_v44 = vpop.eup %19727 }
 0xec7   :  { %v1628_v47 = vsub.f32 1.0, %v19728_v44  ;;  %v1634_v46 = vmul.f32 %v19728_v44, %v21084_v31 }
 0xf2b   :  { %v1631_v51 = vpop.permute.xlu0 %1630 }
 0xf2c   :  { %v1633_v63 = vmul.f32 %v1631_v51, %v1628_v47 }
 0xf2e   :  { %v21205_v56 = vadd.f32 %v1634_v46, %v1633_v63 }
 0xf30   :  { %1637 = vrot.lane.b32.xlu1 %v21205_v56, %s20574_s24 }
 0xfa2   :  { %v1638_v2 = vpop.permute.xlu1 %1637 }
 0xfa3   :  { %17131 = vmatmul.mubr.msk.f32.vlgmr.msra.gmra.mrb[14].mxu1 %vm342_vm4, %v1638_v2 }
 0xfa4   :  { %18867 = vmatpush3.bf16.msra.mxu1 %v21101_v7  ;;  %17152 = vmatprep.mubr.msk.f32.mxu1 %vm20569_vm2, %v23398_v0 }
 0xfa5   :  { %18868 = vmatprep.subr.bf16.mxu1 %v23396_v10 }
 0xfa8   :  { %18870 = vmatpush3.bf16.msra.mxu1 %v21119_v20 }
 0xfa9   :  { %18871 = vmatprep.subr.bf16.mxu1 %v23396_v10 }
0x1076   :  { %v1707_v58 = vpop.f32.mrb[14].mxu1 }
0x1077   :  { %v1708_v5 = vadd.f32 %v21105_v8, %v1707_v58  ;;  %v17132_v12 = vpop.f32.mrb[15].mxu1 }
0x1079   :  { %v1711_v14 = vmax.f32 %v1708_v5, 0.0 }
0x107b   :  { %17142 = vmatmul.mubr.msk.f32.vlgmr.msra.gmra.mrb[16].mxu0 %vm342_vm4, %v1711_v14 }
0x107c   :  { %17156 = vmatpush3.msra.mxu0 %v20959_v45  ;;  %17157 = vmatprep.mubr.msk.f32.mxu0 %vm20569_vm2, %v23398_v0 }
0x107d   :  { %18877 = vmatprep.subr.bf16.mxu0 %v23396_v10 }
0x114e   :  { %v1781_v17 = vpop.f32.mrb[16].mxu0 }
0x114f   :  { %v1782_v29 = vadd.f32 %v21123_v22, %v1781_v17  ;;  %v17143_v59 = vpop.f32.mrb[17].mxu0 }
0x1151   :  { %v1785_v23 = vmax.f32 %v1782_v29, 0.0 }
0x1153   :  { %17153 = vmatmul.mubr.msk.f32.vlgmr.msra.gmra.mrb[16].mxu1 %vm342_vm4, %v1785_v23 }
0x1154   :  { %18873 = vmatpush3.bf16.msra.mxu1 %v20945_v39  ;;  %17168 = vmatprep.mubr.msk.f32.mxu1 %vm20569_vm2, %v23398_v0 }
0x1155   :  { %18874 = vmatprep.subr.bf16.mxu1 %v23396_v10 }
0x1158   :  { %18876 = vmatpush3.bf16.msra.mxu1 %v20949_v43 }
0x1159   :  { %18883 = vmatprep.subr.bf16.mxu1 %v23396_v10 }
0x115b   :  { %17169 = vmatmul.mubr.msk.f32.vlgmr.msra.gmra.mrb[18].mxu1 %vm342_vm4, %v21185_v57 }
0x115c   :  { %18885 = vmatpush3.bf16.msra.mxu1 %v21000_v21  ;;  %17190 = vmatprep.mubr.msk.f32.mxu1 %vm20569_vm2, %v23398_v0 }
0x115d   :  { %18886 = vmatprep.subr.bf16.mxu1 %v23396_v10 }
0x1160   :  { %18888 = vmatpush3.bf16.msra.mxu1 %v21003_v28 }
0x1161   :  { %18895 = vmatprep.subr.bf16.mxu1 %v23396_v10 }
0x1163   :  { %17191 = vmatmul.mubr.msk.f32.vlgmr.msra.gmra.mrb[20].mxu1 %vm342_vm4, %v1638_v2 }
0x1164   :  { %18897 = vmatpush3.bf16.msra.mxu1 %v21080_v49  ;;  %17212 = vmatprep.mubr.msk.f32.mxu1 %vm20569_vm2, %v23398_v0 }
0x1165   :  { %18898 = vmatprep.subr.bf16.mxu1 %v23396_v10 }
0x1168   :  { %18900 = vmatpush3.bf16.msra.mxu1 %v21091_v3 }
0x1169   :  { %17226 = vmatprep.subr.mxu1 %v23398_v0 }
0x1226   :  { %v1855_v57 = vpop.f32.mrb[16].mxu1 }
0x1227   :  { %v21246_v24 = vadd.f32 %v21148_v54, %v1855_v57  ;;  %v17154_v26 = vpop.f32.mrb[17].mxu1 }
0x1229   :  { %17158 = vmatmul.mubr.msk.f32.vlgmr.msra.gmra.mrb[18].mxu0 %vm347_vm1, %v21246_v24 }
0x122a   :  { %18879 = vmatpush3.bf16.msra.mxu0 %v21005_v30  ;;  %17179 = vmatprep.mubr.msk.f32.mxu0 %vm20569_vm2, %v23398_v0 }
0x122b   :  { %18880 = vmatprep.subr.bf16.mxu0 %v23396_v10 }
0x122e   :  { %v1998_v35 = vpop.f32.mrb[18].mxu1  ;;  %18882 = vmatpush3.bf16.msra.mxu0 %v21009_v32 }
0x122f   :  { %v2018_v38 = vadd.f32 %v1998_v35, %v20981_v53  ;;  %v17170_v41 = vpop.f32.mrb[19].mxu1  ;;  %18889 = vmatprep.subr.bf16.mxu0 %v23396_v10 }
0x1231   :  { %2020 = vrot.lane.b32.xlu0 %v2018_v38, %s20572_s6 }
0x1236   :  { %v2179_v44 = vpop.f32.mrb[20].mxu1 }
0x1237   :  { %v17192_v47 = vpop.f32.mrb[21].mxu1 }
0x12a3   :  { %v2021_v17 = vpop.permute.xlu0 %2020 }
0x12fc   :  { %v1928_v51 = vpop.f32.mrb[18].mxu0 }
0x12fd   :  { %v2002_v46 = vadd.f32 %v1998_v35, %v1928_v51  ;;  %v17159_v63 = vpop.f32.mrb[19].mxu0  ;;  %v2017_v59 = vadd.f32 %v1928_v51, %v20997_v11  ;;  %v2199_v35 = vadd.f32 %v2179_v44, %v21037_v62 }
0x12ff   :  { %v2003_v2 = vadd.f32 %v2002_v46, %v20993_v60  ;;  %v2010_v38 = vadd.f32 %v2002_v46, %v21020_v36 }
0x1301   :  { %v15903_v58 = vmul.f32 -1.442695, %v2003_v2  ;;  %v15904_v41 = vmul.f32 -1.442695, %v2010_v38 }
0x1303   :  { %19729 = vpow2.f32 %v15903_v58 }
0x130d   :  { %v19730_v5 = vpop.eup %19729 }
0x130e   :  { %v2007_v12 = vadd.f32 1.0, %v19730_v5 }
0x1310   :  { %19731 = vrcp.f32 %v2007_v12 }
0x131a   :  { %v19732_v14 = vpop.eup %19731 }
0x131b   :  { %v2023_v29 = vmul.f32 %v19732_v14, %v2021_v17 }
0x131d   :  { %2025 = vrot.lane.b32.xlu1 %v2023_v29, %s20572_s6 }
0x138f   :  { %v2026_v23 = vpop.permute.xlu1 %2025 }
0x1390   :  { %v2028_v57 = vadd.f32 %v2026_v23, %v2017_v59 }
0x1392   :  { %19733 = vtanh.f32 %v2028_v57 }
0x1393   :  { %19735 = vpow2.f32 %v15904_v41 }
0x139c   :  { %v19734_v26 = vpop.eup %19733 }
0x139d   :  { %2032 = vrot.lane.b32.xlu0 %v19734_v26, %s20574_s24  ;;  %v19736_v47 = vpop.eup %19735 }
0x139e   :  { %v2014_v63 = vadd.f32 1.0, %v19736_v47 }
0x13a0   :  { %19737 = vrcp.f32 %v2014_v63 }
0x13a1   :  { %2201 = vrot.lane.b32.xlu0 %v2199_v35, %s20572_s6 }
0x13aa   :  { %v19738_v2 = vpop.eup %19737 }
0x13ab   :  { %v2030_v58 = vsub.f32 1.0, %v19738_v2  ;;  %v2036_v5 = vmul.f32 %v19738_v2, %v21181_v55 }
0x140f   :  { %v2033_v51 = vpop.permute.xlu0 %2032 }
0x1410   :  { %v2035_v12 = vmul.f32 %v2033_v51, %v2030_v58 }
0x1412   :  { %v2037_v14 = vadd.f32 %v2036_v5, %v2035_v12 }
0x1413   :  { %v2202_v38 = vpop.permute.xlu0 %2201 }
0x1414   :  { %2039 = vrot.lane.b32.xlu1 %v2037_v14, %s20574_s24 }
0x1486   :  { %v2040_v17 = vpop.permute.xlu1 %2039 }
0x1487   :  { %17180 = vmatmul.mubr.msk.f32.vlgmr.msra.gmra.mrb[20].mxu0 %vm342_vm4, %v2040_v17 }
0x1488   :  { %18891 = vmatpush3.bf16.msra.mxu0 %v21065_v25  ;;  %17201 = vmatprep.mubr.msk.f32.mxu0 %vm20569_vm2, %v23398_v0 }
0x1489   :  { %18892 = vmatprep.subr.bf16.mxu0 %v23396_v10 }
0x148c   :  { %18894 = vmatpush3.bf16.msra.mxu0 %v21071_v34 }
0x148d   :  { %18901 = vmatprep.subr.bf16.mxu0 %v23396_v10 }
0x155a   :  { %v2109_v46 = vpop.f32.mrb[20].mxu0 }
0x155b   :  { %v2183_v55 = vadd.f32 %v2179_v44, %v2109_v46  ;;  %v17181_v29 = vpop.f32.mrb[21].mxu0  ;;  %v2198_v47 = vadd.f32 %v2109_v46, %v21053_v18 }
0x155d   :  { %v2184_v59 = vadd.f32 %v2183_v55, %v21049_v1  ;;  %v2191_v44 = vadd.f32 %v2183_v55, %v21077_v37 }
0x155f   :  { %v15907_v23 = vmul.f32 -1.442695, %v2184_v59  ;;  %v15908_v51 = vmul.f32 -1.442695, %v2191_v44  ;;  %v15912_v44 = vld [vmem:[%s23427_s28 + $0x8] sm:$0xff] }
0x1561   :  { %19739 = vpow2.f32 %v15907_v23 }
0x156b   :  { %v19740_v57 = vpop.eup %19739 }
0x156c   :  { %v2188_v26 = vadd.f32 1.0, %v19740_v57 }
0x156e   :  { %19741 = vrcp.f32 %v2188_v26 }
0x1578   :  { %v19742_v35 = vpop.eup %19741 }
0x1579   :  { %v2204_v41 = vmul.f32 %v19742_v35, %v2202_v38 }
0x157b   :  { %2206 = vrot.lane.b32.xlu1 %v2204_v41, %s20572_s6 }
0x15ed   :  { %v2207_v63 = vpop.permute.xlu1 %2206 }
0x15ee   :  { %v2209_v2 = vadd.f32 %v2207_v63, %v2198_v47 }
0x15f0   :  { %19743 = vtanh.f32 %v2209_v2 }
0x15f1   :  { %19745 = vpow2.f32 %v15908_v51 }
0x15fa   :  { %v19744_v58 = vpop.eup %19743 }
0x15fb   :  { %2213 = vrot.lane.b32.xlu0 %v19744_v58, %s20574_s24  ;;  %v19746_v5 = vpop.eup %19745  ;;  %v21304_v58 = vld [vmem:[#allocation21] sm:$0xf] }
0x15fc   :  { %v2195_v12 = vadd.f32 1.0, %v19746_v5 }
0x15fe   :  { %19747 = vrcp.f32 %v2195_v12 }
0x1608   :  { %v19748_v14 = vpop.eup %19747 }
0x1609   :  { %v2211_v17 = vsub.f32 1.0, %v19748_v14  ;;  %v2217_v59 = vmul.f32 %v19748_v14, %v21205_v56 }
0x166d   :  { %v2214_v29 = vpop.permute.xlu0 %2213 }
0x166e   :  { %v2216_v23 = vmul.f32 %v2214_v29, %v2211_v17 }
0x1670   :  { %v2218_v46 = vadd.f32 %v2217_v59, %v2216_v23 }
0x1672   :  { %2220 = vrot.lane.b32.xlu1 %v2218_v46, %s20574_s24 }
0x16e4   :  { %v2221_v57 = vpop.permute.xlu1 %2220 }
0x16e5   :  { %17202 = vmatmul.mubr.msk.f32.vlgmr.msra.gmra.mrb[22].mxu0 %vm342_vm4, %v2221_v57 }
0x16e6   :  { %18903 = vmatpush3.bf16.msra.mxu0 %v21101_v7  ;;  %17223 = vmatprep.mubr.msk.f32.mxu0 %vm20569_vm2, %v23398_v0 }
0x16e7   :  { %18904 = vmatprep.subr.bf16.mxu0 %v23396_v10 }
0x16ea   :  { %18906 = vmatpush3.bf16.msra.mxu0 %v21119_v20 }
0x16eb   :  { %17231 = vmatprep.subr.mxu0 %v23398_v0 }
0x17b8   :  { %v2290_v55 = vpop.f32.mrb[22].mxu0 }
0x17b9   :  { %v2291_v56 = vadd.f32 %v21105_v8, %v2290_v55  ;;  %v17203_v26 = vpop.f32.mrb[23].mxu0 }
0x17bb   :  { %v2294_v35 = vmax.f32 %v2291_v56, 0.0 }
0x17bd   :  { %17213 = vmatmul.mubr.msk.f32.vlgmr.msra.gmra.mrb[22].mxu1 %vm342_vm4, %v2294_v35 }
0x17be   :  { %17227 = vmatpush3.msra.mxu1 %v20865_v4  ;;  %17228 = vmatprep.mubr.msk.f32.mxu1 %vm20569_vm2, %v23398_v0 }
0x17bf   :  { %18907 = vmatprep.subr.bf16.mxu1 %v23396_v10 }
0x17c1   :  { %17229 = vmatmul.mubr.msk.f32.vlgmr.msra.gmra.mrb[24].mxu1 %vm347_vm1, %v21151_v40 }
0x17c2   :  { %18909 = vmatpush3.bf16.msra.mxu1 %v20887_v9  ;;  %17244 = vmatprep.mubr.msk.f32.mxu1 %vm20569_vm2, %v23398_v0 }
0x17c3   :  { %18910 = vmatprep.subr.bf16.mxu1 %v23396_v10 }
0x17c6   :  { %18912 = vmatpush3.bf16.msra.mxu1 %v20899_v13 }
0x17c7   :  { %17258 = vmatprep.subr.mxu1 %v23398_v0 }
0x1890   :  { %v2364_v4 = vpop.f32.mrb[22].mxu1 }
0x1891   :  { %v2365_v38 = vadd.f32 %v21123_v22, %v2364_v4  ;;  %v17214_v41 = vpop.f32.mrb[23].mxu1 }
0x1893   :  { %v2368_v47 = vmax.f32 %v2365_v38, 0.0 }
0x1894   :  { %v2526_v63 = vpop.f32.mrb[24].mxu1 }
0x1895   :  { %17224 = vmatmul.mubr.msk.f32.vlgmr.msra.gmra.mrb[24].mxu0 %vm342_vm4, %v2368_v47  ;;  %v17230_v2 = vpop.f32.mrb[25].mxu1 }
0x1896   :  { %17232 = vmatpush3.msk.msra.mxu0 %vm432_vm3, %v21304_v58  ;;  %17233 = vmatprep.mubr.msk.f32.mxu0 %vm20569_vm2, %v23398_v0 }
0x1897   :  { %18913 = vmatprep.subr.bf16.mxu0 %v23396_v10 }
0x1899   :  { %17234 = vmatmul.mubr.msk.f32.vlgmr.msra.gmra.mrb[26].mxu0 %vm345_vm0, %v15912_v44 }
0x189a   :  { %18915 = vmatpush3.bf16.msra.mxu0 %v20913_v16  ;;  %17255 = vmatprep.mubr.msk.f32.mxu0 %vm20569_vm2, %v23398_v0 }
0x189b   :  { %18916 = vmatprep.subr.bf16.mxu0 %v23396_v10 }
0x189e   :  { %18918 = vmatpush3.bf16.msra.mxu0 %v20929_v27 }
0x189f   :  { %18919 = vmatprep.subr.bf16.mxu0 %v23396_v10 }
0x1968   :  { %v21321_v51 = vpop.f32.mrb[24].mxu0 }
0x1969   :  { %23430 = vst [vmem:[#allocation38_spill] sm:$0xff] %v21321_v51  ;;  %v17225_v5 = vpop.f32.mrb[25].mxu0 }
0x196c   :  { %v2599_v12 = vpop.f32.mrb[26].mxu0 }
0x196d   :  { %v2600_v14 = vadd.f32 %v2599_v12, %v2526_v63  ;;  %v17235_v17 = vpop.f32.mrb[27].mxu0 }
0x196f   :  { %v2603_v29 = vadd.f32 %v20917_v19, %v2600_v14 }
0x1971   :  { %v2604_v59 = vmax.f32 %v2603_v29, 0.0 }
0x1973   :  { %17245 = vmatmul.mubr.msk.f32.vlgmr.msra.gmra.mrb[26].mxu1 %vm342_vm4, %v2604_v59 }
0x1974   :  { %17259 = vmatpush3.msra.mxu1 %v20959_v45  ;;  %17260 = vmatprep.mubr.msk.f32.mxu1 %vm20569_vm2, %v23398_v0 }
0x1975   :  { %18925 = vmatprep.subr.bf16.mxu1 %v23396_v10 }
0x1a46   :  { %v2674_v23 = vpop.f32.mrb[26].mxu1 }
0x1a47   :  { %v2675_v46 = vadd.f32 %v20942_v33, %v2674_v23  ;;  %v17246_v57 = vpop.f32.mrb[27].mxu1 }
0x1a49   :  { %v2678_v55 = vmax.f32 %v2675_v46, 0.0 }
0x1a4b   :  { %17256 = vmatmul.mubr.msk.f32.vlgmr.msra.gmra.mrb[28].mxu0 %vm342_vm4, %v2678_v55 }
0x1a4c   :  { %18921 = vmatpush3.bf16.msra.mxu0 %v21005_v30  ;;  %17271 = vmatprep.mubr.msk.f32.mxu0 %vm20569_vm2, %v23398_v0 }
0x1a4d   :  { %18922 = vmatprep.subr.bf16.mxu0 %v23396_v10 }
0x1a50   :  { %18924 = vmatpush3.bf16.msra.mxu0 %v21009_v32 }
0x1a51   :  { %18931 = vmatprep.subr.bf16.mxu0 %v23396_v10 }
0x1b1e   :  { %v2748_v19 = vpop.f32.mrb[28].mxu0 }
0x1b1f   :  { %v2749_v45 = vadd.f32 %v20970_v48, %v2748_v19  ;;  %v17257_v56 = vpop.f32.mrb[29].mxu0 }
0x1b21   :  { %v21339_v33 = vsel %vm345_vm0, %v2749_v45, %v15912_v44 }
0x1b22   :  { %23431 = vst [vmem:[#allocation39_spill] sm:$0xff] %v21339_v33  ;;  %17261 = vmatmul.mubr.msk.f32.vlgmr.msra.gmra.mrb[28].mxu1 %vm347_vm1, %v21339_v33 }
0x1b23   :  { %18927 = vmatpush3.bf16.msra.mxu1 %v21065_v25  ;;  %17282 = vmatprep.mubr.msk.f32.mxu1 %vm20569_vm2, %v23398_v0 }
0x1b24   :  { %18928 = vmatprep.subr.bf16.mxu1 %v23396_v10 }
0x1b27   :  { %18930 = vmatpush3.bf16.msra.mxu1 %v21071_v34 }
0x1b28   :  { %18937 = vmatprep.subr.bf16.mxu1 %v23396_v10 }
0x1bf5   :  { %v2822_v26 = vpop.f32.mrb[28].mxu1 }
0x1bf6   :  { %v2826_v48 = vadd.f32 %v2822_v26, %v21159_v42  ;;  %v17262_v35 = vpop.f32.mrb[29].mxu1  ;;  %v2841_v44 = vadd.f32 %v2822_v26, %v20997_v11 }
0x1bf8   :  { %v2827_v4 = vadd.f32 %v2826_v48, %v20993_v60  ;;  %v2834_v42 = vadd.f32 %v2826_v48, %v21020_v36 }
0x1bfa   :  { %v15919_v38 = vmul.f32 -1.442695, %v2827_v4  ;;  %v15920_v17 = vmul.f32 -1.442695, %v2834_v42 }
0x1bfc   :  { %19749 = vpow2.f32 %v15919_v38 }
0x1c06   :  { %v19750_v41 = vpop.eup %19749 }
0x1c07   :  { %v2831_v47 = vadd.f32 1.0, %v19750_v41 }
0x1c09   :  { %19751 = vrcp.f32 %v2831_v47 }
0x1c13   :  { %v19752_v63 = vpop.eup %19751 }
0x1c14   :  { %v2842_v2 = vmul.f32 %v19752_v63, %v21170_v6 }
0x1c16   :  { %2844 = vrot.lane.b32.xlu0 %v2842_v2, %s20572_s6 }
0x1c88   :  { %v2845_v5 = vpop.permute.xlu0 %2844 }
0x1c89   :  { %v2847_v12 = vadd.f32 %v2845_v5, %v2841_v44 }
0x1c8b   :  { %19753 = vtanh.f32 %v2847_v12 }
0x1c8c   :  { %19755 = vpow2.f32 %v15920_v17 }
0x1c95   :  { %v19754_v14 = vpop.eup %19753 }
0x1c96   :  { %2851 = vrot.lane.b32.xlu1 %v19754_v14, %s20574_s24  ;;  %v19756_v29 = vpop.eup %19755 }
0x1c97   :  { %v2838_v59 = vadd.f32 1.0, %v19756_v29 }
0x1c99   :  { %19757 = vrcp.f32 %v2838_v59 }
0x1ca3   :  { %v19758_v23 = vpop.eup %19757 }
0x1ca4   :  { %v2849_v46 = vsub.f32 1.0, %v19758_v23  ;;  %v2855_v57 = vmul.f32 %v19758_v23, %v21031_v61 }
0x1d08   :  { %v2852_v6 = vpop.permute.xlu1 %2851 }
0x1d09   :  { %v2854_v55 = vmul.f32 %v2852_v6, %v2849_v46 }
0x1d0b   :  { %v21357_v19 = vadd.f32 %v2855_v57, %v2854_v55 }
0x1d0d   :  { %2858 = vrot.lane.b32.xlu0 %v21357_v19, %s20574_s24 }
0x1d7f   :  { %v21361_v45 = vpop.permute.xlu0 %2858 }
0x1d80   :  { %17272 = vmatmul.mubr.msk.f32.vlgmr.msra.gmra.mrb[30].mxu0 %vm342_vm4, %v21361_v45 }
0x1d81   :  { %18933 = vmatpush3.bf16.msra.mxu0 %v21080_v49  ;;  %17293 = vmatprep.mubr.msk.f32.mxu0 %vm20569_vm2, %v23398_v0 }
0x1d82   :  { %18934 = vmatprep.subr.bf16.mxu0 %v23396_v10 }
0x1d85   :  { %18936 = vmatpush3.bf16.msra.mxu0 %v21091_v3 }
0x1d86   :  { %17307 = vmatprep.subr.mxu0 %v23398_v0 }
0x1e53   :  { %v2928_v61 = vpop.f32.mrb[30].mxu0 }
0x1e54   :  { %v2932_v56 = vadd.f32 %v2928_v61, %v21166_v50  ;;  %v17273_v26 = vpop.f32.mrb[31].mxu0  ;;  %v2947_v63 = vadd.f32 %v2928_v61, %v21053_v18 }
0x1e56   :  { %v2933_v48 = vadd.f32 %v2932_v56, %v21049_v1  ;;  %v2940_v50 = vadd.f32 %v2932_v56, %v21077_v37  ;;  %v21392_v56 = vld [vmem:[#allocation4] sm:$0xff] }
0x1e58   :  { %v15922_v35 = vmul.f32 -1.442695, %v2933_v48  ;;  %v15923_v12 = vmul.f32 -1.442695, %v2940_v50 }
0x1e5a   :  { %19759 = vpow2.f32 %v15922_v35 }
0x1e64   :  { %v19760_v4 = vpop.eup %19759 }
0x1e65   :  { %v2937_v38 = vadd.f32 1.0, %v19760_v4 }
0x1e67   :  { %19761 = vrcp.f32 %v2937_v38 }
0x1e71   :  { %v19762_v41 = vpop.eup %19761 }
0x1e72   :  { %v2948_v47 = vmul.f32 %v19762_v41, %v21197_v15 }
0x1e74   :  { %2950 = vrot.lane.b32.xlu1 %v2948_v47, %s20572_s6 }
0x1ee6   :  { %v2951_v2 = vpop.permute.xlu1 %2950 }
0x1ee7   :  { %v2953_v44 = vadd.f32 %v2951_v2, %v2947_v63 }
0x1ee9   :  { %19763 = vtanh.f32 %v2953_v44 }
0x1eea   :  { %19765 = vpow2.f32 %v15923_v12 }
0x1ef3   :  { %v19764_v5 = vpop.eup %19763 }
0x1ef4   :  { %2957 = vrot.lane.b32.xlu0 %v19764_v5, %s20574_s24  ;;  %v19766_v14 = vpop.eup %19765 }
0x1ef5   :  { %v2944_v42 = vadd.f32 1.0, %v19766_v14 }
0x1ef7   :  { %19767 = vrcp.f32 %v2944_v42 }
0x1f01   :  { %v19768_v17 = vpop.eup %19767 }
0x1f02   :  { %v2955_v29 = vsub.f32 1.0, %v19768_v17  ;;  %v2961_v59 = vmul.f32 %v19768_v17, %v21084_v31 }
0x1f66   :  { %v2958_v15 = vpop.permute.xlu0 %2957 }
0x1f67   :  { %v2960_v23 = vmul.f32 %v2958_v15, %v2955_v29 }
0x1f69   :  { %v21379_v46 = vadd.f32 %v2961_v59, %v2960_v23 }
0x1f6b   :  { %2964 = vrot.lane.b32.xlu1 %v21379_v46, %s20574_s24 }
0x1fdd   :  { %v2965_v6 = vpop.permute.xlu1 %2964 }
0x1fde   :  { %17283 = vmatmul.mubr.msk.f32.vlgmr.msra.gmra.mrb[30].mxu1 %vm342_vm4, %v2965_v6 }
0x1fdf   :  { %18939 = vmatpush3.bf16.msra.mxu1 %v21101_v7  ;;  %17304 = vmatprep.mubr.msk.f32.mxu1 %vm20569_vm2, %v23398_v0 }
0x1fe0   :  { %18940 = vmatprep.subr.bf16.mxu1 %v23396_v10 }
0x1fe3   :  { %18942 = vmatpush3.bf16.msra.mxu1 %v21119_v20 }
0x1fe4   :  { %18943 = vmatprep.subr.bf16.mxu1 %v23396_v10 }
0x20b1   :  { %v3034_v31 = vpop.f32.mrb[30].mxu1 }
0x20b2   :  { %v3035_v57 = vadd.f32 %v21105_v8, %v3034_v31  ;;  %v17284_v55 = vpop.f32.mrb[31].mxu1 }
0x20b4   :  { %v3038_v61 = vmax.f32 %v3035_v57, 0.0 }
0x20b6   :  { %17294 = vmatmul.mubr.msk.f32.vlgmr.msra.gmra.mrb[32].mxu0 %vm342_vm4, %v3038_v61 }
0x20b7   :  { %17308 = vmatpush3.msra.mxu0 %v21392_v56  ;;  %17309 = vmatprep.mubr.msk.f32.mxu0 %vm20569_vm2, %v23398_v0 }
0x20b8   :  { %18949 = vmatprep.subr.bf16.mxu0 %v23396_v10 }
0x2189   :  { %v3108_v26 = vpop.f32.mrb[32].mxu0 }
0x218a   :  { %v3109_v48 = vadd.f32 %v21123_v22, %v3108_v26  ;;  %v17295_v35 = vpop.f32.mrb[33].mxu0 }
0x218c   :  { %v3112_v4 = vmax.f32 %v3109_v48, 0.0 }
0x218e   :  { %17305 = vmatmul.mubr.msk.f32.vlgmr.msra.gmra.mrb[32].mxu1 %vm342_vm4, %v3112_v4 }
0x218f   :  { %18945 = vmatpush3.bf16.msra.mxu1 %v20945_v39  ;;  %17320 = vmatprep.mubr.msk.f32.mxu1 %vm20569_vm2, %v23398_v0 }
0x2190   :  { %18946 = vmatprep.subr.bf16.mxu1 %v23396_v10 }
0x2193   :  { %18948 = vmatpush3.bf16.msra.mxu1 %v20949_v43 }
0x2194   :  { %18955 = vmatprep.subr.bf16.mxu1 %v23396_v10 }
0x2196   :  { %17321 = vmatmul.mubr.msk.f32.vlgmr.msra.gmra.mrb[34].mxu1 %vm342_vm4, %v21361_v45 }
0x2197   :  { %18957 = vmatpush3.bf16.msra.mxu1 %v21000_v21  ;;  %17342 = vmatprep.mubr.msk.f32.mxu1 %vm20569_vm2, %v23398_v0 }
0x2198   :  { %18958 = vmatprep.subr.bf16.mxu1 %v23396_v10 }
0x219b   :  { %18960 = vmatpush3.bf16.msra.mxu1 %v21003_v28 }
0x219c   :  { %18967 = vmatprep.subr.bf16.mxu1 %v23396_v10 }
0x219e   :  { %17343 = vmatmul.mubr.msk.f32.vlgmr.msra.gmra.mrb[36].mxu1 %vm342_vm4, %v2965_v6 }
0x219f   :  { %18969 = vmatpush3.bf16.msra.mxu1 %v21080_v49  ;;  %17364 = vmatprep.mubr.msk.f32.mxu1 %vm20569_vm2, %v23398_v0 }
0x21a0   :  { %18970 = vmatprep.subr.bf16.mxu1 %v23396_v10 }
0x21a3   :  { %18972 = vmatpush3.bf16.msra.mxu1 %v21091_v3 }
0x21a4   :  { %17378 = vmatprep.subr.mxu1 %v23398_v0 }
0x2261   :  { %v3182_v8 = vpop.f32.mrb[32].mxu1 }
0x2262   :  { %v21422_v22 = vadd.f32 %v21148_v54, %v3182_v8  ;;  %v17306_v45 = vpop.f32.mrb[33].mxu1 }
0x2264   :  { %23432 = vst [vmem:[#allocation40_spill] sm:$0xff] %v21422_v22  ;;  %17310 = vmatmul.mubr.msk.f32.vlgmr.msra.gmra.mrb[34].mxu0 %vm347_vm1, %v21422_v22 }
0x2265   :  { %18951 = vmatpush3.bf16.msra.mxu0 %v21005_v30  ;;  %17331 = vmatprep.mubr.msk.f32.mxu0 %vm20569_vm2, %v23398_v0 }
0x2266   :  { %18952 = vmatprep.subr.bf16.mxu0 %v23396_v10 }
0x2269   :  { %v21430_v38 = vpop.f32.mrb[34].mxu1  ;;  %18954 = vmatpush3.bf16.msra.mxu0 %v21009_v32 }
0x226a   :  { %v3345_v41 = vadd.f32 %v21430_v38, %v20981_v53  ;;  %v17322_v54 = vpop.f32.mrb[35].mxu1  ;;  %18961 = vmatprep.subr.bf16.mxu0 %v23396_v10 }
0x226c   :  { %3347 = vrot.lane.b32.xlu0 %v3345_v41, %s20572_s6 }
0x2271   :  { %v21437_v47 = vpop.f32.mrb[36].mxu1 }
0x2272   :  { %v17344_v63 = vpop.f32.mrb[37].mxu1  ;;  %v3526_v57 = vadd.f32 %v21437_v47, %v21037_v62 }
0x22de   :  { %v21441_v29 = vpop.permute.xlu0 %3347 }
0x2337   :  { %v3255_v2 = vpop.f32.mrb[34].mxu0 }
0x2338   :  { %v3329_v44 = vadd.f32 %v21430_v38, %v3255_v2  ;;  %v17311_v5 = vpop.f32.mrb[35].mxu0  ;;  %v3344_v59 = vadd.f32 %v3255_v2, %v20997_v11 }
0x233a   :  { %v3330_v50 = vadd.f32 %v3329_v44, %v20993_v60  ;;  %v3337_v55 = vadd.f32 %v3329_v44, %v21020_v36 }
0x233c   :  { %v15929_v12 = vmul.f32 -1.442695, %v3330_v50  ;;  %v15930_v61 = vmul.f32 -1.442695, %v3337_v55 }
0x233e   :  { %19769 = vpow2.f32 %v15929_v12 }
0x2348   :  { %v19770_v14 = vpop.eup %19769 }
0x2349   :  { %v3334_v42 = vadd.f32 1.0, %v19770_v14 }
0x234b   :  { %19771 = vrcp.f32 %v3334_v42 }
0x2355   :  { %v19772_v17 = vpop.eup %19771 }
0x2356   :  { %v3350_v15 = vmul.f32 %v19772_v17, %v21441_v29 }
0x2358   :  { %3352 = vrot.lane.b32.xlu1 %v3350_v15, %s20572_s6 }
0x23ca   :  { %v3353_v23 = vpop.permute.xlu1 %3352 }
0x23cb   :  { %v3355_v6 = vadd.f32 %v3353_v23, %v3344_v59 }
0x23cd   :  { %19773 = vtanh.f32 %v3355_v6 }
0x23ce   :  { %19775 = vpow2.f32 %v15930_v61 }
0x23d7   :  { %v19774_v31 = vpop.eup %19773 }
0x23d8   :  { %3359 = vrot.lane.b32.xlu0 %v19774_v31, %s20574_s24  ;;  %v19776_v26 = vpop.eup %19775 }
0x23d9   :  { %v3341_v48 = vadd.f32 1.0, %v19776_v26 }
0x23db   :  { %19777 = vrcp.f32 %v3341_v48 }
0x23dc   :  { %3528 = vrot.lane.b32.xlu0 %v3526_v57, %s20572_s6 }
0x23e5   :  { %v19778_v35 = vpop.eup %19777 }
0x23e6   :  { %v3357_v4 = vsub.f32 1.0, %v19778_v35  ;;  %v3363_v45 = vmul.f32 %v19778_v35, %v21357_v19 }
0x244a   :  { %v3360_v8 = vpop.permute.xlu0 %3359 }
0x244b   :  { %v3362_v41 = vmul.f32 %v3360_v8, %v3357_v4 }
0x244d   :  { %v21452_v54 = vadd.f32 %v3363_v45, %v3362_v41 }
0x244e   :  { %v21468_v15 = vpop.permute.xlu0 %3528 }
0x244f   :  { %3366 = vrot.lane.b32.xlu1 %v21452_v54, %s20574_s24 }
0x24c1   :  { %v21456_v63 = vpop.permute.xlu1 %3366 }
0x24c2   :  { %17332 = vmatmul.mubr.msk.f32.vlgmr.msra.gmra.mrb[36].mxu0 %vm342_vm4, %v21456_v63 }
0x24c3   :  { %18963 = vmatpush3.bf16.msra.mxu0 %v21065_v25  ;;  %17353 = vmatprep.mubr.msk.f32.mxu0 %vm20569_vm2, %v23398_v0 }
0x24c4   :  { %18964 = vmatprep.subr.bf16.mxu0 %v23396_v10 }
0x24c7   :  { %18966 = vmatpush3.bf16.msra.mxu0 %v21071_v34 }
0x24c8   :  { %18973 = vmatprep.subr.bf16.mxu0 %v23396_v10 }
0x2595   :  { %v3436_v2 = vpop.f32.mrb[36].mxu0 }
0x2596   :  { %v3510_v44 = vadd.f32 %v21437_v47, %v3436_v2  ;;  %v17333_v5 = vpop.f32.mrb[37].mxu0  ;;  %v3525_v23 = vadd.f32 %v3436_v2, %v21053_v18 }
0x2598   :  { %v3511_v50 = vadd.f32 %v3510_v44, %v21049_v1  ;;  %v3518_v55 = vadd.f32 %v3510_v44, %v21077_v37 }
0x259a   :  { %v15933_v12 = vmul.f32 -1.442695, %v3511_v50  ;;  %v15934_v61 = vmul.f32 -1.442695, %v3518_v55  ;;  %v21487_v50 = vld [vmem:[#allocation15] ss:$0 sm:$0xff] }
0x259c   :  { %19779 = vpow2.f32 %v15933_v12 }
0x25a6   :  { %v19780_v14 = vpop.eup %19779 }
0x25a7   :  { %v3515_v42 = vadd.f32 1.0, %v19780_v14 }
0x25a9   :  { %19781 = vrcp.f32 %v3515_v42 }
0x25b3   :  { %v19782_v17 = vpop.eup %19781 }
0x25b4   :  { %v3531_v59 = vmul.f32 %v19782_v17, %v21468_v15 }
0x25b6   :  { %3533 = vrot.lane.b32.xlu1 %v3531_v59, %s20572_s6  ;;  %v21495_v59 = vld [vmem:[#allocation18] ss:$0 sm:$0xff] }
0x2628   :  { %v3534_v6 = vpop.permute.xlu1 %3533 }
0x2629   :  { %v3536_v31 = vadd.f32 %v3534_v6, %v3525_v23 }
0x262b   :  { %19783 = vtanh.f32 %v3536_v31 }
0x262c   :  { %19785 = vpow2.f32 %v15934_v61 }
0x2635   :  { %v19784_v57 = vpop.eup %19783 }
0x2636   :  { %3540 = vrot.lane.b32.xlu0 %v19784_v57, %s20574_s24  ;;  %v19786_v26 = vpop.eup %19785  ;;  %v21520_v57 = vld [vmem:[#allocation19] ss:$0 sm:$0xff] }
0x2637   :  { %v3522_v48 = vadd.f32 1.0, %v19786_v26 }
0x2639   :  { %19787 = vrcp.f32 %v3522_v48 }
0x2643   :  { %v19788_v35 = vpop.eup %19787 }
0x2644   :  { %v3538_v4 = vsub.f32 1.0, %v19788_v35  ;;  %v3544_v45 = vmul.f32 %v19788_v35, %v21379_v46 }
0x26a8   :  { %v3541_v8 = vpop.permute.xlu0 %3540 }
0x26a9   :  { %v3543_v41 = vmul.f32 %v3541_v8, %v3538_v4 }
0x26ab   :  { %v21476_v2 = vadd.f32 %v3544_v45, %v3543_v41 }
0x26ad   :  { %3547 = vrot.lane.b32.xlu1 %v21476_v2, %s20574_s24 }
0x271f   :  { %v3548_v5 = vpop.permute.xlu1 %3547 }
0x2720   :  { %17354 = vmatmul.mubr.msk.f32.vlgmr.msra.gmra.mrb[38].mxu0 %vm342_vm4, %v3548_v5 }
0x2721   :  { %18975 = vmatpush3.bf16.msra.mxu0 %v21101_v7  ;;  %17375 = vmatprep.mubr.msk.f32.mxu0 %vm20569_vm2, %v23398_v0 }
0x2722   :  { %18976 = vmatprep.subr.bf16.mxu0 %v23396_v10 }
0x2725   :  { %18978 = vmatpush3.bf16.msra.mxu0 %v21119_v20 }
0x2726   :  { %18979 = vmatprep.subr.bf16.mxu0 %v23396_v10 }
0x27f3   :  { %v3617_v44 = vpop.f32.mrb[38].mxu0 }
0x27f4   :  { %v3618_v12 = vadd.f32 %v21487_v50, %v3617_v44  ;;  %v17355_v14 = vpop.f32.mrb[39].mxu0 }
0x27f6   :  { %v3621_v42 = vmax.f32 %v3618_v12, 0.0 }
0x27f8   :  { %17365 = vmatmul.mubr.msk.f32.vlgmr.msra.gmra.mrb[38].mxu1 %vm342_vm4, %v3621_v42 }
0x27f9   :  { %17379 = vmatpush3.msra.mxu1 %v21392_v56  ;;  %17380 = vmatprep.mubr.msk.f32.mxu1 %vm20569_vm2, %v23398_v0 }
0x27fa   :  { %18985 = vmatprep.subr.bf16.mxu1 %v23396_v10 }
0x28cb   :  { %v3691_v17 = vpop.f32.mrb[38].mxu1 }
0x28cc   :  { %v3692_v23 = vadd.f32 %v21495_v59, %v3691_v17  ;;  %v17366_v6 = vpop.f32.mrb[39].mxu1 }
0x28ce   :  { %v3695_v31 = vmax.f32 %v3692_v23, 0.0 }
0x28d0   :  { %17376 = vmatmul.mubr.msk.f32.vlgmr.msra.gmra.mrb[40].mxu0 %vm342_vm4, %v3695_v31 }
0x28d1   :  { %18981 = vmatpush3.bf16.msra.mxu0 %v20945_v39  ;;  %17391 = vmatprep.mubr.msk.f32.mxu0 %vm20569_vm2, %v23398_v0 }
0x28d2   :  { %18982 = vmatprep.subr.bf16.mxu0 %v23396_v10 }
0x28d5   :  { %18984 = vmatpush3.bf16.msra.mxu0 %v20949_v43 }
0x28d6   :  { %18991 = vmatprep.subr.bf16.mxu0 %v23396_v10 }
0x28d8   :  { %17392 = vmatmul.mubr.msk.f32.vlgmr.msra.gmra.mrb[42].mxu0 %vm342_vm4, %v21456_v63 }
0x28d9   :  { %18993 = vmatpush3.bf16.msra.mxu0 %v21000_v21  ;;  %17413 = vmatprep.mubr.msk.f32.mxu0 %vm20569_vm2, %v23398_v0 }
0x28da   :  { %18994 = vmatprep.subr.bf16.mxu0 %v23396_v10 }
0x28dd   :  { %18996 = vmatpush3.bf16.msra.mxu0 %v21003_v28 }
0x28de   :  { %19003 = vmatprep.subr.bf16.mxu0 %v23396_v10 }
0x28e0   :  { %17414 = vmatmul.mubr.msk.f32.vlgmr.msra.gmra.mrb[44].mxu0 %vm342_vm4, %v3548_v5 }
0x28e1   :  { %19005 = vmatpush3.bf16.msra.mxu0 %v21080_v49  ;;  %17435 = vmatprep.mubr.msk.f32.mxu0 %vm20569_vm2, %v23398_v0 }
0x28e2   :  { %19006 = vmatprep.subr.bf16.mxu0 %v23396_v10 }
0x28e5   :  { %19008 = vmatpush3.bf16.msra.mxu0 %v21091_v3 }
0x28e6   :  { %17449 = vmatprep.subr.mxu0 %v23398_v0 }
0x29a3   :  { %v3765_v63 = vpop.f32.mrb[40].mxu0 }
0x29a4   :  { %v21523_v55 = vadd.f32 %v21520_v57, %v3765_v63  ;;  %v17377_v61 = vpop.f32.mrb[41].mxu0 }
0x29a6   :  { %23433 = vst [vmem:[#allocation41_spill] sm:$0xff] %v21523_v55  ;;  %17381 = vmatmul.mubr.msk.f32.vlgmr.msra.gmra.mrb[40].mxu1 %vm347_vm1, %v21523_v55 }
0x29a7   :  { %18987 = vmatpush3.bf16.msra.mxu1 %v21005_v30  ;;  %17402 = vmatprep.mubr.msk.f32.mxu1 %vm20569_vm2, %v23398_v0 }
0x29a8   :  { %18988 = vmatprep.subr.bf16.mxu1 %v23396_v10 }
0x29ab   :  { %v3908_v26 = vpop.f32.mrb[42].mxu0  ;;  %18990 = vmatpush3.bf16.msra.mxu1 %v21009_v32 }
0x29ac   :  { %v3928_v48 = vadd.f32 %v3908_v26, %v20981_v53  ;;  %v17393_v35 = vpop.f32.mrb[43].mxu0  ;;  %18997 = vmatprep.subr.bf16.mxu1 %v23396_v10 }
0x29ae   :  { %3930 = vrot.lane.b32.xlu0 %v3928_v48, %s20572_s6 }
0x29b3   :  { %v4089_v4 = vpop.f32.mrb[44].mxu0 }
0x29b4   :  { %v17415_v8 = vpop.f32.mrb[45].mxu0 }
0x2a20   :  { %v3931_v23 = vpop.permute.xlu0 %3930 }
0x2a79   :  { %v3838_v45 = vpop.f32.mrb[40].mxu1 }
0x2a7a   :  { %v3912_v41 = vadd.f32 %v3908_v26, %v3838_v45  ;;  %v17382_v5 = vpop.f32.mrb[41].mxu1  ;;  %v3927_v31 = vadd.f32 %v3838_v45, %v20997_v11  ;;  %v4109_v26 = vadd.f32 %v4089_v4, %v21037_v62 }
0x2a7c   :  { %v3913_v44 = vadd.f32 %v3912_v41, %v20993_v60  ;;  %v3920_v35 = vadd.f32 %v3912_v41, %v21020_v36 }
0x2a7e   :  { %v15940_v12 = vmul.f32 -1.442695, %v3913_v44  ;;  %v15941_v8 = vmul.f32 -1.442695, %v3920_v35 }
0x2a80   :  { %19789 = vpow2.f32 %v15940_v12 }
0x2a8a   :  { %v19790_v14 = vpop.eup %19789 }
0x2a8b   :  { %v3917_v42 = vadd.f32 1.0, %v19790_v14 }
0x2a8d   :  { %19791 = vrcp.f32 %v3917_v42 }
0x2a97   :  { %v19792_v17 = vpop.eup %19791 }
0x2a98   :  { %v3933_v6 = vmul.f32 %v19792_v17, %v3931_v23 }
0x2a9a   :  { %3935 = vrot.lane.b32.xlu1 %v3933_v6, %s20572_s6 }
0x2b0c   :  { %v3936_v63 = vpop.permute.xlu1 %3935 }
0x2b0d   :  { %v3938_v61 = vadd.f32 %v3936_v63, %v3927_v31 }
0x2b0f   :  { %19793 = vtanh.f32 %v3938_v61 }
0x2b10   :  { %19795 = vpow2.f32 %v15941_v8 }
0x2b19   :  { %v19794_v48 = vpop.eup %19793 }
0x2b1a   :  { %3942 = vrot.lane.b32.xlu0 %v19794_v48, %s20574_s24  ;;  %v19796_v5 = vpop.eup %19795 }
0x2b1b   :  { %v3924_v44 = vadd.f32 1.0, %v19796_v5 }
0x2b1d   :  { %19797 = vrcp.f32 %v3924_v44 }
0x2b1e   :  { %4111 = vrot.lane.b32.xlu0 %v4109_v26, %s20572_s6 }
0x2b27   :  { %v19798_v12 = vpop.eup %19797 }
0x2b28   :  { %v3940_v14 = vsub.f32 1.0, %v19798_v12  ;;  %v3946_v42 = vmul.f32 %v19798_v12, %v21452_v54 }
0x2b8c   :  { %v3943_v45 = vpop.permute.xlu0 %3942 }
0x2b8d   :  { %v3945_v17 = vmul.f32 %v3943_v45, %v3940_v14 }
0x2b8f   :  { %v3947_v23 = vadd.f32 %v3946_v42, %v3945_v17 }
0x2b90   :  { %v4112_v8 = vpop.permute.xlu0 %4111 }
0x2b91   :  { %3949 = vrot.lane.b32.xlu1 %v3947_v23, %s20574_s24 }
0x2c03   :  { %v3950_v6 = vpop.permute.xlu1 %3949 }
0x2c04   :  { %17403 = vmatmul.mubr.msk.f32.vlgmr.msra.gmra.mrb[42].mxu1 %vm342_vm4, %v3950_v6 }
0x2c05   :  { %18999 = vmatpush3.bf16.msra.mxu1 %v21065_v25  ;;  %17424 = vmatprep.mubr.msk.f32.mxu1 %vm20569_vm2, %v23398_v0 }
0x2c06   :  { %19000 = vmatprep.subr.bf16.mxu1 %v23396_v10 }
0x2c09   :  { %19002 = vmatpush3.bf16.msra.mxu1 %v21071_v34 }
0x2c0a   :  { %19009 = vmatprep.subr.bf16.mxu1 %v23396_v10 }
0x2cd7   :  { %v4019_v41 = vpop.f32.mrb[42].mxu1 }
0x2cd8   :  { %v4093_v54 = vadd.f32 %v4089_v4, %v4019_v41  ;;  %v17404_v31 = vpop.f32.mrb[43].mxu1  ;;  %v4108_v44 = vadd.f32 %v4019_v41, %v21053_v18 }
0x2cda   :  { %v4094_v63 = vadd.f32 %v4093_v54, %v21049_v1  ;;  %v4101_v4 = vadd.f32 %v4093_v54, %v21077_v37 }
0x2cdc   :  { %v15944_v61 = vmul.f32 -1.442695, %v4094_v63  ;;  %v15945_v42 = vmul.f32 -1.442695, %v4101_v4 }
0x2cde   :  { %19799 = vpow2.f32 %v15944_v61 }
0x2ce8   :  { %v19800_v48 = vpop.eup %19799 }
0x2ce9   :  { %v4098_v26 = vadd.f32 1.0, %v19800_v48 }
0x2ceb   :  { %19801 = vrcp.f32 %v4098_v26 }
0x2cf5   :  { %v19802_v35 = vpop.eup %19801 }
0x2cf6   :  { %v4114_v5 = vmul.f32 %v19802_v35, %v4112_v8 }
0x2cf8   :  { %4116 = vrot.lane.b32.xlu1 %v4114_v5, %s20572_s6  ;;  %v21567_v5 = vld [vmem:[#allocation22] sm:$0xff] }
0x2d6a   :  { %v4117_v12 = vpop.permute.xlu1 %4116 }
0x2d6b   :  { %v4119_v14 = vadd.f32 %v4117_v12, %v4108_v44 }
0x2d6d   :  { %19803 = vtanh.f32 %v4119_v14 }
0x2d6e   :  { %19805 = vpow2.f32 %v15945_v42 }
0x2d77   :  { %v19804_v45 = vpop.eup %19803 }
0x2d78   :  { %4123 = vrot.lane.b32.xlu0 %v19804_v45, %s20574_s24  ;;  %v19806_v17 = vpop.eup %19805 }
0x2d79   :  { %v4105_v23 = vadd.f32 1.0, %v19806_v17  ;;  %v15949_v17 = vld [vmem:[%s23427_s28 + $0x10] sm:$0xff] }
0x2d7b   :  { %19807 = vrcp.f32 %v4105_v23 }
0x2d85   :  { %v19808_v6 = vpop.eup %19807 }
0x2d86   :  { %v4121_v31 = vsub.f32 1.0, %v19808_v6  ;;  %v4127_v61 = vmul.f32 %v19808_v6, %v21476_v2 }
0x2dea   :  { %v4124_v63 = vpop.permute.xlu0 %4123 }
0x2deb   :  { %v4126_v48 = vmul.f32 %v4124_v63, %v4121_v31 }
0x2ded   :  { %v4128_v41 = vadd.f32 %v4127_v61, %v4126_v48  ;;  %v21600_v61 = vld [vmem:[#allocation24] ss:$0 sm:$0xff] }
0x2def   :  { %4130 = vrot.lane.b32.xlu1 %v4128_v41, %s20574_s24 }
0x2e61   :  { %v4131_v26 = vpop.permute.xlu1 %4130 }
0x2e62   :  { %17425 = vmatmul.mubr.msk.f32.vlgmr.msra.gmra.mrb[44].mxu1 %vm342_vm4, %v4131_v26 }
0x2e63   :  { %19011 = vmatpush3.bf16.msra.mxu1 %v21101_v7  ;;  %17446 = vmatprep.mubr.msk.f32.mxu1 %vm20569_vm2, %v23398_v0 }
0x2e64   :  { %19012 = vmatprep.subr.bf16.mxu1 %v23396_v10 }
0x2e67   :  { %19014 = vmatpush3.bf16.msra.mxu1 %v21119_v20 }
0x2e68   :  { %17454 = vmatprep.subr.mxu1 %v23398_v0 }
0x2f35   :  { %v4200_v54 = vpop.f32.mrb[44].mxu1 }
0x2f36   :  { %v4201_v2 = vadd.f32 %v21487_v50, %v4200_v54  ;;  %v17426_v35 = vpop.f32.mrb[45].mxu1  ;;  %v21611_v54 = vld [vmem:[%s23382_s17] ss:$0 sm:$0xff] }
0x2f38   :  { %v4204_v8 = vmax.f32 %v4201_v2, 0.0 }
0x2f3a   :  { %17436 = vmatmul.mubr.msk.f32.vlgmr.msra.gmra.mrb[46].mxu0 %vm342_vm4, %v4204_v8 }
0x2f3b   :  { %17450 = vmatpush3.msra.mxu0 %v21567_v5  ;;  %17451 = vmatprep.mubr.msk.f32.mxu0 %vm20569_vm2, %v23398_v0 }
0x2f3c   :  { %19015 = vmatprep.subr.bf16.mxu0 %v23396_v10 }
0x2f3e   :  { %17452 = vmatmul.mubr.msk.f32.vlgmr.msra.gmra.mrb[48].mxu0 %vm347_vm1, %v21422_v22 }
0x2f3f   :  { %19017 = vmatpush3.bf16.msra.mxu0 %v20887_v9  ;;  %17467 = vmatprep.mubr.msk.f32.mxu0 %vm20569_vm2, %v23398_v0 }
0x2f40   :  { %19018 = vmatprep.subr.bf16.mxu0 %v23396_v10 }
0x2f43   :  { %19020 = vmatpush3.bf16.msra.mxu0 %v20899_v13 }
0x2f44   :  { %17481 = vmatprep.subr.mxu0 %v23398_v0 }
0x300d   :  { %v4274_v44 = vpop.f32.mrb[46].mxu0 }
0x300e   :  { %v4275_v12 = vadd.f32 %v21495_v59, %v4274_v44  ;;  %v17437_v14 = vpop.f32.mrb[47].mxu0 }
0x3010   :  { %v4278_v45 = vmax.f32 %v4275_v12, 0.0  ;;  %v21624_v12 = vld [vmem:[%s23384_s19] ss:$0 sm:$0xff] }
0x3011   :  { %v4435_v4 = vpop.f32.mrb[48].mxu0 }
0x3012   :  { %17447 = vmatmul.mubr.msk.f32.vlgmr.msra.gmra.mrb[46].mxu1 %vm342_vm4, %v4278_v45  ;;  %v17453_v42 = vpop.f32.mrb[49].mxu0 }
0x3013   :  { %17455 = vmatpush3.msk.msra.mxu1 %vm432_vm3, %v21304_v58  ;;  %17456 = vmatprep.mubr.msk.f32.mxu1 %vm20569_vm2, %v23398_v0 }
0x3014   :  { %19021 = vmatprep.subr.bf16.mxu1 %v23396_v10 }
0x3016   :  { %17457 = vmatmul.mubr.msk.f32.vlgmr.msra.gmra.mrb[48].mxu1 %vm345_vm0, %v15949_v17 }
0x3017   :  { %19023 = vmatpush3.bf16.msra.mxu1 %v20913_v16  ;;  %17478 = vmatprep.mubr.msk.f32.mxu1 %vm20569_vm2, %v23398_v0 }
0x3018   :  { %19024 = vmatprep.subr.bf16.mxu1 %v23396_v10 }
0x301b   :  { %19026 = vmatpush3.bf16.msra.mxu1 %v20929_v27 }
0x301c   :  { %19027 = vmatprep.subr.bf16.mxu1 %v23396_v10 }
0x30e5   :  { %v21598_v58 = vpop.f32.mrb[46].mxu1 }
0x30e6   :  { %23434 = vst [vmem:[#allocation42_spill] sm:$0xff] %v21598_v58  ;;  %v17448_v23 = vpop.f32.mrb[47].mxu1 }
0x30e9   :  { %v4508_v6 = vpop.f32.mrb[48].mxu1 }
0x30ea   :  { %v4509_v31 = vadd.f32 %v4508_v6, %v4435_v4  ;;  %v17458_v63 = vpop.f32.mrb[49].mxu1 }
0x30ec   :  { %v4512_v48 = vadd.f32 %v21600_v61, %v4509_v31 }
0x30ee   :  { %v4513_v41 = vmax.f32 %v4512_v48, 0.0 }
0x30f0   :  { %17468 = vmatmul.mubr.msk.f32.vlgmr.msra.gmra.mrb[50].mxu0 %vm342_vm4, %v4513_v41 }
0x30f1   :  { %17482 = vmatpush3.msra.mxu0 %v21392_v56  ;;  %17483 = vmatprep.mubr.msk.f32.mxu0 %vm20569_vm2, %v23398_v0 }
0x30f2   :  { %19033 = vmatprep.subr.bf16.mxu0 %v23396_v10 }
0x31c3   :  { %v4583_v26 = vpop.f32.mrb[50].mxu0 }
0x31c4   :  { %v4584_v2 = vadd.f32 %v21611_v54, %v4583_v26  ;;  %v17469_v35 = vpop.f32.mrb[51].mxu0 }
0x31c6   :  { %v4587_v8 = vmax.f32 %v4584_v2, 0.0 }
0x31c8   :  { %17479 = vmatmul.mubr.msk.f32.vlgmr.msra.gmra.mrb[50].mxu1 %vm342_vm4, %v4587_v8 }
0x31c9   :  { %19029 = vmatpush3.bf16.msra.mxu1 %v21005_v30  ;;  %17494 = vmatprep.mubr.msk.f32.mxu1 %vm20569_vm2, %v23398_v0 }
0x31ca   :  { %19030 = vmatprep.subr.bf16.mxu1 %v23396_v10 }
0x31cd   :  { %19032 = vmatpush3.bf16.msra.mxu1 %v21009_v32 }
0x31ce   :  { %19039 = vmatprep.subr.bf16.mxu1 %v23396_v10 }
0x329b   :  { %v4657_v44 = vpop.f32.mrb[50].mxu1 }
0x329c   :  { %v4658_v14 = vadd.f32 %v21624_v12, %v4657_v44  ;;  %v17480_v45 = vpop.f32.mrb[51].mxu1 }
0x329e   :  { %v21628_v4 = vsel %vm345_vm0, %v4658_v14, %v15949_v17 }
0x329f   :  { %23435 = vst [vmem:[#allocation43_spill] sm:$0xff] %v21628_v4  ;;  %17484 = vmatmul.mubr.msk.f32.vlgmr.msra.gmra.mrb[52].mxu0 %vm347_vm1, %v21628_v4 }
0x32a0   :  { %19035 = vmatpush3.bf16.msra.mxu0 %v21065_v25  ;;  %17505 = vmatprep.mubr.msk.f32.mxu0 %vm20569_vm2, %v23398_v0 }
0x32a1   :  { %19036 = vmatprep.subr.bf16.mxu0 %v23396_v10 }
0x32a4   :  { %19038 = vmatpush3.bf16.msra.mxu0 %v21071_v34 }
0x32a5   :  { %19045 = vmatprep.subr.bf16.mxu0 %v23396_v10 }
0x3372   :  { %v4731_v42 = vpop.f32.mrb[52].mxu0 }
0x3373   :  { %v4735_v23 = vadd.f32 %v4731_v42, %v21430_v38  ;;  %v17485_v6 = vpop.f32.mrb[53].mxu0  ;;  %v4750_v2 = vadd.f32 %v4731_v42, %v20997_v11 }
0x3375   :  { %v4736_v17 = vadd.f32 %v4735_v23, %v20993_v60  ;;  %v4743_v38 = vadd.f32 %v4735_v23, %v21020_v36 }
0x3377   :  { %v15956_v31 = vmul.f32 -1.442695, %v4736_v17  ;;  %v15957_v14 = vmul.f32 -1.442695, %v4743_v38 }
0x3379   :  { %19809 = vpow2.f32 %v15956_v31 }
0x3383   :  { %v19810_v63 = vpop.eup %19809 }
0x3384   :  { %v4740_v48 = vadd.f32 1.0, %v19810_v63 }
0x3386   :  { %19811 = vrcp.f32 %v4740_v48 }
0x3390   :  { %v19812_v41 = vpop.eup %19811 }
0x3391   :  { %v4751_v26 = vmul.f32 %v19812_v41, %v21441_v29 }
0x3393   :  { %4753 = vrot.lane.b32.xlu0 %v4751_v26, %s20572_s6 }
0x3405   :  { %v4754_v35 = vpop.permute.xlu0 %4753 }
0x3406   :  { %v4756_v8 = vadd.f32 %v4754_v35, %v4750_v2 }
0x3408   :  { %19813 = vtanh.f32 %v4756_v8 }
0x3409   :  { %19815 = vpow2.f32 %v15957_v14 }
0x3412   :  { %v19814_v44 = vpop.eup %19813 }
0x3413   :  { %4760 = vrot.lane.b32.xlu1 %v19814_v44, %s20574_s24  ;;  %v19816_v45 = vpop.eup %19815 }
0x3414   :  { %v4747_v6 = vadd.f32 1.0, %v19816_v45 }
0x3416   :  { %19817 = vrcp.f32 %v4747_v6 }
0x3420   :  { %v19818_v17 = vpop.eup %19817 }
0x3421   :  { %v4758_v31 = vsub.f32 1.0, %v19818_v17  ;;  %v4764_v63 = vmul.f32 %v19818_v17, %v21357_v19 }
0x3485   :  { %v4761_v29 = vpop.permute.xlu1 %4760 }
0x3486   :  { %v4763_v48 = vmul.f32 %v4761_v29, %v4758_v31 }
0x3488   :  { %v21646_v42 = vadd.f32 %v4764_v63, %v4763_v48 }
0x348a   :  { %4767 = vrot.lane.b32.xlu0 %v21646_v42, %s20574_s24 }
0x34fc   :  { %v21650_v41 = vpop.permute.xlu0 %4767 }
0x34fd   :  { %17495 = vmatmul.mubr.msk.f32.vlgmr.msra.gmra.mrb[52].mxu1 %vm342_vm4, %v21650_v41 }
0x34fe   :  { %19041 = vmatpush3.bf16.msra.mxu1 %v21080_v49  ;;  %17516 = vmatprep.mubr.msk.f32.mxu1 %vm20569_vm2, %v23398_v0 }
0x34ff   :  { %19042 = vmatprep.subr.bf16.mxu1 %v23396_v10 }
0x3502   :  { %19044 = vmatpush3.bf16.msra.mxu1 %v21091_v3 }
0x3503   :  { %17530 = vmatprep.subr.mxu1 %v23398_v0 }
0x35d0   :  { %v4837_v19 = vpop.f32.mrb[52].mxu1 }
0x35d1   :  { %v4841_v23 = vadd.f32 %v4837_v19, %v21437_v47  ;;  %v17496_v26 = vpop.f32.mrb[53].mxu1  ;;  %v4856_v45 = vadd.f32 %v4837_v19, %v21053_v18 }
0x35d3   :  { %v4842_v2 = vadd.f32 %v4841_v23, %v21049_v1  ;;  %v4849_v47 = vadd.f32 %v4841_v23, %v21077_v37 }
0x35d5   :  { %v15959_v35 = vmul.f32 -1.442695, %v4842_v2  ;;  %v15960_v29 = vmul.f32 -1.442695, %v4849_v47 }
0x35d7   :  { %19819 = vpow2.f32 %v15959_v35 }
0x35e1   :  { %v19820_v8 = vpop.eup %19819 }
0x35e2   :  { %v4846_v44 = vadd.f32 1.0, %v19820_v8 }
0x35e4   :  { %19821 = vrcp.f32 %v4846_v44 }
0x35ee   :  { %v19822_v38 = vpop.eup %19821 }
0x35ef   :  { %v4857_v14 = vmul.f32 %v19822_v38, %v21468_v15 }
0x35f1   :  { %4859 = vrot.lane.b32.xlu1 %v4857_v14, %s20572_s6 }
0x3663   :  { %v4860_v6 = vpop.permute.xlu1 %4859 }
0x3664   :  { %v4862_v17 = vadd.f32 %v4860_v6, %v4856_v45 }
0x3666   :  { %19823 = vtanh.f32 %v4862_v17 }
0x3667   :  { %19825 = vpow2.f32 %v15960_v29 }
0x3670   :  { %v19824_v31 = vpop.eup %19823 }
0x3671   :  { %4866 = vrot.lane.b32.xlu0 %v19824_v31, %s20574_s24  ;;  %v19826_v63 = vpop.eup %19825 }
0x3672   :  { %v4853_v48 = vadd.f32 1.0, %v19826_v63 }
0x3674   :  { %19827 = vrcp.f32 %v4853_v48 }
0x367e   :  { %v19828_v26 = vpop.eup %19827 }
0x367f   :  { %v4864_v2 = vsub.f32 1.0, %v19828_v26  ;;  %v4870_v35 = vmul.f32 %v19828_v26, %v21379_v46 }
0x36e3   :  { %v4867_v15 = vpop.permute.xlu0 %4866 }
0x36e4   :  { %v4869_v8 = vmul.f32 %v4867_v15, %v4864_v2 }
0x36e6   :  { %v21668_v19 = vadd.f32 %v4870_v35, %v4869_v8 }
0x36e8   :  { %4873 = vrot.lane.b32.xlu1 %v21668_v19, %s20574_s24 }
0x375a   :  { %v4874_v44 = vpop.permute.xlu1 %4873 }
0x375b   :  { %17506 = vmatmul.mubr.msk.f32.vlgmr.msra.gmra.mrb[54].mxu0 %vm342_vm4, %v4874_v44 }
0x375c   :  { %19047 = vmatpush3.bf16.msra.mxu0 %v21101_v7  ;;  %17527 = vmatprep.mubr.msk.f32.mxu0 %vm20569_vm2, %v23398_v0 }
0x375d   :  { %19048 = vmatprep.subr.bf16.mxu0 %v23396_v10 }
0x3760   :  { %19050 = vmatpush3.bf16.msra.mxu0 %v21119_v20 }
0x3761   :  { %19051 = vmatprep.subr.bf16.mxu0 %v23396_v10 }
0x382e   :  { %v4943_v46 = vpop.f32.mrb[54].mxu0 }
0x382f   :  { %v4944_v23 = vadd.f32 %v21487_v50, %v4943_v46  ;;  %v17507_v38 = vpop.f32.mrb[55].mxu0 }
0x3831   :  { %v4947_v14 = vmax.f32 %v4944_v23, 0.0 }
0x3833   :  { %17517 = vmatmul.mubr.msk.f32.vlgmr.msra.gmra.mrb[54].mxu1 %vm342_vm4, %v4947_v14 }
0x3834   :  { %17531 = vmatpush3.msra.mxu1 %v21392_v56  ;;  %17532 = vmatprep.mubr.msk.f32.mxu1 %vm20569_vm2, %v23398_v0 }
0x3835   :  { %19057 = vmatprep.subr.bf16.mxu1 %v23396_v10 }
0x3906   :  { %v5017_v45 = vpop.f32.mrb[54].mxu1 }
0x3907   :  { %v5018_v6 = vadd.f32 %v21495_v59, %v5017_v45  ;;  %v17518_v17 = vpop.f32.mrb[55].mxu1 }
0x3909   :  { %v5021_v31 = vmax.f32 %v5018_v6, 0.0 }
0x390b   :  { %17528 = vmatmul.mubr.msk.f32.vlgmr.msra.gmra.mrb[56].mxu0 %vm342_vm4, %v5021_v31 }
0x390c   :  { %19053 = vmatpush3.bf16.msra.mxu0 %v20945_v39  ;;  %17543 = vmatprep.mubr.msk.f32.mxu0 %vm20569_vm2, %v23398_v0 }
0x390d   :  { %19054 = vmatprep.subr.bf16.mxu0 %v23396_v10 }
0x3910   :  { %19056 = vmatpush3.bf16.msra.mxu0 %v20949_v43 }
0x3911   :  { %19063 = vmatprep.subr.bf16.mxu0 %v23396_v10 }
0x3913   :  { %17544 = vmatmul.mubr.msk.f32.vlgmr.msra.gmra.mrb[58].mxu0 %vm342_vm4, %v21650_v41 }
0x3914   :  { %19065 = vmatpush3.bf16.msra.mxu0 %v21000_v21  ;;  %17565 = vmatprep.mubr.msk.f32.mxu0 %vm20569_vm2, %v23398_v0 }
0x3915   :  { %19066 = vmatprep.subr.bf16.mxu0 %v23396_v10 }
0x3918   :  { %19068 = vmatpush3.bf16.msra.mxu0 %v21003_v28 }
0x3919   :  { %19075 = vmatprep.subr.bf16.mxu0 %v23396_v10 }
0x391b   :  { %17566 = vmatmul.mubr.msk.f32.vlgmr.msra.gmra.mrb[60].mxu0 %vm342_vm4, %v4874_v44 }
0x391c   :  { %19077 = vmatpush3.bf16.msra.mxu0 %v21080_v49  ;;  %17587 = vmatprep.mubr.msk.f32.mxu0 %vm20569_vm2, %v23398_v0 }
0x391d   :  { %19078 = vmatprep.subr.bf16.mxu0 %v23396_v10 }
0x3920   :  { %19080 = vmatpush3.bf16.msra.mxu0 %v21091_v3 }
0x3921   :  { %17601 = vmatprep.subr.mxu0 %v23398_v0 }
0x39de   :  { %v5091_v56 = vpop.f32.mrb[56].mxu0 }
0x39df   :  { %v21709_v41 = vadd.f32 %v21520_v57, %v5091_v56  ;;  %v17529_v47 = vpop.f32.mrb[57].mxu0 }
0x39e1   :  { %17533 = vmatmul.mubr.msk.f32.vlgmr.msra.gmra.mrb[56].mxu1 %vm347_vm1, %v21709_v41 }
0x39e2   :  { %19059 = vmatpush3.bf16.msra.mxu1 %v21005_v30  ;;  %17554 = vmatprep.mubr.msk.f32.mxu1 %vm20569_vm2, %v23398_v0 }
0x39e3   :  { %19060 = vmatprep.subr.bf16.mxu1 %v23396_v10 }
0x39e6   :  { %v21717_v29 = vpop.f32.mrb[58].mxu0  ;;  %19062 = vmatpush3.bf16.msra.mxu1 %v21009_v32 }
0x39e7   :  { %v5254_v63 = vadd.f32 %v21717_v29, %v20981_v53  ;;  %v17545_v48 = vpop.f32.mrb[59].mxu0  ;;  %19069 = vmatprep.subr.bf16.mxu1 %v23396_v10 }
0x39e9   :  { %5256 = vrot.lane.b32.xlu0 %v5254_v63, %s20572_s6 }
0x39ee   :  { %v21724_v26 = vpop.f32.mrb[60].mxu0 }
0x39ef   :  { %v17567_v2 = vpop.f32.mrb[61].mxu0  ;;  %v5435_v63 = vadd.f32 %v21724_v26, %v21037_v62 }
0x3a5b   :  { %v21728_v45 = vpop.permute.xlu0 %5256 }
0x3ab4   :  { %v5164_v15 = vpop.f32.mrb[56].mxu1 }
0x3ab5   :  { %v5238_v35 = vadd.f32 %v21717_v29, %v5164_v15  ;;  %v17534_v8 = vpop.f32.mrb[57].mxu1  ;;  %v5253_v17 = vadd.f32 %v5164_v15, %v20997_v11 }
0x3ab7   :  { %v5239_v44 = vadd.f32 %v5238_v35, %v20993_v60  ;;  %v5246_v48 = vadd.f32 %v5238_v35, %v21020_v36 }
0x3ab9   :  { %v15966_v46 = vmul.f32 -1.442695, %v5239_v44  ;;  %v15967_v2 = vmul.f32 -1.442695, %v5246_v48 }
0x3abb   :  { %19829 = vpow2.f32 %v15966_v46 }
0x3ac5   :  { %v19830_v23 = vpop.eup %19829 }
0x3ac6   :  { %v5243_v38 = vadd.f32 1.0, %v19830_v23 }
0x3ac8   :  { %19831 = vrcp.f32 %v5243_v38 }
0x3ad2   :  { %v19832_v14 = vpop.eup %19831 }
0x3ad3   :  { %v5259_v6 = vmul.f32 %v19832_v14, %v21728_v45 }
0x3ad5   :  { %5261 = vrot.lane.b32.xlu1 %v5259_v6, %s20572_s6 }
0x3b47   :  { %v5262_v31 = vpop.permute.xlu1 %5261 }
0x3b48   :  { %v5264_v56 = vadd.f32 %v5262_v31, %v5253_v17 }
0x3b4a   :  { %19833 = vtanh.f32 %v5264_v56 }
0x3b4b   :  { %19835 = vpow2.f32 %v15967_v2 }
0x3b54   :  { %v19834_v47 = vpop.eup %19833 }
0x3b55   :  { %5268 = vrot.lane.b32.xlu0 %v19834_v47, %s20574_s24  ;;  %v19836_v8 = vpop.eup %19835 }
0x3b56   :  { %v5250_v44 = vadd.f32 1.0, %v19836_v8 }
0x3b58   :  { %19837 = vrcp.f32 %v5250_v44 }
0x3b59   :  { %5437 = vrot.lane.b32.xlu0 %v5435_v63, %s20572_s6 }
0x3b62   :  { %v19838_v46 = vpop.eup %19837 }
0x3b63   :  { %v5266_v15 = vsub.f32 1.0, %v19838_v46  ;;  %v5272_v38 = vmul.f32 %v19838_v46, %v21646_v42 }
0x3bc7   :  { %v5269_v23 = vpop.permute.xlu0 %5268 }
0x3bc8   :  { %v5271_v14 = vmul.f32 %v5269_v23, %v5266_v15 }
0x3bca   :  { %v21739_v6 = vadd.f32 %v5272_v38, %v5271_v14 }
0x3bcb   :  { %v21755_v44 = vpop.permute.xlu0 %5437 }
0x3bcc   :  { %5275 = vrot.lane.b32.xlu1 %v21739_v6, %s20574_s24 }
0x3c3e   :  { %v21743_v17 = vpop.permute.xlu1 %5275 }
0x3c3f   :  { %17555 = vmatmul.mubr.msk.f32.vlgmr.msra.gmra.mrb[58].mxu1 %vm342_vm4, %v21743_v17 }
0x3c40   :  { %19071 = vmatpush3.bf16.msra.mxu1 %v21065_v25  ;;  %17576 = vmatprep.mubr.msk.f32.mxu1 %vm20569_vm2, %v23398_v0 }
0x3c41   :  { %19072 = vmatprep.subr.bf16.mxu1 %v23396_v10 }
0x3c44   :  { %19074 = vmatpush3.bf16.msra.mxu1 %v21071_v34 }
0x3c45   :  { %19081 = vmatprep.subr.bf16.mxu1 %v23396_v10 }
0x3d12   :  { %v5345_v35 = vpop.f32.mrb[58].mxu1 }
0x3d13   :  { %v5419_v31 = vadd.f32 %v21724_v26, %v5345_v35  ;;  %v17556_v56 = vpop.f32.mrb[59].mxu1  ;;  %v5434_v15 = vadd.f32 %v5345_v35, %v21053_v18 }
0x3d15   :  { %v5420_v47 = vadd.f32 %v5419_v31, %v21049_v1  ;;  %v5427_v56 = vadd.f32 %v5419_v31, %v21077_v37  ;;  %v23436_v31 = vmov 0.0  }
0x3d17   :  { %v15970_v63 = vmul.f32 -1.442695, %v5420_v47  ;;  %v15971_v47 = vmul.f32 -1.442695, %v5427_v56  ;;  %v21776_v56 = vld [vmem:[#allocation4] sm:$0xff] }
0x3d19   :  { %19839 = vpow2.f32 %v15970_v63 }
0x3d23   :  { %v19840_v48 = vpop.eup %19839 }
0x3d24   :  { %v5424_v2 = vadd.f32 1.0, %v19840_v48 }
0x3d26   :  { %19841 = vrcp.f32 %v5424_v2 }
0x3d30   :  { %v19842_v8 = vpop.eup %19841 }
0x3d31   :  { %v5440_v46 = vmul.f32 %v19842_v8, %v21755_v44 }
0x3d33   :  { %5442 = vrot.lane.b32.xlu1 %v5440_v46, %s20572_s6 }
0x3da5   :  { %v5443_v23 = vpop.permute.xlu1 %5442 }
0x3da6   :  { %v5445_v38 = vadd.f32 %v5443_v23, %v5434_v15  ;;  %v23437_v23 = vmov 0.0|0.0  }
0x3da8   :  { %19843 = vtanh.f32 %v5445_v38 }
0x3da9   :  { %19845 = vpow2.f32 %v15971_v47 }
0x3db2   :  { %v19844_v14 = vpop.eup %19843 }
0x3db3   :  { %5449 = vrot.lane.b32.xlu0 %v19844_v14, %s20574_s24  ;;  %v19846_v63 = vpop.eup %19845 }
0x3db4   :  { %v5431_v48 = vadd.f32 1.0, %v19846_v63 }
0x3db6   :  { %19847 = vrcp.f32 %v5431_v48 }
0x3dc0   :  { %v19848_v2 = vpop.eup %19847 }
0x3dc1   :  { %v5447_v10 = vsub.f32 1.0, %v19848_v2  ;;  %v5453_v46 = vmul.f32 %v19848_v2, %v21668_v19 }
0x3e25   :  { %v5450_v8 = vpop.permute.xlu0 %5449 }
0x3e26   :  { %v5452_v0 = vmul.f32 %v5450_v8, %v5447_v10 }
0x3e28   :  { %v21763_v35 = vadd.f32 %v5453_v46, %v5452_v0 }
0x3e2a   :  { %5456 = vrot.lane.b32.xlu1 %v21763_v35, %s20574_s24 }
0x3e9c   :  { %v5457_v15 = vpop.permute.xlu1 %5456 }
0x3e9d   :  { %17577 = vmatmul.mubr.msk.f32.vlgmr.msra.gmra.mrb[60].mxu1 %vm342_vm4, %v5457_v15 }
0x3e9e   :  { %19083 = vmatpush3.bf16.msra.mxu1 %v21101_v7  ;;  %17598 = vmatprep.mubr.msk.f32.mxu1 %vm20569_vm2, %v23436_v31 }
0x3e9f   :  { %19084 = vmatprep.subr.bf16.mxu1 %v23437_v23 }
0x3ea2   :  { %19086 = vmatpush3.bf16.msra.mxu1 %v21119_v20 }
0x3ea3   :  { %19087 = vmatprep.subr.bf16.mxu1 %v23437_v23 }
0x3f70   :  { %v5526_v10 = vpop.f32.mrb[60].mxu1 }
0x3f71   :  { %v5527_v0 = vadd.f32 %v21487_v50, %v5526_v10  ;;  %v17578_v38 = vpop.f32.mrb[61].mxu1 }
0x3f73   :  { %v5530_v14 = vmax.f32 %v5527_v0, 0.0 }
0x3f75   :  { %17588 = vmatmul.mubr.msk.f32.vlgmr.msra.gmra.mrb[62].mxu0 %vm342_vm4, %v5530_v14 }
0x3f76   :  { %17602 = vmatpush3.msra.mxu0 %v21776_v56  ;;  %17603 = vmatprep.mubr.msk.f32.mxu0 %vm20569_vm2, %v23436_v31 }
0x3f77   :  { %19093 = vmatprep.subr.bf16.mxu0 %v23437_v23 }
0x4048   :  { %v5600_v47 = vpop.f32.mrb[62].mxu0 }
0x4049   :  { %v5601_v63 = vadd.f32 %v21495_v59, %v5600_v47  ;;  %v17589_v48 = vpop.f32.mrb[63].mxu0 }
0x404b   :  { %v5604_v2 = vmax.f32 %v5601_v63, 0.0 }
0x404d   :  { %17599 = vmatmul.mubr.msk.f32.vlgmr.msra.gmra.mrb[62].mxu1 %vm342_vm4, %v5604_v2 }
0x404e   :  { %19089 = vmatpush3.bf16.msra.mxu1 %v20945_v39  ;;  %17614 = vmatprep.mubr.msk.f32.mxu1 %vm20569_vm2, %v23436_v31 }
0x404f   :  { %19090 = vmatprep.subr.bf16.mxu1 %v23437_v23 }
0x4052   :  { %19092 = vmatpush3.bf16.msra.mxu1 %v20949_v43 }
0x4053   :  { %19099 = vmatprep.subr.bf16.mxu1 %v23437_v23 }
0x4055   :  { %17615 = vmatmul.mubr.msk.f32.vlgmr.msra.gmra.mrb[64].mxu1 %vm342_vm4, %v21743_v17 }
0x4056   :  { %19101 = vmatpush3.bf16.msra.mxu1 %v21000_v21  ;;  %17636 = vmatprep.mubr.msk.f32.mxu1 %vm20569_vm2, %v23436_v31 }
0x4057   :  { %19102 = vmatprep.subr.bf16.mxu1 %v23437_v23 }
0x405a   :  { %19104 = vmatpush3.bf16.msra.mxu1 %v21003_v28 }
0x405b   :  { %19111 = vmatprep.subr.bf16.mxu1 %v23437_v23 }
0x405d   :  { %17637 = vmatmul.mubr.msk.f32.vlgmr.msra.gmra.mrb[66].mxu1 %vm342_vm4, %v5457_v15 }
0x405e   :  { %19113 = vmatpush3.bf16.msra.mxu1 %v21080_v49  ;;  %17658 = vmatprep.mubr.msk.f32.mxu1 %vm20569_vm2, %v23436_v31 }
0x405f   :  { %19114 = vmatprep.subr.bf16.mxu1 %v23437_v23 }
0x4062   :  { %19116 = vmatpush3.bf16.msra.mxu1 %v21091_v3 }
0x4063   :  { %17672 = vmatprep.subr.mxu1 %v23436_v31 }
0x4120   :  { %v5674_v50 = vpop.f32.mrb[62].mxu1 }
0x4121   :  { %v21806_v59 = vadd.f32 %v21520_v57, %v5674_v50  ;;  %v17600_v17 = vpop.f32.mrb[63].mxu1 }
0x4123   :  { %17604 = vmatmul.mubr.msk.f32.vlgmr.msra.gmra.mrb[64].mxu0 %vm347_vm1, %v21806_v59 }
0x4124   :  { %19095 = vmatpush3.bf16.msra.mxu0 %v21005_v30  ;;  %17625 = vmatprep.mubr.msk.f32.mxu0 %vm20569_vm2, %v23436_v31 }
0x4125   :  { %19096 = vmatprep.subr.bf16.mxu0 %v23437_v23 }
0x4128   :  { %v5817_v8 = vpop.f32.mrb[64].mxu1  ;;  %19098 = vmatpush3.bf16.msra.mxu0 %v21009_v32 }
0x4129   :  { %v5837_v46 = vadd.f32 %v5817_v8, %v20981_v53  ;;  %v17616_v15 = vpop.f32.mrb[65].mxu1  ;;  %19105 = vmatprep.subr.bf16.mxu0 %v23437_v23 }
0x412b   :  { %5839 = vrot.lane.b32.xlu0 %v5837_v46, %s20572_s6 }
0x4130   :  { %v5998_v57 = vpop.f32.mrb[66].mxu1 }
0x4131   :  { %v17638_v10 = vpop.f32.mrb[67].mxu1 }
0x419d   :  { %v5840_v17 = vpop.permute.xlu0 %5839 }
0x41f6   :  { %v5747_v0 = vpop.f32.mrb[64].mxu0 }
0x41f7   :  { %v5821_v38 = vadd.f32 %v5817_v8, %v5747_v0  ;;  %v17605_v14 = vpop.f32.mrb[65].mxu0  ;;  %v5836_v15 = vadd.f32 %v5747_v0, %v20997_v11  ;;  %v6018_v8 = vadd.f32 %v5998_v57, %v21037_v62 }
0x41f9   :  { %v5822_v47 = vadd.f32 %v5821_v38, %v20993_v60  ;;  %v5829_v14 = vadd.f32 %v5821_v38, %v21020_v36 }
0x41fb   :  { %v15977_v63 = vmul.f32 -1.442695, %v5822_v47  ;;  %v15978_v47 = vmul.f32 -1.442695, %v5829_v14 }
0x41fd   :  { %19849 = vpow2.f32 %v15977_v63 }
0x4207   :  { %v19850_v48 = vpop.eup %19849 }
0x4208   :  { %v5826_v2 = vadd.f32 1.0, %v19850_v48 }
0x420a   :  { %19851 = vrcp.f32 %v5826_v2 }
0x4214   :  { %v19852_v50 = vpop.eup %19851 }
0x4215   :  { %v5842_v33 = vmul.f32 %v19852_v50, %v5840_v17 }
0x4217   :  { %5844 = vrot.lane.b32.xlu1 %v5842_v33, %s20572_s6 }
0x4289   :  { %v5845_v46 = vpop.permute.xlu1 %5844 }
0x428a   :  { %v5847_v4 = vadd.f32 %v5845_v46, %v5836_v15 }
0x428c   :  { %19853 = vtanh.f32 %v5847_v4 }
0x428d   :  { %19855 = vpow2.f32 %v15978_v47 }
0x4296   :  { %v19854_v10 = vpop.eup %19853 }
0x4297   :  { %5851 = vrot.lane.b32.xlu0 %v19854_v10, %s20574_s24  ;;  %v19856_v63 = vpop.eup %19855 }
0x4298   :  { %v5833_v48 = vadd.f32 1.0, %v19856_v63 }
0x429a   :  { %19857 = vrcp.f32 %v5833_v48 }
0x429b   :  { %6020 = vrot.lane.b32.xlu0 %v6018_v8, %s20572_s6 }
0x42a4   :  { %v19858_v33 = vpop.eup %19857 }
0x42a5   :  { %v5849_v2 = vsub.f32 1.0, %v19858_v33  ;;  %v5855_v50 = vmul.f32 %v19858_v33, %v21739_v6 }
0x4309   :  { %v5852_v0 = vpop.permute.xlu0 %5851 }
0x430a   :  { %v5854_v4 = vmul.f32 %v5852_v0, %v5849_v2 }
0x430c   :  { %v5856_v17 = vadd.f32 %v5855_v50, %v5854_v4 }
0x430d   :  { %v6021_v48 = vpop.permute.xlu0 %6020 }
0x430e   :  { %5858 = vrot.lane.b32.xlu1 %v5856_v17, %s20574_s24 }
0x4380   :  { %v5859_v15 = vpop.permute.xlu1 %5858 }
0x4381   :  { %17626 = vmatmul.mubr.msk.f32.vlgmr.msra.gmra.mrb[66].mxu0 %vm342_vm4, %v5859_v15 }
0x4382   :  { %19107 = vmatpush3.bf16.msra.mxu0 %v21065_v25  ;;  %17647 = vmatprep.mubr.msk.f32.mxu0 %vm20569_vm2, %v23436_v31 }
0x4383   :  { %19108 = vmatprep.subr.bf16.mxu0 %v23437_v23 }
0x4386   :  { %19110 = vmatpush3.bf16.msra.mxu0 %v21071_v34 }
0x4387   :  { %19117 = vmatprep.subr.bf16.mxu0 %v23437_v23 }
0x4454   :  { %v5928_v38 = vpop.f32.mrb[66].mxu0 }
0x4455   :  { %v6002_v6 = vadd.f32 %v5998_v57, %v5928_v38  ;;  %v17627_v46 = vpop.f32.mrb[67].mxu0  ;;  %v6017_v2 = vadd.f32 %v5928_v38, %v21053_v18 }
0x4457   :  { %v6003_v10 = vadd.f32 %v6002_v6, %v21049_v1  ;;  %v6010_v57 = vadd.f32 %v6002_v6, %v21077_v37 }
0x4459   :  { %v15981_v8 = vmul.f32 -1.442695, %v6003_v10  ;;  %v15982_v17 = vmul.f32 -1.442695, %v6010_v57 }
0x445b   :  { %19859 = vpow2.f32 %v15981_v8 }
0x4465   :  { %v19860_v14 = vpop.eup %19859 }
0x4466   :  { %v6007_v47 = vadd.f32 1.0, %v19860_v14 }
0x4468   :  { %19861 = vrcp.f32 %v6007_v47 }
0x4472   :  { %v19862_v63 = vpop.eup %19861 }
0x4473   :  { %v6023_v33 = vmul.f32 %v19862_v63, %v6021_v48 }
0x4475   :  { %6025 = vrot.lane.b32.xlu1 %v6023_v33, %s20572_s6 }
0x44e7   :  { %v6026_v0 = vpop.permute.xlu1 %6025 }
0x44e8   :  { %v6028_v50 = vadd.f32 %v6026_v0, %v6017_v2 }
0x44ea   :  { %19863 = vtanh.f32 %v6028_v50  ;;  %v21864_v50 = vld [vmem:[#allocation18] ss:$0 sm:$0xff] }
0x44eb   :  { %19865 = vpow2.f32 %v15982_v17 }
0x44f4   :  { %v19864_v4 = vpop.eup %19863 }
0x44f5   :  { %6032 = vrot.lane.b32.xlu0 %v19864_v4, %s20574_s24  ;;  %v19866_v15 = vpop.eup %19865 }
0x44f6   :  { %v6014_v46 = vadd.f32 1.0, %v19866_v15 }
0x44f8   :  { %19867 = vrcp.f32 %v6014_v46 }
0x4502   :  { %v19868_v10 = vpop.eup %19867 }
0x4503   :  { %v6030_v8 = vsub.f32 1.0, %v19868_v10  ;;  %v6036_v47 = vmul.f32 %v19868_v10, %v21763_v35  ;;  %v21848_v35 = vld [vmem:[#allocation15] ss:$0 sm:$0xff]  ;;  %v21868_v10 = vld [vmem:[#allocation21] sm:$0xf] }
0x4567   :  { %v6033_v14 = vpop.permute.xlu0 %6032 }
0x4568   :  { %v6035_v63 = vmul.f32 %v6033_v14, %v6030_v8  ;;  %v15986_v8 = vld [vmem:[%s23427_s28 + $0x18] sm:$0xff] }
0x456a   :  { %v6037_v38 = vadd.f32 %v6036_v47, %v6035_v63 }
0x456c   :  { %6039 = vrot.lane.b32.xlu1 %v6037_v38, %s20574_s24 }
0x45de   :  { %v6040_v48 = vpop.permute.xlu1 %6039 }
0x45df   :  { %17648 = vmatmul.mubr.msk.f32.vlgmr.msra.gmra.mrb[68].mxu0 %vm342_vm4, %v6040_v48 }
0x45e0   :  { %19119 = vmatpush3.bf16.msra.mxu0 %v21101_v7  ;;  %17669 = vmatprep.mubr.msk.f32.mxu0 %vm20569_vm2, %v23436_v31 }
0x45e1   :  { %19120 = vmatprep.subr.bf16.mxu0 %v23437_v23 }
0x45e4   :  { %19122 = vmatpush3.bf16.msra.mxu0 %v21119_v20 }
0x45e5   :  { %17677 = vmatprep.subr.mxu0 %v23436_v31 }
0x46b2   :  { %v6109_v6 = vpop.f32.mrb[68].mxu0 }
0x46b3   :  { %v6110_v33 = vadd.f32 %v21848_v35, %v6109_v6  ;;  %v17649_v2 = vpop.f32.mrb[69].mxu0 }
0x46b5   :  { %v6113_v0 = vmax.f32 %v6110_v33, 0.0 }
0x46b7   :  { %17659 = vmatmul.mubr.msk.f32.vlgmr.msra.gmra.mrb[68].mxu1 %vm342_vm4, %v6113_v0 }
0x46b8   :  { %17673 = vmatpush3.msra.mxu1 %v21567_v5  ;;  %17674 = vmatprep.mubr.msk.f32.mxu1 %vm20569_vm2, %v23436_v31 }
0x46b9   :  { %19123 = vmatprep.subr.bf16.mxu1 %v23437_v23 }
0x46bb   :  { %17675 = vmatmul.mubr.msk.f32.vlgmr.msra.gmra.mrb[70].mxu1 %vm347_vm1, %v21709_v41 }
0x46bc   :  { %19125 = vmatpush3.bf16.msra.mxu1 %v20887_v9  ;;  %17690 = vmatprep.mubr.msk.f32.mxu1 %vm20569_vm2, %v23436_v31 }
0x46bd   :  { %19126 = vmatprep.subr.bf16.mxu1 %v23437_v23 }
0x46c0   :  { %19128 = vmatpush3.bf16.msra.mxu1 %v20899_v13 }
0x46c1   :  { %17704 = vmatprep.subr.mxu1 %v23436_v31 }
0x478a   :  { %v6183_v5 = vpop.f32.mrb[68].mxu1 }
0x478b   :  { %v6184_v4 = vadd.f32 %v21864_v50, %v6183_v5  ;;  %v17660_v57 = vpop.f32.mrb[69].mxu1 }
0x478d   :  { %v6187_v17 = vmax.f32 %v6184_v4, 0.0 }
0x478e   :  { %v6344_v15 = vpop.f32.mrb[70].mxu1 }
0x478f   :  { %17670 = vmatmul.mubr.msk.f32.vlgmr.msra.gmra.mrb[70].mxu0 %vm342_vm4, %v6187_v17  ;;  %v17676_v46 = vpop.f32.mrb[71].mxu1 }
0x4790   :  { %17678 = vmatpush3.msk.msra.mxu0 %vm432_vm3, %v21868_v10  ;;  %17679 = vmatprep.mubr.msk.f32.mxu0 %vm20569_vm2, %v23436_v31 }
0x4791   :  { %19129 = vmatprep.subr.bf16.mxu0 %v23437_v23 }
0x4793   :  { %17680 = vmatmul.mubr.msk.f32.vlgmr.msra.gmra.mrb[72].mxu0 %vm345_vm0, %v15986_v8 }
0x4794   :  { %19131 = vmatpush3.bf16.msra.mxu0 %v20913_v16  ;;  %17701 = vmatprep.mubr.msk.f32.mxu0 %vm20569_vm2, %v23436_v31 }
0x4795   :  { %19132 = vmatprep.subr.bf16.mxu0 %v23437_v23 }
0x4798   :  { %19134 = vmatpush3.bf16.msra.mxu0 %v20929_v27 }
0x4799   :  { %19135 = vmatprep.subr.bf16.mxu0 %v23437_v23 }
0x4862   :  { %v21885_v14 = vpop.f32.mrb[70].mxu0 }
0x4863   :  { %23438 = vst [vmem:[#allocation44_spill] sm:$0xff] %v21885_v14  ;;  %v17671_v47 = vpop.f32.mrb[71].mxu0 }
0x4866   :  { %v6417_v63 = vpop.f32.mrb[72].mxu0 }
0x4867   :  { %v6418_v38 = vadd.f32 %v6417_v63, %v6344_v15  ;;  %v17681_v48 = vpop.f32.mrb[73].mxu0 }
0x4869   :  { %v6421_v6 = vadd.f32 %v21600_v61, %v6418_v38 }
0x486b   :  { %v6422_v33 = vmax.f32 %v6421_v6, 0.0 }
0x486d   :  { %17691 = vmatmul.mubr.msk.f32.vlgmr.msra.gmra.mrb[72].mxu1 %vm342_vm4, %v6422_v33 }
0x486e   :  { %17705 = vmatpush3.msra.mxu1 %v21776_v56  ;;  %17706 = vmatprep.mubr.msk.f32.mxu1 %vm20569_vm2, %v23436_v31 }
0x486f   :  { %19141 = vmatprep.subr.bf16.mxu1 %v23437_v23 }
0x4940   :  { %v6492_v2 = vpop.f32.mrb[72].mxu1 }
0x4941   :  { %v6493_v0 = vadd.f32 %v21611_v54, %v6492_v2  ;;  %v17692_v5 = vpop.f32.mrb[73].mxu1 }
0x4943   :  { %v6496_v4 = vmax.f32 %v6493_v0, 0.0 }
0x4945   :  { %17702 = vmatmul.mubr.msk.f32.vlgmr.msra.gmra.mrb[74].mxu0 %vm342_vm4, %v6496_v4 }
0x4946   :  { %19137 = vmatpush3.bf16.msra.mxu0 %v21005_v30  ;;  %17717 = vmatprep.mubr.msk.f32.mxu0 %vm20569_vm2, %v23436_v31 }
0x4947   :  { %19138 = vmatprep.subr.bf16.mxu0 %v23437_v23 }
0x494a   :  { %19140 = vmatpush3.bf16.msra.mxu0 %v21009_v32 }
0x494b   :  { %19147 = vmatprep.subr.bf16.mxu0 %v23437_v23 }
0x4a18   :  { %v6566_v61 = vpop.f32.mrb[74].mxu0 }
0x4a19   :  { %v6567_v57 = vadd.f32 %v21624_v12, %v6566_v61  ;;  %v17703_v17 = vpop.f32.mrb[75].mxu0 }
0x4a1b   :  { %v21903_v54 = vsel %vm345_vm0, %v6567_v57, %v15986_v8 }
0x4a1c   :  { %23439 = vst [vmem:[#allocation45_spill] sm:$0xff] %v21903_v54  ;;  %17707 = vmatmul.mubr.msk.f32.vlgmr.msra.gmra.mrb[74].mxu1 %vm347_vm1, %v21903_v54 }
0x4a1d   :  { %19143 = vmatpush3.bf16.msra.mxu1 %v21065_v25  ;;  %17728 = vmatprep.mubr.msk.f32.mxu1 %vm20569_vm2, %v23436_v31 }
0x4a1e   :  { %19144 = vmatprep.subr.bf16.mxu1 %v23437_v23 }
0x4a21   :  { %19146 = vmatpush3.bf16.msra.mxu1 %v21071_v34 }
0x4a22   :  { %19153 = vmatprep.subr.bf16.mxu1 %v23437_v23 }
0x4aef   :  { %v6640_v15 = vpop.f32.mrb[74].mxu1 }
0x4af0   :  { %v6644_v12 = vadd.f32 %v6640_v15, %v21717_v29  ;;  %v17708_v46 = vpop.f32.mrb[75].mxu1  ;;  %v6659_v33 = vadd.f32 %v6640_v15, %v20997_v11 }
0x4af2   :  { %v6645_v8 = vadd.f32 %v6644_v12, %v20993_v60  ;;  %v6652_v29 = vadd.f32 %v6644_v12, %v21020_v36 }
0x4af4   :  { %v15993_v47 = vmul.f32 -1.442695, %v6645_v8  ;;  %v15994_v4 = vmul.f32 -1.442695, %v6652_v29 }
0x4af6   :  { %19869 = vpow2.f32 %v15993_v47 }
0x4b00   :  { %v19870_v63 = vpop.eup %19869 }
0x4b01   :  { %v6649_v38 = vadd.f32 1.0, %v19870_v63 }
0x4b03   :  { %19871 = vrcp.f32 %v6649_v38 }
0x4b0d   :  { %v19872_v48 = vpop.eup %19871 }
0x4b0e   :  { %v6660_v6 = vmul.f32 %v19872_v48, %v21728_v45 }
0x4b10   :  { %6662 = vrot.lane.b32.xlu0 %v6660_v6, %s20572_s6 }
0x4b82   :  { %v6663_v2 = vpop.permute.xlu0 %6662 }
0x4b83   :  { %v6665_v0 = vadd.f32 %v6663_v2, %v6659_v33 }
0x4b85   :  { %19873 = vtanh.f32 %v6665_v0 }
0x4b86   :  { %19875 = vpow2.f32 %v15994_v4 }
0x4b8f   :  { %v19874_v5 = vpop.eup %19873 }
0x4b90   :  { %6669 = vrot.lane.b32.xlu1 %v19874_v5, %s20574_s24  ;;  %v19876_v61 = vpop.eup %19875 }
0x4b91   :  { %v6656_v57 = vadd.f32 1.0, %v19876_v61 }
0x4b93   :  { %19877 = vrcp.f32 %v6656_v57 }
0x4b9d   :  { %v19878_v17 = vpop.eup %19877 }
0x4b9e   :  { %v6667_v46 = vsub.f32 1.0, %v19878_v17  ;;  %v6673_v8 = vmul.f32 %v19878_v17, %v21646_v42 }
0x4c02   :  { %v6670_v45 = vpop.permute.xlu1 %6669 }
0x4c03   :  { %v6672_v47 = vmul.f32 %v6670_v45, %v6667_v46 }
0x4c05   :  { %v21921_v15 = vadd.f32 %v6673_v8, %v6672_v47 }
0x4c07   :  { %6676 = vrot.lane.b32.xlu0 %v21921_v15, %s20574_s24 }
0x4c79   :  { %v21925_v63 = vpop.permute.xlu0 %6676 }
0x4c7a   :  { %17718 = vmatmul.mubr.msk.f32.vlgmr.msra.gmra.mrb[76].mxu0 %vm342_vm4, %v21925_v63 }
0x4c7b   :  { %19149 = vmatpush3.bf16.msra.mxu0 %v21080_v49  ;;  %17739 = vmatprep.mubr.msk.f32.mxu0 %vm20569_vm2, %v23436_v31 }
0x4c7c   :  { %19150 = vmatprep.subr.bf16.mxu0 %v23437_v23 }
0x4c7f   :  { %19152 = vmatpush3.bf16.msra.mxu0 %v21091_v3 }
0x4c80   :  { %17753 = vmatprep.subr.mxu0 %v23436_v31 }
0x4d4d   :  { %v6746_v42 = vpop.f32.mrb[76].mxu0 }
0x4d4e   :  { %v6750_v12 = vadd.f32 %v6746_v42, %v21724_v26  ;;  %v17719_v38 = vpop.f32.mrb[77].mxu0  ;;  %v6765_v29 = vadd.f32 %v6746_v42, %v21053_v18 }
0x4d50   :  { %v6751_v48 = vadd.f32 %v6750_v12, %v21049_v1  ;;  %v6758_v26 = vadd.f32 %v6750_v12, %v21077_v37 }
0x4d52   :  { %v15996_v6 = vmul.f32 -1.442695, %v6751_v48  ;;  %v15997_v17 = vmul.f32 -1.442695, %v6758_v26 }
0x4d54   :  { %19879 = vpow2.f32 %v15996_v6 }
0x4d5e   :  { %v19880_v33 = vpop.eup %19879 }
0x4d5f   :  { %v6755_v2 = vadd.f32 1.0, %v19880_v33 }
0x4d61   :  { %19881 = vrcp.f32 %v6755_v2 }
0x4d6b   :  { %v19882_v0 = vpop.eup %19881 }
0x4d6c   :  { %v6766_v5 = vmul.f32 %v19882_v0, %v21755_v44 }
0x4d6e   :  { %6768 = vrot.lane.b32.xlu1 %v6766_v5, %s20572_s6 }
0x4de0   :  { %v6769_v4 = vpop.permute.xlu1 %6768 }
0x4de1   :  { %v6771_v61 = vadd.f32 %v6769_v4, %v6765_v29 }
0x4de3   :  { %19883 = vtanh.f32 %v6771_v61  ;;  %v21983_v61 = vld [vmem:[#allocation19] ss:$0 sm:$0xff] }
0x4de4   :  { %19885 = vpow2.f32 %v15997_v17 }
0x4ded   :  { %v19884_v57 = vpop.eup %19883 }
0x4dee   :  { %6775 = vrot.lane.b32.xlu0 %v19884_v57, %s20574_s24  ;;  %v19886_v46 = vpop.eup %19885 }
0x4def   :  { %v6762_v45 = vadd.f32 1.0, %v19886_v46 }
0x4df1   :  { %19887 = vrcp.f32 %v6762_v45 }
0x4dfb   :  { %v19888_v8 = vpop.eup %19887 }
0x4dfc   :  { %v6773_v47 = vsub.f32 1.0, %v19888_v8  ;;  %v6779_v38 = vmul.f32 %v19888_v8, %v21668_v19 }
0x4e60   :  { %v6776_v44 = vpop.permute.xlu0 %6775 }
0x4e61   :  { %v6778_v48 = vmul.f32 %v6776_v44, %v6773_v47 }
0x4e63   :  { %v21943_v42 = vadd.f32 %v6779_v38, %v6778_v48 }
0x4e65   :  { %6782 = vrot.lane.b32.xlu1 %v21943_v42, %s20574_s24 }
0x4ed7   :  { %v6783_v6 = vpop.permute.xlu1 %6782 }
0x4ed8   :  { %17729 = vmatmul.mubr.msk.f32.vlgmr.msra.gmra.mrb[76].mxu1 %vm342_vm4, %v6783_v6 }
0x4ed9   :  { %19155 = vmatpush3.bf16.msra.mxu1 %v21101_v7  ;;  %17750 = vmatprep.mubr.msk.f32.mxu1 %vm20569_vm2, %v23436_v31 }
0x4eda   :  { %19156 = vmatprep.subr.bf16.mxu1 %v23437_v23 }
0x4edd   :  { %19158 = vmatpush3.bf16.msra.mxu1 %v21119_v20 }
0x4ede   :  { %19159 = vmatprep.subr.bf16.mxu1 %v23437_v23 }
0x4fab   :  { %v6852_v19 = vpop.f32.mrb[76].mxu1 }
0x4fac   :  { %v6853_v12 = vadd.f32 %v21848_v35, %v6852_v19  ;;  %v17730_v33 = vpop.f32.mrb[77].mxu1 }
0x4fae   :  { %v6856_v2 = vmax.f32 %v6853_v12, 0.0 }
0x4fb0   :  { %17740 = vmatmul.mubr.msk.f32.vlgmr.msra.gmra.mrb[78].mxu0 %vm342_vm4, %v6856_v2 }
0x4fb1   :  { %17754 = vmatpush3.msra.mxu0 %v21776_v56  ;;  %17755 = vmatprep.mubr.msk.f32.mxu0 %vm20569_vm2, %v23436_v31 }
0x4fb2   :  { %19165 = vmatprep.subr.bf16.mxu0 %v23437_v23 }
0x5083   :  { %v6926_v0 = vpop.f32.mrb[78].mxu0 }
0x5084   :  { %v6927_v5 = vadd.f32 %v21864_v50, %v6926_v0  ;;  %v17741_v29 = vpop.f32.mrb[79].mxu0 }
0x5086   :  { %v6930_v4 = vmax.f32 %v6927_v5, 0.0 }
0x5088   :  { %17751 = vmatmul.mubr.msk.f32.vlgmr.msra.gmra.mrb[78].mxu1 %vm342_vm4, %v6930_v4 }
0x5089   :  { %19161 = vmatpush3.bf16.msra.mxu1 %v20945_v39  ;;  %17766 = vmatprep.mubr.msk.f32.mxu1 %vm20569_vm2, %v23436_v31 }
0x508a   :  { %19162 = vmatprep.subr.bf16.mxu1 %v23437_v23 }
0x508d   :  { %19164 = vmatpush3.bf16.msra.mxu1 %v20949_v43 }
0x508e   :  { %19171 = vmatprep.subr.bf16.mxu1 %v23437_v23 }
0x5090   :  { %17767 = vmatmul.mubr.msk.f32.vlgmr.msra.gmra.mrb[80].mxu1 %vm342_vm4, %v21925_v63 }
0x5091   :  { %19173 = vmatpush3.bf16.msra.mxu1 %v21000_v21  ;;  %17788 = vmatprep.mubr.msk.f32.mxu1 %vm20569_vm2, %v23436_v31 }
0x5092   :  { %19174 = vmatprep.subr.bf16.mxu1 %v23437_v23 }
0x5095   :  { %19176 = vmatpush3.bf16.msra.mxu1 %v21003_v28 }
0x5096   :  { %19183 = vmatprep.subr.bf16.mxu1 %v23437_v23 }
0x5098   :  { %17789 = vmatmul.mubr.msk.f32.vlgmr.msra.gmra.mrb[82].mxu1 %vm342_vm4, %v6783_v6 }
0x5099   :  { %19185 = vmatpush3.bf16.msra.mxu1 %v21080_v49  ;;  %17810 = vmatprep.mubr.msk.f32.mxu1 %vm20569_vm2, %v23436_v31 }
0x509a   :  { %19186 = vmatprep.subr.bf16.mxu1 %v23437_v23 }
0x509d   :  { %19188 = vmatpush3.bf16.msra.mxu1 %v21091_v3 }
0x509e   :  { %17824 = vmatprep.subr.mxu1 %v23436_v31 }
0x515b   :  { %v7000_v63 = vpop.f32.mrb[78].mxu1 }
0x515c   :  { %v21986_v57 = vadd.f32 %v21983_v61, %v7000_v63  ;;  %v17752_v26 = vpop.f32.mrb[79].mxu1 }
0x515e   :  { %23440 = vst [vmem:[#allocation46_spill] sm:$0xff] %v21986_v57  ;;  %17756 = vmatmul.mubr.msk.f32.vlgmr.msra.gmra.mrb[80].mxu0 %vm347_vm1, %v21986_v57 }
0x515f   :  { %19167 = vmatpush3.bf16.msra.mxu0 %v21005_v30  ;;  %17777 = vmatprep.mubr.msk.f32.mxu0 %vm20569_vm2, %v23436_v31 }
0x5160   :  { %19168 = vmatprep.subr.bf16.mxu0 %v23437_v23 }
0x5163   :  { %v21994_v17 = vpop.f32.mrb[80].mxu1  ;;  %19170 = vmatpush3.bf16.msra.mxu0 %v21009_v32 }
0x5164   :  { %v7163_v46 = vadd.f32 %v21994_v17, %v20981_v53  ;;  %v17768_v45 = vpop.f32.mrb[81].mxu1  ;;  %19177 = vmatprep.subr.bf16.mxu0 %v23437_v23 }
0x5166   :  { %7165 = vrot.lane.b32.xlu0 %v7163_v46, %s20572_s6 }
0x516b   :  { %v22001_v8 = vpop.f32.mrb[82].mxu1 }
0x516c   :  { %v17790_v47 = vpop.f32.mrb[83].mxu1  ;;  %v7344_v46 = vadd.f32 %v22001_v8, %v21037_v62 }
0x51d8   :  { %v22005_v0 = vpop.permute.xlu0 %7165 }
0x5231   :  { %v7073_v44 = vpop.f32.mrb[80].mxu0 }
0x5232   :  { %v7147_v38 = vadd.f32 %v21994_v17, %v7073_v44  ;;  %v17757_v48 = vpop.f32.mrb[81].mxu0  ;;  %v7162_v29 = vadd.f32 %v7073_v44, %v20997_v11 }
0x5234   :  { %v7148_v6 = vadd.f32 %v7147_v38, %v20993_v60  ;;  %v7155_v45 = vadd.f32 %v7147_v38, %v21020_v36 }
0x5236   :  { %v16003_v19 = vmul.f32 -1.442695, %v7148_v6  ;;  %v16004_v47 = vmul.f32 -1.442695, %v7155_v45 }
0x5238   :  { %19889 = vpow2.f32 %v16003_v19 }
0x5242   :  { %v19890_v12 = vpop.eup %19889 }
0x5243   :  { %v7152_v33 = vadd.f32 1.0, %v19890_v12 }
0x5245   :  { %19891 = vrcp.f32 %v7152_v33 }
0x524f   :  { %v19892_v2 = vpop.eup %19891 }
0x5250   :  { %v7168_v5 = vmul.f32 %v19892_v2, %v22005_v0 }
0x5252   :  { %7170 = vrot.lane.b32.xlu1 %v7168_v5, %s20572_s6 }
0x52c4   :  { %v7171_v4 = vpop.permute.xlu1 %7170 }
0x52c5   :  { %v7173_v63 = vadd.f32 %v7171_v4, %v7162_v29 }
0x52c7   :  { %19893 = vtanh.f32 %v7173_v63 }
0x52c8   :  { %19895 = vpow2.f32 %v16004_v47 }
0x52d1   :  { %v19894_v26 = vpop.eup %19893 }
0x52d2   :  { %7177 = vrot.lane.b32.xlu0 %v19894_v26, %s20574_s24  ;;  %v19896_v48 = vpop.eup %19895 }
0x52d3   :  { %v7159_v6 = vadd.f32 1.0, %v19896_v48 }
0x52d5   :  { %19897 = vrcp.f32 %v7159_v6 }
0x52d6   :  { %7346 = vrot.lane.b32.xlu0 %v7344_v46, %s20572_s6 }
0x52df   :  { %v19898_v19 = vpop.eup %19897 }
0x52e0   :  { %v7175_v44 = vsub.f32 1.0, %v19898_v19  ;;  %v7181_v33 = vmul.f32 %v19898_v19, %v21921_v15 }
0x5344   :  { %v7178_v12 = vpop.permute.xlu0 %7177 }
0x5345   :  { %v7180_v2 = vmul.f32 %v7178_v12, %v7175_v44 }
0x5347   :  { %v22016_v5 = vadd.f32 %v7181_v33, %v7180_v2 }
0x5348   :  { %v22032_v6 = vpop.permute.xlu0 %7346 }
0x5349   :  { %7184 = vrot.lane.b32.xlu1 %v22016_v5, %s20574_s24 }
0x53bb   :  { %v22020_v29 = vpop.permute.xlu1 %7184 }
0x53bc   :  { %17778 = vmatmul.mubr.msk.f32.vlgmr.msra.gmra.mrb[82].mxu0 %vm342_vm4, %v22020_v29 }
0x53bd   :  { %19179 = vmatpush3.bf16.msra.mxu0 %v21065_v25  ;;  %17799 = vmatprep.mubr.msk.f32.mxu0 %vm20569_vm2, %v23436_v31 }
0x53be   :  { %19180 = vmatprep.subr.bf16.mxu0 %v23437_v23 }
0x53c1   :  { %19182 = vmatpush3.bf16.msra.mxu0 %v21071_v34 }
0x53c2   :  { %19189 = vmatprep.subr.bf16.mxu0 %v23437_v23 }
0x548f   :  { %v7254_v38 = vpop.f32.mrb[82].mxu0 }
0x5490   :  { %v7328_v4 = vadd.f32 %v22001_v8, %v7254_v38  ;;  %v17779_v63 = vpop.f32.mrb[83].mxu0  ;;  %v7343_v44 = vadd.f32 %v7254_v38, %v21053_v18 }
0x5492   :  { %v7329_v26 = vadd.f32 %v7328_v4, %v21049_v1  ;;  %v7336_v63 = vadd.f32 %v7328_v4, %v21077_v37 }
0x5494   :  { %v16007_v46 = vmul.f32 -1.442695, %v7329_v26  ;;  %v16008_v26 = vmul.f32 -1.442695, %v7336_v63 }
0x5496   :  { %19899 = vpow2.f32 %v16007_v46 }
0x54a0   :  { %v19900_v45 = vpop.eup %19899 }
0x54a1   :  { %v7333_v47 = vadd.f32 1.0, %v19900_v45 }
0x54a3   :  { %19901 = vrcp.f32 %v7333_v47 }
0x54ad   :  { %v19902_v48 = vpop.eup %19901 }
0x54ae   :  { %v7349_v19 = vmul.f32 %v19902_v48, %v22032_v6 }
0x54b0   :  { %7351 = vrot.lane.b32.xlu1 %v7349_v19, %s20572_s6 }
0x5522   :  { %v7352_v12 = vpop.permute.xlu1 %7351 }
0x5523   :  { %v7354_v33 = vadd.f32 %v7352_v12, %v7343_v44 }
0x5525   :  { %19903 = vtanh.f32 %v7354_v33 }
0x5526   :  { %19905 = vpow2.f32 %v16008_v26 }
0x552f   :  { %v19904_v2 = vpop.eup %19903 }
0x5530   :  { %7358 = vrot.lane.b32.xlu0 %v19904_v2, %s20574_s24  ;;  %v19906_v46 = vpop.eup %19905 }
0x5531   :  { %v7340_v45 = vadd.f32 1.0, %v19906_v46 }
0x5533   :  { %19907 = vrcp.f32 %v7340_v45 }
0x553d   :  { %v19908_v47 = vpop.eup %19907 }
0x553e   :  { %v7356_v54 = vsub.f32 1.0, %v19908_v47  ;;  %v7362_v19 = vmul.f32 %v19908_v47, %v21943_v42 }
0x55a2   :  { %v7359_v48 = vpop.permute.xlu0 %7358 }
0x55a3   :  { %v7361_v58 = vmul.f32 %v7359_v48, %v7356_v54 }
0x55a5   :  { %v22040_v38 = vadd.f32 %v7362_v19, %v7361_v58 }
0x55a7   :  { %7365 = vrot.lane.b32.xlu1 %v22040_v38, %s20574_s24 }
0x5619   :  { %v7366_v44 = vpop.permute.xlu1 %7365 }
0x561a   :  { %17800 = vmatmul.mubr.msk.f32.vlgmr.msra.gmra.mrb[84].mxu0 %vm342_vm4, %v7366_v44 }
0x561b   :  { %19191 = vmatpush3.bf16.msra.mxu0 %v21101_v7  ;;  %17821 = vmatprep.mubr.msk.f32.mxu0 %vm20569_vm2, %v23436_v31 }
0x561c   :  { %19192 = vmatprep.subr.bf16.mxu0 %v23437_v23 }
0x561f   :  { %19194 = vmatpush3.bf16.msra.mxu0 %v21119_v20 }
0x5620   :  { %19195 = vmatprep.subr.bf16.mxu0 %v23437_v23 }
0x56ed   :  { %v7435_v54 = vpop.f32.mrb[84].mxu0 }
0x56ee   :  { %v7436_v58 = vadd.f32 %v21848_v35, %v7435_v54  ;;  %v17801_v4 = vpop.f32.mrb[85].mxu0 }
0x56f0   :  { %v7439_v12 = vmax.f32 %v7436_v58, 0.0 }
0x56f2   :  { %17811 = vmatmul.mubr.msk.f32.vlgmr.msra.gmra.mrb[84].mxu1 %vm342_vm4, %v7439_v12 }
0x56f3   :  { %17825 = vmatpush3.msra.mxu1 %v21776_v56  ;;  %17826 = vmatprep.mubr.msk.f32.mxu1 %vm20569_vm2, %v23436_v31 }
0x56f4   :  { %19201 = vmatprep.subr.bf16.mxu1 %v23437_v23 }
0x57c5   :  { %v7509_v33 = vpop.f32.mrb[84].mxu1 }
0x57c6   :  { %v7510_v2 = vadd.f32 %v21864_v50, %v7509_v33  ;;  %v17812_v63 = vpop.f32.mrb[85].mxu1 }
0x57c8   :  { %v7513_v26 = vmax.f32 %v7510_v2, 0.0 }
0x57ca   :  { %17822 = vmatmul.mubr.msk.f32.vlgmr.msra.gmra.mrb[86].mxu0 %vm342_vm4, %v7513_v26 }
0x57cb   :  { %19197 = vmatpush3.bf16.msra.mxu0 %v20945_v39  ;;  %17837 = vmatprep.mubr.msk.f32.mxu0 %vm20569_vm2, %v23436_v31 }
0x57cc   :  { %19198 = vmatprep.subr.bf16.mxu0 %v23437_v23 }
0x57cf   :  { %19200 = vmatpush3.bf16.msra.mxu0 %v20949_v43 }
0x57d0   :  { %19207 = vmatprep.subr.bf16.mxu0 %v23437_v23 }
0x57d2   :  { %17838 = vmatmul.mubr.msk.f32.vlgmr.msra.gmra.mrb[88].mxu0 %vm342_vm4, %v22020_v29 }
0x57d3   :  { %19209 = vmatpush3.bf16.msra.mxu0 %v21000_v21  ;;  %17859 = vmatprep.mubr.msk.f32.mxu0 %vm20569_vm2, %v23436_v31 }
0x57d4   :  { %19210 = vmatprep.subr.bf16.mxu0 %v23437_v23 }
0x57d7   :  { %19212 = vmatpush3.bf16.msra.mxu0 %v21003_v28 }
0x57d8   :  { %19219 = vmatprep.subr.bf16.mxu0 %v23437_v23 }
0x57da   :  { %17860 = vmatmul.mubr.msk.f32.vlgmr.msra.gmra.mrb[90].mxu0 %vm342_vm4, %v7366_v44 }
0x57db   :  { %19221 = vmatpush3.bf16.msra.mxu0 %v21080_v49  ;;  %17881 = vmatprep.mubr.msk.f32.mxu0 %vm20569_vm2, %v23436_v31 }
0x57dc   :  { %19222 = vmatprep.subr.bf16.mxu0 %v23437_v23 }
0x57df   :  { %19224 = vmatpush3.bf16.msra.mxu0 %v21091_v3 }
0x57e0   :  { %17895 = vmatprep.subr.mxu0 %v23436_v31 }
0x589d   :  { %v7583_v56 = vpop.f32.mrb[86].mxu0 }
0x589e   :  { %v22081_v29 = vadd.f32 %v21983_v61, %v7583_v56  ;;  %v17823_v46 = vpop.f32.mrb[87].mxu0 }
0x58a0   :  { %23441 = vst [vmem:[#allocation47_spill] sm:$0xff] %v22081_v29  ;;  %17827 = vmatmul.mubr.msk.f32.vlgmr.msra.gmra.mrb[86].mxu1 %vm347_vm1, %v22081_v29 }
0x58a1   :  { %19203 = vmatpush3.bf16.msra.mxu1 %v21005_v30  ;;  %17848 = vmatprep.mubr.msk.f32.mxu1 %vm20569_vm2, %v23436_v31 }
0x58a2   :  { %19204 = vmatprep.subr.bf16.mxu1 %v23437_v23 }
0x58a5   :  { %v7726_v45 = vpop.f32.mrb[88].mxu0  ;;  %19206 = vmatpush3.bf16.msra.mxu1 %v21009_v32 }
0x58a6   :  { %v7746_v47 = vadd.f32 %v7726_v45, %v20981_v53  ;;  %v17839_v48 = vpop.f32.mrb[89].mxu0  ;;  %19213 = vmatprep.subr.bf16.mxu1 %v23437_v23 }
0x58a8   :  { %7748 = vrot.lane.b32.xlu0 %v7746_v47, %s20572_s6 }
0x58ad   :  { %v7907_v19 = vpop.f32.mrb[90].mxu0 }
0x58ae   :  { %v17861_v44 = vpop.f32.mrb[91].mxu0 }
0x591a   :  { %v7749_v56 = vpop.permute.xlu0 %7748 }
0x5973   :  { %v7656_v54 = vpop.f32.mrb[86].mxu1 }
0x5974   :  { %v7730_v58 = vadd.f32 %v7726_v45, %v7656_v54  ;;  %v17828_v4 = vpop.f32.mrb[87].mxu1  ;;  %v7745_v48 = vadd.f32 %v7656_v54, %v20997_v11  ;;  %v7927_v45 = vadd.f32 %v7907_v19, %v21037_v62 }
0x5976   :  { %v7731_v12 = vadd.f32 %v7730_v58, %v20993_v60  ;;  %v7738_v4 = vadd.f32 %v7730_v58, %v21020_v36 }
0x5978   :  { %v16014_v33 = vmul.f32 -1.442695, %v7731_v12  ;;  %v16015_v12 = vmul.f32 -1.442695, %v7738_v4 }
0x597a   :  { %19909 = vpow2.f32 %v16014_v33 }
0x5984   :  { %v19910_v2 = vpop.eup %19909 }
0x5985   :  { %v7735_v63 = vadd.f32 1.0, %v19910_v2 }
0x5987   :  { %19911 = vrcp.f32 %v7735_v63 }
0x5991   :  { %v19912_v26 = vpop.eup %19911 }
0x5992   :  { %v7751_v46 = vmul.f32 %v19912_v26, %v7749_v56 }
0x5994   :  { %7753 = vrot.lane.b32.xlu1 %v7751_v46, %s20572_s6 }
0x5a06   :  { %v7754_v47 = vpop.permute.xlu1 %7753 }
0x5a07   :  { %v7756_v52 = vadd.f32 %v7754_v47, %v7745_v48 }
0x5a09   :  { %19913 = vtanh.f32 %v7756_v52 }
0x5a0a   :  { %19915 = vpow2.f32 %v16015_v12 }
0x5a13   :  { %v19914_v44 = vpop.eup %19913 }
0x5a14   :  { %7760 = vrot.lane.b32.xlu0 %v19914_v44, %s20574_s24  ;;  %v19916_v33 = vpop.eup %19915 }
0x5a15   :  { %v7742_v2 = vadd.f32 1.0, %v19916_v33 }
0x5a17   :  { %19917 = vrcp.f32 %v7742_v2 }
0x5a18   :  { %7929 = vrot.lane.b32.xlu0 %v7927_v45, %s20572_s6 }
0x5a21   :  { %v19918_v63 = vpop.eup %19917 }
0x5a22   :  { %v7758_v26 = vsub.f32 1.0, %v19918_v63  ;;  %v7764_v56 = vmul.f32 %v19918_v63, %v22016_v5 }
0x5a86   :  { %v7761_v54 = vpop.permute.xlu0 %7760 }
0x5a87   :  { %v7763_v52 = vmul.f32 %v7761_v54, %v7758_v26 }
0x5a89   :  { %v7765_v46 = vadd.f32 %v7764_v56, %v7763_v52 }
0x5a8a   :  { %v7930_v2 = vpop.permute.xlu0 %7929 }
0x5a8b   :  { %7767 = vrot.lane.b32.xlu1 %v7765_v46, %s20574_s24 }
0x5afd   :  { %v7768_v48 = vpop.permute.xlu1 %7767 }
0x5afe   :  { %17849 = vmatmul.mubr.msk.f32.vlgmr.msra.gmra.mrb[88].mxu1 %vm342_vm4, %v7768_v48 }
0x5aff   :  { %19215 = vmatpush3.bf16.msra.mxu1 %v21065_v25  ;;  %17870 = vmatprep.mubr.msk.f32.mxu1 %vm20569_vm2, %v23436_v31 }
0x5b00   :  { %19216 = vmatprep.subr.bf16.mxu1 %v23437_v23 }
0x5b03   :  { %19218 = vmatpush3.bf16.msra.mxu1 %v21071_v34 }
0x5b04   :  { %19225 = vmatprep.subr.bf16.mxu1 %v23437_v23 }
0x5bd1   :  { %v7837_v58 = vpop.f32.mrb[88].mxu1 }
0x5bd2   :  { %v7911_v5 = vadd.f32 %v7907_v19, %v7837_v58  ;;  %v17850_v47 = vpop.f32.mrb[89].mxu1  ;;  %v7926_v26 = vadd.f32 %v7837_v58, %v21053_v18 }
0x5bd4   :  { %v7912_v44 = vadd.f32 %v7911_v5, %v21049_v1  ;;  %v7919_v19 = vadd.f32 %v7911_v5, %v21077_v37 }
0x5bd6   :  { %v16018_v45 = vmul.f32 -1.442695, %v7912_v44  ;;  %v16019_v46 = vmul.f32 -1.442695, %v7919_v19 }
0x5bd8   :  { %19919 = vpow2.f32 %v16018_v45 }
0x5be2   :  { %v19920_v4 = vpop.eup %19919 }
0x5be3   :  { %v7916_v12 = vadd.f32 1.0, %v19920_v4 }
0x5be5   :  { %19921 = vrcp.f32 %v7916_v12 }
0x5bef   :  { %v19922_v33 = vpop.eup %19921 }
0x5bf0   :  { %v7932_v63 = vmul.f32 %v19922_v33, %v7930_v2 }
0x5bf2   :  { %7934 = vrot.lane.b32.xlu1 %v7932_v63, %s20572_s6 }
0x5c64   :  { %v7935_v54 = vpop.permute.xlu1 %7934 }
0x5c65   :  { %v7937_v56 = vadd.f32 %v7935_v54, %v7926_v26  ;;  %v22125_v54 = vld [vmem:[#allocation22] sm:$0xff] }
0x5c67   :  { %19923 = vtanh.f32 %v7937_v56 }
0x5c68   :  { %19925 = vpow2.f32 %v16019_v46 }
0x5c71   :  { %v19924_v52 = vpop.eup %19923 }
0x5c72   :  { %7941 = vrot.lane.b32.xlu0 %v19924_v52, %s20574_s24  ;;  %v19926_v48 = vpop.eup %19925 }
0x5c73   :  { %v7923_v47 = vadd.f32 1.0, %v19926_v48 }
0x5c75   :  { %19927 = vrcp.f32 %v7923_v47  ;;  %v16023_v47 = vld [vmem:[%s23427_s28 + $0x20] sm:$0xff] }
0x5c7f   :  { %v19928_v44 = vpop.eup %19927 }
0x5c80   :  { %v7939_v45 = vsub.f32 1.0, %v19928_v44  ;;  %v7945_v12 = vmul.f32 %v19928_v44, %v22040_v38 }
0x5ce4   :  { %v7942_v4 = vpop.permute.xlu0 %7941 }
0x5ce5   :  { %v7944_v33 = vmul.f32 %v7942_v4, %v7939_v45 }
0x5ce7   :  { %v7946_v58 = vadd.f32 %v7945_v12, %v7944_v33  ;;  %v22158_v12 = vld [vmem:[#allocation24] ss:$0 sm:$0xff] }
0x5ce9   :  { %7948 = vrot.lane.b32.xlu1 %v7946_v58, %s20574_s24 }
0x5d5b   :  { %v7949_v2 = vpop.permute.xlu1 %7948 }
0x5d5c   :  { %17871 = vmatmul.mubr.msk.f32.vlgmr.msra.gmra.mrb[90].mxu1 %vm342_vm4, %v7949_v2  ;;  %v22162_v2 = vld [vmem:[#allocation4] sm:$0xff] }
0x5d5d   :  { %19227 = vmatpush3.bf16.msra.mxu1 %v21101_v7  ;;  %17892 = vmatprep.mubr.msk.f32.mxu1 %vm20569_vm2, %v23436_v31 }
0x5d5e   :  { %19228 = vmatprep.subr.bf16.mxu1 %v23437_v23 }
0x5d61   :  { %19230 = vmatpush3.bf16.msra.mxu1 %v21119_v20 }
0x5d62   :  { %17900 = vmatprep.subr.mxu1 %v23436_v31 }
0x5e2f   :  { %v8018_v5 = vpop.f32.mrb[90].mxu1 }
0x5e30   :  { %v8019_v38 = vadd.f32 %v21848_v35, %v8018_v5  ;;  %v17872_v63 = vpop.f32.mrb[91].mxu1 }
0x5e32   :  { %v8022_v26 = vmax.f32 %v8019_v38, 0.0  ;;  %v22171_v38 = vld [vmem:[%s23382_s17] ss:$0 sm:$0xff] }
0x5e34   :  { %17882 = vmatmul.mubr.msk.f32.vlgmr.msra.gmra.mrb[92].mxu0 %vm342_vm4, %v8022_v26 }
0x5e35   :  { %17896 = vmatpush3.msra.mxu0 %v22125_v54  ;;  %17897 = vmatprep.mubr.msk.f32.mxu0 %vm20569_vm2, %v23436_v31 }
0x5e36   :  { %19231 = vmatprep.subr.bf16.mxu0 %v23437_v23 }
0x5e38   :  { %17898 = vmatmul.mubr.msk.f32.vlgmr.msra.gmra.mrb[94].mxu0 %vm347_vm1, %v21986_v57 }
0x5e39   :  { %19233 = vmatpush3.bf16.msra.mxu0 %v20887_v9  ;;  %17913 = vmatprep.mubr.msk.f32.mxu0 %vm20569_vm2, %v23436_v31 }
0x5e3a   :  { %19234 = vmatprep.subr.bf16.mxu0 %v23437_v23 }
0x5e3d   :  { %19236 = vmatpush3.bf16.msra.mxu0 %v20899_v13 }
0x5e3e   :  { %17927 = vmatprep.subr.mxu0 %v23436_v31 }
0x5f07   :  { %v8092_v35 = vpop.f32.mrb[92].mxu0 }
0x5f08   :  { %v8093_v56 = vadd.f32 %v21864_v50, %v8092_v35  ;;  %v17883_v52 = vpop.f32.mrb[93].mxu0 }
0x5f09   :  { %v22184_v52 = vld [vmem:[%s23384_s19] ss:$0 sm:$0xff] }
0x5f0a   :  { %v8096_v19 = vmax.f32 %v8093_v56, 0.0 }
0x5f0b   :  { %v8253_v46 = vpop.f32.mrb[94].mxu0 }
0x5f0c   :  { %17893 = vmatmul.mubr.msk.f32.vlgmr.msra.gmra.mrb[92].mxu1 %vm342_vm4, %v8096_v19  ;;  %v17899_v48 = vpop.f32.mrb[95].mxu0 }
0x5f0d   :  { %17901 = vmatpush3.msk.msra.mxu1 %vm432_vm3, %v21868_v10  ;;  %17902 = vmatprep.mubr.msk.f32.mxu1 %vm20569_vm2, %v23436_v31 }
0x5f0e   :  { %19237 = vmatprep.subr.bf16.mxu1 %v23437_v23 }
0x5f10   :  { %17903 = vmatmul.mubr.msk.f32.vlgmr.msra.gmra.mrb[94].mxu1 %vm345_vm0, %v16023_v47 }
0x5f11   :  { %19239 = vmatpush3.bf16.msra.mxu1 %v20913_v16  ;;  %17924 = vmatprep.mubr.msk.f32.mxu1 %vm20569_vm2, %v23436_v31 }
0x5f12   :  { %19240 = vmatprep.subr.bf16.mxu1 %v23437_v23 }
0x5f15   :  { %19242 = vmatpush3.bf16.msra.mxu1 %v20929_v27 }
0x5f16   :  { %19243 = vmatprep.subr.bf16.mxu1 %v23437_v23 }
0x5fdf   :  { %v22156_v50 = vpop.f32.mrb[92].mxu1 }
0x5fe0   :  { %23442 = vst [vmem:[#allocation48_spill] sm:$0xff] %v22156_v50  ;;  %v17894_v10 = vpop.f32.mrb[93].mxu1 }
0x5fe3   :  { %v8326_v44 = vpop.f32.mrb[94].mxu1 }
0x5fe4   :  { %v8327_v45 = vadd.f32 %v8326_v44, %v8253_v46  ;;  %v17904_v4 = vpop.f32.mrb[95].mxu1 }
0x5fe6   :  { %v8330_v33 = vadd.f32 %v22158_v12, %v8327_v45 }
0x5fe8   :  { %v8331_v58 = vmax.f32 %v8330_v33, 0.0 }
0x5fea   :  { %17914 = vmatmul.mubr.msk.f32.vlgmr.msra.gmra.mrb[96].mxu0 %vm342_vm4, %v8331_v58 }
0x5feb   :  { %17928 = vmatpush3.msra.mxu0 %v22162_v2  ;;  %17929 = vmatprep.mubr.msk.f32.mxu0 %vm20569_vm2, %v23436_v31 }
0x5fec   :  { %19249 = vmatprep.subr.bf16.mxu0 %v23437_v23 }
0x60bd   :  { %v8401_v5 = vpop.f32.mrb[96].mxu0 }
0x60be   :  { %v8402_v63 = vadd.f32 %v22171_v38, %v8401_v5  ;;  %v17915_v26 = vpop.f32.mrb[97].mxu0 }
0x60c0   :  { %v8405_v35 = vmax.f32 %v8402_v63, 0.0 }
0x60c2   :  { %17925 = vmatmul.mubr.msk.f32.vlgmr.msra.gmra.mrb[96].mxu1 %vm342_vm4, %v8405_v35 }
0x60c3   :  { %19245 = vmatpush3.bf16.msra.mxu1 %v21005_v30  ;;  %17940 = vmatprep.mubr.msk.f32.mxu1 %vm20569_vm2, %v23436_v31 }
0x60c4   :  { %19246 = vmatprep.subr.bf16.mxu1 %v23437_v23 }
0x60c7   :  { %19248 = vmatpush3.bf16.msra.mxu1 %v21009_v32 }
0x60c8   :  { %19255 = vmatprep.subr.bf16.mxu1 %v23437_v23 }
0x6195   :  { %v8475_v56 = vpop.f32.mrb[96].mxu1 }
0x6196   :  { %v8476_v19 = vadd.f32 %v22184_v52, %v8475_v56  ;;  %v17926_v46 = vpop.f32.mrb[97].mxu1 }
0x6198   :  { %v22188_v48 = vsel %vm345_vm0, %v8476_v19, %v16023_v47 }
0x6199   :  { %23443 = vst [vmem:[#allocation49_spill] sm:$0xff] %v22188_v48  ;;  %17930 = vmatmul.mubr.msk.f32.vlgmr.msra.gmra.mrb[98].mxu0 %vm347_vm1, %v22188_v48 }
0x619a   :  { %19251 = vmatpush3.bf16.msra.mxu0 %v21065_v25  ;;  %17951 = vmatprep.mubr.msk.f32.mxu0 %vm20569_vm2, %v23436_v31 }
0x619b   :  { %19252 = vmatprep.subr.bf16.mxu0 %v23437_v23 }
0x619e   :  { %19254 = vmatpush3.bf16.msra.mxu0 %v21071_v34 }
0x619f   :  { %19261 = vmatprep.subr.bf16.mxu0 %v23437_v23 }
0x626c   :  { %v8549_v10 = vpop.f32.mrb[98].mxu0 }
0x626d   :  { %v8553_v44 = vadd.f32 %v8549_v10, %v21994_v17  ;;  %v17931_v45 = vpop.f32.mrb[99].mxu0  ;;  %v8568_v26 = vadd.f32 %v8549_v10, %v20997_v11 }
0x626f   :  { %v8554_v47 = vadd.f32 %v8553_v44, %v20993_v60  ;;  %v8561_v17 = vadd.f32 %v8553_v44, %v21020_v36 }
0x6271   :  { %v16030_v4 = vmul.f32 -1.442695, %v8554_v47  ;;  %v16031_v46 = vmul.f32 -1.442695, %v8561_v17 }
0x6273   :  { %19929 = vpow2.f32 %v16030_v4 }
0x627d   :  { %v19930_v33 = vpop.eup %19929 }
0x627e   :  { %v8558_v58 = vadd.f32 1.0, %v19930_v33 }
0x6280   :  { %19931 = vrcp.f32 %v8558_v58 }
0x628a   :  { %v19932_v5 = vpop.eup %19931 }
0x628b   :  { %v8569_v63 = vmul.f32 %v19932_v5, %v22005_v0 }
0x628d   :  { %8571 = vrot.lane.b32.xlu0 %v8569_v63, %s20572_s6 }
0x62ff   :  { %v8572_v35 = vpop.permute.xlu0 %8571 }
0x6300   :  { %v8574_v56 = vadd.f32 %v8572_v35, %v8568_v26 }
0x6302   :  { %19933 = vtanh.f32 %v8574_v56 }
0x6303   :  { %19935 = vpow2.f32 %v16031_v46 }
0x630c   :  { %v19934_v19 = vpop.eup %19933 }
0x630d   :  { %8578 = vrot.lane.b32.xlu1 %v19934_v19, %s20574_s24  ;;  %v19936_v45 = vpop.eup %19935 }
0x630e   :  { %v8565_v47 = vadd.f32 1.0, %v19936_v45 }
0x6310   :  { %19937 = vrcp.f32 %v8565_v47 }
0x631a   :  { %v19938_v4 = vpop.eup %19937 }
0x631b   :  { %v8576_v33 = vsub.f32 1.0, %v19938_v4  ;;  %v8582_v58 = vmul.f32 %v19938_v4, %v21921_v15 }
0x637f   :  { %v8579_v0 = vpop.permute.xlu1 %8578 }
0x6380   :  { %v8581_v5 = vmul.f32 %v8579_v0, %v8576_v33 }
0x6382   :  { %v22206_v10 = vadd.f32 %v8582_v58, %v8581_v5 }
0x6384   :  { %8585 = vrot.lane.b32.xlu0 %v22206_v10, %s20574_s24 }
0x63f6   :  { %v22210_v63 = vpop.permute.xlu0 %8585 }
0x63f7   :  { %17941 = vmatmul.mubr.msk.f32.vlgmr.msra.gmra.mrb[98].mxu1 %vm342_vm4, %v22210_v63 }
0x63f8   :  { %19257 = vmatpush3.bf16.msra.mxu1 %v21080_v49  ;;  %17962 = vmatprep.mubr.msk.f32.mxu1 %vm20569_vm2, %v23436_v31 }
0x63f9   :  { %19258 = vmatprep.subr.bf16.mxu1 %v23437_v23 }
0x63fc   :  { %19260 = vmatpush3.bf16.msra.mxu1 %v21091_v3 }
0x63fd   :  { %17976 = vmatprep.subr.mxu1 %v23436_v31 }
0x64ca   :  { %v8655_v15 = vpop.f32.mrb[98].mxu1 }
0x64cb   :  { %v8659_v44 = vadd.f32 %v8655_v15, %v22001_v8  ;;  %v17942_v26 = vpop.f32.mrb[99].mxu1  ;;  %v8674_v47 = vadd.f32 %v8655_v15, %v21053_v18 }
0x64cd   :  { %v8660_v35 = vadd.f32 %v8659_v44, %v21049_v1  ;;  %v8667_v8 = vadd.f32 %v8659_v44, %v21077_v37  ;;  %v22239_v44 = vld [vmem:[#allocation15] ss:$0 sm:$0xff] }
0x64cf   :  { %v16033_v56 = vmul.f32 -1.442695, %v8660_v35  ;;  %v16034_v58 = vmul.f32 -1.442695, %v8667_v8 }
0x64d1   :  { %19939 = vpow2.f32 %v16033_v56 }
0x64db   :  { %v19940_v19 = vpop.eup %19939 }
0x64dc   :  { %v8664_v17 = vadd.f32 1.0, %v19940_v19 }
0x64de   :  { %19941 = vrcp.f32 %v8664_v17 }
0x64e8   :  { %v19942_v46 = vpop.eup %19941 }
0x64e9   :  { %v8675_v45 = vmul.f32 %v19942_v46, %v22032_v6 }
0x64eb   :  { %8677 = vrot.lane.b32.xlu1 %v8675_v45, %s20572_s6 }
0x655d   :  { %v8678_v4 = vpop.permute.xlu1 %8677 }
0x655e   :  { %v8680_v33 = vadd.f32 %v8678_v4, %v8674_v47 }
0x6560   :  { %19943 = vtanh.f32 %v8680_v33 }
0x6561   :  { %19945 = vpow2.f32 %v16034_v58 }
0x656a   :  { %v19944_v0 = vpop.eup %19943 }
0x656b   :  { %8684 = vrot.lane.b32.xlu0 %v19944_v0, %s20574_s24  ;;  %v19946_v5 = vpop.eup %19945  ;;  %v22247_v0 = vld [vmem:[#allocation18] ss:$0 sm:$0xff] }
0x656c   :  { %v8671_v26 = vadd.f32 1.0, %v19946_v5 }
0x656e   :  { %19947 = vrcp.f32 %v8671_v26 }
0x6578   :  { %v19948_v35 = vpop.eup %19947 }
0x6579   :  { %v8682_v56 = vsub.f32 1.0, %v19948_v35  ;;  %v8688_v19 = vmul.f32 %v19948_v35, %v21943_v42 }
0x65dd   :  { %v8685_v6 = vpop.permute.xlu0 %8684 }
0x65de   :  { %v8687_v17 = vmul.f32 %v8685_v6, %v8682_v56 }
0x65e0   :  { %v22228_v15 = vadd.f32 %v8688_v19, %v8687_v17 }
0x65e2   :  { %8691 = vrot.lane.b32.xlu1 %v22228_v15, %s20574_s24 }
0x6654   :  { %v8692_v46 = vpop.permute.xlu1 %8691 }
0x6655   :  { %17952 = vmatmul.mubr.msk.f32.vlgmr.msra.gmra.mrb[100].mxu0 %vm342_vm4, %v8692_v46 }
0x6656   :  { %19263 = vmatpush3.bf16.msra.mxu0 %v21101_v7  ;;  %17973 = vmatprep.mubr.msk.f32.mxu0 %vm20569_vm2, %v23436_v31 }
0x6657   :  { %19264 = vmatprep.subr.bf16.mxu0 %v23437_v23 }
0x665a   :  { %19266 = vmatpush3.bf16.msra.mxu0 %v21119_v20 }
0x665b   :  { %19267 = vmatprep.subr.bf16.mxu0 %v23437_v23 }
0x6728   :  { %v8761_v42 = vpop.f32.mrb[100].mxu0 }
0x6729   :  { %v8762_v45 = vadd.f32 %v22239_v44, %v8761_v42  ;;  %v17953_v47 = vpop.f32.mrb[101].mxu0 }
0x672b   :  { %v8765_v4 = vmax.f32 %v8762_v45, 0.0 }
0x672d   :  { %17963 = vmatmul.mubr.msk.f32.vlgmr.msra.gmra.mrb[100].mxu1 %vm342_vm4, %v8765_v4 }
0x672e   :  { %17977 = vmatpush3.msra.mxu1 %v22162_v2  ;;  %17978 = vmatprep.mubr.msk.f32.mxu1 %vm20569_vm2, %v23436_v31 }
0x672f   :  { %19273 = vmatprep.subr.bf16.mxu1 %v23437_v23 }
0x6800   :  { %v8835_v33 = vpop.f32.mrb[100].mxu1 }
0x6801   :  { %v8836_v8 = vadd.f32 %v22247_v0, %v8835_v33  ;;  %v17964_v58 = vpop.f32.mrb[101].mxu1 }
0x6803   :  { %v8839_v5 = vmax.f32 %v8836_v8, 0.0 }
0x6805   :  { %17974 = vmatmul.mubr.msk.f32.vlgmr.msra.gmra.mrb[102].mxu0 %vm342_vm4, %v8839_v5 }
0x6806   :  { %19269 = vmatpush3.bf16.msra.mxu0 %v20945_v39  ;;  %17989 = vmatprep.mubr.msk.f32.mxu0 %vm20569_vm2, %v23436_v31 }
0x6807   :  { %19270 = vmatprep.subr.bf16.mxu0 %v23437_v23 }
0x680a   :  { %19272 = vmatpush3.bf16.msra.mxu0 %v20949_v43 }
0x680b   :  { %19279 = vmatprep.subr.bf16.mxu0 %v23437_v23 }
0x680d   :  { %17990 = vmatmul.mubr.msk.f32.vlgmr.msra.gmra.mrb[104].mxu0 %vm342_vm4, %v22210_v63 }
0x680e   :  { %19281 = vmatpush3.bf16.msra.mxu0 %v21000_v21  ;;  %18011 = vmatprep.mubr.msk.f32.mxu0 %vm20569_vm2, %v23436_v31 }
0x680f   :  { %19282 = vmatprep.subr.bf16.mxu0 %v23437_v23 }
0x6812   :  { %19284 = vmatpush3.bf16.msra.mxu0 %v21003_v28 }
0x6813   :  { %19291 = vmatprep.subr.bf16.mxu0 %v23437_v23 }
0x6815   :  { %18012 = vmatmul.mubr.msk.f32.vlgmr.msra.gmra.mrb[106].mxu0 %vm342_vm4, %v8692_v46 }
0x6816   :  { %19293 = vmatpush3.bf16.msra.mxu0 %v21080_v49  ;;  %18033 = vmatprep.mubr.msk.f32.mxu0 %vm20569_vm2, %v23436_v31 }
0x6817   :  { %19294 = vmatprep.subr.bf16.mxu0 %v23437_v23 }
0x681a   :  { %19296 = vmatpush3.bf16.msra.mxu0 %v21091_v3 }
0x681b   :  { %18047 = vmatprep.subr.mxu0 %v23436_v31 }
0x68d8   :  { %v8909_v63 = vpop.f32.mrb[102].mxu0 }
0x68d9   :  { %v22273_v26 = vadd.f32 %v21983_v61, %v8909_v63  ;;  %v17975_v35 = vpop.f32.mrb[103].mxu0 }
0x68db   :  { %17979 = vmatmul.mubr.msk.f32.vlgmr.msra.gmra.mrb[102].mxu1 %vm347_vm1, %v22273_v26 }
0x68dc   :  { %19275 = vmatpush3.bf16.msra.mxu1 %v21005_v30  ;;  %18000 = vmatprep.mubr.msk.f32.mxu1 %vm20569_vm2, %v23436_v31 }
0x68dd   :  { %19276 = vmatprep.subr.bf16.mxu1 %v23437_v23 }
0x68e0   :  { %v22281_v56 = vpop.f32.mrb[104].mxu0  ;;  %19278 = vmatpush3.bf16.msra.mxu1 %v21009_v32 }
0x68e1   :  { %v9072_v6 = vadd.f32 %v22281_v56, %v20981_v53  ;;  %v17991_v61 = vpop.f32.mrb[105].mxu0  ;;  %19285 = vmatprep.subr.bf16.mxu1 %v23437_v23 }
0x68e3   :  { %9074 = vrot.lane.b32.xlu0 %v9072_v6, %s20572_s6 }
0x68e8   :  { %v22288_v19 = vpop.f32.mrb[106].mxu0 }
0x68e9   :  { %v18013_v17 = vpop.f32.mrb[107].mxu0 }
0x6955   :  { %v22292_v5 = vpop.permute.xlu0 %9074 }
0x69ae   :  { %v8982_v46 = vpop.f32.mrb[102].mxu1 }
0x69af   :  { %v9056_v42 = vadd.f32 %v22281_v56, %v8982_v46  ;;  %v17980_v45 = vpop.f32.mrb[103].mxu1  ;;  %v9071_v35 = vadd.f32 %v8982_v46, %v20997_v11 }
0x69b0   :  { %v9253_v45 = vadd.f32 %v22288_v19, %v21037_v62 }
0x69b1   :  { %v9057_v47 = vadd.f32 %v9056_v42, %v20993_v60 }
0x69b3   :  { %v16040_v4 = vmul.f32 -1.442695, %v9057_v47  ;;  %v9064_v47 = vadd.f32 %v9056_v42, %v21020_v36 }
0x69b5   :  { %19949 = vpow2.f32 %v16040_v4  ;;  %v16041_v4 = vmul.f32 -1.442695, %v9064_v47 }
0x69bf   :  { %v19950_v33 = vpop.eup %19949 }
0x69c0   :  { %v9061_v8 = vadd.f32 1.0, %v19950_v33 }
0x69c2   :  { %19951 = vrcp.f32 %v9061_v8 }
0x69cc   :  { %v19952_v58 = vpop.eup %19951 }
0x69cd   :  { %v9077_v63 = vmul.f32 %v19952_v58, %v22292_v5 }
0x69cf   :  { %9079 = vrot.lane.b32.xlu1 %v9077_v63, %s20572_s6 }
0x6a41   :  { %v9080_v6 = vpop.permute.xlu1 %9079 }
0x6a42   :  { %v9082_v61 = vadd.f32 %v9080_v6, %v9071_v35 }
0x6a44   :  { %19953 = vtanh.f32 %v9082_v61 }
0x6a45   :  { %19955 = vpow2.f32 %v16041_v4 }
0x6a4e   :  { %v19954_v17 = vpop.eup %19953 }
0x6a4f   :  { %9086 = vrot.lane.b32.xlu0 %v19954_v17, %s20574_s24  ;;  %v19956_v33 = vpop.eup %19955 }
0x6a50   :  { %v9068_v8 = vadd.f32 1.0, %v19956_v33 }
0x6a52   :  { %19957 = vrcp.f32 %v9068_v8 }
0x6a53   :  { %9255 = vrot.lane.b32.xlu0 %v9253_v45, %s20572_s6 }
0x6a5c   :  { %v19958_v58 = vpop.eup %19957 }
0x6a5d   :  { %v9084_v46 = vsub.f32 1.0, %v19958_v58  ;;  %v9090_v35 = vmul.f32 %v19958_v58, %v22206_v10 }
0x6ac1   :  { %v9087_v63 = vpop.permute.xlu0 %9086 }
0x6ac2   :  { %v9089_v6 = vmul.f32 %v9087_v63, %v9084_v46 }
0x6ac4   :  { %v22303_v61 = vadd.f32 %v9090_v35, %v9089_v6 }
0x6ac5   :  { %v22319_v63 = vpop.permute.xlu0 %9255 }
0x6ac6   :  { %9093 = vrot.lane.b32.xlu1 %v22303_v61, %s20574_s24 }
0x6b38   :  { %v22307_v17 = vpop.permute.xlu1 %9093 }
0x6b39   :  { %18001 = vmatmul.mubr.msk.f32.vlgmr.msra.gmra.mrb[104].mxu1 %vm342_vm4, %v22307_v17 }
0x6b3a   :  { %19287 = vmatpush3.bf16.msra.mxu1 %v21065_v25  ;;  %18022 = vmatprep.mubr.msk.f32.mxu1 %vm20569_vm2, %v23436_v31 }
0x6b3b   :  { %19288 = vmatprep.subr.bf16.mxu1 %v23437_v23 }
0x6b3e   :  { %19290 = vmatpush3.bf16.msra.mxu1 %v21071_v34 }
0x6b3f   :  { %19297 = vmatprep.subr.bf16.mxu1 %v23437_v23 }
0x6c0c   :  { %v9163_v42 = vpop.f32.mrb[104].mxu1 }
0x6c0d   :  { %v9237_v45 = vadd.f32 %v22288_v19, %v9163_v42  ;;  %v18002_v47 = vpop.f32.mrb[105].mxu1  ;;  %v9252_v6 = vadd.f32 %v9163_v42, %v21053_v18 }
0x6c0f   :  { %v9238_v4 = vadd.f32 %v9237_v45, %v21049_v1 }
0x6c11   :  { %v16044_v33 = vmul.f32 -1.442695, %v9238_v4  ;;  %v9245_v4 = vadd.f32 %v9237_v45, %v21077_v37 }
0x6c13   :  { %19959 = vpow2.f32 %v16044_v33  ;;  %v16045_v33 = vmul.f32 -1.442695, %v9245_v4 }
0x6c1d   :  { %v19960_v8 = vpop.eup %19959 }
0x6c1e   :  { %v9242_v58 = vadd.f32 1.0, %v19960_v8 }
0x6c20   :  { %19961 = vrcp.f32 %v9242_v58 }
0x6c2a   :  { %v19962_v46 = vpop.eup %19961 }
0x6c2b   :  { %v9258_v35 = vmul.f32 %v19962_v46, %v22319_v63 }
0x6c2d   :  { %9260 = vrot.lane.b32.xlu1 %v9258_v35, %s20572_s6 }
0x6c9f   :  { %v9261_v48 = vpop.permute.xlu1 %9260 }
0x6ca0   :  { %v9263_v50 = vadd.f32 %v9261_v48, %v9252_v6 }
0x6ca2   :  { %19963 = vtanh.f32 %v9263_v50 }
0x6ca3   :  { %19965 = vpow2.f32 %v16045_v33  ;;  %v22367_v33 = vld [vmem:[#allocation19] ss:$0 sm:$0xff] }
0x6cac   :  { %v19964_v47 = vpop.eup %19963 }
0x6cad   :  { %9267 = vrot.lane.b32.xlu0 %v19964_v47, %s20574_s24  ;;  %v19966_v8 = vpop.eup %19965 }
0x6cae   :  { %v9249_v58 = vadd.f32 1.0, %v19966_v8 }
0x6cb0   :  { %19967 = vrcp.f32 %v9249_v58 }
0x6cba   :  { %v19968_v29 = vpop.eup %19967 }
0x6cbb   :  { %v9265_v55 = vsub.f32 1.0, %v19968_v29  ;;  %v9271_v35 = vmul.f32 %v19968_v29, %v22228_v15 }
0x6d1f   :  { %v9268_v46 = vpop.permute.xlu0 %9267 }
0x6d20   :  { %v9270_v57 = vmul.f32 %v9268_v46, %v9265_v55 }
0x6d22   :  { %v22327_v42 = vadd.f32 %v9271_v35, %v9270_v57 }
0x6d24   :  { %9274 = vrot.lane.b32.xlu1 %v22327_v42, %s20574_s24 }
0x6d96   :  { %v9275_v50 = vpop.permute.xlu1 %9274 }
0x6d97   :  { %18023 = vmatmul.mubr.msk.f32.vlgmr.msra.gmra.mrb[106].mxu1 %vm342_vm4, %v9275_v50 }
0x6d98   :  { %19299 = vmatpush3.bf16.msra.mxu1 %v21101_v7  ;;  %18044 = vmatprep.mubr.msk.f32.mxu1 %vm20569_vm2, %v23436_v31 }
0x6d99   :  { %19300 = vmatprep.subr.bf16.mxu1 %v23437_v23 }
0x6d9c   :  { %19302 = vmatpush3.bf16.msra.mxu1 %v21119_v20 }
0x6d9d   :  { %19303 = vmatprep.subr.bf16.mxu1 %v23437_v23 }
0x6e6a   :  { %v9344_v55 = vpop.f32.mrb[106].mxu1 }
0x6e6b   :  { %v9345_v57 = vadd.f32 %v22239_v44, %v9344_v55  ;;  %v18024_v29 = vpop.f32.mrb[107].mxu1 }
0x6e6d   :  { %v9348_v48 = vmax.f32 %v9345_v57, 0.0 }
0x6e6f   :  { %18034 = vmatmul.mubr.msk.f32.vlgmr.msra.gmra.mrb[108].mxu0 %vm342_vm4, %v9348_v48 }
0x6e70   :  { %18048 = vmatpush3.msra.mxu0 %v22162_v2  ;;  %18049 = vmatprep.mubr.msk.f32.mxu0 %vm20569_vm2, %v23436_v31 }
0x6e71   :  { %19309 = vmatprep.subr.bf16.mxu0 %v23437_v23 }
0x6f42   :  { %v9418_v45 = vpop.f32.mrb[108].mxu0 }
0x6f43   :  { %v9419_v6 = vadd.f32 %v22247_v0, %v9418_v45  ;;  %v18035_v47 = vpop.f32.mrb[109].mxu0 }
0x6f45   :  { %v9422_v4 = vmax.f32 %v9419_v6, 0.0 }
0x6f47   :  { %18045 = vmatmul.mubr.msk.f32.vlgmr.msra.gmra.mrb[108].mxu1 %vm342_vm4, %v9422_v4 }
0x6f48   :  { %19305 = vmatpush3.bf16.msra.mxu1 %v20945_v39  ;;  %18060 = vmatprep.mubr.msk.f32.mxu1 %vm20569_vm2, %v23436_v31 }
0x6f49   :  { %19306 = vmatprep.subr.bf16.mxu1 %v23437_v23 }
0x6f4c   :  { %19308 = vmatpush3.bf16.msra.mxu1 %v20949_v43 }
0x6f4d   :  { %19315 = vmatprep.subr.bf16.mxu1 %v23437_v23 }
0x6f4f   :  { %18061 = vmatmul.mubr.msk.f32.vlgmr.msra.gmra.mrb[110].mxu1 %vm342_vm4, %v22307_v17 }
0x6f50   :  { %19317 = vmatpush3.bf16.msra.mxu1 %v21000_v21  ;;  %18082 = vmatprep.mubr.msk.f32.mxu1 %vm20569_vm2, %v23436_v31 }
0x6f51   :  { %19318 = vmatprep.subr.bf16.mxu1 %v23437_v23 }
0x6f54   :  { %19320 = vmatpush3.bf16.msra.mxu1 %v21003_v28 }
0x6f55   :  { %19327 = vmatprep.subr.bf16.mxu1 %v23437_v23 }
0x6f57   :  { %18083 = vmatmul.mubr.msk.f32.vlgmr.msra.gmra.mrb[112].mxu1 %vm342_vm4, %v9275_v50 }
0x6f58   :  { %19329 = vmatpush3.bf16.msra.mxu1 %v21080_v49  ;;  %18104 = vmatprep.mubr.msk.f32.mxu1 %vm20569_vm2, %v23436_v31 }
0x6f59   :  { %19330 = vmatprep.subr.bf16.mxu1 %v23437_v23 }
0x6f5c   :  { %19332 = vmatpush3.bf16.msra.mxu1 %v21091_v3 }
0x6f5d   :  { %18118 = vmatprep.subr.mxu1 %v23436_v31 }
0x701a   :  { %v9492_v17 = vpop.f32.mrb[108].mxu1 }
0x701b   :  { %v22370_v8 = vadd.f32 %v22367_v33, %v9492_v17  ;;  %v18046_v58 = vpop.f32.mrb[109].mxu1 }
0x701d   :  { %18050 = vmatmul.mubr.msk.f32.vlgmr.msra.gmra.mrb[110].mxu0 %vm347_vm1, %v22370_v8 }
0x701e   :  { %19311 = vmatpush3.bf16.msra.mxu0 %v21005_v30  ;;  %18071 = vmatprep.mubr.msk.f32.mxu0 %vm20569_vm2, %v23436_v31 }
0x701f   :  { %19312 = vmatprep.subr.bf16.mxu0 %v23437_v23 }
0x7022   :  { %v9635_v46 = vpop.f32.mrb[110].mxu1  ;;  %19314 = vmatpush3.bf16.msra.mxu0 %v21009_v32 }
0x7023   :  { %v9655_v35 = vadd.f32 %v9635_v46, %v20981_v53  ;;  %v18062_v50 = vpop.f32.mrb[111].mxu1  ;;  %19321 = vmatprep.subr.bf16.mxu0 %v23437_v23 }
0x7025   :  { %9657 = vrot.lane.b32.xlu0 %v9655_v35, %s20572_s6 }
0x702a   :  { %v9816_v55 = vpop.f32.mrb[112].mxu1 }
0x702b   :  { %v18084_v57 = vpop.f32.mrb[113].mxu1 }
0x7097   :  { %v9658_v22 = vpop.permute.xlu0 %9657 }
0x70f0   :  { %v9565_v29 = vpop.f32.mrb[110].mxu0 }
0x70f1   :  { %v9639_v48 = vadd.f32 %v9635_v46, %v9565_v29  ;;  %v18051_v45 = vpop.f32.mrb[111].mxu0  ;;  %v9654_v50 = vadd.f32 %v9565_v29, %v20997_v11  ;;  %v9836_v46 = vadd.f32 %v9816_v55, %v21037_v62 }
0x70f3   :  { %v9640_v6 = vadd.f32 %v9639_v48, %v20993_v60  ;;  %v9647_v45 = vadd.f32 %v9639_v48, %v21020_v36 }
0x70f5   :  { %v16051_v47 = vmul.f32 -1.442695, %v9640_v6  ;;  %v16052_v6 = vmul.f32 -1.442695, %v9647_v45 }
0x70f7   :  { %19969 = vpow2.f32 %v16051_v47 }
0x7101   :  { %v19970_v4 = vpop.eup %19969 }
0x7102   :  { %v9644_v17 = vadd.f32 1.0, %v19970_v4 }
0x7104   :  { %19971 = vrcp.f32 %v9644_v17 }
0x710e   :  { %v19972_v58 = vpop.eup %19971 }
0x710f   :  { %v9660_v14 = vmul.f32 %v19972_v58, %v9658_v22 }
0x7111   :  { %9662 = vrot.lane.b32.xlu1 %v9660_v14, %s20572_s6 }
0x7183   :  { %v9663_v35 = vpop.permute.xlu1 %9662 }
0x7184   :  { %v9665_v51 = vadd.f32 %v9663_v35, %v9654_v50 }
0x7186   :  { %19973 = vtanh.f32 %v9665_v51 }
0x7187   :  { %19975 = vpow2.f32 %v16052_v6 }
0x7190   :  { %v19974_v57 = vpop.eup %19973 }
0x7191   :  { %9669 = vrot.lane.b32.xlu0 %v19974_v57, %s20574_s24  ;;  %v19976_v47 = vpop.eup %19975 }
0x7192   :  { %v9651_v22 = vadd.f32 1.0, %v19976_v47 }
0x7194   :  { %19977 = vrcp.f32 %v9651_v22 }
0x7195   :  { %9838 = vrot.lane.b32.xlu0 %v9836_v46, %s20572_s6 }
0x719e   :  { %v19978_v14 = vpop.eup %19977 }
0x719f   :  { %v9667_v4 = vsub.f32 1.0, %v19978_v14  ;;  %v9673_v17 = vmul.f32 %v19978_v14, %v22303_v61 }
0x7203   :  { %v9670_v29 = vpop.permute.xlu0 %9669 }
0x7204   :  { %v9672_v51 = vmul.f32 %v9670_v29, %v9667_v4 }
0x7206   :  { %v9674_v58 = vadd.f32 %v9673_v17, %v9672_v51 }
0x7207   :  { %v9839_v22 = vpop.permute.xlu0 %9838 }
0x7208   :  { %9676 = vrot.lane.b32.xlu1 %v9674_v58, %s20574_s24 }
0x727a   :  { %v9677_v50 = vpop.permute.xlu1 %9676 }
0x727b   :  { %18072 = vmatmul.mubr.msk.f32.vlgmr.msra.gmra.mrb[112].mxu0 %vm342_vm4, %v9677_v50 }
0x727c   :  { %19323 = vmatpush3.bf16.msra.mxu0 %v21065_v25  ;;  %18093 = vmatprep.mubr.msk.f32.mxu0 %vm20569_vm2, %v23436_v31 }
0x727d   :  { %19324 = vmatprep.subr.bf16.mxu0 %v23437_v23 }
0x7280   :  { %19326 = vmatpush3.bf16.msra.mxu0 %v21071_v34 }
0x7281   :  { %19333 = vmatprep.subr.bf16.mxu0 %v23437_v23 }
0x734e   :  { %v9746_v48 = vpop.f32.mrb[112].mxu0 }
0x734f   :  { %v9820_v61 = vadd.f32 %v9816_v55, %v9746_v48  ;;  %v18073_v35 = vpop.f32.mrb[113].mxu0  ;;  %v9835_v4 = vadd.f32 %v9746_v48, %v21053_v18 }
0x7351   :  { %v9821_v57 = vadd.f32 %v9820_v61, %v21049_v1  ;;  %v9828_v55 = vadd.f32 %v9820_v61, %v21077_v37 }
0x7353   :  { %v16055_v46 = vmul.f32 -1.442695, %v9821_v57  ;;  %v16056_v58 = vmul.f32 -1.442695, %v9828_v55 }
0x7355   :  { %19979 = vpow2.f32 %v16055_v46 }
0x735f   :  { %v19980_v45 = vpop.eup %19979 }
0x7360   :  { %v9825_v6 = vadd.f32 1.0, %v19980_v45 }
0x7362   :  { %19981 = vrcp.f32 %v9825_v6 }
0x736c   :  { %v19982_v47 = vpop.eup %19981 }
0x736d   :  { %v9841_v14 = vmul.f32 %v19982_v47, %v9839_v22 }
0x736f   :  { %9843 = vrot.lane.b32.xlu1 %v9841_v14, %s20572_s6 }
0x73e1   :  { %v9844_v29 = vpop.permute.xlu1 %9843 }
0x73e2   :  { %v9846_v17 = vadd.f32 %v9844_v29, %v9835_v4 }
0x73e4   :  { %19983 = vtanh.f32 %v9846_v17 }
0x73e5   :  { %19985 = vpow2.f32 %v16056_v58 }
0x73ee   :  { %v19984_v51 = vpop.eup %19983 }
0x73ef   :  { %9850 = vrot.lane.b32.xlu0 %v19984_v51, %s20574_s24  ;;  %v19986_v50 = vpop.eup %19985 }
0x73f0   :  { %v9832_v35 = vadd.f32 1.0, %v19986_v50  ;;  %v22428_v50 = vld [vmem:[#allocation21] sm:$0xf] }
0x73f2   :  { %19987 = vrcp.f32 %v9832_v35  ;;  %v16060_v35 = vld [vmem:[%s23427_s28 + $0x28] sm:$0xff] }
0x73fc   :  { %v19988_v57 = vpop.eup %19987 }
0x73fd   :  { %v9848_v46 = vsub.f32 1.0, %v19988_v57  ;;  %v9854_v6 = vmul.f32 %v19988_v57, %v22327_v42 }
0x7461   :  { %v9851_v45 = vpop.permute.xlu0 %9850 }
0x7462   :  { %v9853_v47 = vmul.f32 %v9851_v45, %v9848_v46 }
0x7464   :  { %v9855_v48 = vadd.f32 %v9854_v6, %v9853_v47 }
0x7466   :  { %9857 = vrot.lane.b32.xlu1 %v9855_v48, %s20574_s24 }
0x74d8   :  { %v9858_v22 = vpop.permute.xlu1 %9857 }
0x74d9   :  { %18094 = vmatmul.mubr.msk.f32.vlgmr.msra.gmra.mrb[114].mxu0 %vm342_vm4, %v9858_v22 }
0x74da   :  { %19335 = vmatpush3.bf16.msra.mxu0 %v21101_v7  ;;  %18115 = vmatprep.mubr.msk.f32.mxu0 %vm20569_vm2, %v23436_v31 }
0x74db   :  { %19336 = vmatprep.subr.bf16.mxu0 %v23437_v23 }
0x74de   :  { %19338 = vmatpush3.bf16.msra.mxu0 %v21119_v20 }
0x74df   :  { %18123 = vmatprep.subr.mxu0 %v23436_v31 }
0x75ac   :  { %v9927_v61 = vpop.f32.mrb[114].mxu0 }
0x75ad   :  { %v9928_v42 = vadd.f32 %v22239_v44, %v9927_v61  ;;  %v18095_v14 = vpop.f32.mrb[115].mxu0 }
0x75af   :  { %v9931_v4 = vmax.f32 %v9928_v42, 0.0 }
0x75b1   :  { %18105 = vmatmul.mubr.msk.f32.vlgmr.msra.gmra.mrb[114].mxu1 %vm342_vm4, %v9931_v4 }
0x75b2   :  { %18119 = vmatpush3.msra.mxu1 %v22125_v54  ;;  %18120 = vmatprep.mubr.msk.f32.mxu1 %vm20569_vm2, %v23436_v31 }
0x75b3   :  { %19339 = vmatprep.subr.bf16.mxu1 %v23437_v23 }
0x75b5   :  { %18121 = vmatmul.mubr.msk.f32.vlgmr.msra.gmra.mrb[116].mxu1 %vm347_vm1, %v22273_v26 }
0x75b6   :  { %19341 = vmatpush3.bf16.msra.mxu1 %v20887_v9  ;;  %18136 = vmatprep.mubr.msk.f32.mxu1 %vm20569_vm2, %v23436_v31 }
0x75b7   :  { %19342 = vmatprep.subr.bf16.mxu1 %v23437_v23 }
0x75ba   :  { %19344 = vmatpush3.bf16.msra.mxu1 %v20899_v13 }
0x75bb   :  { %18150 = vmatprep.subr.mxu1 %v23436_v31 }
0x7684   :  { %v10001_v54 = vpop.f32.mrb[114].mxu1 }
0x7685   :  { %v10002_v29 = vadd.f32 %v22247_v0, %v10001_v54  ;;  %v18106_v17 = vpop.f32.mrb[115].mxu1 }
0x7687   :  { %v10005_v51 = vmax.f32 %v10002_v29, 0.0 }
0x7688   :  { %v10162_v55 = vpop.f32.mrb[116].mxu1 }
0x7689   :  { %18116 = vmatmul.mubr.msk.f32.vlgmr.msra.gmra.mrb[116].mxu0 %vm342_vm4, %v10005_v51  ;;  %v18122_v58 = vpop.f32.mrb[117].mxu1 }
0x768a   :  { %18124 = vmatpush3.msk.msra.mxu0 %vm432_vm3, %v22428_v50  ;;  %18125 = vmatprep.mubr.msk.f32.mxu0 %vm20569_vm2, %v23436_v31 }
0x768b   :  { %19345 = vmatprep.subr.bf16.mxu0 %v23437_v23 }
0x768d   :  { %18126 = vmatmul.mubr.msk.f32.vlgmr.msra.gmra.mrb[118].mxu0 %vm345_vm0, %v16060_v35 }
0x768e   :  { %19347 = vmatpush3.bf16.msra.mxu0 %v20913_v16  ;;  %18147 = vmatprep.mubr.msk.f32.mxu0 %vm20569_vm2, %v23436_v31 }
0x768f   :  { %19348 = vmatprep.subr.bf16.mxu0 %v23437_v23 }
0x7692   :  { %19350 = vmatpush3.bf16.msra.mxu0 %v20929_v27 }
0x7693   :  { %19351 = vmatprep.subr.bf16.mxu0 %v23437_v23 }
0x775c   :  { %v22445_v57 = vpop.f32.mrb[116].mxu0 }
0x775d   :  { %23444 = vst [vmem:[#allocation50_spill] sm:$0xff] %v22445_v57  ;;  %v18117_v46 = vpop.f32.mrb[117].mxu0 }
0x7760   :  { %v10235_v45 = vpop.f32.mrb[118].mxu0 }
0x7761   :  { %v10236_v6 = vadd.f32 %v10235_v45, %v10162_v55  ;;  %v18127_v47 = vpop.f32.mrb[119].mxu0 }
0x7763   :  { %v10239_v48 = vadd.f32 %v22158_v12, %v10236_v6 }
0x7765   :  { %v10240_v22 = vmax.f32 %v10239_v48, 0.0 }
0x7767   :  { %18137 = vmatmul.mubr.msk.f32.vlgmr.msra.gmra.mrb[118].mxu1 %vm342_vm4, %v10240_v22 }
0x7768   :  { %18151 = vmatpush3.msra.mxu1 %v22162_v2  ;;  %18152 = vmatprep.mubr.msk.f32.mxu1 %vm20569_vm2, %v23436_v31 }
0x7769   :  { %19357 = vmatprep.subr.bf16.mxu1 %v23437_v23 }
0x783a   :  { %v10310_v61 = vpop.f32.mrb[118].mxu1 }
0x783b   :  { %v10311_v42 = vadd.f32 %v22171_v38, %v10310_v61  ;;  %v18138_v14 = vpop.f32.mrb[119].mxu1 }
0x783d   :  { %v10314_v4 = vmax.f32 %v10311_v42, 0.0 }
0x783f   :  { %18148 = vmatmul.mubr.msk.f32.vlgmr.msra.gmra.mrb[120].mxu0 %vm342_vm4, %v10314_v4 }
0x7840   :  { %19353 = vmatpush3.bf16.msra.mxu0 %v21005_v30  ;;  %18163 = vmatprep.mubr.msk.f32.mxu0 %vm20569_vm2, %v23436_v31 }
0x7841   :  { %19354 = vmatprep.subr.bf16.mxu0 %v23437_v23 }
0x7844   :  { %19356 = vmatpush3.bf16.msra.mxu0 %v21009_v32 }
0x7845   :  { %19363 = vmatprep.subr.bf16.mxu0 %v23437_v23 }
0x7912   :  { %v10384_v12 = vpop.f32.mrb[120].mxu0 }
0x7913   :  { %v10385_v54 = vadd.f32 %v22184_v52, %v10384_v12  ;;  %v18149_v29 = vpop.f32.mrb[121].mxu0 }
0x7915   :  { %v22463_v38 = vsel %vm345_vm0, %v10385_v54, %v16060_v35 }
0x7916   :  { %23445 = vst [vmem:[#allocation51_spill] sm:$0xff] %v22463_v38  ;;  %18153 = vmatmul.mubr.msk.f32.vlgmr.msra.gmra.mrb[120].mxu1 %vm347_vm1, %v22463_v38 }
0x7917   :  { %19359 = vmatpush3.bf16.msra.mxu1 %v21065_v25  ;;  %18174 = vmatprep.mubr.msk.f32.mxu1 %vm20569_vm2, %v23436_v31 }
0x7918   :  { %19360 = vmatprep.subr.bf16.mxu1 %v23437_v23 }
0x791b   :  { %19362 = vmatpush3.bf16.msra.mxu1 %v21071_v34 }
0x791c   :  { %19369 = vmatprep.subr.bf16.mxu1 %v23437_v23 }
0x79e9   :  { %v10458_v17 = vpop.f32.mrb[120].mxu1 }
0x79ea   :  { %v10462_v52 = vadd.f32 %v10458_v17, %v22281_v56  ;;  %v18154_v51 = vpop.f32.mrb[121].mxu1  ;;  %v10477_v47 = vadd.f32 %v10458_v17, %v20997_v11 }
0x79ec   :  { %v10463_v55 = vadd.f32 %v10462_v52, %v20993_v60  ;;  %v10470_v56 = vadd.f32 %v10462_v52, %v21020_v36 }
0x79ee   :  { %v16067_v58 = vmul.f32 -1.442695, %v10463_v55  ;;  %v16068_v42 = vmul.f32 -1.442695, %v10470_v56 }
0x79f0   :  { %19989 = vpow2.f32 %v16067_v58 }
0x79fa   :  { %v19990_v35 = vpop.eup %19989 }
0x79fb   :  { %v10467_v46 = vadd.f32 1.0, %v19990_v35 }
0x79fd   :  { %19991 = vrcp.f32 %v10467_v46 }
0x7a07   :  { %v19992_v45 = vpop.eup %19991 }
0x7a08   :  { %v10478_v6 = vmul.f32 %v19992_v45, %v22292_v5 }
0x7a0a   :  { %10480 = vrot.lane.b32.xlu0 %v10478_v6, %s20572_s6 }
0x7a7c   :  { %v10481_v48 = vpop.permute.xlu0 %10480 }
0x7a7d   :  { %v10483_v22 = vadd.f32 %v10481_v48, %v10477_v47 }
0x7a7f   :  { %19993 = vtanh.f32 %v10483_v22 }
0x7a80   :  { %19995 = vpow2.f32 %v16068_v42 }
0x7a89   :  { %v19994_v61 = vpop.eup %19993 }
0x7a8a   :  { %10487 = vrot.lane.b32.xlu1 %v19994_v61, %s20574_s24  ;;  %v19996_v14 = vpop.eup %19995 }
0x7a8b   :  { %v10474_v4 = vadd.f32 1.0, %v19996_v14 }
0x7a8d   :  { %19997 = vrcp.f32 %v10474_v4 }
0x7a97   :  { %v19998_v12 = vpop.eup %19997 }
0x7a98   :  { %v10485_v54 = vsub.f32 1.0, %v19998_v12  ;;  %v10491_v29 = vmul.f32 %v19998_v12, %v22206_v10 }
0x7afc   :  { %v10488_v5 = vpop.permute.xlu1 %10487 }
0x7afd   :  { %v10490_v51 = vmul.f32 %v10488_v5, %v10485_v54 }
0x7aff   :  { %v22481_v17 = vadd.f32 %v10491_v29, %v10490_v51 }
0x7b01   :  { %10494 = vrot.lane.b32.xlu0 %v22481_v17, %s20574_s24 }
0x7b73   :  { %v22485_v55 = vpop.permute.xlu0 %10494 }
0x7b74   :  { %18164 = vmatmul.mubr.msk.f32.vlgmr.msra.gmra.mrb[122].mxu0 %vm342_vm4, %v22485_v55 }
0x7b75   :  { %19365 = vmatpush3.bf16.msra.mxu0 %v21080_v49  ;;  %18185 = vmatprep.mubr.msk.f32.mxu0 %vm20569_vm2, %v23436_v31 }
0x7b76   :  { %19366 = vmatprep.subr.bf16.mxu0 %v23437_v23 }
0x7b79   :  { %19368 = vmatpush3.bf16.msra.mxu0 %v21091_v3 }
0x7b7a   :  { %18199 = vmatprep.subr.mxu0 %v23436_v31 }
0x7c47   :  { %v10564_v10 = vpop.f32.mrb[122].mxu0 }
0x7c48   :  { %v10568_v52 = vadd.f32 %v10564_v10, %v22288_v19  ;;  %v18165_v58 = vpop.f32.mrb[123].mxu0  ;;  %v10583_v22 = vadd.f32 %v10564_v10, %v21053_v18 }
0x7c4a   :  { %v10569_v35 = vadd.f32 %v10568_v52, %v21049_v1  ;;  %v10576_v19 = vadd.f32 %v10568_v52, %v21077_v37 }
0x7c4c   :  { %v16070_v46 = vmul.f32 -1.442695, %v10569_v35  ;;  %v16071_v14 = vmul.f32 -1.442695, %v10576_v19 }
0x7c4e   :  { %19999 = vpow2.f32 %v16070_v46 }
0x7c58   :  { %v20000_v45 = vpop.eup %19999 }
0x7c59   :  { %v10573_v6 = vadd.f32 1.0, %v20000_v45 }
0x7c5b   :  { %20001 = vrcp.f32 %v10573_v6 }
0x7c65   :  { %v20002_v47 = vpop.eup %20001 }
0x7c66   :  { %v10584_v48 = vmul.f32 %v20002_v47, %v22319_v63 }
0x7c68   :  { %10586 = vrot.lane.b32.xlu1 %v10584_v48, %s20572_s6 }
0x7cda   :  { %v10587_v61 = vpop.permute.xlu1 %10586 }
0x7cdb   :  { %v10589_v56 = vadd.f32 %v10587_v61, %v10583_v22 }
0x7cdd   :  { %20003 = vtanh.f32 %v10589_v56 }
0x7cde   :  { %20005 = vpow2.f32 %v16071_v14 }
0x7ce7   :  { %v20004_v42 = vpop.eup %20003 }
0x7ce8   :  { %10593 = vrot.lane.b32.xlu0 %v20004_v42, %s20574_s24  ;;  %v20006_v4 = vpop.eup %20005 }
0x7ce9   :  { %v10580_v12 = vadd.f32 1.0, %v20006_v4 }
0x7ceb   :  { %20007 = vrcp.f32 %v10580_v12 }
0x7cf5   :  { %v20008_v54 = vpop.eup %20007 }
0x7cf6   :  { %v10591_v5 = vsub.f32 1.0, %v20008_v54  ;;  %v10597_v29 = vmul.f32 %v20008_v54, %v22228_v15 }
0x7d5a   :  { %v10594_v63 = vpop.permute.xlu0 %10593 }
0x7d5b   :  { %v10596_v51 = vmul.f32 %v10594_v63, %v10591_v5 }
0x7d5d   :  { %v22503_v10 = vadd.f32 %v10597_v29, %v10596_v51 }
0x7d5f   :  { %10600 = vrot.lane.b32.xlu1 %v22503_v10, %s20574_s24 }
0x7dd1   :  { %v10601_v58 = vpop.permute.xlu1 %10600 }
0x7dd2   :  { %18175 = vmatmul.mubr.msk.f32.vlgmr.msra.gmra.mrb[122].mxu1 %vm342_vm4, %v10601_v58 }
0x7dd3   :  { %19371 = vmatpush3.bf16.msra.mxu1 %v21101_v7  ;;  %18196 = vmatprep.mubr.msk.f32.mxu1 %vm20569_vm2, %v23436_v31 }
0x7dd4   :  { %19372 = vmatprep.subr.bf16.mxu1 %v23437_v23 }
0x7dd7   :  { %19374 = vmatpush3.bf16.msra.mxu1 %v21119_v20 }
0x7dd8   :  { %19375 = vmatprep.subr.bf16.mxu1 %v23437_v23 }
0x7ea5   :  { %v10670_v15 = vpop.f32.mrb[122].mxu1 }
0x7ea6   :  { %v10671_v52 = vadd.f32 %v22239_v44, %v10670_v15  ;;  %v18176_v35 = vpop.f32.mrb[123].mxu1 }
0x7ea8   :  { %v10674_v46 = vmax.f32 %v10671_v52, 0.0 }
0x7eaa   :  { %18186 = vmatmul.mubr.msk.f32.vlgmr.msra.gmra.mrb[124].mxu0 %vm342_vm4, %v10674_v46 }
0x7eab   :  { %18200 = vmatpush3.msra.mxu0 %v22162_v2  ;;  %18201 = vmatprep.mubr.msk.f32.mxu0 %vm20569_vm2, %v23436_v31 }
0x7eac   :  { %19381 = vmatprep.subr.bf16.mxu0 %v23437_v23 }
0x7f7d   :  { %v10744_v45 = vpop.f32.mrb[124].mxu0 }
0x7f7e   :  { %v10745_v6 = vadd.f32 %v22247_v0, %v10744_v45  ;;  %v18187_v47 = vpop.f32.mrb[125].mxu0 }
0x7f80   :  { %v10748_v48 = vmax.f32 %v10745_v6, 0.0 }
0x7f82   :  { %18197 = vmatmul.mubr.msk.f32.vlgmr.msra.gmra.mrb[124].mxu1 %vm342_vm4, %v10748_v48 }
0x7f83   :  { %19377 = vmatpush3.bf16.msra.mxu1 %v20945_v39  ;;  %18212 = vmatprep.mubr.msk.f32.mxu1 %vm20569_vm2, %v23436_v31 }
0x7f84   :  { %19378 = vmatprep.subr.bf16.mxu1 %v23437_v23 }
0x7f87   :  { %19380 = vmatpush3.bf16.msra.mxu1 %v20949_v43 }
0x7f88   :  { %19387 = vmatprep.subr.bf16.mxu1 %v23437_v23 }
0x7f8a   :  { %18213 = vmatmul.mubr.msk.f32.vlgmr.msra.gmra.mrb[126].mxu1 %vm342_vm4, %v22485_v55 }
0x7f8b   :  { %19389 = vmatpush3.bf16.msra.mxu1 %v21000_v21  ;;  %18234 = vmatprep.mubr.msk.f32.mxu1 %vm20569_vm2, %v23436_v31 }
0x7f8c   :  { %19390 = vmatprep.subr.bf16.mxu1 %v23437_v23 }
0x7f8f   :  { %19392 = vmatpush3.bf16.msra.mxu1 %v21003_v28 }
0x7f90   :  { %19399 = vmatprep.subr.bf16.mxu1 %v23437_v23 }
0x7f92   :  { %18235 = vmatmul.mubr.msk.f32.vlgmr.msra.gmra.mrb[128].mxu1 %vm342_vm4, %v10601_v58 }
0x7f93   :  { %19401 = vmatpush3.bf16.msra.mxu1 %v21080_v49  ;;  %18256 = vmatprep.mubr.msk.f32.mxu1 %vm20569_vm2, %v23436_v31 }
0x7f94   :  { %19402 = vmatprep.subr.bf16.mxu1 %v23437_v23 }
0x7f97   :  { %19404 = vmatpush3.bf16.msra.mxu1 %v21091_v3 }
0x7f98   :  { %18270 = vmatprep.subr.mxu1 %v23436_v31 }
0x8055   :  { %v10818_v2 = vpop.f32.mrb[124].mxu1 }
0x8056   :  { %v22544_v44 = vadd.f32 %v22367_v33, %v10818_v2  ;;  %v18198_v0 = vpop.f32.mrb[125].mxu1 }
0x8058   :  { %23446 = vst [vmem:[#allocation52_spill] sm:$0xff] %v22544_v44  ;;  %18202 = vmatmul.mubr.msk.f32.vlgmr.msra.gmra.mrb[126].mxu0 %vm347_vm1, %v22544_v44 }
0x8059   :  { %19383 = vmatpush3.bf16.msra.mxu0 %v21005_v30  ;;  %18223 = vmatprep.mubr.msk.f32.mxu0 %vm20569_vm2, %v23436_v31 }
0x805a   :  { %19384 = vmatprep.subr.bf16.mxu0 %v23437_v23 }
0x805d   :  { %v22552_v55 = vpop.f32.mrb[126].mxu1  ;;  %19386 = vmatpush3.bf16.msra.mxu0 %v21009_v32 }
0x805e   :  { %v10981_v22 = vadd.f32 %v22552_v55, %v20981_v53  ;;  %v18214_v61 = vpop.f32.mrb[127].mxu1  ;;  %19393 = vmatprep.subr.bf16.mxu0 %v23437_v23 }
0x8060   :  { %10983 = vrot.lane.b32.xlu0 %v10981_v22, %s20572_s6 }
0x8065   :  { %v22559_v56 = vpop.f32.mrb[128].mxu1 }
0x8066   :  { %v18236_v42 = vpop.f32.mrb[129].mxu1  ;;  %v11162_v45 = vadd.f32 %v22559_v56, %v21037_v62 }
0x80d2   :  { %v22563_v51 = vpop.permute.xlu0 %10983 }
0x812b   :  { %v10891_v19 = vpop.f32.mrb[126].mxu0 }
0x812c   :  { %v10965_v14 = vadd.f32 %v22552_v55, %v10891_v19  ;;  %v18203_v4 = vpop.f32.mrb[127].mxu0  ;;  %v10980_v15 = vadd.f32 %v10891_v19, %v20997_v11 }
0x812e   :  { %v10966_v12 = vadd.f32 %v10965_v14, %v20993_v60  ;;  %v10973_v6 = vadd.f32 %v10965_v14, %v21020_v36 }
0x8130   :  { %v16077_v54 = vmul.f32 -1.442695, %v10966_v12  ;;  %v16078_v47 = vmul.f32 -1.442695, %v10973_v6 }
0x8132   :  { %20009 = vpow2.f32 %v16077_v54 }
0x813c   :  { %v20010_v5 = vpop.eup %20009 }
0x813d   :  { %v10970_v63 = vadd.f32 1.0, %v20010_v5 }
0x813f   :  { %20011 = vrcp.f32 %v10970_v63 }
0x8149   :  { %v20012_v29 = vpop.eup %20011 }
0x814a   :  { %v10986_v58 = vmul.f32 %v20012_v29, %v22563_v51 }
0x814c   :  { %10988 = vrot.lane.b32.xlu1 %v10986_v58, %s20572_s6 }
0x81be   :  { %v10989_v52 = vpop.permute.xlu1 %10988 }
0x81bf   :  { %v10991_v35 = vadd.f32 %v10989_v52, %v10980_v15 }
0x81c1   :  { %20013 = vtanh.f32 %v10991_v35 }
0x81c2   :  { %20015 = vpow2.f32 %v16078_v47 }
0x81cb   :  { %v20014_v46 = vpop.eup %20013 }
0x81cc   :  { %10995 = vrot.lane.b32.xlu0 %v20014_v46, %s20574_s24  ;;  %v20016_v48 = vpop.eup %20015 }
0x81cd   :  { %v10977_v2 = vadd.f32 1.0, %v20016_v48 }
0x81cf   :  { %20017 = vrcp.f32 %v10977_v2 }
0x81d0   :  { %11164 = vrot.lane.b32.xlu0 %v11162_v45, %s20572_s6 }
0x81d9   :  { %v20018_v0 = vpop.eup %20017 }
0x81da   :  { %v10993_v22 = vsub.f32 1.0, %v20018_v0  ;;  %v10999_v42 = vmul.f32 %v20018_v0, %v22481_v17 }
0x823e   :  { %v10996_v61 = vpop.permute.xlu0 %10995 }
0x823f   :  { %v10998_v19 = vmul.f32 %v10996_v61, %v10993_v22 }
0x8241   :  { %v22574_v4 = vadd.f32 %v10999_v42, %v10998_v19 }
0x8242   :  { %v22590_v35 = vpop.permute.xlu0 %11164 }
0x8243   :  { %11002 = vrot.lane.b32.xlu1 %v22574_v4, %s20574_s24 }
0x82b5   :  { %v22578_v12 = vpop.permute.xlu1 %11002 }
0x82b6   :  { %18224 = vmatmul.mubr.msk.f32.vlgmr.msra.gmra.mrb[128].mxu0 %vm342_vm4, %v22578_v12 }
0x82b7   :  { %19395 = vmatpush3.bf16.msra.mxu0 %v21065_v25  ;;  %18245 = vmatprep.mubr.msk.f32.mxu0 %vm20569_vm2, %v23436_v31 }
0x82b8   :  { %19396 = vmatprep.subr.bf16.mxu0 %v23437_v23 }
0x82bb   :  { %19398 = vmatpush3.bf16.msra.mxu0 %v21071_v34 }
0x82bc   :  { %19405 = vmatprep.subr.bf16.mxu0 %v23437_v23 }
0x8389   :  { %v11072_v14 = vpop.f32.mrb[128].mxu0 }
0x838a   :  { %v11146_v54 = vadd.f32 %v22559_v56, %v11072_v14  ;;  %v18225_v5 = vpop.f32.mrb[129].mxu0  ;;  %v11161_v45 = vadd.f32 %v11072_v14, %v21053_v18 }
0x838c   :  { %v11147_v63 = vadd.f32 %v11146_v54, %v21049_v1  ;;  %v11154_v2 = vadd.f32 %v11146_v54, %v21077_v37 }
0x838e   :  { %v16081_v29 = vmul.f32 -1.442695, %v11147_v63  ;;  %v16082_v0 = vmul.f32 -1.442695, %v11154_v2 }
0x8390   :  { %20019 = vpow2.f32 %v16081_v29 }
0x839a   :  { %v20020_v58 = vpop.eup %20019 }
0x839b   :  { %v11151_v15 = vadd.f32 1.0, %v20020_v58 }
0x839d   :  { %20021 = vrcp.f32 %v11151_v15  ;;  %v22609_v15 = vld [vmem:[#allocation15] ss:$0 sm:$0xff] }
0x83a7   :  { %v20022_v52 = vpop.eup %20021 }
0x83a8   :  { %v11167_v46 = vmul.f32 %v20022_v52, %v22590_v35 }
0x83aa   :  { %11169 = vrot.lane.b32.xlu1 %v11167_v46, %s20572_s6 }
0x841c   :  { %v11170_v6 = vpop.permute.xlu1 %11169 }
0x841d   :  { %v11172_v47 = vadd.f32 %v11170_v6, %v11161_v45  ;;  %v22613_v6 = vld [vmem:[#allocation4] sm:$0xff] }
0x841f   :  { %20023 = vtanh.f32 %v11172_v47 }
0x8420   :  { %20025 = vpow2.f32 %v16082_v0 }
0x8429   :  { %v20024_v48 = vpop.eup %20023 }
0x842a   :  { %11176 = vrot.lane.b32.xlu0 %v20024_v48, %s20574_s24  ;;  %v20026_v22 = vpop.eup %20025  ;;  %v22619_v48 = vld [vmem:[#allocation18] ss:$0 sm:$0xff] }
0x842b   :  { %v11158_v61 = vadd.f32 1.0, %v20026_v22 }
0x842d   :  { %20027 = vrcp.f32 %v11158_v61 }
0x8437   :  { %v20028_v42 = vpop.eup %20027 }
0x8438   :  { %v11174_v19 = vsub.f32 1.0, %v20028_v42  ;;  %v11180_v63 = vmul.f32 %v20028_v42, %v22503_v10 }
0x849c   :  { %v11177_v5 = vpop.permute.xlu0 %11176 }
0x849d   :  { %v11179_v29 = vmul.f32 %v11177_v5, %v11174_v19 }
0x849f   :  { %v22598_v14 = vadd.f32 %v11180_v63, %v11179_v29 }
0x84a1   :  { %11183 = vrot.lane.b32.xlu1 %v22598_v14, %s20574_s24 }
0x8513   :  { %v11184_v58 = vpop.permute.xlu1 %11183 }
0x8514   :  { %18246 = vmatmul.mubr.msk.f32.vlgmr.msra.gmra.mrb[130].mxu0 %vm342_vm4, %v11184_v58 }
0x8515   :  { %19407 = vmatpush3.bf16.msra.mxu0 %v21101_v7  ;;  %18267 = vmatprep.mubr.msk.f32.mxu0 %vm20569_vm2, %v23436_v31 }
0x8516   :  { %19408 = vmatprep.subr.bf16.mxu0 %v23437_v23 }
0x8519   :  { %19410 = vmatpush3.bf16.msra.mxu0 %v21119_v20 }
0x851a   :  { %19411 = vmatprep.subr.bf16.mxu0 %v23437_v23 }
0x85e7   :  { %v11253_v54 = vpop.f32.mrb[130].mxu0 }
0x85e8   :  { %v11254_v52 = vadd.f32 %v22609_v15, %v11253_v54  ;;  %v18247_v46 = vpop.f32.mrb[131].mxu0 }
0x85ea   :  { %v11257_v45 = vmax.f32 %v11254_v52, 0.0 }
0x85ec   :  { %18257 = vmatmul.mubr.msk.f32.vlgmr.msra.gmra.mrb[130].mxu1 %vm342_vm4, %v11257_v45 }
0x85ed   :  { %18271 = vmatpush3.msra.mxu1 %v22613_v6  ;;  %18272 = vmatprep.mubr.msk.f32.mxu1 %vm20569_vm2, %v23436_v31 }
0x85ee   :  { %19417 = vmatprep.subr.bf16.mxu1 %v23437_v23 }
0x86bf   :  { %v11327_v47 = vpop.f32.mrb[130].mxu1 }
0x86c0   :  { %v11328_v2 = vadd.f32 %v22619_v48, %v11327_v47  ;;  %v18258_v0 = vpop.f32.mrb[131].mxu1 }
0x86c2   :  { %v11331_v22 = vmax.f32 %v11328_v2, 0.0 }
0x86c4   :  { %18268 = vmatmul.mubr.msk.f32.vlgmr.msra.gmra.mrb[132].mxu0 %vm342_vm4, %v11331_v22 }
0x86c5   :  { %19413 = vmatpush3.bf16.msra.mxu0 %v20945_v39  ;;  %18283 = vmatprep.mubr.msk.f32.mxu0 %vm20569_vm2, %v23436_v31 }
0x86c6   :  { %19414 = vmatprep.subr.bf16.mxu0 %v23437_v23 }
0x86c9   :  { %19416 = vmatpush3.bf16.msra.mxu0 %v20949_v43 }
0x86ca   :  { %19423 = vmatprep.subr.bf16.mxu0 %v23437_v23 }
0x86cc   :  { %18284 = vmatmul.mubr.msk.f32.vlgmr.msra.gmra.mrb[134].mxu0 %vm342_vm4, %v22578_v12 }
0x86cd   :  { %19425 = vmatpush3.bf16.msra.mxu0 %v21000_v21  ;;  %18305 = vmatprep.mubr.msk.f32.mxu0 %vm20569_vm2, %v23436_v31 }
0x86ce   :  { %19426 = vmatprep.subr.bf16.mxu0 %v23437_v23 }
0x86d1   :  { %19428 = vmatpush3.bf16.msra.mxu0 %v21003_v28 }
0x86d2   :  { %19435 = vmatprep.subr.bf16.mxu0 %v23437_v23 }
0x86d4   :  { %18306 = vmatmul.mubr.msk.f32.vlgmr.msra.gmra.mrb[136].mxu0 %vm342_vm4, %v11184_v58 }
0x86d5   :  { %19437 = vmatpush3.bf16.msra.mxu0 %v21080_v49  ;;  %18327 = vmatprep.mubr.msk.f32.mxu0 %vm20569_vm2, %v23436_v31 }
0x86d6   :  { %19438 = vmatprep.subr.bf16.mxu0 %v23437_v23 }
0x86d9   :  { %19440 = vmatpush3.bf16.msra.mxu0 %v21091_v3 }
0x86da   :  { %18341 = vmatprep.subr.mxu0 %v23436_v31 }
0x8797   :  { %v11401_v12 = vpop.f32.mrb[132].mxu0 }
0x8798   :  { %v22645_v61 = vadd.f32 %v22367_v33, %v11401_v12  ;;  %v18269_v42 = vpop.f32.mrb[133].mxu0 }
0x879a   :  { %23447 = vst [vmem:[#allocation53_spill] sm:$0xff] %v22645_v61  ;;  %18273 = vmatmul.mubr.msk.f32.vlgmr.msra.gmra.mrb[132].mxu1 %vm347_vm1, %v22645_v61 }
0x879b   :  { %19419 = vmatpush3.bf16.msra.mxu1 %v21005_v30  ;;  %18294 = vmatprep.mubr.msk.f32.mxu1 %vm20569_vm2, %v23436_v31 }
0x879c   :  { %19420 = vmatprep.subr.bf16.mxu1 %v23437_v23 }
0x879f   :  { %v11544_v19 = vpop.f32.mrb[134].mxu0  ;;  %19422 = vmatpush3.bf16.msra.mxu1 %v21009_v32 }
0x87a0   :  { %v11564_v5 = vadd.f32 %v11544_v19, %v20981_v53  ;;  %v18285_v63 = vpop.f32.mrb[135].mxu0  ;;  %19429 = vmatprep.subr.bf16.mxu1 %v23437_v23 }
0x87a2   :  { %11566 = vrot.lane.b32.xlu0 %v11564_v5, %s20572_s6 }
0x87a7   :  { %v11725_v33 = vpop.f32.mrb[136].mxu0 }
0x87a8   :  { %v18307_v29 = vpop.f32.mrb[137].mxu0 }
0x8814   :  { %v11567_v22 = vpop.permute.xlu0 %11566 }
0x886d   :  { %v11474_v58 = vpop.f32.mrb[132].mxu1 }
0x886e   :  { %v11548_v54 = vadd.f32 %v11544_v19, %v11474_v58  ;;  %v18274_v52 = vpop.f32.mrb[133].mxu1  ;;  %v11563_v42 = vadd.f32 %v11474_v58, %v20997_v11  ;;  %v11745_v19 = vadd.f32 %v11725_v33, %v21037_v62 }
0x8870   :  { %v11549_v46 = vadd.f32 %v11548_v54, %v20993_v60  ;;  %v11556_v52 = vadd.f32 %v11548_v54, %v21020_v36 }
0x8872   :  { %v16088_v45 = vmul.f32 -1.442695, %v11549_v46  ;;  %v16089_v46 = vmul.f32 -1.442695, %v11556_v52 }
0x8874   :  { %20029 = vpow2.f32 %v16088_v45 }
0x887e   :  { %v20030_v47 = vpop.eup %20029 }
0x887f   :  { %v11553_v2 = vadd.f32 1.0, %v20030_v47 }
0x8881   :  { %20031 = vrcp.f32 %v11553_v2 }
0x888b   :  { %v20032_v0 = vpop.eup %20031 }
0x888c   :  { %v11569_v12 = vmul.f32 %v20032_v0, %v11567_v22 }
0x888e   :  { %11571 = vrot.lane.b32.xlu1 %v11569_v12, %s20572_s6 }
0x8900   :  { %v11572_v5 = vpop.permute.xlu1 %11571 }
0x8901   :  { %v11574_v63 = vadd.f32 %v11572_v5, %v11563_v42 }
0x8903   :  { %20033 = vtanh.f32 %v11574_v63 }
0x8904   :  { %20035 = vpow2.f32 %v16089_v46 }
0x890d   :  { %v20034_v29 = vpop.eup %20033 }
0x890e   :  { %11578 = vrot.lane.b32.xlu0 %v20034_v29, %s20574_s24  ;;  %v20036_v45 = vpop.eup %20035 }
0x890f   :  { %v11560_v47 = vadd.f32 1.0, %v20036_v45 }
0x8911   :  { %20037 = vrcp.f32 %v11560_v47 }
0x8912   :  { %11747 = vrot.lane.b32.xlu0 %v11745_v19, %s20572_s6 }
0x891b   :  { %v20038_v2 = vpop.eup %20037 }
0x891c   :  { %v11576_v0 = vsub.f32 1.0, %v20038_v2  ;;  %v11582_v22 = vmul.f32 %v20038_v2, %v22574_v4 }
0x8980   :  { %v11579_v58 = vpop.permute.xlu0 %11578 }
0x8981   :  { %v11581_v12 = vmul.f32 %v11579_v58, %v11576_v0 }
0x8983   :  { %v11583_v42 = vadd.f32 %v11582_v22, %v11581_v12 }
0x8984   :  { %v11748_v47 = vpop.permute.xlu0 %11747 }
0x8985   :  { %11585 = vrot.lane.b32.xlu1 %v11583_v42, %s20574_s24 }
0x89f7   :  { %v11586_v5 = vpop.permute.xlu1 %11585 }
0x89f8   :  { %18295 = vmatmul.mubr.msk.f32.vlgmr.msra.gmra.mrb[134].mxu1 %vm342_vm4, %v11586_v5 }
0x89f9   :  { %19431 = vmatpush3.bf16.msra.mxu1 %v21065_v25  ;;  %18316 = vmatprep.mubr.msk.f32.mxu1 %vm20569_vm2, %v23436_v31 }
0x89fa   :  { %19432 = vmatprep.subr.bf16.mxu1 %v23437_v23 }
0x89fd   :  { %19434 = vmatpush3.bf16.msra.mxu1 %v21071_v34 }
0x89fe   :  { %19441 = vmatprep.subr.bf16.mxu1 %v23437_v23 }
0x8acb   :  { %v11655_v54 = vpop.f32.mrb[134].mxu1 }
0x8acc   :  { %v11729_v4 = vadd.f32 %v11725_v33, %v11655_v54  ;;  %v18296_v63 = vpop.f32.mrb[135].mxu1  ;;  %v11744_v0 = vadd.f32 %v11655_v54, %v21053_v18 }
0x8ace   :  { %v11730_v29 = vadd.f32 %v11729_v4, %v21049_v1  ;;  %v11737_v33 = vadd.f32 %v11729_v4, %v21077_v37 }
0x8ad0   :  { %v16092_v19 = vmul.f32 -1.442695, %v11730_v29  ;;  %v16093_v42 = vmul.f32 -1.442695, %v11737_v33 }
0x8ad2   :  { %20039 = vpow2.f32 %v16092_v19 }
0x8adc   :  { %v20040_v52 = vpop.eup %20039 }
0x8add   :  { %v11734_v46 = vadd.f32 1.0, %v20040_v52 }
0x8adf   :  { %20041 = vrcp.f32 %v11734_v46 }
0x8ae9   :  { %v20042_v45 = vpop.eup %20041 }
0x8aea   :  { %v11750_v2 = vmul.f32 %v20042_v45, %v11748_v47 }
0x8aec   :  { %11752 = vrot.lane.b32.xlu1 %v11750_v2, %s20572_s6 }
0x8b5e   :  { %v11753_v58 = vpop.permute.xlu1 %11752 }
0x8b5f   :  { %v11755_v22 = vadd.f32 %v11753_v58, %v11744_v0  ;;  %v22689_v58 = vld [vmem:[#allocation22] sm:$0xff] }
0x8b61   :  { %20043 = vtanh.f32 %v11755_v22 }
0x8b62   :  { %20045 = vpow2.f32 %v16093_v42 }
0x8b6b   :  { %v20044_v12 = vpop.eup %20043 }
0x8b6c   :  { %11759 = vrot.lane.b32.xlu0 %v20044_v12, %s20574_s24  ;;  %v20046_v5 = vpop.eup %20045 }
0x8b6d   :  { %v11741_v63 = vadd.f32 1.0, %v20046_v5 }
0x8b6f   :  { %20047 = vrcp.f32 %v11741_v63 }
0x8b79   :  { %v20048_v29 = vpop.eup %20047 }
0x8b7a   :  { %v11757_v19 = vsub.f32 1.0, %v20048_v29  ;;  %v11763_v46 = vmul.f32 %v20048_v29, %v22598_v14  ;;  %v16097_v29 = vld [vmem:[%s23427_s28 + $0x30] sm:$0xff] }
0x8bde   :  { %v11760_v52 = vpop.permute.xlu0 %11759 }
0x8bdf   :  { %v11762_v45 = vmul.f32 %v11760_v52, %v11757_v19 }
0x8be1   :  { %v11764_v54 = vadd.f32 %v11763_v46, %v11762_v45 }
0x8be3   :  { %11766 = vrot.lane.b32.xlu1 %v11764_v54, %s20574_s24  ;;  %v22722_v54 = vld [vmem:[#allocation24] ss:$0 sm:$0xff] }
0x8c55   :  { %v11767_v47 = vpop.permute.xlu1 %11766 }
0x8c56   :  { %18317 = vmatmul.mubr.msk.f32.vlgmr.msra.gmra.mrb[136].mxu1 %vm342_vm4, %v11767_v47 }
0x8c57   :  { %19443 = vmatpush3.bf16.msra.mxu1 %v21101_v7  ;;  %18338 = vmatprep.mubr.msk.f32.mxu1 %vm20569_vm2, %v23436_v31 }
0x8c58   :  { %19444 = vmatprep.subr.bf16.mxu1 %v23437_v23 }
0x8c5b   :  { %19446 = vmatpush3.bf16.msra.mxu1 %v21119_v20 }
0x8c5c   :  { %18346 = vmatprep.subr.mxu1 %v23436_v31 }
0x8d29   :  { %v11836_v4 = vpop.f32.mrb[136].mxu1 }
0x8d2a   :  { %v11837_v14 = vadd.f32 %v22609_v15, %v11836_v4  ;;  %v18318_v2 = vpop.f32.mrb[137].mxu1 }
0x8d2b   :  { %v22733_v2 = vld [vmem:[%s23382_s17] ss:$0 sm:$0xff] }
0x8d2c   :  { %v11840_v0 = vmax.f32 %v11837_v14, 0.0 }
0x8d2e   :  { %18328 = vmatmul.mubr.msk.f32.vlgmr.msra.gmra.mrb[138].mxu0 %vm342_vm4, %v11840_v0 }
0x8d2f   :  { %18342 = vmatpush3.msra.mxu0 %v22689_v58  ;;  %18343 = vmatprep.mubr.msk.f32.mxu0 %vm20569_vm2, %v23436_v31 }
0x8d30   :  { %19447 = vmatprep.subr.bf16.mxu0 %v23437_v23 }
0x8d32   :  { %18344 = vmatmul.mubr.msk.f32.vlgmr.msra.gmra.mrb[140].mxu0 %vm347_vm1, %v22544_v44 }
0x8d33   :  { %19449 = vmatpush3.bf16.msra.mxu0 %v20887_v9  ;;  %18359 = vmatprep.mubr.msk.f32.mxu0 %vm20569_vm2, %v23436_v31 }
0x8d34   :  { %19450 = vmatprep.subr.bf16.mxu0 %v23437_v23 }
0x8d37   :  { %19452 = vmatpush3.bf16.msra.mxu0 %v20899_v13 }
0x8d38   :  { %18373 = vmatprep.subr.mxu0 %v23436_v31 }
0x8e01   :  { %v11910_v22 = vpop.f32.mrb[138].mxu0 }
0x8e02   :  { %v11911_v12 = vadd.f32 %v22619_v48, %v11910_v22  ;;  %v18329_v33 = vpop.f32.mrb[139].mxu0 }
0x8e04   :  { %v11914_v42 = vmax.f32 %v11911_v12, 0.0 }
0x8e05   :  { %v12071_v5 = vpop.f32.mrb[140].mxu0 }
0x8e06   :  { %18339 = vmatmul.mubr.msk.f32.vlgmr.msra.gmra.mrb[138].mxu1 %vm342_vm4, %v11914_v42  ;;  %v18345_v63 = vpop.f32.mrb[141].mxu0  ;;  %v22746_v42 = vld [vmem:[%s23384_s19] ss:$0 sm:$0xff] }
0x8e07   :  { %18347 = vmatpush3.msk.msra.mxu1 %vm432_vm3, %v22428_v50  ;;  %18348 = vmatprep.mubr.msk.f32.mxu1 %vm20569_vm2, %v23436_v31 }
0x8e08   :  { %19453 = vmatprep.subr.bf16.mxu1 %v23437_v23 }
0x8e0a   :  { %18349 = vmatmul.mubr.msk.f32.vlgmr.msra.gmra.mrb[140].mxu1 %vm345_vm0, %v16097_v29 }
0x8e0b   :  { %19455 = vmatpush3.bf16.msra.mxu1 %v20913_v16  ;;  %18370 = vmatprep.mubr.msk.f32.mxu1 %vm20569_vm2, %v23436_v31 }
0x8e0c   :  { %19456 = vmatprep.subr.bf16.mxu1 %v23437_v23 }
0x8e0f   :  { %19458 = vmatpush3.bf16.msra.mxu1 %v20929_v27 }
0x8e10   :  { %19459 = vmatprep.subr.bf16.mxu1 %v23437_v23 }
0x8ed9   :  { %v22720_v50 = vpop.f32.mrb[138].mxu1 }
0x8eda   :  { %23448 = vst [vmem:[#allocation54_spill] sm:$0xff] %v22720_v50  ;;  %v18340_v19 = vpop.f32.mrb[139].mxu1 }
0x8edd   :  { %v12144_v52 = vpop.f32.mrb[140].mxu1 }
0x8ede   :  { %v12145_v46 = vadd.f32 %v12144_v52, %v12071_v5  ;;  %v18350_v45 = vpop.f32.mrb[141].mxu1 }
0x8ee0   :  { %v12148_v47 = vadd.f32 %v22722_v54, %v12145_v46 }
0x8ee2   :  { %v12149_v4 = vmax.f32 %v12148_v47, 0.0 }
0x8ee4   :  { %18360 = vmatmul.mubr.msk.f32.vlgmr.msra.gmra.mrb[142].mxu0 %vm342_vm4, %v12149_v4 }
0x8ee5   :  { %18374 = vmatpush3.msra.mxu0 %v22613_v6  ;;  %18375 = vmatprep.mubr.msk.f32.mxu0 %vm20569_vm2, %v23436_v31 }
0x8ee6   :  { %19465 = vmatprep.subr.bf16.mxu0 %v23437_v23 }
0x8fb7   :  { %v12219_v14 = vpop.f32.mrb[142].mxu0 }
0x8fb8   :  { %v12220_v0 = vadd.f32 %v22733_v2, %v12219_v14  ;;  %v18361_v22 = vpop.f32.mrb[143].mxu0 }
0x8fba   :  { %v12223_v12 = vmax.f32 %v12220_v0, 0.0 }
0x8fbc   :  { %18371 = vmatmul.mubr.msk.f32.vlgmr.msra.gmra.mrb[142].mxu1 %vm342_vm4, %v12223_v12 }
0x8fbd   :  { %19461 = vmatpush3.bf16.msra.mxu1 %v21005_v30  ;;  %18386 = vmatprep.mubr.msk.f32.mxu1 %vm20569_vm2, %v23436_v31 }
0x8fbe   :  { %19462 = vmatprep.subr.bf16.mxu1 %v23437_v23 }
0x8fc1   :  { %19464 = vmatpush3.bf16.msra.mxu1 %v21009_v32 }
0x8fc2   :  { %19471 = vmatprep.subr.bf16.mxu1 %v23437_v23 }
0x908f   :  { %v12293_v33 = vpop.f32.mrb[142].mxu1 }
0x9090   :  { %v12294_v5 = vadd.f32 %v22746_v42, %v12293_v33  ;;  %v18372_v63 = vpop.f32.mrb[143].mxu1 }
0x9092   :  { %v22750_v19 = vsel %vm345_vm0, %v12294_v5, %v16097_v29 }
0x9093   :  { %23449 = vst [vmem:[#allocation55_spill] sm:$0xff] %v22750_v19  ;;  %18376 = vmatmul.mubr.msk.f32.vlgmr.msra.gmra.mrb[144].mxu0 %vm347_vm1, %v22750_v19 }
0x9094   :  { %19467 = vmatpush3.bf16.msra.mxu0 %v21065_v25  ;;  %18397 = vmatprep.mubr.msk.f32.mxu0 %vm20569_vm2, %v23436_v31 }
0x9095   :  { %19468 = vmatprep.subr.bf16.mxu0 %v23437_v23 }
0x9098   :  { %19470 = vmatpush3.bf16.msra.mxu0 %v21071_v34 }
0x9099   :  { %19477 = vmatprep.subr.bf16.mxu0 %v23437_v23 }
0x9166   :  { %v12367_v52 = vpop.f32.mrb[144].mxu0 }
0x9167   :  { %v12371_v46 = vadd.f32 %v12367_v52, %v22552_v55  ;;  %v18377_v45 = vpop.f32.mrb[145].mxu0  ;;  %v12386_v12 = vadd.f32 %v12367_v52, %v20997_v11 }
0x9169   :  { %v12372_v29 = vadd.f32 %v12371_v46, %v20993_v60  ;;  %v12379_v55 = vadd.f32 %v12371_v46, %v21020_v36 }
0x916b   :  { %v16104_v47 = vmul.f32 -1.442695, %v12372_v29  ;;  %v16105_v45 = vmul.f32 -1.442695, %v12379_v55 }
0x916d   :  { %20049 = vpow2.f32 %v16104_v47 }
0x9177   :  { %v20050_v4 = vpop.eup %20049 }
0x9178   :  { %v12376_v14 = vadd.f32 1.0, %v20050_v4 }
0x917a   :  { %20051 = vrcp.f32 %v12376_v14 }
0x9184   :  { %v20052_v0 = vpop.eup %20051 }
0x9185   :  { %v12387_v22 = vmul.f32 %v20052_v0, %v22563_v51 }
0x9187   :  { %12389 = vrot.lane.b32.xlu0 %v12387_v22, %s20572_s6 }
0x91f9   :  { %v12390_v33 = vpop.permute.xlu0 %12389 }
0x91fa   :  { %v12392_v5 = vadd.f32 %v12390_v33, %v12386_v12 }
0x91fc   :  { %20053 = vtanh.f32 %v12392_v5 }
0x91fd   :  { %20055 = vpow2.f32 %v16105_v45 }
0x9206   :  { %v20054_v63 = vpop.eup %20053 }
0x9207   :  { %12396 = vrot.lane.b32.xlu1 %v20054_v63, %s20574_s24  ;;  %v20056_v29 = vpop.eup %20055 }
0x9208   :  { %v12383_v47 = vadd.f32 1.0, %v20056_v29 }
0x920a   :  { %20057 = vrcp.f32 %v12383_v47 }
0x9214   :  { %v20058_v4 = vpop.eup %20057 }
0x9215   :  { %v12394_v14 = vsub.f32 1.0, %v20058_v4  ;;  %v12400_v0 = vmul.f32 %v20058_v4, %v22481_v17 }
0x9279   :  { %v12397_v51 = vpop.permute.xlu1 %12396 }
0x927a   :  { %v12399_v22 = vmul.f32 %v12397_v51, %v12394_v14 }
0x927c   :  { %v22768_v52 = vadd.f32 %v12400_v0, %v12399_v22 }
0x927e   :  { %12403 = vrot.lane.b32.xlu0 %v22768_v52, %s20574_s24 }
0x92f0   :  { %v22772_v12 = vpop.permute.xlu0 %12403 }
0x92f1   :  { %18387 = vmatmul.mubr.msk.f32.vlgmr.msra.gmra.mrb[144].mxu1 %vm342_vm4, %v22772_v12 }
0x92f2   :  { %19473 = vmatpush3.bf16.msra.mxu1 %v21080_v49  ;;  %18408 = vmatprep.mubr.msk.f32.mxu1 %vm20569_vm2, %v23436_v31 }
0x92f3   :  { %19474 = vmatprep.subr.bf16.mxu1 %v23437_v23 }
0x92f6   :  { %19476 = vmatpush3.bf16.msra.mxu1 %v21091_v3 }
0x92f7   :  { %18422 = vmatprep.subr.mxu1 %v23436_v31 }
0x93c4   :  { %v12473_v17 = vpop.f32.mrb[144].mxu1 }
0x93c5   :  { %v12477_v46 = vadd.f32 %v12473_v17, %v22559_v56  ;;  %v18388_v33 = vpop.f32.mrb[145].mxu1  ;;  %v12492_v4 = vadd.f32 %v12473_v17, %v21053_v18 }
0x93c7   :  { %v12478_v5 = vadd.f32 %v12477_v46, %v21049_v1  ;;  %v12485_v56 = vadd.f32 %v12477_v46, %v21077_v37 }
0x93c9   :  { %v16107_v63 = vmul.f32 -1.442695, %v12478_v5  ;;  %v16108_v22 = vmul.f32 -1.442695, %v12485_v56 }
0x93cb   :  { %20059 = vpow2.f32 %v16107_v63 }
0x93d5   :  { %v20060_v55 = vpop.eup %20059 }
0x93d6   :  { %v12482_v45 = vadd.f32 1.0, %v20060_v55 }
0x93d8   :  { %20061 = vrcp.f32 %v12482_v45 }
0x93e2   :  { %v20062_v29 = vpop.eup %20061 }
0x93e3   :  { %v12493_v47 = vmul.f32 %v20062_v29, %v22590_v35 }
0x93e5   :  { %12495 = vrot.lane.b32.xlu1 %v12493_v47, %s20572_s6 }
0x9457   :  { %v12496_v14 = vpop.permute.xlu1 %12495 }
0x9458   :  { %v12498_v51 = vadd.f32 %v12496_v14, %v12492_v4 }
0x945a   :  { %20063 = vtanh.f32 %v12498_v51 }
0x945b   :  { %20065 = vpow2.f32 %v16108_v22 }
0x9464   :  { %v20064_v0 = vpop.eup %20063 }
0x9465   :  { %12502 = vrot.lane.b32.xlu0 %v20064_v0, %s20574_s24  ;;  %v20066_v33 = vpop.eup %20065 }
0x9466   :  { %v12489_v5 = vadd.f32 1.0, %v20066_v33  ;;  %v22830_v33 = vld [vmem:[#allocation19] ss:$0 sm:$0xff] }
0x9468   :  { %20067 = vrcp.f32 %v12489_v5 }
0x9472   :  { %v20068_v63 = vpop.eup %20067 }
0x9473   :  { %v12500_v55 = vsub.f32 1.0, %v20068_v63  ;;  %v12506_v45 = vmul.f32 %v20068_v63, %v22503_v10 }
0x94d7   :  { %v12503_v35 = vpop.permute.xlu0 %12502 }
0x94d8   :  { %v12505_v29 = vmul.f32 %v12503_v35, %v12500_v55 }
0x94da   :  { %v22790_v17 = vadd.f32 %v12506_v45, %v12505_v29 }
0x94dc   :  { %12509 = vrot.lane.b32.xlu1 %v22790_v17, %s20574_s24 }
0x954e   :  { %v12510_v47 = vpop.permute.xlu1 %12509 }
0x954f   :  { %18398 = vmatmul.mubr.msk.f32.vlgmr.msra.gmra.mrb[146].mxu0 %vm342_vm4, %v12510_v47 }
0x9550   :  { %19479 = vmatpush3.bf16.msra.mxu0 %v21101_v7  ;;  %18419 = vmatprep.mubr.msk.f32.mxu0 %vm20569_vm2, %v23436_v31 }
0x9551   :  { %19480 = vmatprep.subr.bf16.mxu0 %v23437_v23 }
0x9554   :  { %19482 = vmatpush3.bf16.msra.mxu0 %v21119_v20 }
0x9555   :  { %19483 = vmatprep.subr.bf16.mxu0 %v23437_v23 }
0x9622   :  { %v12579_v10 = vpop.f32.mrb[146].mxu0 }
0x9623   :  { %v12580_v46 = vadd.f32 %v22609_v15, %v12579_v10  ;;  %v18399_v4 = vpop.f32.mrb[147].mxu0 }
0x9625   :  { %v12583_v14 = vmax.f32 %v12580_v46, 0.0 }
0x9627   :  { %18409 = vmatmul.mubr.msk.f32.vlgmr.msra.gmra.mrb[146].mxu1 %vm342_vm4, %v12583_v14 }
0x9628   :  { %18423 = vmatpush3.msra.mxu1 %v22613_v6  ;;  %18424 = vmatprep.mubr.msk.f32.mxu1 %vm20569_vm2, %v23436_v31 }
0x9629   :  { %19489 = vmatprep.subr.bf16.mxu1 %v23437_v23 }
0x96fa   :  { %v12653_v51 = vpop.f32.mrb[146].mxu1 }
0x96fb   :  { %v12654_v0 = vadd.f32 %v22619_v48, %v12653_v51  ;;  %v18410_v56 = vpop.f32.mrb[147].mxu1 }
0x96fd   :  { %v12657_v22 = vmax.f32 %v12654_v0, 0.0 }
0x96ff   :  { %18420 = vmatmul.mubr.msk.f32.vlgmr.msra.gmra.mrb[148].mxu0 %vm342_vm4, %v12657_v22 }
0x9700   :  { %19485 = vmatpush3.bf16.msra.mxu0 %v20945_v39  ;;  %18435 = vmatprep.mubr.msk.f32.mxu0 %vm20569_vm2, %v23436_v31 }
0x9701   :  { %19486 = vmatprep.subr.bf16.mxu0 %v23437_v23 }
0x9704   :  { %19488 = vmatpush3.bf16.msra.mxu0 %v20949_v43 }
0x9705   :  { %19495 = vmatprep.subr.bf16.mxu0 %v23437_v23 }
0x9707   :  { %18436 = vmatmul.mubr.msk.f32.vlgmr.msra.gmra.mrb[150].mxu0 %vm342_vm4, %v22772_v12 }
0x9708   :  { %19497 = vmatpush3.bf16.msra.mxu0 %v21000_v21  ;;  %18457 = vmatprep.mubr.msk.f32.mxu0 %vm20569_vm2, %v23436_v31 }
0x9709   :  { %19498 = vmatprep.subr.bf16.mxu0 %v23437_v23 }
0x970c   :  { %19500 = vmatpush3.bf16.msra.mxu0 %v21003_v28 }
0x970d   :  { %19507 = vmatprep.subr.bf16.mxu0 %v23437_v23 }
0x970f   :  { %18458 = vmatmul.mubr.msk.f32.vlgmr.msra.gmra.mrb[152].mxu0 %vm342_vm4, %v12510_v47 }
0x9710   :  { %19509 = vmatpush3.bf16.msra.mxu0 %v21080_v49  ;;  %18479 = vmatprep.mubr.msk.f32.mxu0 %vm20569_vm2, %v23436_v31 }
0x9711   :  { %19510 = vmatprep.subr.bf16.mxu0 %v23437_v23 }
0x9714   :  { %19512 = vmatpush3.bf16.msra.mxu0 %v21091_v3 }
0x9715   :  { %18493 = vmatprep.subr.mxu0 %v23436_v31 }
0x97d2   :  { %v12727_v12 = vpop.f32.mrb[148].mxu0 }
0x97d3   :  { %v22833_v5 = vadd.f32 %v22830_v33, %v12727_v12  ;;  %v18421_v63 = vpop.f32.mrb[149].mxu0 }
0x97d5   :  { %18425 = vmatmul.mubr.msk.f32.vlgmr.msra.gmra.mrb[148].mxu1 %vm347_vm1, %v22833_v5 }
0x97d6   :  { %19491 = vmatpush3.bf16.msra.mxu1 %v21005_v30  ;;  %18446 = vmatprep.mubr.msk.f32.mxu1 %vm20569_vm2, %v23436_v31 }
0x97d7   :  { %19492 = vmatprep.subr.bf16.mxu1 %v23437_v23 }
0x97da   :  { %v22841_v55 = vpop.f32.mrb[150].mxu0  ;;  %19494 = vmatpush3.bf16.msra.mxu1 %v21009_v32 }
0x97db   :  { %v12890_v35 = vadd.f32 %v22841_v55, %v20981_v53  ;;  %v18437_v45 = vpop.f32.mrb[151].mxu0  ;;  %19501 = vmatprep.subr.bf16.mxu1 %v23437_v23 }
0x97dd   :  { %12892 = vrot.lane.b32.xlu0 %v12890_v35, %s20572_s6 }
0x97e2   :  { %v22848_v29 = vpop.f32.mrb[152].mxu0 }
0x97e3   :  { %v18459_v47 = vpop.f32.mrb[153].mxu0 }
0x984f   :  { %v22852_v12 = vpop.permute.xlu0 %12892 }
0x98a8   :  { %v12800_v10 = vpop.f32.mrb[148].mxu1 }
0x98a9   :  { %v12874_v46 = vadd.f32 %v22841_v55, %v12800_v10  ;;  %v18426_v4 = vpop.f32.mrb[149].mxu1  ;;  %v12889_v35 = vadd.f32 %v12800_v10, %v20997_v11 }
0x98ab   :  { %v12875_v14 = vadd.f32 %v12874_v46, %v20993_v60 }
0x98ad   :  { %v16114_v51 = vmul.f32 -1.442695, %v12875_v14  ;;  %v13071_v14 = vadd.f32 %v22848_v29, %v21037_v62 }
0x98af   :  { %20069 = vpow2.f32 %v16114_v51  ;;  %v12882_v51 = vadd.f32 %v12874_v46, %v21020_v36 }
0x98b9   :  { %v20070_v0 = vpop.eup %20069 }
0x98ba   :  { %v12879_v56 = vadd.f32 1.0, %v20070_v0  ;;  %v16115_v0 = vmul.f32 -1.442695, %v12882_v51 }
0x98bc   :  { %20071 = vrcp.f32 %v12879_v56 }
0x98c6   :  { %v20072_v22 = vpop.eup %20071 }
0x98c7   :  { %v12895_v63 = vmul.f32 %v20072_v22, %v22852_v12 }
0x98c9   :  { %12897 = vrot.lane.b32.xlu1 %v12895_v63, %s20572_s6 }
0x993b   :  { %v12898_v45 = vpop.permute.xlu1 %12897 }
0x993c   :  { %v12900_v47 = vadd.f32 %v12898_v45, %v12889_v35 }
0x993e   :  { %20073 = vtanh.f32 %v12900_v47 }
0x993f   :  { %20075 = vpow2.f32 %v16115_v0 }
0x9948   :  { %v20074_v4 = vpop.eup %20073 }
0x9949   :  { %12904 = vrot.lane.b32.xlu0 %v20074_v4, %s20574_s24  ;;  %v20076_v56 = vpop.eup %20075 }
0x994a   :  { %v12886_v22 = vadd.f32 1.0, %v20076_v56 }
0x994c   :  { %20077 = vrcp.f32 %v12886_v22 }
0x994d   :  { %13073 = vrot.lane.b32.xlu0 %v13071_v14, %s20572_s6 }
0x9956   :  { %v20078_v63 = vpop.eup %20077 }
0x9957   :  { %v12902_v10 = vsub.f32 1.0, %v20078_v63  ;;  %v12908_v35 = vmul.f32 %v20078_v63, %v22768_v52 }
0x99bb   :  { %v12905_v38 = vpop.permute.xlu0 %12904 }
0x99bc   :  { %v12907_v45 = vmul.f32 %v12905_v38, %v12902_v10 }
0x99be   :  { %v22863_v47 = vadd.f32 %v12908_v35, %v12907_v45 }
0x99bf   :  { %v22879_v10 = vpop.permute.xlu0 %13073 }
0x99c0   :  { %12911 = vrot.lane.b32.xlu1 %v22863_v47, %s20574_s24 }
0x9a32   :  { %v22867_v4 = vpop.permute.xlu1 %12911 }
0x9a33   :  { %18447 = vmatmul.mubr.msk.f32.vlgmr.msra.gmra.mrb[150].mxu1 %vm342_vm4, %v22867_v4 }
0x9a34   :  { %19503 = vmatpush3.bf16.msra.mxu1 %v21065_v25  ;;  %18468 = vmatprep.mubr.msk.f32.mxu1 %vm20569_vm2, %v23436_v31 }
0x9a35   :  { %19504 = vmatprep.subr.bf16.mxu1 %v23437_v23 }
0x9a38   :  { %19506 = vmatpush3.bf16.msra.mxu1 %v21071_v34 }
0x9a39   :  { %19513 = vmatprep.subr.bf16.mxu1 %v23437_v23 }
0x9b06   :  { %v12981_v38 = vpop.f32.mrb[150].mxu1 }
0x9b07   :  { %v13055_v46 = vadd.f32 %v22848_v29, %v12981_v38  ;;  %v18448_v14 = vpop.f32.mrb[151].mxu1  ;;  %v13070_v45 = vadd.f32 %v12981_v38, %v21053_v18 }
0x9b09   :  { %v13056_v51 = vadd.f32 %v13055_v46, %v21049_v1 }
0x9b0b   :  { %v16118_v0 = vmul.f32 -1.442695, %v13056_v51  ;;  %v13063_v51 = vadd.f32 %v13055_v46, %v21077_v37 }
0x9b0d   :  { %20079 = vpow2.f32 %v16118_v0  ;;  %v16119_v0 = vmul.f32 -1.442695, %v13063_v51 }
0x9b17   :  { %v20080_v56 = vpop.eup %20079 }
0x9b18   :  { %v13060_v22 = vadd.f32 1.0, %v20080_v56 }
0x9b1a   :  { %20081 = vrcp.f32 %v13060_v22 }
0x9b24   :  { %v20082_v63 = vpop.eup %20081 }
0x9b25   :  { %v13076_v35 = vmul.f32 %v20082_v63, %v22879_v10 }
0x9b27   :  { %13078 = vrot.lane.b32.xlu1 %v13076_v35, %s20572_s6 }
0x9b99   :  { %v13079_v19 = vpop.permute.xlu1 %13078 }
0x9b9a   :  { %v13081_v50 = vadd.f32 %v13079_v19, %v13070_v45 }
0x9b9c   :  { %20083 = vtanh.f32 %v13081_v50 }
0x9b9d   :  { %20085 = vpow2.f32 %v16119_v0 }
0x9ba6   :  { %v20084_v14 = vpop.eup %20083 }
0x9ba7   :  { %13085 = vrot.lane.b32.xlu0 %v20084_v14, %s20574_s24  ;;  %v20086_v56 = vpop.eup %20085 }
0x9ba8   :  { %v13067_v22 = vadd.f32 1.0, %v20086_v56 }
0x9baa   :  { %20087 = vrcp.f32 %v13067_v22 }
0x9bb4   :  { %v20088_v61 = vpop.eup %20087 }
0x9bb5   :  { %v13083_v44 = vsub.f32 1.0, %v20088_v61  ;;  %v13089_v35 = vmul.f32 %v20088_v61, %v22790_v17 }
0x9c19   :  { %v13086_v63 = vpop.permute.xlu0 %13085 }
0x9c1a   :  { %v13088_v57 = vmul.f32 %v13086_v63, %v13083_v44 }
0x9c1c   :  { %v22887_v38 = vadd.f32 %v13089_v35, %v13088_v57 }
0x9c1e   :  { %13092 = vrot.lane.b32.xlu1 %v22887_v38, %s20574_s24 }
0x9c90   :  { %v13093_v50 = vpop.permute.xlu1 %13092 }
0x9c91   :  { %18469 = vmatmul.mubr.msk.f32.vlgmr.msra.gmra.mrb[152].mxu1 %vm342_vm4, %v13093_v50 }
0x9c92   :  { %19515 = vmatpush3.bf16.msra.mxu1 %v21101_v7  ;;  %18490 = vmatprep.mubr.msk.f32.mxu1 %vm20569_vm2, %v23436_v31 }
0x9c93   :  { %19516 = vmatprep.subr.bf16.mxu1 %v23437_v23 }
0x9c96   :  { %19518 = vmatpush3.bf16.msra.mxu1 %v21119_v20 }
0x9c97   :  { %19519 = vmatprep.subr.bf16.mxu1 %v23437_v23 }
0x9d64   :  { %v13162_v44 = vpop.f32.mrb[152].mxu1 }
0x9d65   :  { %v13163_v57 = vadd.f32 %v22609_v15, %v13162_v44  ;;  %v18470_v61 = vpop.f32.mrb[153].mxu1 }
0x9d67   :  { %v13166_v19 = vmax.f32 %v13163_v57, 0.0 }
0x9d69   :  { %18480 = vmatmul.mubr.msk.f32.vlgmr.msra.gmra.mrb[154].mxu0 %vm342_vm4, %v13166_v19 }
0x9d6a   :  { %18494 = vmatpush3.msra.mxu0 %v22613_v6  ;;  %18495 = vmatprep.mubr.msk.f32.mxu0 %vm20569_vm2, %v23436_v31 }
0x9d6b   :  { %19525 = vmatprep.subr.bf16.mxu0 %v23437_v23 }
0x9e3c   :  { %v13236_v46 = vpop.f32.mrb[154].mxu0 }
0x9e3d   :  { %v13237_v45 = vadd.f32 %v22619_v48, %v13236_v46  ;;  %v18481_v14 = vpop.f32.mrb[155].mxu0 }
0x9e3f   :  { %v13240_v51 = vmax.f32 %v13237_v45, 0.0 }
0x9e41   :  { %18491 = vmatmul.mubr.msk.f32.vlgmr.msra.gmra.mrb[154].mxu1 %vm342_vm4, %v13240_v51 }
0x9e42   :  { %19521 = vmatpush3.bf16.msra.mxu1 %v20945_v39  ;;  %18506 = vmatprep.mubr.msk.f32.mxu1 %vm20569_vm2, %v23436_v31 }
0x9e43   :  { %19522 = vmatprep.subr.bf16.mxu1 %v23437_v23 }
0x9e46   :  { %19524 = vmatpush3.bf16.msra.mxu1 %v20949_v43 }
0x9e47   :  { %19531 = vmatprep.subr.bf16.mxu1 %v23437_v23 }
0x9e49   :  { %18507 = vmatmul.mubr.msk.f32.vlgmr.msra.gmra.mrb[156].mxu1 %vm342_vm4, %v22867_v4 }
0x9e4a   :  { %19533 = vmatpush3.bf16.msra.mxu1 %v21000_v21  ;;  %18528 = vmatprep.mubr.msk.f32.mxu1 %vm20569_vm2, %v23436_v31 }
0x9e4b   :  { %19534 = vmatprep.subr.bf16.mxu1 %v23437_v23 }
0x9e4e   :  { %19536 = vmatpush3.bf16.msra.mxu1 %v21003_v28 }
0x9e4f   :  { %19543 = vmatprep.subr.bf16.mxu1 %v23437_v23 }
0x9e51   :  { %18529 = vmatmul.mubr.msk.f32.vlgmr.msra.gmra.mrb[158].mxu1 %vm342_vm4, %v13093_v50 }
0x9e52   :  { %19545 = vmatpush3.bf16.msra.mxu1 %v21080_v49  ;;  %18550 = vmatprep.mubr.msk.f32.mxu1 %vm20569_vm2, %v23436_v31 }
0x9e53   :  { %19546 = vmatprep.subr.bf16.mxu1 %v23437_v23 }
0x9e56   :  { %19548 = vmatpush3.bf16.msra.mxu1 %v21091_v3 }
0x9e57   :  { %18564 = vmatprep.subr.mxu1 %v23436_v31 }
0x9f14   :  { %v13310_v15 = vpop.f32.mrb[154].mxu1 }
0x9f15   :  { %v22928_v6 = vadd.f32 %v22830_v33, %v13310_v15  ;;  %v18492_v48 = vpop.f32.mrb[155].mxu1 }
0x9f17   :  { %18496 = vmatmul.mubr.msk.f32.vlgmr.msra.gmra.mrb[156].mxu0 %vm347_vm1, %v22928_v6 }
0x9f18   :  { %19527 = vmatpush3.bf16.msra.mxu0 %v21005_v30  ;;  %18517 = vmatprep.mubr.msk.f32.mxu0 %vm20569_vm2, %v23436_v31 }
0x9f19   :  { %19528 = vmatprep.subr.bf16.mxu0 %v23437_v23 }
0x9f1c   :  { %v13453_v4 = vpop.f32.mrb[156].mxu1  ;;  %19530 = vmatpush3.bf16.msra.mxu0 %v21009_v32 }
0x9f1d   :  { %v13473_v0 = vadd.f32 %v13453_v4, %v20981_v53  ;;  %v18508_v56 = vpop.f32.mrb[157].mxu1  ;;  %19537 = vmatprep.subr.bf16.mxu0 %v23437_v23 }
0x9f1f   :  { %13475 = vrot.lane.b32.xlu0 %v13473_v0, %s20572_s6 }
0x9f24   :  { %v13634_v22 = vpop.f32.mrb[158].mxu1 }
0x9f25   :  { %v18530_v63 = vpop.f32.mrb[159].mxu1 }
0x9f91   :  { %v13476_v14 = vpop.permute.xlu0 %13475 }
0x9fea   :  { %v13383_v35 = vpop.f32.mrb[156].mxu0 }
0x9feb   :  { %v13457_v50 = vadd.f32 %v13453_v4, %v13383_v35  ;;  %v18497_v44 = vpop.f32.mrb[157].mxu0  ;;  %v13472_v15 = vadd.f32 %v13383_v35, %v20997_v11  ;;  %v13654_v4 = vadd.f32 %v13634_v22, %v21037_v62 }
0x9fed   :  { %v13458_v57 = vadd.f32 %v13457_v50, %v20993_v60  ;;  %v13465_v63 = vadd.f32 %v13457_v50, %v21020_v36 }
0x9fef   :  { %v16125_v61 = vmul.f32 -1.442695, %v13458_v57  ;;  %v16126_v44 = vmul.f32 -1.442695, %v13465_v63 }
0x9ff1   :  { %20089 = vpow2.f32 %v16125_v61 }
0x9ffb   :  { %v20090_v19 = vpop.eup %20089 }
0x9ffc   :  { %v13462_v46 = vadd.f32 1.0, %v20090_v19 }
0x9ffe   :  { %20091 = vrcp.f32 %v13462_v46 }
0xa008   :  { %v20092_v45 = vpop.eup %20091 }
0xa009   :  { %v13478_v51 = vmul.f32 %v20092_v45, %v13476_v14 }
0xa00b   :  { %13480 = vrot.lane.b32.xlu1 %v13478_v51, %s20572_s6 }
0xa07d   :  { %v13481_v48 = vpop.permute.xlu1 %13480 }
0xa07e   :  { %v13483_v0 = vadd.f32 %v13481_v48, %v13472_v15 }
0xa080   :  { %20093 = vtanh.f32 %v13483_v0 }
0xa081   :  { %20095 = vpow2.f32 %v16126_v44 }
0xa08a   :  { %v20094_v56 = vpop.eup %20093 }
0xa08b   :  { %13487 = vrot.lane.b32.xlu0 %v20094_v56, %s20574_s24  ;;  %v20096_v57 = vpop.eup %20095 }
0xa08c   :  { %v13469_v61 = vadd.f32 1.0, %v20096_v57 }
0xa08e   :  { %20097 = vrcp.f32 %v13469_v61 }
0xa08f   :  { %13656 = vrot.lane.b32.xlu0 %v13654_v4, %s20572_s6 }
0xa098   :  { %v20098_v19 = vpop.eup %20097 }
0xa099   :  { %v13485_v46 = vsub.f32 1.0, %v20098_v19  ;;  %v13491_v45 = vmul.f32 %v20098_v19, %v22863_v47 }
0xa0fd   :  { %v13488_v35 = vpop.permute.xlu0 %13487 }
0xa0fe   :  { %v13490_v14 = vmul.f32 %v13488_v35, %v13485_v46 }
0xa100   :  { %v13492_v51 = vadd.f32 %v13491_v45, %v13490_v14 }
0xa101   :  { %v13657_v57 = vpop.permute.xlu0 %13656 }
0xa102   :  { %13494 = vrot.lane.b32.xlu1 %v13492_v51, %s20574_s24 }
0xa174   :  { %v13495_v15 = vpop.permute.xlu1 %13494 }
0xa175   :  { %18518 = vmatmul.mubr.msk.f32.vlgmr.msra.gmra.mrb[158].mxu0 %vm342_vm4, %v13495_v15 }
0xa176   :  { %19539 = vmatpush3.bf16.msra.mxu0 %v21065_v25  ;;  %18539 = vmatprep.mubr.msk.f32.mxu0 %vm20569_vm2, %v23436_v31 }
0xa177   :  { %19540 = vmatprep.subr.bf16.mxu0 %v23437_v23 }
0xa17a   :  { %19542 = vmatpush3.bf16.msra.mxu0 %v21071_v34 }
0xa17b   :  { %19549 = vmatprep.subr.bf16.mxu0 %v23437_v23 }
0xa248   :  { %v13564_v50 = vpop.f32.mrb[158].mxu0 }
0xa249   :  { %v13638_v47 = vadd.f32 %v13634_v22, %v13564_v50  ;;  %v18519_v48 = vpop.f32.mrb[159].mxu0  ;;  %v13653_v19 = vadd.f32 %v13564_v50, %v21053_v18 }
0xa24b   :  { %v13639_v0 = vadd.f32 %v13638_v47, %v21049_v1  ;;  %v13646_v22 = vadd.f32 %v13638_v47, %v21077_v37 }
0xa24d   :  { %v16129_v56 = vmul.f32 -1.442695, %v13639_v0  ;;  %v16130_v14 = vmul.f32 -1.442695, %v13646_v22 }
0xa24f   :  { %20099 = vpow2.f32 %v16129_v56 }
0xa259   :  { %v20100_v4 = vpop.eup %20099 }
0xa25a   :  { %v13643_v63 = vadd.f32 1.0, %v20100_v4 }
0xa25c   :  { %20101 = vrcp.f32 %v13643_v63 }
0xa266   :  { %v20102_v44 = vpop.eup %20101 }
0xa267   :  { %v13659_v61 = vmul.f32 %v20102_v44, %v13657_v57 }
0xa269   :  { %13661 = vrot.lane.b32.xlu1 %v13659_v61, %s20572_s6 }
0xa2db   :  { %v13662_v46 = vpop.permute.xlu1 %13661 }
0xa2dc   :  { %v13664_v35 = vadd.f32 %v13662_v46, %v13653_v19  ;;  %v22986_v46 = vld [vmem:[#allocation18] ss:$0 sm:$0xff] }
0xa2de   :  { %20103 = vtanh.f32 %v13664_v35 }
0xa2df   :  { %20105 = vpow2.f32 %v16130_v14 }
0xa2e8   :  { %v20104_v45 = vpop.eup %20103 }
0xa2e9   :  { %13668 = vrot.lane.b32.xlu0 %v20104_v45, %s20574_s24  ;;  %v20106_v51 = vpop.eup %20105 }
0xa2ea   :  { %v13650_v15 = vadd.f32 1.0, %v20106_v51  ;;  %v20202_v51 = vld [vmem:[#allocation21] sm:$0xf] }
0xa2ec   :  { %20107 = vrcp.f32 %v13650_v15 }
0xa2f6   :  { %v20108_v48 = vpop.eup %20107 }
0xa2f7   :  { %v13666_v0 = vsub.f32 1.0, %v20108_v48  ;;  %v13672_v4 = vmul.f32 %v20108_v48, %v22887_v38  ;;  %v22970_v38 = vld [vmem:[#allocation15] ss:$0 sm:$0xff] }
0xa35b   :  { %v13669_v56 = vpop.permute.xlu0 %13668 }
0xa35c   :  { %v13671_v63 = vmul.f32 %v13669_v56, %v13666_v0 }
0xa35e   :  { %v13673_v50 = vadd.f32 %v13672_v4, %v13671_v63 }
0xa360   :  { %13675 = vrot.lane.b32.xlu1 %v13673_v50, %s20574_s24 }
0xa3d2   :  { %v13676_v44 = vpop.permute.xlu1 %13675 }
0xa3d3   :  { %18540 = vmatmul.mubr.msk.f32.vlgmr.msra.gmra.mrb[160].mxu0 %vm342_vm4, %v13676_v44 }
0xa3d4   :  { %19551 = vmatpush3.bf16.msra.mxu0 %v21101_v7  ;;  %18561 = vmatprep.mubr.msk.f32.mxu0 %vm20569_vm2, %v23436_v31 }
0xa3d5   :  { %19552 = vmatprep.subr.bf16.mxu0 %v23437_v23 }
0xa3d8   :  { %19554 = vmatpush3.bf16.msra.mxu0 %v21119_v20 }
0xa3d9   :  { %18569 = vmatprep.subr.mxu0 %v23436_v31 }
0xa4a6   :  { %v13745_v47 = vpop.f32.mrb[160].mxu0 }
0xa4a7   :  { %v13746_v57 = vadd.f32 %v22970_v38, %v13745_v47  ;;  %v18541_v61 = vpop.f32.mrb[161].mxu0 }
0xa4a9   :  { %v13749_v19 = vmax.f32 %v13746_v57, 0.0 }
0xa4ab   :  { %18551 = vmatmul.mubr.msk.f32.vlgmr.msra.gmra.mrb[160].mxu1 %vm342_vm4, %v13749_v19 }
0xa4ac   :  { %18565 = vmatpush3.msra.mxu1 %v22689_v58  ;;  %18566 = vmatprep.mubr.msk.f32.mxu1 %vm20569_vm2, %v23436_v31 }
0xa4ad   :  { %19555 = vmatprep.subr.bf16.mxu1 %v23437_v23 }
0xa4af   :  { %18567 = vmatmul.mubr.msk.f32.vlgmr.msra.gmra.mrb[162].mxu1 %vm347_vm1, %v22833_v5 }
0xa4b0   :  { %19557 = vmatpush3.bf16.msra.mxu1 %v20887_v9  ;;  %18582 = vmatprep.mubr.msk.f32.mxu1 %vm20569_vm2, %v23436_v31 }
0xa4b1   :  { %19558 = vmatprep.subr.bf16.mxu1 %v23437_v23 }
0xa4b4   :  { %19560 = vmatpush3.bf16.msra.mxu1 %v20899_v13  ;;  %v16134_v13 = vld [vmem:[%s23427_s28 + $0x38] sm:$0xff]  ;;  %s20575_s28 = smov 16  }
0xa4b5   :  { %18596 = vmatprep.subr.mxu1 %v23436_v31 }
0xa57e   :  { %v13819_v58 = vpop.f32.mrb[160].mxu1 }
0xa57f   :  { %v13820_v35 = vadd.f32 %v22986_v46, %v13819_v58  ;;  %v18552_v45 = vpop.f32.mrb[161].mxu1 }
0xa581   :  { %v13823_v22 = vmax.f32 %v13820_v35, 0.0 }
0xa582   :  { %v13980_v14 = vpop.f32.mrb[162].mxu1 }
0xa583   :  { %18562 = vmatmul.mubr.msk.f32.vlgmr.msra.gmra.mrb[162].mxu0 %vm342_vm4, %v13823_v22  ;;  %v18568_v9 = vpop.f32.mrb[163].mxu1 }
0xa584   :  { %18570 = vmatpush3.msk.msra.mxu0 %vm432_vm3, %v20202_v51  ;;  %18571 = vmatprep.mubr.msk.f32.mxu0 %vm20569_vm2, %v23436_v31 }
0xa585   :  { %19561 = vmatprep.subr.bf16.mxu0 %v23437_v23 }
0xa587   :  { %18572 = vmatmul.mubr.msk.f32.vlgmr.msra.gmra.mrb[164].mxu0 %vm345_vm0, %v16134_v13 }
0xa588   :  { %19563 = vmatpush3.bf16.msra.mxu0 %v20913_v16  ;;  %18593 = vmatprep.mubr.msk.f32.mxu0 %vm20569_vm2, %v23436_v31  ;;  %v23008_v16 = vld [vmem:[#allocation4] sm:$0xff] }
0xa589   :  { %19564 = vmatprep.subr.bf16.mxu0 %v23437_v23 }
0xa58c   :  { %19566 = vmatpush3.bf16.msra.mxu0 %v20929_v27 }
0xa58d   :  { %19567 = vmatprep.subr.bf16.mxu0 %v23437_v23 }
0xa656   :  { %v23004_v15 = vpop.f32.mrb[162].mxu0 }
0xa657   :  { %v18563_v48 = vpop.f32.mrb[163].mxu0 }
0xa65a   :  { %v14053_v0 = vpop.f32.mrb[164].mxu0 }
0xa65b   :  { %v14054_v56 = vadd.f32 %v14053_v0, %v13980_v14  ;;  %v18573_v4 = vpop.f32.mrb[165].mxu0 }
0xa65d   :  { %v14057_v63 = vadd.f32 %v22722_v54, %v14054_v56 }
0xa65f   :  { %v14058_v50 = vmax.f32 %v14057_v63, 0.0 }
0xa661   :  { %18583 = vmatmul.mubr.msk.f32.vlgmr.msra.gmra.mrb[164].mxu1 %vm342_vm4, %v14058_v50 }
0xa662   :  { %18597 = vmatpush3.msra.mxu1 %v23008_v16  ;;  %18598 = vmatprep.mubr.msk.f32.mxu1 %vm20569_vm2, %v23436_v31 }
0xa663   :  { %19573 = vmatprep.subr.bf16.mxu1 %v23437_v23 }
0xa734   :  { %v14128_v27 = vpop.f32.mrb[164].mxu1 }
0xa735   :  { %v14129_v44 = vadd.f32 %v22733_v2, %v14128_v27  ;;  %v18584_v47 = vpop.f32.mrb[165].mxu1 }
0xa737   :  { %v14132_v57 = vmax.f32 %v14129_v44, 0.0 }
0xa739   :  { %18594 = vmatmul.mubr.msk.f32.vlgmr.msra.gmra.mrb[166].mxu0 %vm342_vm4, %v14132_v57 }
0xa73a   :  { %19569 = vmatpush3.bf16.msra.mxu0 %v21005_v30  ;;  %18609 = vmatprep.mubr.msk.f32.mxu0 %vm20569_vm2, %v23436_v31 }
0xa73b   :  { %19570 = vmatprep.subr.bf16.mxu0 %v23437_v23 }
0xa73e   :  { %19572 = vmatpush3.bf16.msra.mxu0 %v21009_v32 }
0xa73f   :  { %19579 = vmatprep.subr.bf16.mxu0 %v23437_v23 }
0xa80c   :  { %v14202_v54 = vpop.f32.mrb[166].mxu0 }
0xa80d   :  { %v14203_v61 = vadd.f32 %v22746_v42, %v14202_v54  ;;  %v18595_v19 = vpop.f32.mrb[167].mxu0 }
0xa80f   :  { %v23024_v2 = vsel %vm345_vm0, %v14203_v61, %v16134_v13 }
0xa810   :  { %18599 = vmatmul.mubr.msk.f32.vlgmr.msra.gmra.mrb[166].mxu1 %vm347_vm1, %v23024_v2 }
0xa811   :  { %19575 = vmatpush3.bf16.msra.mxu1 %v21065_v25  ;;  %18620 = vmatprep.mubr.msk.f32.mxu1 %vm20569_vm2, %v23436_v31 }
0xa812   :  { %19576 = vmatprep.subr.bf16.mxu1 %v23437_v23 }
0xa815   :  { %19578 = vmatpush3.bf16.msra.mxu1 %v21071_v34 }
0xa816   :  { %19585 = vmatprep.subr.bf16.mxu1 %v23437_v23 }
0xa8e3   :  { %v14276_v58 = vpop.f32.mrb[166].mxu1 }
0xa8e4   :  { %v14280_v42 = vadd.f32 %v14276_v58, %v22841_v55  ;;  %v18600_v35 = vpop.f32.mrb[167].mxu1  ;;  %v14295_v48 = vadd.f32 %v14276_v58, %v20997_v11 }
0xa8e6   :  { %v14281_v45 = vadd.f32 %v14280_v42, %v20993_v60  ;;  %v14288_v55 = vadd.f32 %v14280_v42, %v21020_v36 }
0xa8e8   :  { %v16141_v22 = vmul.f32 -1.442695, %v14281_v45  ;;  %v16142_v63 = vmul.f32 -1.442695, %v14288_v55 }
0xa8ea   :  { %20109 = vpow2.f32 %v16141_v22 }
0xa8f4   :  { %v20110_v14 = vpop.eup %20109 }
0xa8f5   :  { %v14285_v9 = vadd.f32 1.0, %v20110_v14 }
0xa8f7   :  { %20111 = vrcp.f32 %v14285_v9 }
0xa901   :  { %v20112_v51 = vpop.eup %20111 }
0xa902   :  { %v14296_v13 = vmul.f32 %v20112_v51, %v22852_v12 }
0xa904   :  { %14298 = vrot.lane.b32.xlu0 %v14296_v13, %s20572_s6 }
0xa976   :  { %v14299_v0 = vpop.permute.xlu0 %14298 }
0xa977   :  { %v14301_v56 = vadd.f32 %v14299_v0, %v14295_v48 }
0xa979   :  { %20113 = vtanh.f32 %v14301_v56 }
0xa97a   :  { %20115 = vpow2.f32 %v16142_v63 }
0xa983   :  { %v20114_v4 = vpop.eup %20113 }
0xa984   :  { %14305 = vrot.lane.b32.xlu1 %v20114_v4, %s20574_s24  ;;  %v20116_v50 = vpop.eup %20115 }
0xa985   :  { %v14292_v27 = vadd.f32 1.0, %v20116_v50 }
0xa987   :  { %20117 = vrcp.f32 %v14292_v27 }
0xa991   :  { %v20118_v44 = vpop.eup %20117 }
0xa992   :  { %v14303_v47 = vsub.f32 1.0, %v20118_v44  ;;  %v14309_v57 = vmul.f32 %v20118_v44, %v22768_v52 }
0xa9f6   :  { %v14306_v12 = vpop.permute.xlu1 %14305 }
0xa9f7   :  { %v14308_v54 = vmul.f32 %v14306_v12, %v14303_v47 }
0xa9f9   :  { %v23042_v61 = vadd.f32 %v14309_v57, %v14308_v54 }
0xa9fb   :  { %14312 = vrot.lane.b32.xlu0 %v23042_v61, %s20574_s24 }
0xaa6d   :  { %v23046_v19 = vpop.permute.xlu0 %14312 }
0xaa6e   :  { %15822 = vst.msk [vmem:[#allocation2] sm:$0xff] %vm342_vm4, %v23046_v19  ;;  %15826 = vst.msk [vmem:[#allocation26] sm:$0xff] %vm342_vm4, %v23046_v19  ;;  %18610 = vmatmul.mubr.msk.f32.vlgmr.msra.gmra.mrb[168].mxu0 %vm342_vm4, %v23046_v19 }
0xaa6f   :  { %19581 = vmatpush3.bf16.msra.mxu0 %v21080_v49  ;;  %18631 = vmatprep.mubr.msk.f32.mxu0 %vm20569_vm2, %v23436_v31 }
0xaa70   :  { %19582 = vmatprep.subr.bf16.mxu0 %v23437_v23 }
0xaa73   :  { %19584 = vmatpush3.bf16.msra.mxu0 %v21091_v3 }
0xaa74   :  { %18645 = vmatprep.subr.mxu0 %v23436_v31 }
0xab41   :  { %v14382_v52 = vpop.f32.mrb[168].mxu0 }
0xab42   :  { %v14386_v58 = vadd.f32 %v14382_v52, %v22848_v29  ;;  %v18611_v42 = vpop.f32.mrb[169].mxu0  ;;  %v14401_v13 = vadd.f32 %v14382_v52, %v21053_v18 }
0xab44   :  { %v14387_v35 = vadd.f32 %v14386_v58, %v21049_v1  ;;  %v14394_v29 = vadd.f32 %v14386_v58, %v21077_v37 }
0xab46   :  { %v16144_v45 = vmul.f32 -1.442695, %v14387_v35  ;;  %v16145_v4 = vmul.f32 -1.442695, %v14394_v29 }
0xab48   :  { %20119 = vpow2.f32 %v16144_v45 }
0xab52   :  { %v20120_v22 = vpop.eup %20119 }
0xab53   :  { %v14391_v14 = vadd.f32 1.0, %v20120_v22 }
0xab55   :  { %20121 = vrcp.f32 %v14391_v14 }
0xab5f   :  { %v20122_v9 = vpop.eup %20121 }
0xab60   :  { %v14402_v51 = vmul.f32 %v20122_v9, %v22879_v10 }
0xab62   :  { %14404 = vrot.lane.b32.xlu1 %v14402_v51, %s20572_s6 }
0xabd4   :  { %v14405_v48 = vpop.permute.xlu1 %14404 }
0xabd5   :  { %v14407_v0 = vadd.f32 %v14405_v48, %v14401_v13 }
0xabd7   :  { %20123 = vtanh.f32 %v14407_v0 }
0xabd8   :  { %20125 = vpow2.f32 %v16145_v4 }
0xabe1   :  { %v20124_v56 = vpop.eup %20123 }
0xabe2   :  { %14411 = vrot.lane.b32.xlu0 %v20124_v56, %s20574_s24  ;;  %v20126_v55 = vpop.eup %20125 }
0xabe3   :  { %v14398_v63 = vadd.f32 1.0, %v20126_v55 }
0xabe5   :  { %20127 = vrcp.f32 %v14398_v63 }
0xabef   :  { %v20128_v50 = vpop.eup %20127 }
0xabf0   :  { %v14409_v27 = vsub.f32 1.0, %v20128_v50  ;;  %v14415_v44 = vmul.f32 %v20128_v50, %v22790_v17 }
0xac54   :  { %v14412_v10 = vpop.permute.xlu0 %14411 }
0xac55   :  { %v14414_v47 = vmul.f32 %v14412_v10, %v14409_v27 }
0xac57   :  { %v23068_v12 = vadd.f32 %v14415_v44, %v14414_v47 }
0xac59   :  { %14418 = vrot.lane.b32.xlu1 %v23068_v12, %s20574_s24 }
0xaccb   :  { %v14419_v57 = vpop.permute.xlu1 %14418 }
0xaccc   :  { %15824 = vst.msk [vmem:[#allocation2 + $0x8] sm:$0xff] %vm342_vm4, %v14419_v57  ;;  %15828 = vst.msk [vmem:[#allocation26 + $0x8] sm:$0xff] %vm342_vm4, %v14419_v57  ;;  %18621 = vmatmul.mubr.msk.f32.vlgmr.msra.gmra.mrb[168].mxu1 %vm342_vm4, %v14419_v57 }
0xaccd   :  { %19587 = vmatpush3.bf16.msra.mxu1 %v21101_v7  ;;  %18642 = vmatprep.mubr.msk.f32.mxu1 %vm20569_vm2, %v23436_v31 }
0xacce   :  { %19588 = vmatprep.subr.bf16.mxu1 %v23437_v23 }
0xacd1   :  { %19590 = vmatpush3.bf16.msra.mxu1 %v21119_v20 }
0xacd2   :  { %19591 = vmatprep.subr.bf16.mxu1 %v23437_v23 }
0xad9f   :  { %v14488_v17 = vpop.f32.mrb[168].mxu1 }
0xada0   :  { %v14489_v54 = vadd.f32 %v22970_v38, %v14488_v17  ;;  %v18622_v52 = vpop.f32.mrb[169].mxu1 }
0xada2   :  { %v14492_v58 = vmax.f32 %v14489_v54, 0.0 }
0xada4   :  { %18632 = vmatmul.mubr.msk.f32.vlgmr.msra.gmra.mrb[170].mxu0 %vm342_vm4, %v14492_v58 }
0xada5   :  { %18646 = vmatpush3.msra.mxu0 %v23008_v16  ;;  %18647 = vmatprep.mubr.msk.f32.mxu0 %vm20569_vm2, %v23436_v31 }
0xada6   :  { %19597 = vmatprep.subr.bf16.mxu0 %v23437_v23 }
0xae77   :  { %v14562_v42 = vpop.f32.mrb[170].mxu0 }
0xae78   :  { %v14563_v35 = vadd.f32 %v22986_v46, %v14562_v42  ;;  %v18633_v45 = vpop.f32.mrb[171].mxu0 }
0xae7a   :  { %v14566_v22 = vmax.f32 %v14563_v35, 0.0 }
0xae7c   :  { %18643 = vmatmul.mubr.msk.f32.vlgmr.msra.gmra.mrb[170].mxu1 %vm342_vm4, %v14566_v22 }
0xae7d   :  { %19593 = vmatpush3.bf16.msra.mxu1 %v20945_v39  ;;  %18658 = vmatprep.mubr.msk.f32.mxu1 %vm20569_vm2, %v23436_v31 }
0xae7e   :  { %19594 = vmatprep.subr.bf16.mxu1 %v23437_v23 }
0xae81   :  { %19596 = vmatpush3.bf16.msra.mxu1 %v20949_v43 }
0xae82   :  { %19603 = vmatprep.subr.bf16.mxu1 %v23437_v23 }
0xae84   :  { %18659 = vmatmul.mubr.msk.f32.vlgmr.msra.gmra.mrb[172].mxu1 %vm342_vm4, %v23046_v19 }
0xae85   :  { %19605 = vmatpush3.bf16.msra.mxu1 %v21000_v21  ;;  %18680 = vmatprep.mubr.msk.f32.mxu1 %vm20569_vm2, %v23436_v31 }
0xae86   :  { %19606 = vmatprep.subr.bf16.mxu1 %v23437_v23 }
0xae89   :  { %19608 = vmatpush3.bf16.msra.mxu1 %v21003_v28 }
0xae8a   :  { %19615 = vmatprep.subr.bf16.mxu1 %v23437_v23 }
0xae8c   :  { %18681 = vmatmul.mubr.msk.f32.vlgmr.msra.gmra.mrb[174].mxu1 %vm342_vm4, %v14419_v57 }
0xae8d   :  { %19617 = vmatpush3.bf16.msra.mxu1 %v21080_v49  ;;  %18702 = vmatprep.mubr.msk.f32.mxu1 %vm20569_vm2, %v23436_v31 }
0xae8e   :  { %19618 = vmatprep.subr.bf16.mxu1 %v23437_v23 }
0xae91   :  { %19620 = vmatpush3.bf16.msra.mxu1 %v21091_v3 }
0xae92   :  { %18716 = vmatprep.subr.mxu1 %v23436_v31 }
0xaf4f   :  { %v14636_v19 = vpop.f32.mrb[170].mxu1 }
0xaf50   :  { %v23111_v14 = vadd.f32 %v22830_v33, %v14636_v19  ;;  %v18644_v9 = vpop.f32.mrb[171].mxu1 }
0xaf52   :  { %15825 = vst.msk [vmem:[#allocation3] sm:$0xff] %vm347_vm1, %v23111_v14  ;;  %18648 = vmatmul.mubr.msk.f32.vlgmr.msra.gmra.mrb[172].mxu0 %vm347_vm1, %v23111_v14 }
0xaf53   :  { %19599 = vmatpush3.bf16.msra.mxu0 %v21005_v30  ;;  %18669 = vmatprep.mubr.msk.f32.mxu0 %vm20569_vm2, %v23436_v31 }
0xaf54   :  { %19600 = vmatprep.subr.bf16.mxu0 %v23437_v23 }
0xaf57   :  { %v14779_v51 = vpop.f32.mrb[172].mxu1  ;;  %19602 = vmatpush3.bf16.msra.mxu0 %v21009_v32 }
0xaf58   :  { %v14799_v33 = vadd.f32 %v14779_v51, %v20981_v53  ;;  %v18660_v13 = vpop.f32.mrb[173].mxu1  ;;  %19609 = vmatprep.subr.bf16.mxu0 %v23437_v23 }
0xaf5a   :  { %14801 = vrot.lane.b32.xlu0 %v14799_v33, %s20572_s6 }
0xaf5f   :  { %v14960_v48 = vpop.f32.mrb[174].mxu1 }
0xaf60   :  { %v18682_v0 = vpop.f32.mrb[175].mxu1  ;;  %v14980_v58 = vadd.f32 %v14960_v48, %v21037_v62 }
0xafcc   :  { %v14802_v44 = vpop.permute.xlu0 %14801 }
0xb025   :  { %v14709_v56 = vpop.f32.mrb[172].mxu0 }
0xb026   :  { %v14783_v29 = vadd.f32 %v14779_v51, %v14709_v56  ;;  %v18649_v4 = vpop.f32.mrb[173].mxu0  ;;  %v14798_v57 = vadd.f32 %v14709_v56, %v20997_v11 }
0xb028   :  { %v14784_v55 = vadd.f32 %v14783_v29, %v20993_v60  ;;  %v14791_v42 = vadd.f32 %v14783_v29, %v21020_v36 }
0xb02a   :  { %v16151_v63 = vmul.f32 -1.442695, %v14784_v55  ;;  %v16152_v35 = vmul.f32 -1.442695, %v14791_v42 }
0xb02c   :  { %20129 = vpow2.f32 %v16151_v63 }
0xb036   :  { %v20130_v50 = vpop.eup %20129 }
0xb037   :  { %v14788_v27 = vadd.f32 1.0, %v20130_v50 }
0xb039   :  { %20131 = vrcp.f32 %v14788_v27 }
0xb043   :  { %v20132_v10 = vpop.eup %20131 }
0xb044   :  { %v14804_v47 = vmul.f32 %v20132_v10, %v14802_v44 }
0xb046   :  { %14806 = vrot.lane.b32.xlu1 %v14804_v47, %s20572_s6 }
0xb0b8   :  { %v14807_v17 = vpop.permute.xlu1 %14806 }
0xb0b9   :  { %v14809_v54 = vadd.f32 %v14807_v17, %v14798_v57 }
0xb0bb   :  { %20133 = vtanh.f32 %v14809_v54 }
0xb0bc   :  { %20135 = vpow2.f32 %v16152_v35 }
0xb0c5   :  { %v20134_v52 = vpop.eup %20133 }
0xb0c6   :  { %14813 = vrot.lane.b32.xlu0 %v20134_v52, %s20574_s24  ;;  %v20136_v45 = vpop.eup %20135 }
0xb0c7   :  { %v14795_v22 = vadd.f32 1.0, %v20136_v45 }
0xb0c9   :  { %20137 = vrcp.f32 %v14795_v22 }
0xb0ca   :  { %14982 = vrot.lane.b32.xlu0 %v14980_v58, %s20572_s6 }
0xb0d3   :  { %v20138_v19 = vpop.eup %20137 }
0xb0d4   :  { %v14811_v9 = vsub.f32 1.0, %v20138_v19  ;;  %v14817_v33 = vmul.f32 %v20138_v19, %v23042_v61 }
0xb138   :  { %v14814_v51 = vpop.permute.xlu0 %14813 }
0xb139   :  { %v14816_v13 = vmul.f32 %v14814_v51, %v14811_v9 }
0xb13b   :  { %v23133_v0 = vadd.f32 %v14817_v33, %v14816_v13 }
0xb13c   :  { %v14983_v44 = vpop.permute.xlu0 %14982 }
0xb13d   :  { %14820 = vrot.lane.b32.xlu1 %v23133_v0, %s20574_s24 }
0xb1af   :  { %v23137_v56 = vpop.permute.xlu1 %14820 }
0xb1b0   :  { %18670 = vmatmul.mubr.msk.f32.vlgmr.msra.gmra.mrb[174].mxu0 %vm342_vm4, %v23137_v56 }
0xb1b1   :  { %19611 = vmatpush3.bf16.msra.mxu0 %v21065_v25  ;;  %18691 = vmatprep.mubr.msk.f32.mxu0 %vm20569_vm2, %v23436_v31 }
0xb1b2   :  { %19612 = vmatprep.subr.bf16.mxu0 %v23437_v23 }
0xb1b5   :  { %19614 = vmatpush3.bf16.msra.mxu0 %v21071_v34 }
0xb1b6   :  { %19621 = vmatprep.subr.bf16.mxu0 %v23437_v23 }
0xb283   :  { %v14890_v61 = vpop.f32.mrb[174].mxu0 }
0xb284   :  { %v14964_v29 = vadd.f32 %v14960_v48, %v14890_v61  ;;  %v18671_v4 = vpop.f32.mrb[175].mxu0  ;;  %v14979_v57 = vadd.f32 %v14890_v61, %v21053_v18 }
0xb286   :  { %v14965_v55 = vadd.f32 %v14964_v29, %v21049_v1  ;;  %v14972_v48 = vadd.f32 %v14964_v29, %v21077_v37 }
0xb288   :  { %v16155_v63 = vmul.f32 -1.442695, %v14965_v55  ;;  %v16156_v58 = vmul.f32 -1.442695, %v14972_v48 }
0xb28a   :  { %20139 = vpow2.f32 %v16155_v63 }
0xb294   :  { %v20140_v50 = vpop.eup %20139 }
0xb295   :  { %v14969_v27 = vadd.f32 1.0, %v20140_v50 }
0xb297   :  { %20141 = vrcp.f32 %v14969_v27 }
0xb2a1   :  { %v20142_v10 = vpop.eup %20141 }
0xb2a2   :  { %v14985_v47 = vmul.f32 %v20142_v10, %v14983_v44 }
0xb2a4   :  { %14987 = vrot.lane.b32.xlu1 %v14985_v47, %s20572_s6 }
0xb316   :  { %v14988_v17 = vpop.permute.xlu1 %14987 }
0xb317   :  { %v14990_v54 = vadd.f32 %v14988_v17, %v14979_v57 }
0xb319   :  { %20143 = vtanh.f32 %v14990_v54 }
0xb31a   :  { %20145 = vpow2.f32 %v16156_v58 }
0xb323   :  { %v20144_v52 = vpop.eup %20143 }
0xb324   :  { %14994 = vrot.lane.b32.xlu0 %v20144_v52, %s20574_s24  ;;  %v20146_v42 = vpop.eup %20145 }
0xb325   :  { %v14976_v35 = vadd.f32 1.0, %v20146_v42 }
0xb327   :  { %20147 = vrcp.f32 %v14976_v35 }
0xb331   :  { %v20148_v45 = vpop.eup %20147 }
0xb332   :  { %v14992_v22 = vsub.f32 1.0, %v20148_v45  ;;  %v14998_v9 = vmul.f32 %v20148_v45, %v23068_v12 }
0xb396   :  { %v14995_v19 = vpop.permute.xlu0 %14994 }
0xb397   :  { %v14997_v51 = vmul.f32 %v14995_v19, %v14992_v22 }
0xb399   :  { %v23153_v33 = vadd.f32 %v14998_v9, %v14997_v51 }
0xb39b   :  { %15001 = vrot.lane.b32.xlu1 %v23153_v33, %s20574_s24 }
0xb40d   :  { %v15002_v13 = vpop.permute.xlu1 %15001 }
0xb40e   :  { %18692 = vmatmul.mubr.msk.f32.vlgmr.msra.gmra.mrb[176].mxu0 %vm342_vm4, %v15002_v13 }
0xb40f   :  { %19623 = vmatpush3.bf16.msra.mxu0 %v21101_v7  ;;  %18713 = vmatprep.mubr.msk.f32.mxu0 %vm20569_vm2, %v23436_v31 }
0xb410   :  { %19624 = vmatprep.subr.bf16.mxu0 %v23437_v23 }
0xb413   :  { %19626 = vmatpush3.bf16.msra.mxu0 %v21119_v20 }
0xb414   :  { %19627 = vmatprep.subr.bf16.mxu0 %v23437_v23 }
0xb4e1   :  { %v15071_v12 = vpop.f32.mrb[176].mxu0 }
0xb4e2   :  { %v15072_v61 = vadd.f32 %v22970_v38, %v15071_v12  ;;  %v18693_v29 = vpop.f32.mrb[177].mxu0 }
0xb4e4   :  { %v15075_v4 = vmax.f32 %v15072_v61, 0.0 }
0xb4e6   :  { %18703 = vmatmul.mubr.msk.f32.vlgmr.msra.gmra.mrb[176].mxu1 %vm342_vm4, %v15075_v4 }
0xb4e7   :  { %18717 = vmatpush3.msra.mxu1 %v23008_v16  ;;  %18718 = vmatprep.mubr.msk.f32.mxu1 %vm20569_vm2, %v23436_v31 }
0xb4e8   :  { %19633 = vmatprep.subr.bf16.mxu1 %v23437_v23 }
0xb5b9   :  { %v15145_v55 = vpop.f32.mrb[176].mxu1 }
0xb5ba   :  { %v15146_v63 = vadd.f32 %v22986_v46, %v15145_v55  ;;  %v18704_v50 = vpop.f32.mrb[177].mxu1 }
0xb5bc   :  { %v15149_v27 = vmax.f32 %v15146_v63, 0.0 }
0xb5be   :  { %18714 = vmatmul.mubr.msk.f32.vlgmr.msra.gmra.mrb[178].mxu0 %vm342_vm4, %v15149_v27 }
0xb5bf   :  { %19629 = vmatpush3.bf16.msra.mxu0 %v20945_v39  ;;  %18729 = vmatprep.mubr.msk.f32.mxu0 %vm20569_vm2, %v23436_v31 }
0xb5c0   :  { %19630 = vmatprep.subr.bf16.mxu0 %v23437_v23 }
0xb5c3   :  { %19632 = vmatpush3.bf16.msra.mxu0 %v20949_v43  ;;  %v23192_v43 = vld [vmem:[#allocation19] ss:$0 sm:$0xff] }
0xb5c4   :  { %19639 = vmatprep.subr.bf16.mxu0 %v23437_v23 }
0xb5c6   :  { %18730 = vmatmul.mubr.msk.f32.vlgmr.msra.gmra.mrb[180].mxu0 %vm342_vm4, %v23137_v56 }
0xb5c7   :  { %19641 = vmatpush3.bf16.msra.mxu0 %v21000_v21  ;;  %18751 = vmatprep.mubr.msk.f32.mxu0 %vm20569_vm2, %v23436_v31 }
0xb5c8   :  { %19642 = vmatprep.subr.bf16.mxu0 %v23437_v23 }
0xb5cb   :  { %19644 = vmatpush3.bf16.msra.mxu0 %v21003_v28 }
0xb5cc   :  { %19651 = vmatprep.subr.bf16.mxu0 %v23437_v23 }
0xb5ce   :  { %18752 = vmatmul.mubr.msk.f32.vlgmr.msra.gmra.mrb[182].mxu0 %vm342_vm4, %v15002_v13 }
0xb5cf   :  { %19653 = vmatpush3.bf16.msra.mxu0 %v21080_v49  ;;  %18773 = vmatprep.mubr.msk.f32.mxu0 %vm20569_vm2, %v23436_v31 }
0xb5d0   :  { %19654 = vmatprep.subr.bf16.mxu0 %v23437_v23 }
0xb5d3   :  { %19656 = vmatpush3.bf16.msra.mxu0 %v21091_v3 }
0xb691   :  { %v15219_v39 = vpop.f32.mrb[178].mxu0 }
0xb692   :  { %v23195_v21 = vadd.f32 %v23192_v43, %v15219_v39  ;;  %v18715_v28 = vpop.f32.mrb[179].mxu0 }
0xb694   :  { %18719 = vmatmul.mubr.msk.f32.vlgmr.msra.gmra.mrb[178].mxu1 %vm347_vm1, %v23195_v21 }
0xb695   :  { %19635 = vmatpush3.bf16.msra.mxu1 %v21005_v30  ;;  %18740 = vmatprep.mubr.msk.f32.mxu1 %vm20569_vm2, %v23436_v31 }
0xb696   :  { %19636 = vmatprep.subr.bf16.mxu1 %v23437_v23 }
0xb699   :  { %v15362_v49 = vpop.f32.mrb[180].mxu0  ;;  %19638 = vmatpush3.bf16.msra.mxu1 %v21009_v32 }
0xb69a   :  { %v15382_v3 = vadd.f32 %v15362_v49, %v20981_v53  ;;  %v18731_v16 = vpop.f32.mrb[181].mxu0  ;;  %19645 = vmatprep.subr.bf16.mxu1 %v23437_v23 }
0xb69c   :  { %15384 = vrot.lane.b32.xlu0 %v15382_v3, %s20572_s6 }
0xb6a1   :  { %v15543_v56 = vpop.f32.mrb[182].mxu0 }
0xb6a2   :  { %v18753_v10 = vpop.f32.mrb[183].mxu0 }
0xb70e   :  { %v15385_v48 = vpop.permute.xlu0 %15384 }
0xb767   :  { %v15292_v44 = vpop.f32.mrb[178].mxu1 }
0xb768   :  { %v15366_v47 = vadd.f32 %v15362_v49, %v15292_v44  ;;  %v18720_v30 = vpop.f32.mrb[179].mxu1  ;;  %v15381_v58 = vadd.f32 %v15292_v44, %v20997_v11 }
0xb76a   :  { %v15367_v57 = vadd.f32 %v15366_v47, %v20993_v60  ;;  %v15563_v60 = vadd.f32 %v15543_v56, %v21037_v62  ;;  %v15374_v22 = vadd.f32 %v15366_v47, %v21020_v36 }
0xb76c   :  { %v16162_v17 = vmul.f32 -1.442695, %v15367_v57  ;;  %v16163_v19 = vmul.f32 -1.442695, %v15374_v22 }
0xb76e   :  { %20149 = vpow2.f32 %v16162_v17 }
0xb778   :  { %v20150_v54 = vpop.eup %20149 }
0xb779   :  { %v15371_v52 = vadd.f32 1.0, %v20150_v54 }
0xb77b   :  { %20151 = vrcp.f32 %v15371_v52 }
0xb785   :  { %v20152_v32 = vpop.eup %20151 }
0xb786   :  { %v15387_v53 = vmul.f32 %v20152_v32, %v15385_v48  ;;  %v23453_v32 = vld [vmem:[#allocation40_spill] sm:$0xff]  ;;  %v23454_v48 = vld [vmem:[#allocation46_spill] sm:$0xff] }
0xb788   :  { %15389 = vrot.lane.b32.xlu1 %v15387_v53, %s20572_s6 }
0xb7fa   :  { %v15390_v42 = vpop.permute.xlu1 %15389 }
0xb7fb   :  { %v15392_v35 = vadd.f32 %v15390_v42, %v15381_v58  ;;  %v23455_v58 = vld [vmem:[#allocation52_spill] sm:$0xff] }
0xb7fd   :  { %20153 = vtanh.f32 %v15392_v35  ;;  %v23456_v35 = vld [vmem:[#allocation41_spill] sm:$0xff] }
0xb7fe   :  { %20155 = vpow2.f32 %v16163_v19  ;;  %v23458_v19 = vld [vmem:[#allocation53_spill] sm:$0xff] }
0xb807   :  { %v20154_v45 = vpop.eup %20153 }
0xb808   :  { %15396 = vrot.lane.b32.xlu0 %v20154_v45, %s20574_s24  ;;  %v20156_v9 = vpop.eup %20155 }
0xb809   :  { %v15378_v51 = vadd.f32 1.0, %v20156_v9  ;;  %v23459_v9 = vld [vmem:[#allocation37_spill] sm:$0xff] }
0xb80b   :  { %20157 = vrcp.f32 %v15378_v51 }
0xb80c   :  { %15565 = vrot.lane.b32.xlu0 %v15563_v60, %s20572_s6  ;;  %v23457_v60 = vld [vmem:[#allocation47_spill] sm:$0xff] }
0xb815   :  { %v20158_v13 = vpop.eup %20157 }
0xb816   :  { %v15394_v12 = vsub.f32 1.0, %v20158_v13  ;;  %v15400_v61 = vmul.f32 %v20158_v13, %v23133_v0 }
0xb87a   :  { %v15397_v11 = vpop.permute.xlu0 %15396 }
0xb87b   :  { %v15399_v29 = vmul.f32 %v15397_v11, %v15394_v12  ;;  %v23460_v11 = vld [vmem:[#allocation42_spill] sm:$0xff] }
0xb87d   :  { %v15401_v4 = vadd.f32 %v15400_v61, %v15399_v29  ;;  %v4349_v61 = vadd.f32 %v23192_v43, %v23460_v11  ;;  %v23461_v29 = vld [vmem:[#allocation43_spill] sm:$0xff] }
0xb87e   :  { %v15566_v28 = vpop.permute.xlu0 %15565 }
0xb87f   :  { %15403 = vrot.lane.b32.xlu1 %v15401_v4, %s20574_s24 }
0xb8f1   :  { %v15404_v55 = vpop.permute.xlu1 %15403 }
0xb8f2   :  { %18741 = vmatmul.mubr.msk.f32.vlgmr.msra.gmra.mrb[180].mxu1 %vm342_vm4, %v15404_v55 }
0xb8f3   :  { %19647 = vmatpush3.bf16.msra.mxu1 %v21065_v25  ;;  %18762 = vmatprep.mubr.msk.f32.mxu1 %vm20569_vm2, %v23436_v31 }
0xb8f4   :  { %19648 = vmatprep.subr.bf16.mxu1 %v23437_v23 }
0xb8f7   :  { %19650 = vmatpush3.bf16.msra.mxu1 %v21071_v34 }
0xb8f8   :  { %19657 = vmatprep.subr.bf16.mxu1 %v23437_v23 }
0xb9c5   :  { %v15473_v36 = vpop.f32.mrb[180].mxu1 }
0xb9c6   :  { %v15547_v62 = vadd.f32 %v15543_v56, %v15473_v36  ;;  %v18742_v0 = vpop.f32.mrb[181].mxu1  ;;  %v15562_v3 = vadd.f32 %v15473_v36, %v21053_v18 }
0xb9c7   :  { %v23462_v0 = vld [vmem:[#allocation48_spill] sm:$0xff] }
0xb9c8   :  { %v15548_v63 = vadd.f32 %v15547_v62, %v21049_v1  ;;  %v23450_v1 = vld [vmem:[#allocation38_spill] sm:$0xff] }
0xb9c9   :  { %v2439_v18 = vadd.f32 %v23192_v43, %v23450_v1 }
0xb9ca   :  { %v16166_v50 = vmul.f32 -1.442695, %v15548_v63  ;;  %v23463_v63 = vld [vmem:[#allocation49_spill] sm:$0xff] }
0xb9cc   :  { %20159 = vpow2.f32 %v16166_v50 }
0xb9d6   :  { %v20160_v27 = vpop.eup %20159 }
0xb9d7   :  { %v15552_v39 = vadd.f32 1.0, %v20160_v27 }
0xb9d9   :  { %20161 = vrcp.f32 %v15552_v39 }
0xb9e3   :  { %v20162_v25 = vpop.eup %20161 }
0xb9e4   :  { %v15568_v49 = vmul.f32 %v20162_v25, %v15566_v28  ;;  %v23464_v28 = vld [vmem:[#allocation54_spill] sm:$0xff] }
0xb9e6   :  { %15570 = vrot.lane.b32.xlu1 %v15568_v49, %s20572_s6  ;;  %s20576_s6 = smov 24   ;;  %v11985_v49 = vadd.f32 %v23192_v43, %v23464_v28 }
0xba58   :  { %v15571_v34 = vpop.permute.xlu1 %15570 }
0xba59   :  { %v15573_v16 = vadd.f32 %v15571_v34, %v15562_v3  ;;  %v23465_v3 = vld [vmem:[#allocation55_spill] sm:$0xff] }
0xba5b   :  { %20163 = vtanh.f32 %v15573_v16 }
0xba65   :  { %v20164_v10 = vpop.eup %20163 }
0xba66   :  { %15577 = vrot.lane.b32.xlu0 %v20164_v10, %s20574_s24 }
0xba6a   :  { %2442 = vrot.lane.b32.xlu0 %v21151_v40, %s20555_s23  ;;  %v23451_v40 = vld [vmem:[#allocation44_spill] sm:$0xff] }
0xba6e   :  { %6261 = vrot.lane.b32.xlu0 %v21709_v41, %s20555_s23  ;;  %v6258_v41 = vadd.f32 %v23192_v43, %v23451_v40 }
0xba72   :  { %10079 = vrot.lane.b32.xlu0 %v22273_v26, %s20555_s23  ;;  %v13894_v26 = vadd.f32 %v23192_v43, %v23004_v15 }
0xba76   :  { %13897 = vrot.lane.b32.xlu0 %v22833_v5, %s20555_s23 }
0xba7a   :  { %2445 = vrot.lane.b32.xlu0 %v21246_v24, %s20575_s28  ;;  %v23452_v24 = vld [vmem:[#allocation50_spill] sm:$0xff] }
0xba7e   :  { %6264 = vrot.lane.b32.xlu0 %v21806_v59, %s20575_s28  ;;  %v10076_v59 = vadd.f32 %v23192_v43, %v23452_v24 }
0xba82   :  { %10082 = vrot.lane.b32.xlu0 %v22370_v8, %s20575_s28  ;;  %v15555_v8 = vadd.f32 %v15547_v62, %v21077_v37 }
0xba84   :  { %v16167_v5 = vmul.f32 -1.442695, %v15555_v8 }
0xba86   :  { %13900 = vrot.lane.b32.xlu0 %v22928_v6, %s20575_s28  ;;  %20165 = vpow2.f32 %v16167_v5 }
0xba8a   :  { %2449 = vrot.lane.b32.xlu0 %v2439_v18, %s20576_s6 }
0xba8e   :  { %6268 = vrot.lane.b32.xlu0 %v6258_v41, %s20576_s6 }
0xba90   :  { %v20166_v6 = vpop.eup %20165 }
0xba91   :  { %v15559_v56 = vadd.f32 1.0, %v20166_v6 }
0xba92   :  { %10086 = vrot.lane.b32.xlu0 %v10076_v59, %s20576_s6 }
0xba93   :  { %20167 = vrcp.f32 %v15559_v56 }
0xba96   :  { %13904 = vrot.lane.b32.xlu0 %v13894_v26, %s20576_s6 }
0xba9d   :  { %v20168_v44 = vpop.eup %20167 }
0xba9e   :  { %v15575_v47 = vsub.f32 1.0, %v20168_v44  ;;  %v15581_v57 = vmul.f32 %v20168_v44, %v23153_v33  ;;  %v23466_v44 = vld [vmem:[#allocation39_spill] sm:$0xff] }
0xbad8   :  { %v15578_v30 = vpop.permute.xlu0 %15577 }
0xbad9   :  { %v15580_v17 = vmul.f32 %v15578_v30, %v15575_v47  ;;  %v23467_v30 = vld [vmem:[#allocation45_spill] sm:$0xff] }
0xbadb   :  { %v15582_v54 = vadd.f32 %v15581_v57, %v15580_v17 }
0xbadc   :  { %v2443_v52 = vpop.permute.xlu0 %2442 }
0xbadd   :  { %15584 = vrot.lane.b32.xlu1 %v15582_v54, %s20574_s24  ;;  %v2452_v51 = vsel %vm347_vm1, %v23459_v9, %v2443_v52  ;;  %v23468_v52 = vld [vmem:[#allocation51_spill] sm:$0xff]  ;;  %s20577_s24 = smov [#allocation26]  }
0xbade   :  { %s15846_s11 = sshll.u32 %s20577_s24, 4  ;;  %s15847_s11 = int_to_ptr.vmem [resolvable:$true] %s15846_s11 }
0xbadf   :  { %s20491_s5 = scalar_lea.vmem %s15847_s11, 256  ;;  %p20496_p7 = scmp.lt.s32.totalorder %s15847_s11, %s15847_s11 }
0xbae0   :  { %v6262_v15 = vpop.permute.xlu0 %6261  ;;  %p20492_p6 = scmp.ne.s32.totalorder %s15847_s11, %s20491_s5  ;;  %p20497_p8 = scmp.lt.s32.totalorder %s20491_s5, %s20491_s5 }
0xbae1   :  { %4352 = vrot.lane.b32.xlu1 %v23453_v32, %s20555_s23  ;;  %v6271_v4 = vsel %vm347_vm1, %v23461_v29, %v6262_v15 }
0xbae2   :  { %p20498_p9 = por %p20497_p8, %p20496_p7 }
0xbae4   :  { %v10080_v37 = vpop.permute.xlu0 %10079  ;;  %p20499_p10 = pnand %p20498_p9, %p20492_p6 }
0xbae5   :  { %8170 = vrot.lane.b32.xlu1 %v23454_v48, %s20555_s23  ;;  %v10089_v50 = vsel %vm347_vm1, %v23463_v63, %v10080_v37 }
0xbae8   :  { %v13898_v53 = vpop.permute.xlu0 %13897 }
0xbae9   :  { %11988 = vrot.lane.b32.xlu1 %v23455_v58, %s20555_s23  ;;  %v13907_v34 = vsel %vm347_vm1, %v23465_v3, %v13898_v53 }
0xbaec   :  { %v2446_v42 = vpop.permute.xlu0 %2445 }
0xbaed   :  { %15806 = vrot.lane.b32.xlu1 %v23111_v14, %s20555_s23  ;;  %v2454_v13 = vsel %vm2453_vm5, %v2452_v51, %v2446_v42 }
0xbaf0   :  { %v6265_v33 = vpop.permute.xlu0 %6264 }
0xbaf1   :  { %4355 = vrot.lane.b32.xlu1 %v23456_v35, %s20575_s28  ;;  %v6272_v55 = vsel %vm2453_vm5, %v6271_v4, %v6265_v33 }
0xbaf4   :  { %v10083_v45 = vpop.permute.xlu0 %10082 }
0xbaf5   :  { %8173 = vrot.lane.b32.xlu1 %v23457_v60, %s20575_s28  ;;  %v10090_v27 = vsel %vm2453_vm5, %v10089_v50, %v10083_v45 }
0xbaf8   :  { %v13901_v22 = vpop.permute.xlu0 %13900 }
0xbaf9   :  { %11991 = vrot.lane.b32.xlu1 %v23458_v19, %s20575_s28  ;;  %v13908_v16 = vsel %vm2453_vm5, %v13907_v34, %v13901_v22 }
0xbafc   :  { %v2450_v14 = vpop.permute.xlu0 %2449 }
0xbafd   :  { %v2456_v12 = vsel %vm2455_vm6, %v2454_v13, %v2450_v14  ;;  %15809 = vrot.lane.b32.xlu1 %v23195_v21, %s20575_s28  ;;  %v8167_v21 = vadd.f32 %v23192_v43, %v23462_v0 }
0xbafe   :  { %2457 = vst.msk [vmem:[#allocation25] sm:$0xff] %vm342_vm4, %v2456_v12 }
0xbb00   :  { %v6269_v36 = vpop.permute.xlu0 %6268 }
0xbb01   :  { %v6273_v62 = vsel %vm2455_vm6, %v6272_v55, %v6269_v36  ;;  %4359 = vrot.lane.b32.xlu1 %v4349_v61, %s20576_s6 }
0xbb02   :  { %6275 = vst.msk [vmem:[#allocation25 + $0x10] sm:$0xff] %vm342_vm4, %v6273_v62 }
0xbb04   :  { %v10087_v39 = vpop.permute.xlu0 %10086 }
0xbb05   :  { %v10091_v25 = vsel %vm2455_vm6, %v10090_v27, %v10087_v39  ;;  %8177 = vrot.lane.b32.xlu1 %v8167_v21, %s20576_s6 }
0xbb06   :  { %10093 = vst.msk [vmem:[#allocation25 + $0x20] sm:$0xff] %vm342_vm4, %v10091_v25 }
0xbb08   :  { %v13905_v10 = vpop.permute.xlu0 %13904 }
0xbb09   :  { %v13909_v1 = vsel %vm2455_vm6, %v13908_v16, %v13905_v10  ;;  %11995 = vrot.lane.b32.xlu1 %v11985_v49, %s20576_s6 }
0xbb0a   :  { %13911 = vst.msk [vmem:[#allocation25 + $0x30] sm:$0xff] %vm342_vm4, %v13909_v1 }
0xbb4f   :  { %v15585_v18 = vpop.permute.xlu1 %15584 }
0xbb50   :  { %18763 = vmatmul.mubr.msk.f32.vlgmr.msra.gmra.mrb[182].mxu1 %vm342_vm4, %v15585_v18 }
0xbb51   :  { %19659 = vmatpush3.bf16.msra.mxu1 %v21101_v7  ;;  %18784 = vmatprep.mubr.msk.f32.mxu1 %vm20569_vm2, %v23436_v31 }
0xbb52   :  { %19660 = vmatprep.subr.bf16.mxu1 %v23437_v23 }
0xbb53   :  { %v4353_v40 = vpop.permute.xlu1 %4352 }
0xbb54   :  { %v4362_v31 = vsel %vm347_vm1, %v23466_v44, %v4353_v40 }
0xbb55   :  { %19662 = vmatpush3.bf16.msra.mxu1 %v21119_v20 }
0xbb57   :  { %v8171_v41 = vpop.permute.xlu1 %8170 }
0xbb58   :  { %v8180_v57 = vsel %vm347_vm1, %v23467_v30, %v8171_v41 }
0xbb5b   :  { %v11989_v24 = vpop.permute.xlu1 %11988 }
0xbb5c   :  { %v11998_v15 = vsel %vm347_vm1, %v23468_v52, %v11989_v24 }
0xbb5f   :  { %v15807_v59 = vpop.permute.xlu1 %15806 }
0xbb60   :  { %v15816_v6 = vsel %vm347_vm1, %v23024_v2, %v15807_v59 }
0xbb63   :  { %v4356_v26 = vpop.permute.xlu1 %4355 }
0xbb64   :  { %v4363_v23 = vsel %vm2453_vm5, %v4362_v31, %v4356_v26 }
0xbb67   :  { %v8174_v8 = vpop.permute.xlu1 %8173 }
0xbb68   :  { %v8181_v17 = vsel %vm2453_vm5, %v8180_v57, %v8174_v8 }
0xbb6b   :  { %v11992_v5 = vpop.permute.xlu1 %11991 }
0xbb6c   :  { %v11999_v32 = vsel %vm2453_vm5, %v11998_v15, %v11992_v5 }
0xbb6f   :  { %v15810_v56 = vpop.permute.xlu1 %15809 }
0xbb70   :  { %v15817_v7 = vsel %vm2453_vm5, %v15816_v6, %v15810_v56 }
0xbb73   :  { %v4360_v47 = vpop.permute.xlu1 %4359 }
0xbb74   :  { %v4364_v20 = vsel %vm2455_vm6, %v4363_v23, %v4360_v47 }
0xbb75   :  { %4366 = vst.msk [vmem:[#allocation25 + $0x8] sm:$0xff] %vm342_vm4, %v4364_v20 }
0xbb77   :  { %v8178_v54 = vpop.permute.xlu1 %8177 }
0xbb78   :  { %v8182_v2 = vsel %vm2455_vm6, %v8181_v17, %v8178_v54 }
0xbb79   :  { %8184 = vst.msk [vmem:[#allocation25 + $0x18] sm:$0xff] %vm342_vm4, %v8182_v2 }
0xbb7b   :  { %v11996_v37 = vpop.permute.xlu1 %11995 }
0xbb7c   :  { %v12000_v48 = vsel %vm2455_vm6, %v11999_v32, %v11996_v37 }
0xbb7d   :  { %12002 = vst.msk [vmem:[#allocation25 + $0x28] sm:$0xff] %vm342_vm4, %v12000_v48 }
0xbc23   :  { %v15654_v53 = vpop.f32.mrb[182].mxu1 }
0xbc24   :  { %v15655_v58 = vadd.f32 %v22970_v38, %v15654_v53  ;;  %v18764_v42 = vpop.f32.mrb[183].mxu1 }
0xbc26   :  { %v15658_v33 = vmax.f32 %v15655_v58, 0.0 }
0xbc28   :  { %18774 = vmatmul.mubr.msk.f32.vlgmr.msra.gmra.mrb[184].mxu0 %vm342_vm4, %v15658_v33 }
0xbcfb   :  { %v15728_v35 = vpop.f32.mrb[184].mxu0 }
0xbcfc   :  { %v15729_v45 = vadd.f32 %v22986_v46, %v15728_v35  ;;  %v18775_v60 = vpop.f32.mrb[185].mxu0 }
0xbcfe   :  { %v15732_v22 = vmax.f32 %v15729_v45, 0.0 }
0xbd00   :  { %18785 = vmatmul.mubr.msk.f32.vlgmr.msra.gmra.mrb[184].mxu1 %vm342_vm4, %v15732_v22 }
0xbd01   :  { %20502 = shalt.err (!%p20499_p10)
}
0xbd02   :  { %s23469_s20 = sld [smem:[#allocation64_spill]] }
0xbd08   :  { %s20503_s21 = scalar_lea.hbm %s23469_s20, 256 }
0xbd09   :  { %p20504_p11 = scmp.ne.s32.totalorder %s23469_s20, %s20503_s21  ;;  %p20507_p12 = scmp.lt.u32.totalorder %s20503_s21, %s23469_s20 }
0xbd0b   :  { %p20509_p13 = pnand %p20507_p12, %p20504_p11 }
0xbd0d   :  { %20512 = shalt.err (!%p20509_p13)
}
0xbd0e   :  { %15852 = dma.vmem_to_hbm [thread:$0]  %s15847_s11, 256, %s23469_s20, [#allocation27], %s20554_s22, %s20554_s22, %s20555_s23  }
0xbd0f   :  { %s20578_s2 = smov [#allocation25]  }
0xbd10   :  { %s15834_s0 = sshll.u32 %s20578_s2, 4  ;;  %s15835_s0 = int_to_ptr.vmem [resolvable:$true] %s15834_s0 }
0xbd11   :  { %s20513_s4 = scalar_lea.vmem %s15835_s0, 1024  ;;  %p20518_p1 = scmp.lt.s32.totalorder %s15835_s0, %s15835_s0 }
0xbd12   :  { %p20514_p0 = scmp.ne.s32.totalorder %s15835_s0, %s20513_s4  ;;  %p20519_p2 = scmp.lt.s32.totalorder %s20513_s4, %s20513_s4 }
0xbd14   :  { %p20520_p3 = por %p20519_p2, %p20518_p1 }
0xbd16   :  { %p20521_p4 = pnand %p20520_p3, %p20514_p0 }
0xbdd3   :  { %v15802_v38 = vpop.f32.mrb[184].mxu1 }
0xbdd4   :  { %v15803_v46 = vadd.f32 %v23192_v43, %v15802_v38  ;;  %v18786_v19 = vpop.f32.mrb[185].mxu1 }
0xbdd6   :  { %15813 = vrot.lane.b32.xlu1 %v15803_v46, %s20576_s6 }
0xbe48   :  { %v15814_v9 = vpop.permute.xlu1 %15813 }
0xbe49   :  { %v15818_v51 = vsel %vm2455_vm6, %v15817_v7, %v15814_v9 }
0xbe4a   :  { %15820 = vst.msk [vmem:[#allocation25 + $0x38] sm:$0xff] %vm342_vm4, %v15818_v51 }
0xbe4b   :  { %20524 = shalt.err (!%p20521_p4)
}
0xbe4c   :  { %s23470_s10 = sld [smem:[#allocation63_spill]] }
0xbe52   :  { %s20525_s9 = scalar_lea.hbm %s23470_s10, 1024 }
0xbe53   :  { %p20526_p5 = scmp.ne.s32.totalorder %s23470_s10, %s20525_s9  ;;  %p20529_p6 = scmp.lt.u32.totalorder %s20525_s9, %s23470_s10 }
0xbe55   :  { %p20531_p7 = pnand %p20529_p6, %p20526_p5 }
0xbe57   :  { %20534 = shalt.err (!%p20531_p7)
}
0xbe58   :  { %15840 = dma.vmem_to_hbm [thread:$0]  %s15835_s0, 1024, %s23470_s10, [#allocation6], %s20554_s22, %s20554_s22, %s20555_s23  }
0xbe59   :  { %20549 = dma.done.wait [#allocation6], 1024  }
0xbe5a   :  { %20550 = vsyncadd [#allocation6], 4294966272 }
0xbe5b   :  { %20551 = dma.done.wait [#allocation27], 256  }
0xbe5c   :  { %20552 = vsyncadd [#allocation27], 4294967040 }
0xbe5d   :  { %15859 = vsyncpa [#allocation5], 1 }
0xbe5e   :  { %15860 = vsyncpa [#allocation8], 1 }
0xbe5f   :  { %15861 = vsyncpa [#allocation11], 1 }
0xbe60   :  { %15862 = vsyncpa [#allocation14], 1 }
0xbe61   :  { %15863 = vsyncpa [#allocation17], 1 }
0xbe62   :  { %15864 = vsyncpa [#allocation20], 1 }
0xbe63   :  { %15865 = vsyncpa [#allocation23], 1 }
0xbe64   :  { %15866 = vsyncpa [#allocation6], 1 }
0xbe65   :  { %15867 = vsyncpa [#allocation27], 1 }

</bundles_post_ra>
